<compile_context>
chip_gen: v7x
topology: tpu7x:2x2x1
jax: 0.10.0
libtpu: 0.0.40
codegen_flags: <defaults>
</compile_context>

<pallas_src>
import jax
import jax.numpy as jnp
from jax.experimental import pallas as pl
from jax.experimental.pallas import tpu as pltpu

NUM_CONV_OUT = 128      # conv: in_channels -> 128, 1x1, no bias
FC1_IN = 2048           # 128 * 4 * 4
FC1_OUT = 1024
_POOL = 4               # AdaptiveAvgPool2d((4, 4))
_NPOS = _POOL * _POOL   # 16 pooled spatial positions


def _round_up(x, m):
    return (x + m - 1) // m * m


def _inception_aux_kernel(xr_ref, convw_ref, fc1w_ref, fc1b_ref,
                          fc2w_ref, fc2b_ref, out_ref):
    tn = out_ref.shape[0]
    c = xr_ref.shape[3]
    # AdaptiveAvgPool2d((4,4)): sum over each pooling window (axis 2 of the tile);
    # the 1/(hs*ws) scale is folded into the conv weight. Accumulate in f32.
    pooled = jnp.sum(xr_ref[...], axis=2, dtype=jnp.float32)          # [16, TN, C]
    pooled = pooled.reshape(_NPOS * tn, c)                            # [16*TN, C]
    # 1x1 conv (bias=False) + ReLU == channel matmul over all (sample, position).
    conv = jnp.maximum(
        jnp.dot(pooled.astype(jnp.bfloat16), convw_ref[...],
                preferred_element_type=jnp.float32),
        0.0)                                                          # [16*TN, 128]
    # Re-pack the 16 position blocks along the lane dim so fc1 is one K=2048 MXU
    # contraction (sublane-aligned static slices + lane concat; no per-position
    # matmuls, no VPU accumulation adds).
    flat = jnp.concatenate(
        [conv[p * tn:(p + 1) * tn, :] for p in range(_NPOS)], axis=1)  # [TN, 2048]
    h1 = jnp.dot(flat.astype(jnp.bfloat16), fc1w_ref[...],
                 preferred_element_type=jnp.float32)                  # [TN, 1024]
    h1 = jnp.maximum(h1 + fc1b_ref[...], 0.0)                         # ReLU (f32)
    # TODO(synk): nn.Dropout(0.7) treated as identity (eval/inference semantics).
    out = jnp.dot(h1.astype(jnp.bfloat16), fc2w_ref[...],
                  preferred_element_type=jnp.float32) + fc2b_ref[...]
    out_ref[...] = out.astype(out_ref.dtype)


def _pick_tile_n(n, hs, ws, c):
    # Keep one bf16 xr tile <= ~6 MiB: double-buffered input (~12 MiB) + f32
    # temporaries + resident bf16 weights (~4.5 MiB) stay far below v7x's 64 MiB
    # physical VMEM (and below the 48 MiB scoped request).
    per_sample = _NPOS * hs * ws * c * 2           # bf16 bytes per sample
    budget = 6 * 1024 * 1024
    tn = budget // max(per_sample, 1)
    tn = max(8, min(128, (tn // 8) * 8))
    tn = min(tn, max(8, _round_up(n, 8)))          # don't over-pad tiny batches
    return int(tn)


def init_params(key, in_channels, num_classes):
    k1, k2, k3, k4, k5 = jax.random.split(key, 5)
    return {
        "conv_w": 0.10 * jax.random.normal(k1, (NUM_CONV_OUT, in_channels, 1, 1), jnp.float32),
        "fc1_w": 0.02 * jax.random.normal(k2, (FC1_OUT, FC1_IN), jnp.float32),
        "fc1_b": 0.01 * jax.random.normal(k3, (FC1_OUT,), jnp.float32),
        "fc2_w": 0.05 * jax.random.normal(k4, (num_classes, FC1_OUT), jnp.float32),
        "fc2_b": 0.01 * jax.random.normal(k5, (num_classes,), jnp.float32),
    }


@jax.jit
def inception_aux_forward(x, params):
    """InceptionAux forward. x: [N, C_in, H, W] (NCHW); H % 4 == 0, W % 4 == 0."""
    n, c, h, w = x.shape
    # AdaptiveAvgPool2d((4,4)) reduces to uniform-window avg pool when H,W % 4 == 0.
    # TODO(synk): non-divisible adaptive-pool window sizes not implemented.
    assert h % _POOL == 0 and w % _POOL == 0, (
        "adaptive pool implemented for divisible sizes")
    hs, ws = h // _POOL, w // _POOL
    num_classes = params["fc2_w"].shape[0]
    nc_pad = _round_up(num_classes, 128)

    tn = _pick_tile_n(n, hs, ws, c)
    n_pad = _round_up(n, tn)
    grid = (n_pad // tn,)

    # ---- glue: layout plumbing / parameter prep (no heavy compute) ----
    # Position-major input: xr[p, n, t, c] with p = 4*ph + pw, t = ih*ws + iw.
    x_nhwc = jnp.transpose(x, (0, 2, 3, 1))
    xr = (x_nhwc.reshape(n, _POOL, hs, _POOL, ws, c)
          .transpose(1, 3, 0, 2, 4, 5)
          .reshape(_NPOS, n, hs * ws, c))
    xr = jnp.pad(xr, ((0, 0), (0, n_pad - n), (0, 0), (0, 0))).astype(jnp.bfloat16)

    # 1x1 conv weight [C, 128] with the pooling average folded in.
    convw_k = (params["conv_w"].reshape(NUM_CONV_OUT, c).T
               * (1.0 / (hs * ws))).astype(jnp.bfloat16)
    # fc1 weight rows re-ordered from PyTorch flatten order (c, p) to the kernel's
    # lane-packed order (p, c): [2048, 1024].
    fc1w_k = (params["fc1_w"].T
              .reshape(NUM_CONV_OUT, _NPOS, FC1_OUT)
              .transpose(1, 0, 2)
              .reshape(FC1_IN, FC1_OUT)).astype(jnp.bfloat16)
    fc1b_k = params["fc1_b"].reshape(1, FC1_OUT).astype(jnp.float32)
    # fc2 weight/bias lane-padded to a multiple of 128 for a dense output store.
    fc2w_k = jnp.pad(params["fc2_w"].T,
                     ((0, 0), (0, nc_pad - num_classes))).astype(jnp.bfloat16)
    fc2b_k = jnp.pad(params["fc2_b"],
                     (0, nc_pad - num_classes)).reshape(1, nc_pad).astype(jnp.float32)

    def resident(shape):
        return pl.BlockSpec(shape, lambda i, _s=shape: (0,) * len(_s))

    out_pad = pl.pallas_call(
        _inception_aux_kernel,
        out_shape=jax.ShapeDtypeStruct((n_pad, nc_pad), jnp.float32),
        grid=grid,
        in_specs=[
            pl.BlockSpec((_NPOS, tn, hs * ws, c), lambda i: (0, i, 0, 0)),
            resident((c, NUM_CONV_OUT)),
            resident((FC1_IN, FC1_OUT)),
            resident((1, FC1_OUT)),
            resident((FC1_OUT, nc_pad)),
            resident((1, nc_pad)),
        ],
        out_specs=pl.BlockSpec((tn, nc_pad), lambda i: (i, 0)),
        compiler_params=pltpu.CompilerParams(
            dimension_semantics=("parallel",),
            vmem_limit_bytes=48 * 1024 * 1024),
    )(xr, convw_k, fc1w_k, fc1b_k, fc2w_k, fc2b_k)
    return out_pad[:n, :num_classes]


def _reference(x, params):
    # Pure-JAX f32 mirror of the PyTorch forward (eval mode), NCHW semantics.
    n, c, h, w = x.shape
    pooled = x.reshape(n, c, 4, h // 4, 4, w // 4).mean(axis=(3, 5))     # [N,C,4,4]
    conv = jnp.maximum(
        jnp.einsum("nchw,fc->nfhw", pooled,
                   params["conv_w"].reshape(NUM_CONV_OUT, c)), 0.0)      # [N,128,4,4]
    flat = conv.reshape(n, FC1_IN)                                       # (c,h,w) order
    h1 = jnp.maximum(flat @ params["fc1_w"].T + params["fc1_b"], 0.0)
    return h1 @ params["fc2_w"].T + params["fc2_b"]


if __name__ == "__main__":
    key = jax.random.PRNGKey(0)
    kx, kp = jax.random.split(key)
    N, C_IN, H, W = 2, 16, 16, 16
    NUM_CLASSES = 10

    x = jax.random.normal(kx, (N, C_IN, H, W), jnp.float32)
    params = init_params(kp, C_IN, NUM_CLASSES)

    out = inception_aux_forward(x, params)
    out = jax.block_until_ready(out)

    ref = _reference(x, params)
    assert out.shape == (N, NUM_CLASSES)
    assert bool(jnp.allclose(out, ref, atol=2e-2, rtol=2e-2)), (
        f"max abs diff: {float(jnp.max(jnp.abs(out - ref)))}")
    print("KERNEL_OK")
</pallas_src>

<mosaic_0001>
module attributes {stable_mosaic.version = 11 : i64} {
  func.func @_inception_aux_kernel(%arg0: i32, %arg1: memref<16x8x16x16xbf16, #tpu.memory_space<vmem>>, %arg2: memref<16x128xbf16, #tpu.memory_space<vmem>>, %arg3: memref<2048x1024xbf16, #tpu.memory_space<vmem>>, %arg4: memref<1x1024xf32, #tpu.memory_space<vmem>>, %arg5: memref<1024x128xbf16, #tpu.memory_space<vmem>>, %arg6: memref<1x128xf32, #tpu.memory_space<vmem>>, %arg7: memref<8x128xf32, #tpu.memory_space<vmem>>) attributes {dimension_semantics = [#tpu.dimension_semantics<parallel>], iteration_bounds = array<i64: 1>, scalar_prefetch = 0 : i64, scratch_operands = 0 : i64, tpu.core_type = #tpu.core_type<tc>, window_params = [{transform_indices = @transform_0, window_bounds = array<i64: 16, 8, 16, 16>}, {pipeline_mode = #tpu.pipeline_mode<synchronous>, transform_indices = @transform_1, window_bounds = array<i64: 16, 128>}, {pipeline_mode = #tpu.pipeline_mode<synchronous>, transform_indices = @transform_2, window_bounds = array<i64: 2048, 1024>}, {pipeline_mode = #tpu.pipeline_mode<synchronous>, transform_indices = @transform_3, window_bounds = array<i64: 1, 1024>}, {pipeline_mode = #tpu.pipeline_mode<synchronous>, transform_indices = @transform_4, window_bounds = array<i64: 1024, 128>}, {pipeline_mode = #tpu.pipeline_mode<synchronous>, transform_indices = @transform_5, window_bounds = array<i64: 1, 128>}, {transform_indices = @transform_6, window_bounds = array<i64: 8, 128>}]} {
    %c0 = arith.constant 0 : index
    %c0_0 = arith.constant 0 : index
    %c0_1 = arith.constant 0 : index
    %c0_2 = arith.constant 0 : index
    %0 = vector.load %arg1[%c0, %c0_0, %c0_1, %c0_2] : memref<16x8x16x16xbf16, #tpu.memory_space<vmem>>, vector<16x8x16x16xbf16>
    %1 = arith.extf %0 : vector<16x8x16x16xbf16> to vector<16x8x16x16xf32>
    %cst = arith.constant dense<0.000000e+00> : vector<16x8x16xf32>
    %2 = vector.multi_reduction <add>, %1, %cst [2] : vector<16x8x16x16xf32> to vector<16x8x16xf32>
    %3 = vector.shape_cast %2 : vector<16x8x16xf32> to vector<128x16xf32>
    %4 = arith.truncf %3 : vector<128x16xf32> to vector<128x16xbf16>
    %c0_3 = arith.constant 0 : index
    %c0_4 = arith.constant 0 : index
    %5 = vector.load %arg2[%c0_3, %c0_4] : memref<16x128xbf16, #tpu.memory_space<vmem>>, vector<16x128xbf16>
    %cst_5 = arith.constant dense<0.000000e+00> : vector<128x128xf32>
    %6 = tpu.matmul %4, %5, %cst_5 {dimension_numbers = #tpu.dot_dimension_numbers<[1], [0], [0], [1], [0, 0, 1, 1], [], []>} : vector<128x16xbf16>, vector<16x128xbf16>, vector<128x128xf32> -> vector<128x128xf32>
    %cst_6 = arith.constant 0.000000e+00 : f32
    %7 = vector.broadcast %cst_6 : f32 to vector<128x128xf32>
    %8 = arith.maximumf %6, %7 : vector<128x128xf32>
    %9 = vector.extract_strided_slice %8 {offsets = [0, 0], sizes = [8, 128], strides = [1, 1]} : vector<128x128xf32> to vector<8x128xf32>
    %10 = vector.extract_strided_slice %8 {offsets = [8, 0], sizes = [8, 128], strides = [1, 1]} : vector<128x128xf32> to vector<8x128xf32>
    %11 = vector.extract_strided_slice %8 {offsets = [16, 0], sizes = [8, 128], strides = [1, 1]} : vector<128x128xf32> to vector<8x128xf32>
    %12 = vector.extract_strided_slice %8 {offsets = [24, 0], sizes = [8, 128], strides = [1, 1]} : vector<128x128xf32> to vector<8x128xf32>
    %13 = vector.extract_strided_slice %8 {offsets = [32, 0], sizes = [8, 128], strides = [1, 1]} : vector<128x128xf32> to vector<8x128xf32>
    %14 = vector.extract_strided_slice %8 {offsets = [40, 0], sizes = [8, 128], strides = [1, 1]} : vector<128x128xf32> to vector<8x128xf32>
    %15 = vector.extract_strided_slice %8 {offsets = [48, 0], sizes = [8, 128], strides = [1, 1]} : vector<128x128xf32> to vector<8x128xf32>
    %16 = vector.extract_strided_slice %8 {offsets = [56, 0], sizes = [8, 128], strides = [1, 1]} : vector<128x128xf32> to vector<8x128xf32>
    %17 = vector.extract_strided_slice %8 {offsets = [64, 0], sizes = [8, 128], strides = [1, 1]} : vector<128x128xf32> to vector<8x128xf32>
    %18 = vector.extract_strided_slice %8 {offsets = [72, 0], sizes = [8, 128], strides = [1, 1]} : vector<128x128xf32> to vector<8x128xf32>
    %19 = vector.extract_strided_slice %8 {offsets = [80, 0], sizes = [8, 128], strides = [1, 1]} : vector<128x128xf32> to vector<8x128xf32>
    %20 = vector.extract_strided_slice %8 {offsets = [88, 0], sizes = [8, 128], strides = [1, 1]} : vector<128x128xf32> to vector<8x128xf32>
    %21 = vector.extract_strided_slice %8 {offsets = [96, 0], sizes = [8, 128], strides = [1, 1]} : vector<128x128xf32> to vector<8x128xf32>
    %22 = vector.extract_strided_slice %8 {offsets = [104, 0], sizes = [8, 128], strides = [1, 1]} : vector<128x128xf32> to vector<8x128xf32>
    %23 = vector.extract_strided_slice %8 {offsets = [112, 0], sizes = [8, 128], strides = [1, 1]} : vector<128x128xf32> to vector<8x128xf32>
    %24 = vector.extract_strided_slice %8 {offsets = [120, 0], sizes = [8, 128], strides = [1, 1]} : vector<128x128xf32> to vector<8x128xf32>
    %25 = tpu.concatenate %9, %10, %11, %12, %13, %14, %15, %16, %17, %18, %19, %20, %21, %22, %23, %24 in 1 : vector<8x128xf32>, vector<8x128xf32>, vector<8x128xf32>, vector<8x128xf32>, vector<8x128xf32>, vector<8x128xf32>, vector<8x128xf32>, vector<8x128xf32>, vector<8x128xf32>, vector<8x128xf32>, vector<8x128xf32>, vector<8x128xf32>, vector<8x128xf32>, vector<8x128xf32>, vector<8x128xf32>, vector<8x128xf32> -> vector<8x2048xf32>
    %26 = arith.truncf %25 : vector<8x2048xf32> to vector<8x2048xbf16>
    %c0_7 = arith.constant 0 : index
    %c0_8 = arith.constant 0 : index
    %27 = vector.load %arg3[%c0_7, %c0_8] : memref<2048x1024xbf16, #tpu.memory_space<vmem>>, vector<2048x1024xbf16>
    %cst_9 = arith.constant dense<0.000000e+00> : vector<8x1024xf32>
    %28 = tpu.matmul %26, %27, %cst_9 {dimension_numbers = #tpu.dot_dimension_numbers<[1], [0], [0], [1], [0, 0, 1, 1], [], []>} : vector<8x2048xbf16>, vector<2048x1024xbf16>, vector<8x1024xf32> -> vector<8x1024xf32>
    %c0_10 = arith.constant 0 : index
    %c0_11 = arith.constant 0 : index
    %29 = vector.load %arg4[%c0_10, %c0_11] : memref<1x1024xf32, #tpu.memory_space<vmem>>, vector<1x1024xf32>
    %30 = vector.broadcast %29 : vector<1x1024xf32> to vector<8x1024xf32>
    %31 = arith.addf %28, %30 : vector<8x1024xf32>
    %cst_12 = arith.constant 0.000000e+00 : f32
    %32 = vector.broadcast %cst_12 : f32 to vector<8x1024xf32>
    %33 = arith.maximumf %31, %32 : vector<8x1024xf32>
    %34 = arith.truncf %33 : vector<8x1024xf32> to vector<8x1024xbf16>
    %c0_13 = arith.constant 0 : index
    %c0_14 = arith.constant 0 : index
    %35 = vector.load %arg5[%c0_13, %c0_14] : memref<1024x128xbf16, #tpu.memory_space<vmem>>, vector<1024x128xbf16>
    %cst_15 = arith.constant dense<0.000000e+00> : vector<8x128xf32>
    %36 = tpu.matmul %34, %35, %cst_15 {dimension_numbers = #tpu.dot_dimension_numbers<[1], [0], [0], [1], [0, 0, 1, 1], [], []>} : vector<8x1024xbf16>, vector<1024x128xbf16>, vector<8x128xf32> -> vector<8x128xf32>
    %c0_16 = arith.constant 0 : index
    %c0_17 = arith.constant 0 : index
    %37 = vector.load %arg6[%c0_16, %c0_17] : memref<1x128xf32, #tpu.memory_space<vmem>>, vector<1x128xf32>
    %38 = vector.broadcast %37 : vector<1x128xf32> to vector<8x128xf32>
    %39 = arith.addf %36, %38 : vector<8x128xf32>
    %c0_18 = arith.constant 0 : index
    %c0_19 = arith.constant 0 : index
    %40 = vector.load %arg7[%c0_18, %c0_19] : memref<8x128xf32, #tpu.memory_space<vmem>>, vector<8x128xf32>
    tpu.vector_store %arg7[%c0_18, %c0_19], %39 {strides = array<i32>} : memref<8x128xf32, #tpu.memory_space<vmem>>, vector<8x128xf32>,
    return
  }
  func.func @transform_0(%arg0: i32) -> (i32, i32, i32, i32) {
    %c0_i32 = arith.constant 0 : i32
    %c0_i32_0 = arith.constant 0 : i32
    %c0_i32_1 = arith.constant 0 : i32
    %c0_i32_2 = arith.constant 0 : i32
    return %c0_i32, %arg0, %c0_i32_0, %c0_i32_1 : i32, i32, i32, i32
  }
  func.func @transform_1(%arg0: i32) -> (i32, i32) {
    %c0_i32 = arith.constant 0 : i32
    %c0_i32_0 = arith.constant 0 : i32
    %c0_i32_1 = arith.constant 0 : i32
    return %c0_i32, %c0_i32_0 : i32, i32
  }
  func.func @transform_2(%arg0: i32) -> (i32, i32) {
    %c0_i32 = arith.constant 0 : i32
    %c0_i32_0 = arith.constant 0 : i32
    %c0_i32_1 = arith.constant 0 : i32
    return %c0_i32, %c0_i32_0 : i32, i32
  }
  func.func @transform_3(%arg0: i32) -> (i32, i32) {
    %c0_i32 = arith.constant 0 : i32
    %c0_i32_0 = arith.constant 0 : i32
    %c0_i32_1 = arith.constant 0 : i32
    return %c0_i32, %c0_i32_0 : i32, i32
  }
  func.func @transform_4(%arg0: i32) -> (i32, i32) {
    %c0_i32 = arith.constant 0 : i32
    %c0_i32_0 = arith.constant 0 : i32
    %c0_i32_1 = arith.constant 0 : i32
    return %c0_i32, %c0_i32_0 : i32, i32
  }
  func.func @transform_5(%arg0: i32) -> (i32, i32) {
    %c0_i32 = arith.constant 0 : i32
    %c0_i32_0 = arith.constant 0 : i32
    %c0_i32_1 = arith.constant 0 : i32
    return %c0_i32, %c0_i32_0 : i32, i32
  }
  func.func @transform_6(%arg0: i32) -> (i32, i32) {
    %c0_i32 = arith.constant 0 : i32
    %c0_i32_0 = arith.constant 0 : i32
    return %arg0, %c0_i32 : i32, i32
  }
}

</mosaic_0001>

<bundles_post_ra>
// kernel: inception_aux_forward.1
= control target key start
LH: loop header
LB: loop body
LE: loop exit
PB: predicated region body
PF: predicated region fallthrough
CT: control target
= control target key end

     0   :  { %vm536_vm0 = vcmask 130048   ;;  %vm2075_vm1 = vcmask 1041409   ;;  %vm2077_vm2 = vcmask 1042434   ;;  %vm2079_vm3 = vcmask 1043459   ;;  %s18083_s1 = inlined_call_operand.vmem [shape: bf16[16,128], index: 1, kind: input, shape index: {}]   ;;  %s18084_s0 = inlined_call_operand.vmem [shape: bf16[16,8,16,16], index: 0, kind: input, shape index: {}]   ;;  %s18085_s2 = inlined_call_operand.vmem [shape: bf16[2048,1024], index: 2, kind: input, shape index: {}]   ;;  %s18086_s4 = inlined_call_operand.vmem [shape: bf16[1024,128], index: 4, kind: input, shape index: {}]   ;;  %s18087_s3 = inlined_call_operand.vmem [shape: f32[1,1024], index: 3, kind: input, shape index: {}]   ;;  %s18088_s5 = inlined_call_operand.vmem [shape: f32[1,128], index: 5, kind: input, shape index: {}]   ;;  %s18089_s6 = inlined_call_operand.vmem [shape: f32[8,128], index: 6, kind: output, shape index: {}]  }
   0x1   :  { %v12531_v0 = vld [vmem:[%s18083_s1] sm:$0xff]   ;;  %v12169_v2 = vld [vmem:[%s18084_s0 + $0x8] sm:$0xff]   ;;  %v12170_v3 = vld [vmem:[%s18084_s0 + $0x10] sm:$0xff]   ;;  %vm2081_vm4 = vcmask 1044484   ;;  %vm2083_vm5 = vcmask 1045509   ;;  %vm2085_vm6 = vcmask 1046534  }
   0x2   :  { %v11658_v1 = vld [vmem:[%s18084_s0] sm:$0xff]   ;;  %12393 = vmatprep.subr.bf16.mxu0 %v12531_v0  ;;  %v11663_v6 = vunpack.c.l.bf16 %v12169_v2  ;;  %v11664_v7 = vunpack.c.h.bf16 %v12169_v2  ;;  %v12171_v8 = vld [vmem:[%s18084_s0 + $0x18] sm:$0xff]   ;;  %v12173_v10 = vld [vmem:[%s18084_s0 + $0x28] sm:$0xff]   ;;  %v11667_v11 = vunpack.c.l.bf16 %v12170_v3  ;;  %v11668_v12 = vunpack.c.h.bf16 %v12170_v3 }
   0x3   :  { %v11659_v4 = vunpack.c.l.bf16 %v11658_v1  ;;  %v11660_v5 = vunpack.c.h.bf16 %v11658_v1  ;;  %v12172_v9 = vld [vmem:[%s18084_s0 + $0x20] sm:$0xff]   ;;  %12394 = vmatpush3.bf16.msra.mxu0 %v12531_v0  ;;  %v11671_v13 = vunpack.c.l.bf16 %v12171_v8  ;;  %v11672_v14 = vunpack.c.h.bf16 %v12171_v8  ;;  %v12174_v15 = vld [vmem:[%s18084_s0 + $0x30] sm:$0xff]   ;;  %v12658_v16 = vld [vmem:[%s18084_s0 + $0x38] sm:$0xff]  }
   0x4   :  { %v12663_v17 = vld [vmem:[%s18084_s0 + $0x40] sm:$0xff]   ;;  %v11675_v18 = vunpack.c.l.bf16 %v12172_v9  ;;  %v11676_v19 = vunpack.c.h.bf16 %v12172_v9  ;;  %v11679_v20 = vunpack.c.l.bf16 %v12173_v10  ;;  %v11680_v21 = vunpack.c.h.bf16 %v12173_v10  ;;  %v12668_v22 = vld [vmem:[%s18084_s0 + $0x48] sm:$0xff]   ;;  %v12673_v23 = vld [vmem:[%s18084_s0 + $0x50] sm:$0xff]  }
   0x5   :  { %v12678_v24 = vld [vmem:[%s18084_s0 + $0x58] sm:$0xff]   ;;  %v11683_v25 = vunpack.c.l.bf16 %v12174_v15  ;;  %v11684_v26 = vunpack.c.h.bf16 %v12174_v15  ;;  %v11687_v27 = vunpack.c.l.bf16 %v12658_v16  ;;  %v11688_v28 = vunpack.c.h.bf16 %v12658_v16  ;;  %v12685_v29 = vld [vmem:[%s18084_s0 + $0x60] sm:$0xff]   ;;  %v12690_v30 = vld [vmem:[%s18084_s0 + $0x68] sm:$0xff]  }
   0x6   :  { %v11691_v31 = vunpack.c.l.bf16 %v12663_v17  ;;  %v11692_v32 = vunpack.c.h.bf16 %v12663_v17  ;;  %v11695_v33 = vunpack.c.l.bf16 %v12668_v22  ;;  %v11696_v34 = vunpack.c.h.bf16 %v12668_v22  ;;  %v12699_v35 = vld [vmem:[%s18084_s0 + $0x70] sm:$0xff]   ;;  %v12704_v36 = vld [vmem:[%s18084_s0 + $0x78] sm:$0xff]  }
   0x7   :  { %v11699_v37 = vunpack.c.l.bf16 %v12673_v23  ;;  %v11700_v38 = vunpack.c.h.bf16 %v12673_v23  ;;  %v11703_v39 = vunpack.c.l.bf16 %v12678_v24  ;;  %v11704_v40 = vunpack.c.h.bf16 %v12678_v24 }
   0x8   :  { %v11707_v41 = vunpack.c.l.bf16 %v12685_v29  ;;  %v11708_v42 = vunpack.c.h.bf16 %v12685_v29  ;;  %v11711_v43 = vunpack.c.l.bf16 %v12690_v30  ;;  %v11712_v44 = vunpack.c.h.bf16 %v12690_v30 }
   0x9   :  { %v11715_v45 = vunpack.c.l.bf16 %v12699_v35  ;;  %v11716_v46 = vunpack.c.h.bf16 %v12699_v35  ;;  %v11719_v47 = vunpack.c.l.bf16 %v12704_v36  ;;  %v11720_v48 = vunpack.c.h.bf16 %v12704_v36 }
   0xa   :  { %v537_v49 = vsel %vm536_vm0, %v11659_v4, 0.0  ;;  %v538_v50 = vsel %vm536_vm0, %v11660_v5, 0.0  ;;  %v546_v51 = vsel %vm536_vm0, %v11663_v6, 0.0  ;;  %v547_v52 = vsel %vm536_vm0, %v11664_v7, 0.0 }
   0xb   :  { %v539_v53 = vadd.f32 %v538_v50, %v537_v49  ;;  %v548_v54 = vadd.f32 %v547_v52, %v546_v51  ;;  %v555_v55 = vsel %vm536_vm0, %v11667_v11, 0.0  ;;  %v556_v56 = vsel %vm536_vm0, %v11668_v12, 0.0 }
   0xc   :  { %v557_v57 = vadd.f32 %v556_v56, %v555_v55  ;;  %v564_v58 = vsel %vm536_vm0, %v11671_v13, 0.0  ;;  %v565_v59 = vsel %vm536_vm0, %v11672_v14, 0.0  ;;  %v573_v60 = vsel %vm536_vm0, %v11675_v18, 0.0 }
   0xd   :  { %v540_v61 = vrot.slane %v539_v53, 4  ;;  %v549_v62 = vrot.slane %v548_v54, 4  ;;  %v566_v63 = vadd.f32 %v565_v59, %v564_v58  ;;  %v574_v0 = vsel %vm536_vm0, %v11676_v19, 0.0 }
   0xe   :  { %v558_v1 = vrot.slane %v557_v57, 4  ;;  %v575_v2 = vadd.f32 %v574_v0, %v573_v60  ;;  %v582_v3 = vsel %vm536_vm0, %v11679_v20, 0.0  ;;  %v583_v4 = vsel %vm536_vm0, %v11680_v21, 0.0 }
   0xf   :  { %v541_v5 = vadd.f32 %v540_v61, %v539_v53  ;;  %v550_v6 = vadd.f32 %v549_v62, %v548_v54  ;;  %v567_v7 = vrot.slane %v566_v63, 4  ;;  %v584_v8 = vadd.f32 %v583_v4, %v582_v3 }
  0x10   :  { %v559_v9 = vadd.f32 %v558_v1, %v557_v57  ;;  %v576_v10 = vrot.slane %v575_v2, 4  ;;  %v591_v11 = vsel %vm536_vm0, %v11683_v25, 0.0  ;;  %v592_v12 = vsel %vm536_vm0, %v11684_v26, 0.0 }
  0x11   :  { %v542_v13 = vrot.slane %v541_v5, 2  ;;  %v551_v14 = vrot.slane %v550_v6, 2  ;;  %v568_v15 = vadd.f32 %v567_v7, %v566_v63  ;;  %v585_v18 = vrot.slane %v584_v8, 4 }
  0x12   :  { %v560_v19 = vrot.slane %v559_v9, 2  ;;  %v577_v49 = vadd.f32 %v576_v10, %v575_v2  ;;  %v593_v50 = vadd.f32 %v592_v12, %v591_v11  ;;  %v600_v20 = vsel %vm536_vm0, %v11687_v27, 0.0 }
  0x13   :  { %v543_v21 = vadd.f32 %v542_v13, %v541_v5  ;;  %v552_v51 = vadd.f32 %v551_v14, %v550_v6  ;;  %v569_v52 = vrot.slane %v568_v15, 2  ;;  %v586_v53 = vadd.f32 %v585_v18, %v584_v8 }
  0x14   :  { %v561_v54 = vadd.f32 %v560_v19, %v559_v9  ;;  %v578_v55 = vrot.slane %v577_v49, 2  ;;  %v594_v56 = vrot.slane %v593_v50, 4  ;;  %v601_v25 = vsel %vm536_vm0, %v11688_v28, 0.0 }
  0x15   :  { %v544_v26 = vrot.slane %v543_v21, 1  ;;  %v553_v57 = vrot.slane %v552_v51, 1  ;;  %v570_v58 = vadd.f32 %v569_v52, %v568_v15  ;;  %v587_v59 = vrot.slane %v586_v53, 2 }
  0x16   :  { %v562_v60 = vrot.slane %v561_v54, 1  ;;  %v579_v61 = vadd.f32 %v578_v55, %v577_v49  ;;  %v595_v62 = vadd.f32 %v594_v56, %v593_v50  ;;  %v602_v63 = vadd.f32 %v601_v25, %v600_v20 }
  0x17   :  { %v12736_v27 = vadd.f32 %v544_v26, %v543_v21  ;;  %v12738_v0 = vadd.f32 %v553_v57, %v552_v51  ;;  %v571_v1 = vrot.slane %v570_v58, 1  ;;  %v588_v2 = vadd.f32 %v587_v59, %v586_v53 }
  0x18   :  { %v12740_v3 = vadd.f32 %v562_v60, %v561_v54  ;;  %v580_v4 = vrot.slane %v579_v61, 1  ;;  %v596_v16 = vrot.slane %v595_v62, 2  ;;  %v603_v5 = vrot.slane %v602_v63, 4 }
  0x19   :  { %v12742_v28 = vadd.f32 %v571_v1, %v570_v58  ;;  %v589_v6 = vrot.slane %v588_v2, 1  ;;  %v609_v7 = vsel %vm536_vm0, %v11691_v31, 0.0  ;;  %v610_v8 = vsel %vm536_vm0, %v11692_v32, 0.0 }
  0x1a   :  { %v12750_v9 = vadd.f32 %v580_v4, %v579_v61  ;;  %v597_v10 = vadd.f32 %v596_v16, %v595_v62  ;;  %v604_v11 = vadd.f32 %v603_v5, %v602_v63  ;;  %v611_v12 = vadd.f32 %v610_v8, %v609_v7 }
  0x1b   :  { %v12752_v13 = vadd.f32 %v589_v6, %v588_v2  ;;  %v618_v14 = vsel %vm536_vm0, %v11695_v33, 0.0  ;;  %v619_v15 = vsel %vm536_vm0, %v11696_v34, 0.0  ;;  %v627_v17 = vsel %vm536_vm0, %v11699_v37, 0.0 }
  0x1c   :  { %v598_v31 = vrot.slane %v597_v10, 1  ;;  %v605_v32 = vrot.slane %v604_v11, 2  ;;  %v612_v18 = vrot.slane %v611_v12, 4  ;;  %v620_v19 = vadd.f32 %v619_v15, %v618_v14 }
  0x1d   :  { %v628_v49 = vsel %vm536_vm0, %v11700_v38, 0.0  ;;  %v636_v33 = vsel %vm536_vm0, %v11703_v39, 0.0  ;;  %v637_v22 = vsel %vm536_vm0, %v11704_v40, 0.0  ;;  %v645_v34 = vsel %vm536_vm0, %v11707_v41, 0.0 }
  0x1e   :  { %v12775_v37 = vadd.f32 %v598_v31, %v597_v10  ;;  %v606_v50 = vadd.f32 %v605_v32, %v604_v11  ;;  %v613_v20 = vadd.f32 %v612_v18, %v611_v12  ;;  %v621_v21 = vrot.slane %v620_v19, 4 }
  0x1f   :  { %v629_v23 = vadd.f32 %v628_v49, %v627_v17  ;;  %v638_v51 = vadd.f32 %v637_v22, %v636_v33  ;;  %v646_v38 = vsel %vm536_vm0, %v11708_v42, 0.0  ;;  %v654_v24 = vsel %vm536_vm0, %v11711_v43, 0.0 }
  0x20   :  { %v607_v39 = vrot.slane %v606_v50, 1  ;;  %v614_v40 = vrot.slane %v613_v20, 2  ;;  %v622_v52 = vadd.f32 %v621_v21, %v620_v19  ;;  %v647_v53 = vadd.f32 %v646_v38, %v645_v34 }
  0x21   :  { %v630_v41 = vrot.slane %v629_v23, 4  ;;  %v639_v54 = vrot.slane %v638_v51, 4  ;;  %v655_v55 = vsel %vm536_vm0, %v11712_v44, 0.0  ;;  %v663_v29 = vsel %vm536_vm0, %v11715_v45, 0.0 }
  0x22   :  { %v12789_v56 = vadd.f32 %v607_v39, %v606_v50  ;;  %v615_v42 = vadd.f32 %v614_v40, %v613_v20  ;;  %v623_v25 = vrot.slane %v622_v52, 2  ;;  %v648_v26 = vrot.slane %v647_v53, 4 }
  0x23   :  { %v631_v43 = vadd.f32 %v630_v41, %v629_v23  ;;  %v640_v57 = vadd.f32 %v639_v54, %v638_v51  ;;  %v656_v58 = vadd.f32 %v655_v55, %v654_v24  ;;  %v664_v59 = vsel %vm536_vm0, %v11716_v46, 0.0 }
  0x24   :  { %v616_v60 = vrot.slane %v615_v42, 1  ;;  %v624_v30 = vadd.f32 %v623_v25, %v622_v52  ;;  %v649_v61 = vadd.f32 %v648_v26, %v647_v53  ;;  %v665_v44 = vadd.f32 %v664_v59, %v663_v29 }
  0x25   :  { %v632_v62 = vrot.slane %v631_v43, 2  ;;  %v641_v63 = vrot.slane %v640_v57, 2  ;;  %v657_v1 = vrot.slane %v656_v58, 4  ;;  %v672_v45 = vsel %vm536_vm0, %v11719_v47, 0.0 }
  0x26   :  { %v617_v2 = vadd.f32 %v616_v60, %v615_v42  ;;  %v625_v4 = vrot.slane %v624_v30, 1  ;;  %v650_v16 = vrot.slane %v649_v61, 2  ;;  %v666_v5 = vrot.slane %v665_v44, 4  ;;  %v12819_v60 = vld [vmem:[%s18084_s0 + $0x80] sm:$0xff]  }
  0x27   :  { %v633_v6 = vadd.f32 %v632_v62, %v631_v43  ;;  %v642_v7 = vadd.f32 %v641_v63, %v640_v57  ;;  %v658_v35 = vadd.f32 %v657_v1, %v656_v58  ;;  %v673_v46 = vsel %vm536_vm0, %v11720_v48, 0.0  ;;  %v12824_v63 = vld [vmem:[%s18084_s0 + $0x88] sm:$0xff]  }
  0x28   :  { %v626_v8 = vadd.f32 %v625_v4, %v624_v30  ;;  %v651_v10 = vadd.f32 %v650_v16, %v649_v61  ;;  %v667_v11 = vadd.f32 %v666_v5, %v665_v44  ;;  %v674_v12 = vadd.f32 %v673_v46, %v672_v45 }
  0x29   :  { %v634_v14 = vrot.slane %v633_v6, 1  ;;  %v643_v15 = vrot.slane %v642_v7, 1  ;;  %v659_v17 = vrot.slane %v658_v35, 2  ;;  %v1689_v47 = vpack.c.bf16 %v12736_v27, %v12736_v27 }
  0x2a   :  { %v652_v31 = vrot.slane %v651_v10, 1  ;;  %v668_v32 = vrot.slane %v667_v11, 2  ;;  %v675_v18 = vrot.slane %v674_v12, 4  ;;  %v1690_v19 = vpack.c.bf16 %v12738_v0, %v12738_v0 }
  0x2b   :  { %v635_v36 = vadd.f32 %v634_v14, %v633_v6  ;;  %v644_v49 = vadd.f32 %v643_v15, %v642_v7  ;;  %v660_v48 = vadd.f32 %v659_v17, %v658_v35  ;;  %v1691_v33 = vpack.c.bf16 %v12740_v3, %v12740_v3  ;;  %v12834_v35 = vld [vmem:[%s18084_s0 + $0x90] sm:$0xff]  }
  0x2c   :  { %v653_v22 = vadd.f32 %v652_v31, %v651_v10  ;;  %v669_v34 = vadd.f32 %v668_v32, %v667_v11  ;;  %v676_v50 = vadd.f32 %v675_v18, %v674_v12  ;;  %v1692_v27 = vpack.c.bf16 %v12742_v28, %v12742_v28  ;;  %v12843_v12 = vld [vmem:[%s18084_s0 + $0x98] sm:$0xff]   ;;  %v12188_v31 = vld [vmem:[%s18084_s0 + $0xa0] sm:$0xff]  }
  0x2d   :  { %v661_v20 = vrot.slane %v660_v48, 1  ;;  %v1693_v21 = vpack.c.bf16 %v12750_v9, %v12750_v9  ;;  %v1694_v0 = vpack.c.bf16 %v12752_v13, %v12752_v13  ;;  %v1695_v23 = vpack.c.bf16 %v12775_v37, %v12775_v37 }
  0x2e   :  { %v670_v3 = vrot.slane %v669_v34, 1  ;;  %v677_v51 = vrot.slane %v676_v50, 2  ;;  %v1696_v38 = vpack.c.bf16 %v12789_v56, %v12789_v56  ;;  %v1697_v24 = vpack.c.bf16 %v617_v2, %v617_v2 }
  0x2f   :  { %v662_v28 = vadd.f32 %v661_v20, %v660_v48  ;;  %v1698_v39 = vpack.c.bf16 %v626_v8, %v626_v8  ;;  %v1699_v40 = vpack.c.bf16 %v635_v36, %v635_v36  ;;  %v1700_v52 = vpack.c.bf16 %v644_v49, %v644_v49  ;;  %v12858_v49 = vld [vmem:[%s18084_s0 + $0xa8] sm:$0xff]   ;;  %v12863_v48 = vld [vmem:[%s18084_s0 + $0xb0] sm:$0xff]   ;;  %v12877_v20 = vld [vmem:[%s18084_s0 + $0xc0] sm:$0xff]  }
  0x30   :  { %v671_v9 = vadd.f32 %v670_v3, %v669_v34  ;;  %v678_v53 = vadd.f32 %v677_v51, %v676_v50  ;;  %v1701_v41 = vpack.c.bf16 %v653_v22, %v653_v22  ;;  %v1947_v13 = vunpack.c.l.b16 %v1689_v47  ;;  %v12884_v51 = vld [vmem:[%s18084_s0 + $0xc8] sm:$0xff]  }
  0x31   :  { %vm2087_vm7 = vcmask 1047559   ;;  %v1702_v54 = vpack.c.bf16 %v662_v28, %v662_v28  ;;  %v1948_v37 = vunpack.c.l.b16 %v1690_v19  ;;  %v1949_v55 = vunpack.c.l.b16 %v1691_v33 }
  0x32   :  { %v1950_v29 = vunpack.c.l.b16 %v1692_v27  ;;  %v679_v42 = vrot.slane %v678_v53, 1  ;;  %v1703_v25 = vpack.c.bf16 %v671_v9, %v671_v9  ;;  %v1951_v26 = vunpack.c.l.b16 %v1693_v21  ;;  %v12872_v27 = vld [vmem:[%s18084_s0 + $0xb8] sm:$0xff]   ;;  %v12902_v9 = vld [vmem:[%s18084_s0 + $0xe0] sm:$0xff]  }
  0x33   :  { %v1952_v56 = vunpack.c.l.b16 %v1694_v0  ;;  %v1953_v43 = vunpack.c.l.b16 %v1695_v23  ;;  %v1954_v57 = vunpack.c.l.b16 %v1696_v38  ;;  %v1955_v58 = vunpack.c.l.b16 %v1697_v24  ;;  %v12889_v38 = vld [vmem:[%s18084_s0 + $0xd0] sm:$0xff]  }
  0x34   :  { %v1956_v59 = vunpack.c.l.b16 %v1698_v39  ;;  %v680_v30 = vadd.f32 %v679_v42, %v678_v53  ;;  %v1957_v61 = vunpack.c.l.b16 %v1699_v40  ;;  %v1958_v44 = vunpack.c.l.b16 %v1700_v52  ;;  %v12897_v52 = vld [vmem:[%s18084_s0 + $0xd8] sm:$0xff]  }
  0x35   :  { %v1959_v62 = vunpack.c.l.b16 %v1701_v41  ;;  %v1960_v1 = vunpack.c.l.b16 %v1702_v54  ;;  %v1961_v45 = vunpack.c.l.b16 %v1703_v25  ;;  %v2076_v2 = vsel %vm2075_vm1, %v1948_v37, %v1947_v13  ;;  %v12911_v37 = vld [vmem:[%s18084_s0 + $0xe8] sm:$0xff]  }
  0x36   :  { %v2089_v4 = vsel %vm2075_vm1, %v1956_v59, %v1955_v58  ;;  %v1704_v16 = vpack.c.bf16 %v680_v30, %v680_v30  ;;  %v2078_v5 = vsel %vm2077_vm2, %v1949_v55, %v2076_v2  ;;  %v11723_v7 = vunpack.c.l.bf16 %v12819_v60  ;;  %v12916_v55 = vld [vmem:[%s18084_s0 + $0xf0] sm:$0xff]  }
  0x37   :  { %v2090_v6 = vsel %vm2077_vm2, %v1957_v61, %v2089_v4  ;;  %v2080_v46 = vsel %vm2079_vm3, %v1950_v29, %v2078_v5  ;;  %v11724_v10 = vunpack.c.h.bf16 %v12819_v60  ;;  %v11727_v11 = vunpack.c.l.bf16 %v12824_v63 }
  0x38   :  { %v2091_v8 = vsel %vm2079_vm3, %v1958_v44, %v2090_v6  ;;  %v1962_v14 = vunpack.c.l.b16 %v1704_v16  ;;  %v2082_v15 = vsel %vm2081_vm4, %v1951_v26, %v2080_v46  ;;  %v11728_v47 = vunpack.c.h.bf16 %v12824_v63 }
  0x39   :  { %v2092_v17 = vsel %vm2081_vm4, %v1959_v62, %v2091_v8  ;;  %v2084_v32 = vsel %vm2083_vm5, %v1952_v56, %v2082_v15  ;;  %v11731_v19 = vunpack.c.l.bf16 %v12834_v35  ;;  %v11732_v36 = vunpack.c.h.bf16 %v12834_v35  ;;  %v12926_v56 = vld [vmem:[%s18084_s0 + $0xf8] sm:$0xff]  }
  0x3a   :  { %v2093_v18 = vsel %vm2083_vm5, %v1960_v1, %v2092_v17  ;;  %v2086_v33 = vsel %vm2085_vm6, %v1953_v43, %v2084_v32  ;;  %v11735_v34 = vunpack.c.l.bf16 %v12843_v12  ;;  %v11736_v50 = vunpack.c.h.bf16 %v12843_v12 }
  0x3b   :  { %v2094_v22 = vsel %vm2085_vm6, %v1961_v45, %v2093_v18  ;;  %v2088_v21 = vsel %vm2087_vm7, %v1954_v57, %v2086_v33  ;;  %v11739_v23 = vunpack.c.l.bf16 %v12188_v31  ;;  %v11740_v3 = vunpack.c.h.bf16 %v12188_v31 }
  0x3c   :  { %v2095_v0 = vsel %vm2087_vm7, %v1962_v14, %v2094_v22  ;;  %v11743_v28 = vunpack.c.l.bf16 %v12858_v49  ;;  %v11744_v39 = vunpack.c.h.bf16 %v12858_v49  ;;  %v11747_v40 = vunpack.c.l.bf16 %v12863_v48 }
  0x3d   :  { %v2194_v24 = vpack.c.b16 %v2095_v0, %v2088_v21  ;;  %v11748_v53 = vunpack.c.h.bf16 %v12863_v48  ;;  %v11751_v41 = vunpack.c.l.bf16 %v12872_v27  ;;  %v11752_v13 = vunpack.c.h.bf16 %v12872_v27 }
  0x3e   :  { %v11755_v54 = vunpack.c.l.bf16 %v12877_v20  ;;  %v11756_v29 = vunpack.c.h.bf16 %v12877_v20  ;;  %v11759_v42 = vunpack.c.l.bf16 %v12884_v51  ;;  %v11760_v25 = vunpack.c.h.bf16 %v12884_v51 }
  0x3f   :  { %12395 = vmatprep.mubr.msk.bf16.mxu0 %vm536_vm0, %v2194_v24  ;;  %v11763_v26 = vunpack.c.l.bf16 %v12889_v38  ;;  %v11764_v43 = vunpack.c.h.bf16 %v12889_v38  ;;  %v11767_v57 = vunpack.c.l.bf16 %v12897_v52  ;;  %v11768_v58 = vunpack.c.h.bf16 %v12897_v52 }
  0x40   :  { %v11771_v59 = vunpack.c.l.bf16 %v12902_v9  ;;  %v11772_v60 = vunpack.c.h.bf16 %v12902_v9  ;;  %v11775_v30 = vunpack.c.l.bf16 %v12911_v37  ;;  %v11776_v61 = vunpack.c.h.bf16 %v12911_v37 }
  0x41   :  { %v11779_v44 = vunpack.c.l.bf16 %v12916_v55  ;;  %v11780_v62 = vunpack.c.h.bf16 %v12916_v55  ;;  %v11783_v63 = vunpack.c.l.bf16 %v12926_v56  ;;  %v11784_v1 = vunpack.c.h.bf16 %v12926_v56 }
  0x42   :  { %v681_v45 = vsel %vm536_vm0, %v11723_v7, 0.0  ;;  %v682_v2 = vsel %vm536_vm0, %v11724_v10, 0.0  ;;  %v690_v4 = vsel %vm536_vm0, %v11727_v11, 0.0  ;;  %v691_v16 = vsel %vm536_vm0, %v11728_v47, 0.0 }
  0x43   :  { %v699_v5 = vsel %vm536_vm0, %v11731_v19, 0.0  ;;  %v683_v6 = vadd.f32 %v682_v2, %v681_v45  ;;  %v692_v35 = vadd.f32 %v691_v16, %v690_v4  ;;  %v700_v46 = vsel %vm536_vm0, %v11732_v36, 0.0 }
  0x44   :  { %v708_v8 = vsel %vm536_vm0, %v11735_v34, 0.0  ;;  %v701_v12 = vadd.f32 %v700_v46, %v699_v5  ;;  %v709_v14 = vsel %vm536_vm0, %v11736_v50, 0.0  ;;  %v717_v15 = vsel %vm536_vm0, %v11739_v23, 0.0 }
  0x45   :  { %v718_v7 = vsel %vm536_vm0, %v11740_v3, 0.0  ;;  %v684_v10 = vrot.slane %v683_v6, 4  ;;  %v693_v17 = vrot.slane %v692_v35, 4  ;;  %v710_v11 = vadd.f32 %v709_v14, %v708_v8 }
  0x46   :  { %v719_v31 = vadd.f32 %v718_v7, %v717_v15  ;;  %v702_v47 = vrot.slane %v701_v12, 4  ;;  %v726_v32 = vsel %vm536_vm0, %v11743_v28, 0.0  ;;  %v727_v18 = vsel %vm536_vm0, %v11744_v39, 0.0 }
  0x47   :  { %v735_v19 = vsel %vm536_vm0, %v11747_v40, 0.0  ;;  %v685_v36 = vadd.f32 %v684_v10, %v683_v6  ;;  %v694_v49 = vadd.f32 %v693_v17, %v692_v35  ;;  %v711_v48 = vrot.slane %v710_v11, 4 }
  0x48   :  { %v720_v33 = vrot.slane %v719_v31, 4  ;;  %v703_v22 = vadd.f32 %v702_v47, %v701_v12  ;;  %v728_v34 = vadd.f32 %v727_v18, %v726_v32  ;;  %v736_v50 = vsel %vm536_vm0, %v11748_v53, 0.0 }
  0x49   :  { %v744_v27 = vsel %vm536_vm0, %v11751_v41, 0.0  ;;  %v686_v21 = vrot.slane %v685_v36, 2  ;;  %v695_v0 = vrot.slane %v694_v49, 2  ;;  %v712_v23 = vadd.f32 %v711_v48, %v710_v11 }
  0x4a   :  { %v721_v3 = vadd.f32 %v720_v33, %v719_v31  ;;  %v704_v24 = vrot.slane %v703_v22, 2  ;;  %v729_v28 = vrot.slane %v728_v34, 4  ;;  %v737_v45 = vadd.f32 %v736_v50, %v735_v19 }
  0x4b   :  { %v745_v39 = vsel %vm536_vm0, %v11752_v13, 0.0  ;;  %v687_v40 = vadd.f32 %v686_v21, %v685_v36  ;;  %v696_v2 = vadd.f32 %v695_v0, %v694_v49  ;;  %v713_v4 = vrot.slane %v712_v23, 2 }
  0x4c   :  { %v722_v16 = vrot.slane %v721_v3, 2  ;;  %v705_v5 = vadd.f32 %v704_v24, %v703_v22  ;;  %v730_v6 = vadd.f32 %v729_v28, %v728_v34  ;;  %v738_v35 = vrot.slane %v737_v45, 4 }
  0x4d   :  { %v746_v46 = vadd.f32 %v745_v39, %v744_v27  ;;  %v688_v53 = vrot.slane %v687_v40, 1  ;;  %v697_v8 = vrot.slane %v696_v2, 1  ;;  %v714_v41 = vadd.f32 %v713_v4, %v712_v23 }
  0x4e   :  { %v723_v12 = vadd.f32 %v722_v16, %v721_v3  ;;  %v706_v14 = vrot.slane %v705_v5, 1  ;;  %v731_v15 = vrot.slane %v730_v6, 2  ;;  %v739_v7 = vadd.f32 %v738_v35, %v737_v45 }
  0x4f   :  { %v747_v10 = vrot.slane %v746_v46, 4  ;;  %v12955_v17 = vadd.f32 %v688_v53, %v687_v40  ;;  %v12957_v11 = vadd.f32 %v697_v8, %v696_v2  ;;  %v715_v13 = vrot.slane %v714_v41, 1 }
  0x50   :  { %v724_v31 = vrot.slane %v723_v12, 1  ;;  %v12959_v47 = vadd.f32 %v706_v14, %v705_v5  ;;  %v732_v32 = vadd.f32 %v731_v15, %v730_v6  ;;  %v740_v18 = vrot.slane %v739_v7, 2 }
  0x51   :  { %v748_v19 = vadd.f32 %v747_v10, %v746_v46  ;;  %v12961_v36 = vadd.f32 %v715_v13, %v714_v41  ;;  %v753_v48 = vsel %vm536_vm0, %v11755_v54, 0.0  ;;  %v754_v33 = vsel %vm536_vm0, %v11756_v29, 0.0 }
  0x52   :  { %v12963_v49 = vadd.f32 %v724_v31, %v723_v12  ;;  %v733_v22 = vrot.slane %v732_v32, 1  ;;  %v741_v34 = vadd.f32 %v740_v18, %v739_v7  ;;  %v755_v27 = vadd.f32 %v754_v33, %v753_v48 }
  0x53   :  { %v749_v50 = vrot.slane %v748_v19, 2  ;;  %v762_v21 = vsel %vm536_vm0, %v11759_v42, 0.0  ;;  %v763_v0 = vsel %vm536_vm0, %v11760_v25, 0.0  ;;  %v771_v54 = vsel %vm536_vm0, %v11763_v26, 0.0 }
  0x54   :  { %v772_v20 = vsel %vm536_vm0, %v11764_v43, 0.0  ;;  %v12983_v29 = vadd.f32 %v733_v22, %v732_v32  ;;  %v742_v23 = vrot.slane %v741_v34, 1  ;;  %v756_v24 = vrot.slane %v755_v27, 4 }
  0x55   :  { %v750_v3 = vadd.f32 %v749_v50, %v748_v19  ;;  %v764_v28 = vadd.f32 %v763_v0, %v762_v21  ;;  %v773_v45 = vadd.f32 %v772_v20, %v771_v54  ;;  %v780_v51 = vsel %vm536_vm0, %v11767_v57, 0.0 }
  0x56   :  { %v781_v42 = vsel %vm536_vm0, %v11768_v58, 0.0  ;;  %v12991_v25 = vadd.f32 %v742_v23, %v741_v34  ;;  %v757_v26 = vadd.f32 %v756_v24, %v755_v27  ;;  %v789_v2 = vsel %vm536_vm0, %v11771_v59, 0.0 }
  0x57   :  { %v751_v38 = vrot.slane %v750_v3, 1  ;;  %v782_v43 = vadd.f32 %v781_v42, %v780_v51  ;;  %v765_v39 = vrot.slane %v764_v28, 4  ;;  %v774_v40 = vrot.slane %v773_v45, 4 }
  0x58   :  { %v790_v4 = vsel %vm536_vm0, %v11772_v60, 0.0  ;;  %v758_v52 = vrot.slane %v757_v26, 2  ;;  %v798_v35 = vsel %vm536_vm0, %v11775_v30, 0.0  ;;  %v799_v46 = vsel %vm536_vm0, %v11776_v61, 0.0 }
  0x59   :  { %v12999_v57 = vadd.f32 %v751_v38, %v750_v3  ;;  %v783_v16 = vrot.slane %v782_v43, 4  ;;  %v791_v58 = vadd.f32 %v790_v4, %v789_v2  ;;  %v766_v5 = vadd.f32 %v765_v39, %v764_v28 }
  0x5a   :  { %v775_v6 = vadd.f32 %v774_v40, %v773_v45  ;;  %v759_v59 = vadd.f32 %v758_v52, %v757_v26  ;;  %v800_v8 = vadd.f32 %v799_v46, %v798_v35  ;;  %v807_v12 = vsel %vm536_vm0, %v11779_v44, 0.0 }
  0x5b   :  { %v784_v53 = vadd.f32 %v783_v16, %v782_v43  ;;  %v792_v9 = vrot.slane %v791_v58, 4  ;;  %v767_v60 = vrot.slane %v766_v5, 2  ;;  %v808_v14 = vsel %vm536_vm0, %v11780_v62, 0.0 }
  0x5c   :  { %v776_v41 = vrot.slane %v775_v6, 2  ;;  %v760_v15 = vrot.slane %v759_v59, 1  ;;  %v801_v37 = vrot.slane %v800_v8, 4  ;;  %v809_v13 = vadd.f32 %v808_v14, %v807_v12 }
  0x5d   :  { %v785_v30 = vrot.slane %v784_v53, 2  ;;  %v793_v7 = vadd.f32 %v792_v9, %v791_v58  ;;  %v768_v10 = vadd.f32 %v767_v60, %v766_v5  ;;  %v816_v31 = vsel %vm536_vm0, %v11783_v63, 0.0  ;;  %v13038_v60 = vld [vmem:[%s18084_s0 + $0x100] sm:$0xff]  }
  0x5e   :  { %v777_v61 = vadd.f32 %v776_v41, %v775_v6  ;;  %v761_v32 = vadd.f32 %v760_v15, %v759_v59  ;;  %v802_v48 = vadd.f32 %v801_v37, %v800_v8  ;;  %v810_v55 = vrot.slane %v809_v13, 4 }
  0x5f   :  { %v786_v18 = vadd.f32 %v785_v30, %v784_v53  ;;  %v794_v19 = vrot.slane %v793_v7, 2  ;;  %v769_v44 = vrot.slane %v768_v10, 1  ;;  %v817_v62 = vsel %vm536_vm0, %v11784_v1, 0.0 }
  0x60   :  { %v778_v33 = vrot.slane %v777_v61, 1  ;;  %v803_v50 = vrot.slane %v802_v48, 2  ;;  %v818_v27 = vadd.f32 %v817_v62, %v816_v31  ;;  %v811_v54 = vadd.f32 %v810_v55, %v809_v13  ;;  %v13059_v62 = vld [vmem:[%s18084_s0 + $0x118] sm:$0xff]  }
  0x61   :  { %v787_v22 = vrot.slane %v786_v18, 1  ;;  %v795_v34 = vadd.f32 %v794_v19, %v793_v7  ;;  %v770_v21 = vadd.f32 %v769_v44, %v768_v10  ;;  %v1705_v63 = vpack.c.bf16 %v12955_v17, %v12955_v17  ;;  %v13051_v19 = vld [vmem:[%s18084_s0 + $0x110] sm:$0xff]  }
  0x62   :  { %v779_v0 = vadd.f32 %v778_v33, %v777_v61  ;;  %v804_v3 = vadd.f32 %v803_v50, %v802_v48  ;;  %v819_v24 = vrot.slane %v818_v27, 4  ;;  %v812_v28 = vrot.slane %v811_v54, 2  ;;  %v13043_v61 = vld [vmem:[%s18084_s0 + $0x108] sm:$0xff]  }
  0x63   :  { %v788_v20 = vadd.f32 %v787_v22, %v786_v18  ;;  %v796_v23 = vrot.slane %v795_v34, 1  ;;  %v1706_v56 = vpack.c.bf16 %v12957_v11, %v12957_v11  ;;  %v1707_v1 = vpack.c.bf16 %v12959_v47, %v12959_v47 }
  0x64   :  { %v1708_v45 = vpack.c.bf16 %v12961_v36, %v12961_v36  ;;  %v805_v42 = vrot.slane %v804_v3, 1  ;;  %v820_v38 = vadd.f32 %v819_v24, %v818_v27  ;;  %v1709_v17 = vpack.c.bf16 %v12963_v49, %v12963_v49 }
  0x65   :  { %v797_v51 = vadd.f32 %v796_v23, %v795_v34  ;;  %v813_v26 = vadd.f32 %v812_v28, %v811_v54  ;;  %v1710_v43 = vpack.c.bf16 %v12983_v29, %v12983_v29  ;;  %v1711_v39 = vpack.c.bf16 %v12991_v25, %v12991_v25  ;;  %v13076_v23 = vld [vmem:[%s18084_s0 + $0x128] sm:$0xff]  }
  0x66   :  { %v1712_v11 = vpack.c.bf16 %v12999_v57, %v12999_v57  ;;  %v806_v47 = vadd.f32 %v805_v42, %v804_v3  ;;  %v821_v40 = vrot.slane %v820_v38, 2  ;;  %v1713_v2 = vpack.c.bf16 %v761_v32, %v761_v32 }
  0x67   :  { %v1714_v36 = vpack.c.bf16 %v770_v21, %v770_v21  ;;  %v814_v4 = vrot.slane %v813_v26, 1  ;;  %v1715_v52 = vpack.c.bf16 %v779_v0, %v779_v0  ;;  %v1716_v16 = vpack.c.bf16 %v788_v20, %v788_v20  ;;  %v13068_v21 = vld [vmem:[%s18084_s0 + $0x120] sm:$0xff]  }
  0x68   :  { %v1717_v58 = vpack.c.bf16 %v797_v51, %v797_v51  ;;  %v822_v5 = vadd.f32 %v821_v40, %v820_v38  ;;  %v1718_v49 = vpack.c.bf16 %v806_v47, %v806_v47  ;;  %v1963_v6 = vunpack.c.l.b16 %v1705_v63  ;;  %v13108_v40 = vld [vmem:[%s18084_s0 + $0x148] sm:$0xff]  }
  0x69   :  { %v1964_v35 = vunpack.c.l.b16 %v1706_v56  ;;  %v815_v46 = vadd.f32 %v814_v4, %v813_v26  ;;  %v1965_v29 = vunpack.c.l.b16 %v1707_v1  ;;  %v1966_v59 = vunpack.c.l.b16 %v1708_v45  ;;  %v13085_v1 = vld [vmem:[%s18084_s0 + $0x130] sm:$0xff]   ;;  %v13099_v26 = vld [vmem:[%s18084_s0 + $0x140] sm:$0xff]  }
  0x6a   :  { %v1967_v53 = vunpack.c.l.b16 %v1709_v17  ;;  %v823_v25 = vrot.slane %v822_v5, 1  ;;  %v1968_v9 = vunpack.c.l.b16 %v1710_v43  ;;  %v1969_v8 = vunpack.c.l.b16 %v1711_v39  ;;  %v13094_v17 = vld [vmem:[%s18084_s0 + $0x138] sm:$0xff]  }
  0x6b   :  { %v1970_v57 = vunpack.c.l.b16 %v1712_v11  ;;  %v1719_v41 = vpack.c.bf16 %v815_v46, %v815_v46  ;;  %v1971_v12 = vunpack.c.l.b16 %v1713_v2  ;;  %v1972_v14 = vunpack.c.l.b16 %v1714_v36  ;;  %v13113_v2 = vld [vmem:[%s18084_s0 + $0x150] sm:$0xff]  }
  0x6c   :  { %v1973_v15 = vunpack.c.l.b16 %v1715_v52  ;;  %v824_v30 = vadd.f32 %v823_v25, %v822_v5  ;;  %v1974_v7 = vunpack.c.l.b16 %v1716_v16  ;;  %v1975_v37 = vunpack.c.l.b16 %v1717_v58  ;;  %v13121_v58 = vld [vmem:[%s18084_s0 + $0x158] sm:$0xff]   ;;  %v13126_v5 = vld [vmem:[%s18084_s0 + $0x160] sm:$0xff]  }
  0x6d   :  { %v1976_v10 = vunpack.c.l.b16 %v1718_v49  ;;  %v1977_v13 = vunpack.c.l.b16 %v1719_v41  ;;  %v2096_v31 = vsel %vm2075_vm1, %v1964_v35, %v1963_v6  ;;  %v2103_v32 = vsel %vm2075_vm1, %v1972_v14, %v1971_v12 }
  0x6e   :  { %v11787_v18 = vunpack.c.l.bf16 %v13038_v60  ;;  %v1720_v48 = vpack.c.bf16 %v824_v30, %v824_v30  ;;  %v2097_v44 = vsel %vm2077_vm2, %v1965_v29, %v2096_v31  ;;  %v2104_v33 = vsel %vm2077_vm2, %v1973_v15, %v2103_v32  ;;  %v13135_v29 = vld [vmem:[%s18084_s0 + $0x168] sm:$0xff]  }
  0x6f   :  { %v11788_v55 = vunpack.c.h.bf16 %v13038_v60  ;;  %v2098_v22 = vsel %vm2079_vm3, %v1966_v59, %v2097_v44  ;;  %v2105_v34 = vsel %vm2079_vm3, %v1974_v7, %v2104_v33  ;;  %v11791_v50 = vunpack.c.l.bf16 %v13043_v61  ;;  %v13140_v59 = vld [vmem:[%s18084_s0 + $0x170] sm:$0xff]  }
  0x70   :  { %v11792_v27 = vunpack.c.h.bf16 %v13043_v61  ;;  %v1978_v0 = vunpack.c.l.b16 %v1720_v48  ;;  %v2099_v54 = vsel %vm2081_vm4, %v1967_v53, %v2098_v22  ;;  %v2106_v63 = vsel %vm2081_vm4, %v1975_v37, %v2105_v34 }
  0x71   :  { %v11795_v20 = vunpack.c.l.bf16 %v13051_v19  ;;  %v2100_v3 = vsel %vm2083_vm5, %v1968_v9, %v2099_v54  ;;  %v2107_v24 = vsel %vm2083_vm5, %v1976_v10, %v2106_v63  ;;  %v11796_v28 = vunpack.c.h.bf16 %v13051_v19 }
  0x72   :  { %v11799_v56 = vunpack.c.l.bf16 %v13059_v62  ;;  %v2101_v45 = vsel %vm2085_vm6, %v1969_v8, %v2100_v3  ;;  %v2108_v51 = vsel %vm2085_vm6, %v1977_v13, %v2107_v24  ;;  %v11800_v42 = vunpack.c.h.bf16 %v13059_v62 }
  0x73   :  { %v11803_v38 = vunpack.c.l.bf16 %v13068_v21  ;;  %v2102_v43 = vsel %vm2087_vm7, %v1970_v57, %v2101_v45  ;;  %v2109_v39 = vsel %vm2087_vm7, %v1978_v0, %v2108_v51  ;;  %v11804_v11 = vunpack.c.h.bf16 %v13068_v21  ;;  %v13150_v57 = vld [vmem:[%s18084_s0 + $0x178] sm:$0xff]  }
  0x74   :  { %v11807_v47 = vunpack.c.l.bf16 %v13076_v23  ;;  %v2195_v36 = vpack.c.b16 %v2109_v39, %v2102_v43  ;;  %v11808_v4 = vunpack.c.h.bf16 %v13076_v23  ;;  %v11811_v52 = vunpack.c.l.bf16 %v13085_v1 }
  0x75   :  { %v11812_v16 = vunpack.c.h.bf16 %v13085_v1  ;;  %v11815_v49 = vunpack.c.l.bf16 %v13094_v17  ;;  %v11816_v6 = vunpack.c.h.bf16 %v13094_v17  ;;  %v11819_v35 = vunpack.c.l.bf16 %v13099_v26 }
  0x76   :  { %v11820_v46 = vunpack.c.h.bf16 %v13099_v26  ;;  %12396 = vmatmul.mubr.msk.bf16.vlgmr.msra.gmra.mrb[0].mxu0 %vm536_vm0, %v2195_v36  ;;  %v11823_v53 = vunpack.c.l.bf16 %v13108_v40  ;;  %v11824_v25 = vunpack.c.h.bf16 %v13108_v40  ;;  %v11827_v9 = vunpack.c.l.bf16 %v13113_v2 }
  0x77   :  { %v11828_v8 = vunpack.c.h.bf16 %v13113_v2  ;;  %v11831_v60 = vunpack.c.l.bf16 %v13121_v58  ;;  %v11832_v41 = vunpack.c.h.bf16 %v13121_v58  ;;  %v11835_v12 = vunpack.c.l.bf16 %v13126_v5 }
  0x78   :  { %v11836_v14 = vunpack.c.h.bf16 %v13126_v5  ;;  %v11839_v15 = vunpack.c.l.bf16 %v13135_v29  ;;  %v11840_v30 = vunpack.c.h.bf16 %v13135_v29  ;;  %v11843_v7 = vunpack.c.l.bf16 %v13140_v59 }
  0x79   :  { %v11844_v37 = vunpack.c.h.bf16 %v13140_v59  ;;  %v11847_v10 = vunpack.c.l.bf16 %v13150_v57  ;;  %v11848_v61 = vunpack.c.h.bf16 %v13150_v57  ;;  %v825_v13 = vsel %vm536_vm0, %v11787_v18, 0.0 }
  0x7a   :  { %v826_v31 = vsel %vm536_vm0, %v11788_v55, 0.0  ;;  %v834_v19 = vsel %vm536_vm0, %v11791_v50, 0.0  ;;  %v835_v48 = vsel %vm536_vm0, %v11792_v27, 0.0  ;;  %v843_v44 = vsel %vm536_vm0, %v11795_v20, 0.0 }
  0x7b   :  { %v827_v32 = vadd.f32 %v826_v31, %v825_v13  ;;  %v836_v33 = vadd.f32 %v835_v48, %v834_v19  ;;  %v844_v62 = vsel %vm536_vm0, %v11796_v28, 0.0  ;;  %v852_v22 = vsel %vm536_vm0, %v11799_v56, 0.0 }
  0x7c   :  { %v853_v34 = vsel %vm536_vm0, %v11800_v42, 0.0  ;;  %v845_v0 = vadd.f32 %v844_v62, %v843_v44  ;;  %v861_v18 = vsel %vm536_vm0, %v11803_v38, 0.0  ;;  %v862_v63 = vsel %vm536_vm0, %v11804_v11, 0.0 }
  0x7d   :  { %v828_v21 = vrot.slane %v827_v32, 4  ;;  %v854_v54 = vadd.f32 %v853_v34, %v852_v22  ;;  %v837_v55 = vrot.slane %v836_v33, 4  ;;  %v870_v50 = vsel %vm536_vm0, %v11807_v47, 0.0 }
  0x7e   :  { %v871_v27 = vsel %vm536_vm0, %v11808_v4, 0.0  ;;  %v846_v23 = vrot.slane %v845_v0, 4  ;;  %v863_v24 = vadd.f32 %v862_v63, %v861_v18  ;;  %v879_v1 = vsel %vm536_vm0, %v11811_v52, 0.0 }
  0x7f   :  { %v829_v20 = vadd.f32 %v828_v21, %v827_v32  ;;  %v855_v3 = vrot.slane %v854_v54, 4  ;;  %v838_v28 = vadd.f32 %v837_v55, %v836_v33  ;;  %v872_v56 = vadd.f32 %v871_v27, %v870_v50 }
  0x80   :  { %v880_v45 = vsel %vm536_vm0, %v11812_v16, 0.0  ;;  %v847_v42 = vadd.f32 %v846_v23, %v845_v0  ;;  %v864_v17 = vrot.slane %v863_v24, 4  ;;  %v888_v47 = vsel %vm536_vm0, %v11815_v49, 0.0 }
  0x81   :  { %v830_v51 = vrot.slane %v829_v20, 2  ;;  %v856_v38 = vadd.f32 %v855_v3, %v854_v54  ;;  %v839_v43 = vrot.slane %v838_v28, 2  ;;  %v873_v39 = vrot.slane %v872_v56, 4 }
  0x82   :  { %v881_v11 = vadd.f32 %v880_v45, %v879_v1  ;;  %v848_v4 = vrot.slane %v847_v42, 2  ;;  %v865_v31 = vadd.f32 %v864_v17, %v863_v24  ;;  %v889_v52 = vsel %vm536_vm0, %v11816_v6, 0.0 }
  0x83   :  { %v831_v36 = vadd.f32 %v830_v51, %v829_v20  ;;  %v857_v13 = vrot.slane %v856_v38, 2  ;;  %v840_v32 = vadd.f32 %v839_v43, %v838_v28  ;;  %v874_v19 = vadd.f32 %v873_v39, %v872_v56 }
  0x84   :  { %v882_v48 = vrot.slane %v881_v11, 4  ;;  %v849_v16 = vadd.f32 %v848_v4, %v847_v42  ;;  %v866_v62 = vrot.slane %v865_v31, 2  ;;  %v890_v0 = vadd.f32 %v889_v52, %v888_v47 }
  0x85   :  { %v832_v44 = vrot.slane %v831_v36, 1  ;;  %v858_v33 = vadd.f32 %v857_v13, %v856_v38  ;;  %v841_v22 = vrot.slane %v840_v32, 1  ;;  %v875_v34 = vrot.slane %v874_v19, 2 }
  0x86   :  { %v883_v21 = vadd.f32 %v882_v48, %v881_v11  ;;  %v850_v49 = vrot.slane %v849_v16, 1  ;;  %v867_v55 = vadd.f32 %v866_v62, %v865_v31  ;;  %v891_v20 = vrot.slane %v890_v0, 4 }
  0x87   :  { %v13178_v54 = vadd.f32 %v832_v44, %v831_v36  ;;  %v859_v18 = vrot.slane %v858_v33, 1  ;;  %v13180_v63 = vadd.f32 %v841_v22, %v840_v32  ;;  %v876_v50 = vadd.f32 %v875_v34, %v874_v19 }
  0x88   :  { %v884_v27 = vrot.slane %v883_v21, 2  ;;  %v13182_v23 = vadd.f32 %v850_v49, %v849_v16  ;;  %v868_v3 = vrot.slane %v867_v55, 1  ;;  %v897_v24 = vsel %vm536_vm0, %v11819_v35, 0.0 }
  0x89   :  { %v13184_v6 = vadd.f32 %v859_v18, %v858_v33  ;;  %v877_v28 = vrot.slane %v876_v50, 1  ;;  %v892_v1 = vadd.f32 %v891_v20, %v890_v0  ;;  %v898_v45 = vsel %vm536_vm0, %v11820_v46, 0.0 }
  0x8a   :  { %v885_v56 = vadd.f32 %v884_v27, %v883_v21  ;;  %v13192_v51 = vadd.f32 %v868_v3, %v867_v55  ;;  %v899_v42 = vadd.f32 %v898_v45, %v897_v24  ;;  %v906_v38 = vsel %vm536_vm0, %v11823_v53, 0.0 }
  0x8b   :  { %v907_v17 = vsel %vm536_vm0, %v11824_v25, 0.0  ;;  %v13200_v43 = vadd.f32 %v877_v28, %v876_v50  ;;  %v893_v39 = vrot.slane %v892_v1, 2  ;;  %v915_v26 = vsel %vm536_vm0, %v11827_v9, 0.0 }
  0x8c   :  { %v886_v35 = vrot.slane %v885_v56, 1  ;;  %v908_v11 = vadd.f32 %v907_v17, %v906_v38  ;;  %v900_v47 = vrot.slane %v899_v42, 4  ;;  %v916_v46 = vsel %vm536_vm0, %v11828_v8, 0.0 }
  0x8d   :  { %v924_v40 = vsel %vm536_vm0, %v11831_v60, 0.0  ;;  %v894_v25 = vadd.f32 %v893_v39, %v892_v1  ;;  %v917_v4 = vadd.f32 %v916_v46, %v915_v26  ;;  %v925_v31 = vsel %vm536_vm0, %v11832_v41, 0.0 }
  0x8e   :  { %v13211_v53 = vadd.f32 %v886_v35, %v885_v56  ;;  %v909_v36 = vrot.slane %v908_v11, 4  ;;  %v901_v13 = vadd.f32 %v900_v47, %v899_v42  ;;  %v933_v2 = vsel %vm536_vm0, %v11835_v12, 0.0 }
  0x8f   :  { %v934_v9 = vsel %vm536_vm0, %v11836_v14, 0.0  ;;  %v895_v8 = vrot.slane %v894_v25, 1  ;;  %v918_v32 = vrot.slane %v917_v4, 4  ;;  %v926_v19 = vadd.f32 %v925_v31, %v924_v40 }
  0x90   :  { %v910_v60 = vadd.f32 %v909_v36, %v908_v11  ;;  %v902_v48 = vrot.slane %v901_v13, 2  ;;  %v935_v52 = vadd.f32 %v934_v9, %v933_v2  ;;  %v942_v58 = vsel %vm536_vm0, %v11839_v15, 0.0 }
  0x91   :  { %v943_v41 = vsel %vm536_vm0, %v11840_v30, 0.0  ;;  %v13228_v44 = vadd.f32 %v895_v8, %v894_v25  ;;  %v919_v5 = vadd.f32 %v918_v32, %v917_v4  ;;  %v927_v16 = vrot.slane %v926_v19, 4 }
  0x92   :  { %v911_v12 = vrot.slane %v910_v60, 2  ;;  %v903_v14 = vadd.f32 %v902_v48, %v901_v13  ;;  %v936_v33 = vrot.slane %v935_v52, 4  ;;  %v944_v62 = vadd.f32 %v943_v41, %v942_v58 }
  0x93   :  { %v951_v22 = vsel %vm536_vm0, %v11843_v7, 0.0  ;;  %v920_v21 = vrot.slane %v919_v5, 2  ;;  %v928_v0 = vadd.f32 %v927_v16, %v926_v19  ;;  %v952_v29 = vsel %vm536_vm0, %v11844_v37, 0.0 }
  0x94   :  { %v912_v34 = vadd.f32 %v911_v12, %v910_v60  ;;  %v904_v15 = vrot.slane %v903_v14, 1  ;;  %v937_v30 = vadd.f32 %v936_v33, %v935_v52  ;;  %v945_v49 = vrot.slane %v944_v62, 4 }
  0x95   :  { %v953_v18 = vadd.f32 %v952_v29, %v951_v22  ;;  %v921_v50 = vadd.f32 %v920_v21, %v919_v5  ;;  %v929_v27 = vrot.slane %v928_v0, 2  ;;  %v960_v20 = vsel %vm536_vm0, %v11847_v10, 0.0 }
  0x96   :  { %v913_v55 = vrot.slane %v912_v34, 1  ;;  %v905_v3 = vadd.f32 %v904_v15, %v903_v14  ;;  %v938_v7 = vrot.slane %v937_v30, 2  ;;  %v946_v24 = vadd.f32 %v945_v49, %v944_v62 }
  0x97   :  { %v954_v28 = vrot.slane %v953_v18, 4  ;;  %v922_v1 = vrot.slane %v921_v50, 1  ;;  %v930_v59 = vadd.f32 %v929_v27, %v928_v0  ;;  %v961_v37 = vsel %vm536_vm0, %v11848_v61, 0.0  ;;  %v13271_v27 = vld [vmem:[%s18084_s0 + $0x190] sm:$0xff]  }
  0x98   :  { %v914_v56 = vadd.f32 %v913_v55, %v912_v34  ;;  %v939_v45 = vadd.f32 %v938_v7, %v937_v30  ;;  %v947_v42 = vrot.slane %v946_v24, 2  ;;  %v962_v17 = vadd.f32 %v961_v37, %v960_v20  ;;  %v13261_v34 = vld [vmem:[%s18084_s0 + $0x180] sm:$0xff]   ;;  %v13266_v30 = vld [vmem:[%s18084_s0 + $0x188] sm:$0xff]   ;;  %v13283_v37 = vld [vmem:[%s18084_s0 + $0x198] sm:$0xff]  }
  0x99   :  { %v955_v38 = vadd.f32 %v954_v28, %v953_v18  ;;  %v923_v35 = vadd.f32 %v922_v1, %v921_v50  ;;  %v931_v39 = vrot.slane %v930_v59, 1  ;;  %v1721_v10 = vpack.c.bf16 %v13178_v54, %v13178_v54 }
  0x9a   :  { %v1722_v11 = vpack.c.bf16 %v13180_v63, %v13180_v63  ;;  %v940_v47 = vrot.slane %v939_v45, 1  ;;  %v948_v26 = vadd.f32 %v947_v42, %v946_v24  ;;  %v963_v40 = vrot.slane %v962_v17, 4 }
  0x9b   :  { %v956_v46 = vrot.slane %v955_v38, 2  ;;  %v932_v25 = vadd.f32 %v931_v39, %v930_v59  ;;  %v1723_v57 = vpack.c.bf16 %v13182_v23, %v13182_v23  ;;  %v1724_v61 = vpack.c.bf16 %v13184_v6, %v13184_v6 }
  0x9c   :  { %v1725_v36 = vpack.c.bf16 %v13192_v51, %v13192_v51  ;;  %v941_v4 = vadd.f32 %v940_v47, %v939_v45  ;;  %v949_v13 = vrot.slane %v948_v26, 1  ;;  %v964_v31 = vadd.f32 %v963_v40, %v962_v17 }
  0x9d   :  { %v957_v54 = vadd.f32 %v956_v46, %v955_v38  ;;  %v1726_v63 = vpack.c.bf16 %v13200_v43, %v13200_v43  ;;  %v1727_v2 = vpack.c.bf16 %v13211_v53, %v13211_v53  ;;  %v1728_v9 = vpack.c.bf16 %v13228_v44, %v13228_v44 }
  0x9e   :  { %v1729_v23 = vpack.c.bf16 %v905_v3, %v905_v3  ;;  %v950_v8 = vadd.f32 %v949_v13, %v948_v26  ;;  %v965_v6 = vrot.slane %v964_v31, 2  ;;  %v1730_v32 = vpack.c.bf16 %v914_v56, %v914_v56  ;;  %v13300_v26 = vld [vmem:[%s18084_s0 + $0x1a8] sm:$0xff]  }
  0x9f   :  { %v958_v60 = vrot.slane %v957_v54, 1  ;;  %v1731_v19 = vpack.c.bf16 %v923_v35, %v923_v35  ;;  %v1732_v51 = vpack.c.bf16 %v932_v25, %v932_v25  ;;  %v1733_v48 = vpack.c.bf16 %v941_v4, %v941_v4  ;;  %v13292_v35 = vld [vmem:[%s18084_s0 + $0x1a0] sm:$0xff]  }
  0xa0   :  { %v1979_v52 = vunpack.c.l.b16 %v1721_v10  ;;  %v966_v41 = vadd.f32 %v965_v6, %v964_v31  ;;  %v1734_v12 = vpack.c.bf16 %v950_v8, %v950_v8  ;;  %v1980_v5 = vunpack.c.l.b16 %v1722_v11  ;;  %v13337_v6 = vld [vmem:[%s18084_s0 + $0x1d0] sm:$0xff]  }
  0xa1   :  { %v959_v58 = vadd.f32 %v958_v60, %v957_v54  ;;  %v1981_v43 = vunpack.c.l.b16 %v1723_v57  ;;  %v1982_v16 = vunpack.c.l.b16 %v1724_v61  ;;  %v1983_v14 = vunpack.c.l.b16 %v1725_v36  ;;  %v13309_v61 = vld [vmem:[%s18084_s0 + $0x1b0] sm:$0xff]   ;;  %v13314_v36 = vld [vmem:[%s18084_s0 + $0x1b8] sm:$0xff]  }
  0xa2   :  { %v1984_v53 = vunpack.c.l.b16 %v1726_v63  ;;  %v967_v33 = vrot.slane %v966_v41, 1  ;;  %v1985_v44 = vunpack.c.l.b16 %v1727_v2  ;;  %v1986_v22 = vunpack.c.l.b16 %v1728_v9  ;;  %v13323_v63 = vld [vmem:[%s18084_s0 + $0x1c0] sm:$0xff]   ;;  %v13328_v2 = vld [vmem:[%s18084_s0 + $0x1c8] sm:$0xff]  }
  0xa3   :  { %v1735_v62 = vpack.c.bf16 %v959_v58, %v959_v58  ;;  %v1987_v21 = vunpack.c.l.b16 %v1729_v23  ;;  %v1988_v0 = vunpack.c.l.b16 %v1730_v32  ;;  %v1989_v29 = vunpack.c.l.b16 %v1731_v19  ;;  %v13342_v32 = vld [vmem:[%s18084_s0 + $0x1d8] sm:$0xff]   ;;  %v13350_v58 = vld [vmem:[%s18084_s0 + $0x1e0] sm:$0xff]  }
  0xa4   :  { %v1990_v15 = vunpack.c.l.b16 %v1732_v51  ;;  %v968_v49 = vadd.f32 %v967_v33, %v966_v41  ;;  %v1991_v18 = vunpack.c.l.b16 %v1733_v48  ;;  %v1992_v55 = vunpack.c.l.b16 %v1734_v12  ;;  %v13355_v41 = vld [vmem:[%s18084_s0 + $0x1e8] sm:$0xff]  }
  0xa5   :  { %v1993_v50 = vunpack.c.l.b16 %v1735_v62  ;;  %v2110_v20 = vsel %vm2075_vm1, %v1980_v5, %v1979_v52  ;;  %v2117_v3 = vsel %vm2075_vm1, %v1988_v0, %v1987_v21  ;;  %v11851_v7 = vunpack.c.l.bf16 %v13261_v34 }
  0xa6   :  { %v11852_v24 = vunpack.c.h.bf16 %v13261_v34  ;;  %v1736_v28 = vpack.c.bf16 %v968_v49, %v968_v49  ;;  %v2111_v56 = vsel %vm2077_vm2, %v1981_v43, %v2110_v20  ;;  %v2118_v1 = vsel %vm2077_vm2, %v1989_v29, %v2117_v3 }
  0xa7   :  { %v11855_v59 = vunpack.c.l.bf16 %v13266_v30  ;;  %v2112_v45 = vsel %vm2079_vm3, %v1982_v16, %v2111_v56  ;;  %v2119_v42 = vsel %vm2079_vm3, %v1990_v15, %v2118_v1  ;;  %v11856_v38 = vunpack.c.h.bf16 %v13266_v30 }
  0xa8   :  { %v11859_v17 = vunpack.c.l.bf16 %v13271_v27  ;;  %v1994_v39 = vunpack.c.l.b16 %v1736_v28  ;;  %v2113_v10 = vsel %vm2081_vm4, %v1983_v14, %v2112_v45  ;;  %v2120_v11 = vsel %vm2081_vm4, %v1991_v18, %v2119_v42  ;;  %v13364_v14 = vld [vmem:[%s18084_s0 + $0x1f0] sm:$0xff]  }
  0xa9   :  { %v11860_v47 = vunpack.c.h.bf16 %v13271_v27  ;;  %v2114_v46 = vsel %vm2083_vm5, %v1984_v53, %v2113_v10  ;;  %v2121_v40 = vsel %vm2083_vm5, %v1992_v55, %v2120_v11  ;;  %v11863_v25 = vunpack.c.l.bf16 %v13283_v37  ;;  %v13369_v53 = vld [vmem:[%s18084_s0 + $0x1f8] sm:$0xff]  }
  0xaa   :  { %v11864_v57 = vunpack.c.h.bf16 %v13283_v37  ;;  %v2115_v4 = vsel %vm2085_vm6, %v1985_v44, %v2114_v46  ;;  %v2122_v13 = vsel %vm2085_vm6, %v1993_v50, %v2121_v40  ;;  %v11867_v54 = vunpack.c.l.bf16 %v13292_v35 }
  0xab   :  { %v11868_v31 = vunpack.c.h.bf16 %v13292_v35  ;;  %v2116_v9 = vsel %vm2087_vm7, %v1986_v22, %v2115_v4  ;;  %v2123_v23 = vsel %vm2087_vm7, %v1994_v39, %v2122_v13  ;;  %v11871_v8 = vunpack.c.l.bf16 %v13300_v26 }
  0xac   :  { %v11872_v60 = vunpack.c.h.bf16 %v13300_v26  ;;  %v2196_v19 = vpack.c.b16 %v2123_v23, %v2116_v9  ;;  %v11875_v51 = vunpack.c.l.bf16 %v13309_v61  ;;  %v11876_v48 = vunpack.c.h.bf16 %v13309_v61 }
  0xad   :  { %v11879_v52 = vunpack.c.l.bf16 %v13314_v36  ;;  %v11880_v12 = vunpack.c.h.bf16 %v13314_v36  ;;  %v11883_v5 = vunpack.c.l.bf16 %v13323_v63  ;;  %v11884_v43 = vunpack.c.h.bf16 %v13323_v63 }
  0xae   :  { %v11887_v16 = vunpack.c.l.bf16 %v13328_v2  ;;  %12399 = vmatprep.mubr.msk.bf16.mxu0 %vm536_vm0, %v2196_v19  ;;  %v11888_v33 = vunpack.c.h.bf16 %v13328_v2  ;;  %v11891_v62 = vunpack.c.l.bf16 %v13337_v6  ;;  %v11892_v44 = vunpack.c.h.bf16 %v13337_v6 }
  0xaf   :  { %v11895_v22 = vunpack.c.l.bf16 %v13342_v32  ;;  %v11896_v34 = vunpack.c.h.bf16 %v13342_v32  ;;  %v11899_v21 = vunpack.c.l.bf16 %v13350_v58  ;;  %v11900_v0 = vunpack.c.h.bf16 %v13350_v58 }
  0xb0   :  { %v11903_v29 = vunpack.c.l.bf16 %v13355_v41  ;;  %v11904_v15 = vunpack.c.h.bf16 %v13355_v41  ;;  %v11907_v30 = vunpack.c.l.bf16 %v13364_v14  ;;  %v11908_v49 = vunpack.c.h.bf16 %v13364_v14 }
  0xb1   :  { %v11911_v18 = vunpack.c.l.bf16 %v13369_v53  ;;  %v11912_v55 = vunpack.c.h.bf16 %v13369_v53  ;;  %v969_v50 = vsel %vm536_vm0, %v11851_v7, 0.0  ;;  %v970_v27 = vsel %vm536_vm0, %v11852_v24, 0.0 }
  0xb2   :  { %v978_v20 = vsel %vm536_vm0, %v11855_v59, 0.0  ;;  %v971_v3 = vadd.f32 %v970_v27, %v969_v50  ;;  %v979_v28 = vsel %vm536_vm0, %v11856_v38, 0.0  ;;  %v987_v56 = vsel %vm536_vm0, %v11859_v17, 0.0 }
  0xb3   :  { %v988_v1 = vsel %vm536_vm0, %v11860_v47, 0.0  ;;  %v980_v37 = vadd.f32 %v979_v28, %v978_v20  ;;  %v996_v42 = vsel %vm536_vm0, %v11863_v25, 0.0  ;;  %v997_v35 = vsel %vm536_vm0, %v11864_v57, 0.0 }
  0xb4   :  { %v989_v45 = vadd.f32 %v988_v1, %v987_v56  ;;  %v972_v39 = vrot.slane %v971_v3, 4  ;;  %v998_v10 = vadd.f32 %v997_v35, %v996_v42  ;;  %v1005_v7 = vsel %vm536_vm0, %v11867_v54, 0.0 }
  0xb5   :  { %v1006_v24 = vsel %vm536_vm0, %v11868_v31, 0.0  ;;  %v981_v59 = vrot.slane %v980_v37, 4  ;;  %v1014_v38 = vsel %vm536_vm0, %v11871_v8, 0.0  ;;  %v1015_v47 = vsel %vm536_vm0, %v11872_v60, 0.0 }
  0xb6   :  { %v990_v11 = vrot.slane %v989_v45, 4  ;;  %v1007_v26 = vadd.f32 %v1006_v24, %v1005_v7  ;;  %v973_v17 = vadd.f32 %v972_v39, %v971_v3  ;;  %v999_v46 = vrot.slane %v998_v10, 4 }
  0xb7   :  { %v1023_v40 = vsel %vm536_vm0, %v11875_v51, 0.0  ;;  %v982_v25 = vadd.f32 %v981_v59, %v980_v37  ;;  %v1016_v36 = vadd.f32 %v1015_v47, %v1014_v38  ;;  %v1024_v54 = vsel %vm536_vm0, %v11876_v48, 0.0 }
  0xb8   :  { %v991_v61 = vadd.f32 %v990_v11, %v989_v45  ;;  %v1008_v57 = vrot.slane %v1007_v26, 4  ;;  %v974_v4 = vrot.slane %v973_v17, 2  ;;  %v1000_v13 = vadd.f32 %v999_v46, %v998_v10 }
  0xb9   :  { %v1032_v31 = vsel %vm536_vm0, %v11879_v52, 0.0  ;;  %v983_v9 = vrot.slane %v982_v25, 2  ;;  %v1017_v8 = vrot.slane %v1016_v36, 4  ;;  %v1025_v20 = vadd.f32 %v1024_v54, %v1023_v40 }
  0xba   :  { %v992_v23 = vrot.slane %v991_v61, 2  ;;  %v1009_v19 = vadd.f32 %v1008_v57, %v1007_v26  ;;  %v975_v50 = vadd.f32 %v974_v4, %v973_v17  ;;  %v1001_v27 = vrot.slane %v1000_v13, 2 }
  0xbb   :  { %v1033_v60 = vsel %vm536_vm0, %v11880_v12, 0.0  ;;  %v984_v51 = vadd.f32 %v983_v9, %v982_v25  ;;  %v1018_v56 = vadd.f32 %v1017_v8, %v1016_v36  ;;  %v1026_v45 = vrot.slane %v1025_v20, 4 }
  0xbc   :  { %v993_v3 = vadd.f32 %v992_v23, %v991_v61  ;;  %v1010_v28 = vrot.slane %v1009_v19, 2  ;;  %v976_v1 = vrot.slane %v975_v50, 1  ;;  %v1002_v37 = vadd.f32 %v1001_v27, %v1000_v13 }
  0xbd   :  { %v1034_v42 = vadd.f32 %v1033_v60, %v1032_v31  ;;  %v985_v48 = vrot.slane %v984_v51, 1  ;;  %v1019_v39 = vrot.slane %v1018_v56, 2  ;;  %v1027_v24 = vadd.f32 %v1026_v45, %v1025_v20 }
  0xbe   :  { %v994_v35 = vrot.slane %v993_v3, 1  ;;  %v1011_v52 = vadd.f32 %v1010_v28, %v1009_v19  ;;  %v13401_v10 = vadd.f32 %v976_v1, %v975_v50  ;;  %v1003_v7 = vrot.slane %v1002_v37, 1 }
  0xbf   :  { %v1035_v59 = vrot.slane %v1034_v42, 4  ;;  %v13403_v11 = vadd.f32 %v985_v48, %v984_v51  ;;  %v1020_v38 = vadd.f32 %v1019_v39, %v1018_v56  ;;  %v1028_v46 = vrot.slane %v1027_v24, 2 }
  0xc0   :  { %v13405_v12 = vadd.f32 %v994_v35, %v993_v3  ;;  %v1012_v26 = vrot.slane %v1011_v52, 1  ;;  %v13407_v17 = vadd.f32 %v1003_v7, %v1002_v37  ;;  %v1041_v40 = vsel %vm536_vm0, %v11883_v5, 0.0 }
  0xc1   :  { %v1036_v47 = vadd.f32 %v1035_v59, %v1034_v42  ;;  %v1021_v61 = vrot.slane %v1020_v38, 1  ;;  %v1042_v57 = vsel %vm536_vm0, %v11884_v43, 0.0  ;;  %v1050_v36 = vsel %vm536_vm0, %v11887_v16, 0.0 }
  0xc2   :  { %v13412_v25 = vadd.f32 %v1012_v26, %v1011_v52  ;;  %v1029_v4 = vadd.f32 %v1028_v46, %v1027_v24  ;;  %v1043_v54 = vadd.f32 %v1042_v57, %v1041_v40  ;;  %v1051_v31 = vsel %vm536_vm0, %v11888_v33, 0.0 }
  0xc3   :  { %v1037_v13 = vrot.slane %v1036_v47, 2  ;;  %v13423_v9 = vadd.f32 %v1021_v61, %v1020_v38  ;;  %v1052_v5 = vadd.f32 %v1051_v31, %v1050_v36  ;;  %v1059_v63 = vsel %vm536_vm0, %v11891_v62, 0.0 }
  0xc4   :  { %v1060_v43 = vsel %vm536_vm0, %v11892_v44, 0.0  ;;  %v1030_v23 = vrot.slane %v1029_v4, 1  ;;  %v1044_v19 = vrot.slane %v1043_v54, 4  ;;  %v1068_v2 = vsel %vm536_vm0, %v11895_v22, 0.0 }
  0xc5   :  { %v1038_v16 = vadd.f32 %v1037_v13, %v1036_v47  ;;  %v1061_v8 = vadd.f32 %v1060_v43, %v1059_v63  ;;  %v1053_v50 = vrot.slane %v1052_v5, 4  ;;  %v1069_v33 = vsel %vm536_vm0, %v11896_v34, 0.0 }
  0xc6   :  { %v1077_v62 = vsel %vm536_vm0, %v11899_v21, 0.0  ;;  %v13440_v6 = vadd.f32 %v1030_v23, %v1029_v4  ;;  %v1045_v27 = vadd.f32 %v1044_v19, %v1043_v54  ;;  %v1070_v51 = vadd.f32 %v1069_v33, %v1068_v2 }
  0xc7   :  { %v1039_v44 = vrot.slane %v1038_v16, 1  ;;  %v1062_v20 = vrot.slane %v1061_v8, 4  ;;  %v1054_v60 = vadd.f32 %v1053_v50, %v1052_v5  ;;  %v1078_v3 = vsel %vm536_vm0, %v11900_v0, 0.0 }
  0xc8   :  { %v1086_v32 = vsel %vm536_vm0, %v11903_v29, 0.0  ;;  %v1046_v34 = vrot.slane %v1045_v27, 2  ;;  %v1079_v21 = vadd.f32 %v1078_v3, %v1077_v62  ;;  %v1071_v1 = vrot.slane %v1070_v51, 4 }
  0xc9   :  { %v13448_v22 = vadd.f32 %v1039_v44, %v1038_v16  ;;  %v1063_v28 = vadd.f32 %v1062_v20, %v1061_v8  ;;  %v1055_v56 = vrot.slane %v1054_v60, 2  ;;  %v1087_v37 = vsel %vm536_vm0, %v11904_v15, 0.0 }
  0xca   :  { %v1095_v58 = vsel %vm536_vm0, %v11907_v30, 0.0  ;;  %v1047_v0 = vadd.f32 %v1046_v34, %v1045_v27  ;;  %v1080_v42 = vrot.slane %v1079_v21, 4  ;;  %v1088_v48 = vadd.f32 %v1087_v37, %v1086_v32 }
  0xcb   :  { %v1064_v45 = vrot.slane %v1063_v28, 2  ;;  %v1056_v29 = vadd.f32 %v1055_v56, %v1054_v60  ;;  %v1072_v35 = vadd.f32 %v1071_v1, %v1070_v51  ;;  %v1096_v52 = vsel %vm536_vm0, %v11908_v49, 0.0 }
  0xcc   :  { %v1104_v41 = vsel %vm536_vm0, %v11911_v18, 0.0  ;;  %v1048_v39 = vrot.slane %v1047_v0, 1  ;;  %v1081_v7 = vadd.f32 %v1080_v42, %v1079_v21  ;;  %v1089_v24 = vrot.slane %v1088_v48, 4 }
  0xcd   :  { %v1065_v15 = vadd.f32 %v1064_v45, %v1063_v28  ;;  %v1057_v59 = vrot.slane %v1056_v29, 1  ;;  %v1073_v30 = vrot.slane %v1072_v35, 2  ;;  %v1097_v26 = vadd.f32 %v1096_v52, %v1095_v58 }
  0xce   :  { %v1105_v38 = vsel %vm536_vm0, %v11912_v55, 0.0  ;;  %v1049_v46 = vadd.f32 %v1048_v39, %v1047_v0  ;;  %v1082_v14 = vrot.slane %v1081_v7, 2  ;;  %v1090_v40 = vadd.f32 %v1089_v24, %v1088_v48  ;;  %v2366_v24 = vld [vmem:[%s18085_s2 + $0x28] sm:$0xff] }
  0xcf   :  { %v1066_v47 = vrot.slane %v1065_v15, 1  ;;  %v1058_v49 = vadd.f32 %v1057_v59, %v1056_v29  ;;  %v1074_v61 = vadd.f32 %v1073_v30, %v1072_v35  ;;  %v1098_v57 = vrot.slane %v1097_v26, 4  ;;  %v2361_v29 = vld [vmem:[%s18085_s2] sm:$0xff] }
  0xd0   :  { %v1106_v36 = vadd.f32 %v1105_v38, %v1104_v41  ;;  %v1083_v4 = vadd.f32 %v1082_v14, %v1081_v7  ;;  %v1091_v13 = vrot.slane %v1090_v40, 2  ;;  %v1737_v54 = vpack.c.bf16 %v13401_v10, %v13401_v10  ;;  %v2362_v7 = vld [vmem:[%s18085_s2 + $0x8] sm:$0xff] }
  0xd1   :  { %v1067_v18 = vadd.f32 %v1066_v47, %v1065_v15  ;;  %v1075_v31 = vrot.slane %v1074_v61, 1  ;;  %v1099_v5 = vadd.f32 %v1098_v57, %v1097_v26  ;;  %v1738_v53 = vpack.c.bf16 %v13403_v11, %v13403_v11  ;;  %v2365_v15 = vld [vmem:[%s18085_s2 + $0x20] sm:$0xff]  ;;  %v13510_v57 = vld [vmem:[%s18085_s2 + $0x48] sm:$0xff] }
  0xd2   :  { %v1107_v63 = vrot.slane %v1106_v36, 4  ;;  %v1084_v55 = vrot.slane %v1083_v4, 1  ;;  %v1092_v43 = vadd.f32 %v1091_v13, %v1090_v40  ;;  %v1739_v23 = vpack.c.bf16 %v13405_v12, %v13405_v12 }
  0xd3   :  { %v1740_v16 = vpack.c.bf16 %v13407_v17, %v13407_v17  ;;  %v1076_v19 = vadd.f32 %v1075_v31, %v1074_v61  ;;  %v1100_v8 = vrot.slane %v1099_v5, 2  ;;  %v1741_v10 = vpack.c.bf16 %v13412_v25, %v13412_v25  ;;  %v13505_v61 = vld [vmem:[%s18085_s2 + $0x60] sm:$0xff] }
  0xd4   :  { %v1108_v50 = vadd.f32 %v1107_v63, %v1106_v36  ;;  %v1085_v2 = vadd.f32 %v1084_v55, %v1083_v4  ;;  %v1093_v33 = vrot.slane %v1092_v43, 1  ;;  %v1742_v62 = vpack.c.bf16 %v13423_v9, %v13423_v9  ;;  %v13515_v36 = vld [vmem:[%s18085_s2 + $0x68] sm:$0xff]  ;;  %v13522_v31 = vld [vmem:[%s18085_s2 + $0x80] sm:$0xff] }
  0xd5   :  { %v1743_v11 = vpack.c.bf16 %v13440_v6, %v13440_v6  ;;  %v1101_v44 = vadd.f32 %v1100_v8, %v1099_v5  ;;  %v1744_v12 = vpack.c.bf16 %v13448_v22, %v13448_v22  ;;  %v1745_v17 = vpack.c.bf16 %v1049_v46, %v1049_v46  ;;  %v13498_v46 = vld [vmem:[%s18085_s2 + $0x40] sm:$0xff]  ;;  %v13532_v63 = vld [vmem:[%s18085_s2 + $0x88] sm:$0xff] }
  0xd6   :  { %v1109_v27 = vrot.slane %v1108_v50, 2  ;;  %v1094_v20 = vadd.f32 %v1093_v33, %v1092_v43  ;;  %v1746_v60 = vpack.c.bf16 %v1058_v49, %v1058_v49  ;;  %v1747_v51 = vpack.c.bf16 %v1067_v18, %v1067_v18  ;;  %v13527_v5 = vld [vmem:[%s18085_s2 + $0xa0] sm:$0xff] }
  0xd7   :  { %v1748_v3 = vpack.c.bf16 %v1076_v19, %v1076_v19  ;;  %v1102_v32 = vrot.slane %v1101_v44, 1  ;;  %v1749_v34 = vpack.c.bf16 %v1085_v2, %v1085_v2  ;;  %v1995_v28 = vunpack.c.l.b16 %v1737_v54  ;;  %v13544_v19 = vld [vmem:[%s18085_s2 + $0xc0] sm:$0xff] }
  0xd8   :  { %v1110_v25 = vadd.f32 %v1109_v27, %v1108_v50  ;;  %v1750_v21 = vpack.c.bf16 %v1094_v20, %v1094_v20  ;;  %v1996_v56 = vunpack.c.l.b16 %v1738_v53  ;;  %v1997_v9 = vunpack.c.l.b16 %v1739_v23  ;;  %v13537_v53 = vld [vmem:[%s18085_s2 + $0xa8] sm:$0xff]  ;;  %v13549_v8 = vld [vmem:[%s18085_s2 + $0xe0] sm:$0xff] }
  0xd9   :  { %v1998_v1 = vunpack.c.l.b16 %v1740_v16  ;;  %v1103_v37 = vadd.f32 %v1102_v32, %v1101_v44  ;;  %v1999_v58 = vunpack.c.l.b16 %v1741_v10  ;;  %v2000_v0 = vunpack.c.l.b16 %v1742_v62  ;;  %v13554_v50 = vld [vmem:[%s18085_s2 + $0xc8] sm:$0xff]  ;;  %v13559_v10 = vld [vmem:[%s18084_s0 + $0x200] sm:$0xff]  }
  0xda   :  { %v1111_v6 = vrot.slane %v1110_v25, 1  ;;  %v2001_v45 = vunpack.c.l.b16 %v1743_v11  ;;  %v2002_v42 = vunpack.c.l.b16 %v1744_v12  ;;  %v2003_v22 = vunpack.c.l.b16 %v1745_v17  ;;  %v13568_v44 = vld [vmem:[%s18085_s2 + $0xe8] sm:$0xff]  ;;  %v13573_v27 = vld [vmem:[%s18085_s2 + $0x100] sm:$0xff] }
  0xdb   :  { %v2004_v48 = vunpack.c.l.b16 %v1746_v60  ;;  %v1751_v52 = vpack.c.bf16 %v1103_v37, %v1103_v37  ;;  %v2005_v41 = vunpack.c.l.b16 %v1747_v51  ;;  %v2006_v39 = vunpack.c.l.b16 %v1748_v3  ;;  %v13578_v12 = vld [vmem:[%s18085_s2 + $0x120] sm:$0xff]  ;;  %v13589_v3 = vld [vmem:[%s18085_s2 + $0x108] sm:$0xff] }
  0xdc   :  { %v1112_v35 = vadd.f32 %v1111_v6, %v1110_v25  ;;  %v2007_v59 = vunpack.c.l.b16 %v1749_v34  ;;  %v2008_v30 = vunpack.c.l.b16 %v1750_v21  ;;  %v2124_v26 = vsel %vm2075_vm1, %v1996_v56, %v1995_v28  ;;  %v13594_v32 = vld [vmem:[%s18085_s2 + $0x128] sm:$0xff]  ;;  %v13599_v25 = vld [vmem:[%s18085_s2 + $0x140] sm:$0xff] }
  0xdd   :  { %v2131_v38 = vsel %vm2075_vm1, %v2004_v48, %v2003_v22  ;;  %v2009_v14 = vunpack.c.l.b16 %v1751_v52  ;;  %v2125_v40 = vsel %vm2077_vm2, %v1997_v9, %v2124_v26  ;;  %v10569_v13 = vcombine.high %v2361_v29, %v2365_v15  ;;  %v13608_v56 = vld [vmem:[%s18085_s2 + $0x160] sm:$0xff]  ;;  %v13613_v9 = vld [vmem:[%s18085_s2 + $0x148] sm:$0xff] }
  0xde   :  { %v1752_v47 = vpack.c.bf16 %v1112_v35, %v1112_v35  ;;  %v2132_v49 = vsel %vm2077_vm2, %v2005_v41, %v2131_v38  ;;  %v2126_v18 = vsel %vm2079_vm3, %v1998_v1, %v2125_v40  ;;  %v10570_v54 = vcombine.low %v2362_v7, %v2366_v24  ;;  %v13618_v1 = vld [vmem:[%s18085_s2 + $0x168] sm:$0xff]  ;;  %v13696_v40 = vld [vmem:[%s18085_s2 + $0x220] sm:$0xff] }
  0xdf   :  { %v2133_v4 = vsel %vm2079_vm3, %v2006_v39, %v2132_v49  ;;  %v2127_v43 = vsel %vm2081_vm4, %v1999_v58, %v2126_v18  ;;  %v10571_v16 = vcombine.high %v2362_v7, %v2366_v24  ;;  %8547 = vmatprep.subr.bf16.mxu1 %v10569_v13  ;;  %v10568_v62 = vcombine.low %v2361_v29, %v2365_v15  ;;  %v13638_v22 = vld [vmem:[%s18085_s2 + $0x188] sm:$0xff]  ;;  %v13662_v7 = vld [vmem:[%s18085_s2 + $0x1c0] sm:$0xff] }
  0xe0   :  { %v2010_v55 = vunpack.c.l.b16 %v1752_v47  ;;  %v2134_v23 = vsel %vm2081_vm4, %v2007_v59, %v2133_v4  ;;  %v2128_v2 = vsel %vm2083_vm5, %v2000_v0, %v2127_v43  ;;  %v10577_v11 = vcombine.high %v13498_v46, %v13505_v61  ;;  %v13643_v48 = vld [vmem:[%s18085_s2 + $0x1a8] sm:$0xff]  ;;  %v13667_v24 = vld [vmem:[%s18085_s2 + $0x1e0] sm:$0xff]  ;;  %v13740_v43 = vld [vmem:[%s18084_s0 + $0x210] sm:$0xff]  }
  0xe1   :  { %v2135_v33 = vsel %vm2083_vm5, %v2008_v30, %v2134_v23  ;;  %v2129_v17 = vsel %vm2085_vm6, %v2001_v45, %v2128_v2  ;;  %8875 = vmatprep.subr.bf16.mxu0 %v10571_v16  ;;  %v10578_v60 = vcombine.low %v13510_v57, %v13515_v36  ;;  %v10579_v51 = vcombine.high %v13510_v57, %v13515_v36  ;;  %v13628_v45 = vld [vmem:[%s18085_s2 + $0x180] sm:$0xff]  ;;  %v13649_v35 = vld [vmem:[%s18084_s0 + $0x208] sm:$0xff]   ;;  %v13820_v16 = vld [vmem:[%s18084_s0 + $0x218] sm:$0xff]  }
  0xe2   :  { %v2136_v20 = vsel %vm2085_vm6, %v2009_v14, %v2135_v33  ;;  %v2130_v34 = vsel %vm2087_vm7, %v2002_v42, %v2129_v17  ;;  %8548 = vmatpush1.bf16.msra.mxu1 %v10568_v62  ;;  %8876 = vmatpush1.bf16.msra.mxu0 %v10570_v54  ;;  %v10576_v21 = vcombine.low %v13498_v46, %v13505_v61  ;;  %v11915_v37 = vunpack.c.l.bf16 %v13559_v10  ;;  %v13633_v42 = vld [vmem:[%s18085_s2 + $0x1a0] sm:$0xff]  ;;  %v13672_v59 = vld [vmem:[%s18085_s2 + $0x1c8] sm:$0xff]  ;;  %v13851_v2 = vld [vmem:[%s18084_s0 + $0x230] sm:$0xff]  }
  0xe3   :  { %v2137_v28 = vsel %vm2087_vm7, %v2010_v55, %v2136_v20  ;;  %8549 = vmatprep.subr.bf16.mxu1 %v10577_v11  ;;  %8877 = vmatprep.subr.bf16.mxu0 %v10579_v51  ;;  %v10585_v58 = vcombine.high %v13522_v31, %v13527_v5  ;;  %v10586_v0 = vcombine.low %v13532_v63, %v13537_v53  ;;  %v11916_v29 = vunpack.c.h.bf16 %v13559_v10  ;;  %v13686_v47 = vld [vmem:[%s18085_s2 + $0x1e8] sm:$0xff]  ;;  %v13691_v14 = vld [vmem:[%s18085_s2 + $0x200] sm:$0xff]  ;;  %v13856_v23 = vld [vmem:[%s18084_s0 + $0x238] sm:$0xff]  }
  0xe4   :  { %v2197_v6 = vpack.c.b16 %v2137_v28, %v2130_v34  ;;  %v10587_v52 = vcombine.high %v13532_v63, %v13537_v53  ;;  %v10584_v41 = vcombine.low %v13522_v31, %v13527_v5  ;;  %v10593_v39 = vcombine.high %v13544_v19, %v13549_v8  ;;  %v13707_v36 = vld [vmem:[%s18085_s2 + $0x208] sm:$0xff]  ;;  %v13717_v4 = vld [vmem:[%s18085_s2 + $0x240] sm:$0xff]  ;;  %v13926_v5 = vld [vmem:[%s18084_s0 + $0x278] sm:$0xff]  }
  0xe5   :  { %v10594_v15 = vcombine.low %v13554_v50, %v13568_v44  ;;  %v10595_v30 = vcombine.high %v13554_v50, %v13568_v44  ;;  %v10592_v26 = vcombine.low %v13544_v19, %v13549_v8  ;;  %v10601_v38 = vcombine.high %v13573_v27, %v13578_v12  ;;  %v13712_v18 = vld [vmem:[%s18085_s2 + $0x228] sm:$0xff]  ;;  %v13729_v63 = vld [vmem:[%s18085_s2 + $0x260] sm:$0xff] }
  0xe6   :  { %12400 = vmatmul.mubr.msk.bf16.gmra.mrb[4].mxu0 %vm536_vm0, %v2197_v6  ;;  %v10602_v46 = vcombine.low %v13589_v3, %v13594_v32  ;;  %8550 = vmatpush1.bf16.msra.mxu1 %v10576_v21  ;;  %v10603_v49 = vcombine.high %v13589_v3, %v13594_v32  ;;  %v10600_v61 = vcombine.low %v13573_v27, %v13578_v12  ;;  %v11919_v13 = vunpack.c.l.bf16 %v13649_v35  ;;  %v13734_v53 = vld [vmem:[%s18085_s2 + $0x248] sm:$0xff]  ;;  %v13758_v11 = vld [vmem:[%s18085_s2 + $0x280] sm:$0xff] }
  0xe7   :  { %8878 = vmatpush1.bf16.msra.mxu0 %v10578_v60  ;;  %v10609_v57 = vcombine.high %v13599_v25, %v13608_v56  ;;  %8551 = vmatprep.subr.bf16.mxu1 %v10585_v58  ;;  %v10611_v31 = vcombine.high %v13613_v9, %v13618_v1  ;;  %v11920_v55 = vunpack.c.h.bf16 %v13649_v35  ;;  %v13753_v62 = vld [vmem:[%s18085_s2 + $0x268] sm:$0xff]  ;;  %v13763_v17 = vld [vmem:[%s18085_s2 + $0x2a0] sm:$0xff]  ;;  %v1114_v12 = vsel %vm536_vm0, %v11916_v29, 0.0 }
  0xe8   :  { %8879 = vmatprep.subr.bf16.mxu0 %v10587_v52  ;;  %v13776_v28 = vld [vmem:[%s18085_s2 + $0x288] sm:$0xff]  ;;  %v13786_v6 = vld [vmem:[%s18085_s2 + $0x2c0] sm:$0xff]  ;;  %v13921_v52 = vld [vmem:[%s18084_s0 + $0x270] sm:$0xff]   ;;  %v1122_v32 = vsel %vm536_vm0, %v11919_v13, 0.0  ;;  %v18092_v29 = vunpack.c.l.bf16 %v13740_v43  ;;  %v18093_v13 = vunpack.c.h.bf16 %v13740_v43 }
  0xe9   :  { %v13781_v21 = vld [vmem:[%s18085_s2 + $0x2a8] sm:$0xff]  ;;  %v13797_v34 = vld [vmem:[%s18085_s2 + $0x2e0] sm:$0xff] }
  0xea   :  { %8552 = vmatpush1.bf16.msra.mxu1 %v10584_v41  ;;  %v13802_v51 = vld [vmem:[%s18085_s2 + $0x2c8] sm:$0xff]  ;;  %v13833_v58 = vld [vmem:[%s18084_s0 + $0x220] sm:$0xff]   ;;  %v18090_v41 = vcombine.low %v13599_v25, %v13608_v56  ;;  %v1132_v35 = vsel %vm536_vm0, %v18093_v13, 0.0  ;;  %v18095_v25 = vcombine.high %v13638_v22, %v13643_v48 }
  0xeb   :  { %8880 = vmatpush1.bf16.msra.mxu0 %v10586_v0  ;;  %v13807_v0 = vld [vmem:[%s18085_s2 + $0x2e8] sm:$0xff]  ;;  %8553 = vmatprep.subr.bf16.mxu1 %v10593_v39  ;;  %v11928_v39 = vunpack.c.h.bf16 %v13820_v16  ;;  %v13873_v20 = vld [vmem:[%s18084_s0 + $0x240] sm:$0xff]   ;;  %v11931_v8 = vunpack.c.l.bf16 %v13833_v58  ;;  %v11932_v50 = vunpack.c.h.bf16 %v13833_v58 }
  0xec   :  { %8881 = vmatprep.subr.bf16.mxu0 %v10595_v30  ;;  %v13838_v33 = vld [vmem:[%s18084_s0 + $0x228] sm:$0xff]   ;;  %v11927_v30 = vunpack.c.l.bf16 %v13820_v16  ;;  %v11940_v16 = vunpack.c.h.bf16 %v13851_v2 }
  0xed   :  { %v13878_v19 = vld [vmem:[%s18084_s0 + $0x248] sm:$0xff]   ;;  %v11935_v44 = vunpack.c.l.bf16 %v13838_v33 }
  0xee   :  { %8554 = vmatpush1.bf16.msra.mxu1 %v10592_v26  ;;  %v13893_v26 = vld [vmem:[%s18084_s0 + $0x250] sm:$0xff]   ;;  %v13912_v60 = vld [vmem:[%s18084_s0 + $0x268] sm:$0xff]  }
  0xef   :  { %8882 = vmatpush1.bf16.msra.mxu0 %v10594_v15  ;;  %8555 = vmatprep.subr.bf16.mxu1 %v10601_v38  ;;  %v11936_v15 = vunpack.c.h.bf16 %v13838_v33  ;;  %v13898_v38 = vld [vmem:[%s18084_s0 + $0x258] sm:$0xff]   ;;  %v13907_v33 = vld [vmem:[%s18084_s0 + $0x260] sm:$0xff]   ;;  %v11955_v58 = vunpack.c.l.bf16 %v13893_v26  ;;  %v11967_v3 = vunpack.c.l.bf16 %v13912_v60 }
  0xf0   :  { %8883 = vmatprep.subr.bf16.mxu0 %v10603_v49  ;;  %v11939_v49 = vunpack.c.l.bf16 %v13851_v2  ;;  %v11956_v2 = vunpack.c.h.bf16 %v13893_v26  ;;  %v11959_v54 = vunpack.c.l.bf16 %v13898_v38  ;;  %v11963_v27 = vunpack.c.l.bf16 %v13907_v33 }
  0xf1   :  { %v1159_v13 = vsel %vm536_vm0, %v11936_v15, 0.0  ;;  %v18119_v26 = vcombine.low %v13758_v11, %v13763_v17 }
  0xf2   :  { %8556 = vmatpush1.bf16.msra.mxu1 %v10600_v61  ;;  %v1123_v61 = vsel %vm536_vm0, %v11920_v55, 0.0  ;;  %v18094_v55 = vcombine.high %v13628_v45, %v13633_v42 }
  0xf3   :  { %8884 = vmatpush1.bf16.msra.mxu0 %v10602_v46  ;;  %8557 = vmatprep.subr.bf16.mxu1 %v10609_v57  ;;  %v18091_v57 = vcombine.low %v13613_v9, %v13618_v1  ;;  %v1124_v10 = vadd.f32 %v1123_v61, %v1122_v32  ;;  %v1131_v46 = vsel %vm536_vm0, %v18092_v29, 0.0  ;;  %v1140_v9 = vsel %vm536_vm0, %v11927_v30, 0.0 }
  0xf4   :  { %8885 = vmatprep.subr.bf16.mxu0 %v10611_v31  ;;  %v1113_v31 = vsel %vm536_vm0, %v11915_v37, 0.0  ;;  %v1133_v56 = vadd.f32 %v1132_v35, %v1131_v46  ;;  %v1141_v1 = vsel %vm536_vm0, %v11928_v39, 0.0  ;;  %v1150_v61 = vsel %vm536_vm0, %v11932_v50, 0.0 }
  0xf5   :  { %v1115_v37 = vadd.f32 %v1114_v12, %v1113_v31  ;;  %v1125_v32 = vrot.slane %v1124_v10, 4  ;;  %v1142_v43 = vadd.f32 %v1141_v1, %v1140_v9  ;;  %v1158_v29 = vsel %vm536_vm0, %v11935_v44, 0.0 }
  0xf6   :  { %8558 = vmatpush1.bf16.msra.mxu1 %v18090_v41  ;;  %v1149_v41 = vsel %vm536_vm0, %v11931_v8, 0.0  ;;  %v18096_v46 = vcombine.low %v13628_v45, %v13633_v42  ;;  %v18097_v39 = vcombine.low %v13638_v22, %v13643_v48  ;;  %v18098_v50 = vcombine.high %v13662_v7, %v13667_v24 }
  0xf7   :  { %8886 = vmatpush1.bf16.msra.mxu0 %v18091_v57  ;;  %8559 = vmatprep.subr.bf16.mxu1 %v18094_v55  ;;  %v1116_v12 = vrot.slane %v1115_v37, 4  ;;  %v1134_v57 = vrot.slane %v1133_v56, 4  ;;  %v1151_v31 = vadd.f32 %v1150_v61, %v1149_v41  ;;  %v1126_v8 = vadd.f32 %v1125_v32, %v1124_v10 }
  0xf8   :  { %8887 = vmatprep.subr.bf16.mxu0 %v18095_v25  ;;  %v1143_v35 = vrot.slane %v1142_v43, 4  ;;  %v1160_v55 = vadd.f32 %v1159_v13, %v1158_v29  ;;  %v18099_v44 = vcombine.high %v13672_v59, %v13686_v47  ;;  %v1167_v45 = vsel %vm536_vm0, %v11939_v49, 0.0 }
  0xf9   :  { %v1117_v30 = vadd.f32 %v1116_v12, %v1115_v37  ;;  %v1135_v15 = vadd.f32 %v1134_v57, %v1133_v56  ;;  %v1152_v25 = vrot.slane %v1151_v31, 4  ;;  %v1168_v42 = vsel %vm536_vm0, %v11940_v16, 0.0 }
  0xfa   :  { %8560 = vmatpush1.bf16.msra.mxu1 %v18096_v46  ;;  %v1127_v48 = vrot.slane %v1126_v8, 2  ;;  %v1144_v37 = vadd.f32 %v1143_v35, %v1142_v43  ;;  %v1161_v10 = vrot.slane %v1160_v55, 4  ;;  %v1169_v41 = vadd.f32 %v1168_v42, %v1167_v45 }
  0xfb   :  { %8888 = vmatpush1.bf16.msra.mxu0 %v18097_v39  ;;  %8561 = vmatprep.subr.bf16.mxu1 %v18098_v50  ;;  %v1118_v22 = vrot.slane %v1117_v30, 2  ;;  %v1136_v9 = vrot.slane %v1135_v15, 2  ;;  %v1153_v1 = vadd.f32 %v1152_v25, %v1151_v31  ;;  %v18100_v12 = vunpack.c.l.bf16 %v13856_v23 }
  0xfc   :  { %8889 = vmatprep.subr.bf16.mxu0 %v18099_v44  ;;  %v18101_v61 = vcombine.low %v13662_v7, %v13667_v24  ;;  %v18102_v49 = vcombine.low %v13672_v59, %v13686_v47  ;;  %v1128_v56 = vadd.f32 %v1127_v48, %v1126_v8  ;;  %v1145_v57 = vrot.slane %v1144_v37, 2 }
  0xfd   :  { %v1176_v32 = vsel %vm536_vm0, %v18100_v12, 0.0  ;;  %v1119_v16 = vadd.f32 %v1118_v22, %v1117_v30  ;;  %v1162_v43 = vadd.f32 %v1161_v10, %v1160_v55  ;;  %v18103_v31 = vcombine.high %v13691_v14, %v13696_v40 }
  0xfe   :  { %8562 = vmatpush1.bf16.msra.mxu1 %v18101_v61  ;;  %v18104_v29 = vcombine.high %v13707_v36, %v13712_v18  ;;  %v1137_v13 = vadd.f32 %v1136_v9, %v1135_v15  ;;  %v1154_v46 = vrot.slane %v1153_v1, 2  ;;  %v1170_v7 = vrot.slane %v1169_v41, 4 }
  0xff   :  { %8890 = vmatpush1.bf16.msra.mxu0 %v18102_v49  ;;  %8563 = vmatprep.subr.bf16.mxu1 %v18103_v31  ;;  %v18105_v24 = vunpack.c.h.bf16 %v13856_v23  ;;  %v1120_v47 = vrot.slane %v1119_v16, 1  ;;  %v1129_v39 = vrot.slane %v1128_v56, 1  ;;  %v1146_v30 = vadd.f32 %v1145_v57, %v1144_v37 }
 0x100   :  { %8891 = vmatprep.subr.bf16.mxu0 %v18104_v29  ;;  %v1163_v8 = vrot.slane %v1162_v43, 2  ;;  %v1138_v35 = vrot.slane %v1137_v13, 1  ;;  %v1155_v55 = vadd.f32 %v1154_v46, %v1153_v1  ;;  %v1171_v50 = vadd.f32 %v1170_v7, %v1169_v41 }
 0x101   :  { %v1177_v59 = vsel %vm536_vm0, %v18105_v24, 0.0  ;;  %v18106_v25 = vcombine.low %v13691_v14, %v13696_v40  ;;  %v18107_v15 = vcombine.low %v13707_v36, %v13712_v18  ;;  %v14026_v45 = vadd.f32 %v1120_v47, %v1119_v16 }
 0x102   :  { %v1178_v44 = vadd.f32 %v1177_v59, %v1176_v32  ;;  %v14028_v23 = vadd.f32 %v1129_v39, %v1128_v56  ;;  %v1147_v42 = vrot.slane %v1146_v30, 1  ;;  %v1164_v22 = vadd.f32 %v1163_v8, %v1162_v43 }
 0x103   :  { %8564 = vmatpush1.bf16.msra.mxu1 %v18106_v25  ;;  %8892 = vmatpush1.bf16.msra.mxu0 %v18107_v15  ;;  %v18108_v48 = vcombine.high %v13717_v4, %v13729_v63  ;;  %v18109_v37 = vcombine.high %v13734_v53, %v13753_v62  ;;  %v14036_v14 = vadd.f32 %v1138_v35, %v1137_v13  ;;  %v1156_v40 = vrot.slane %v1155_v55, 1 }
 0x104   :  { %v1172_v10 = vrot.slane %v1171_v50, 2  ;;  %v1179_v36 = vrot.slane %v1178_v44, 4  ;;  %v14038_v18 = vadd.f32 %v1147_v42, %v1146_v30  ;;  %v1165_v9 = vrot.slane %v1164_v22, 1 }
 0x105   :  { %8565 = vmatprep.subr.bf16.mxu1 %v18108_v48  ;;  %8893 = vmatprep.subr.bf16.mxu0 %v18109_v37  ;;  %v18110_v1 = vunpack.c.l.bf16 %v13873_v20  ;;  %v18111_v12 = vunpack.c.h.bf16 %v13873_v20  ;;  %v14046_v61 = vadd.f32 %v1156_v40, %v1155_v55  ;;  %v18112_v57 = vcombine.low %v13717_v4, %v13729_v63 }
 0x106   :  { %v1173_v49 = vadd.f32 %v1172_v10, %v1171_v50  ;;  %v1180_v16 = vadd.f32 %v1179_v36, %v1178_v44  ;;  %v18113_v43 = vcombine.low %v13734_v53, %v13753_v62  ;;  %v14054_v31 = vadd.f32 %v1165_v9, %v1164_v22 }
 0x107   :  { %v1185_v41 = vsel %vm536_vm0, %v18110_v1, 0.0  ;;  %v1186_v32 = vsel %vm536_vm0, %v18111_v12, 0.0  ;;  %8566 = vmatpush1.bf16.msra.mxu1 %v18112_v57  ;;  %v18114_v29 = vunpack.c.l.bf16 %v13878_v19  ;;  %v18115_v13 = vunpack.c.h.bf16 %v13878_v19 }
 0x108   :  { %v1187_v56 = vadd.f32 %v1186_v32, %v1185_v41  ;;  %8894 = vmatpush1.bf16.msra.mxu0 %v18113_v43  ;;  %v1203_v7 = vsel %vm536_vm0, %v11955_v58, 0.0  ;;  %v18116_v4 = vcombine.high %v13758_v11, %v13763_v17  ;;  %v18117_v63 = vcombine.high %v13776_v28, %v13781_v21 }
 0x109   :  { %v1194_v20 = vsel %vm536_vm0, %v18114_v29, 0.0  ;;  %v1195_v46 = vsel %vm536_vm0, %v18115_v13, 0.0  ;;  %v1174_v53 = vrot.slane %v1173_v49, 1  ;;  %v1181_v62 = vrot.slane %v1180_v16, 2 }
 0x10a   :  { %8567 = vmatprep.subr.bf16.mxu1 %v18116_v4  ;;  %8895 = vmatprep.subr.bf16.mxu0 %v18117_v63  ;;  %v1188_v24 = vrot.slane %v1187_v56, 4  ;;  %v1196_v59 = vadd.f32 %v1195_v46, %v1194_v20  ;;  %v1204_v19 = vsel %vm536_vm0, %v11956_v2, 0.0  ;;  %v1212_v58 = vsel %vm536_vm0, %v11959_v54, 0.0 }
 0x10b   :  { %v18118_v47 = vunpack.c.h.bf16 %v13898_v38  ;;  %v1221_v30 = vsel %vm536_vm0, %v11963_v27, 0.0  ;;  %v14083_v8 = vadd.f32 %v1174_v53, %v1173_v49  ;;  %v1182_v35 = vadd.f32 %v1181_v62, %v1180_v16  ;;  %8568 = vmatpush1.bf16.msra.mxu1 %v18119_v26 }
 0x10c   :  { %v1189_v55 = vadd.f32 %v1188_v24, %v1187_v56  ;;  %v1197_v50 = vrot.slane %v1196_v59, 4  ;;  %v18120_v54 = vcombine.low %v13776_v28, %v13781_v21  ;;  %v1205_v38 = vadd.f32 %v1204_v19, %v1203_v7 }
 0x10d   :  { %v1213_v39 = vsel %vm536_vm0, %v18118_v47, 0.0  ;;  %v18121_v44 = vunpack.c.h.bf16 %v13907_v33  ;;  %v1230_v27 = vsel %vm536_vm0, %v11967_v3, 0.0  ;;  %v18122_v15 = vcombine.high %v13786_v6, %v13797_v34 }
 0x10e   :  { %8896 = vmatpush1.bf16.msra.mxu0 %v18120_v54  ;;  %v1214_v2 = vadd.f32 %v1213_v39, %v1212_v58  ;;  %v18123_v11 = vcombine.high %v13802_v51, %v13807_v0  ;;  %v1183_v17 = vrot.slane %v1182_v35, 1  ;;  %v1190_v28 = vrot.slane %v1189_v55, 2 }
 0x10f   :  { %v1222_v25 = vsel %vm536_vm0, %v18121_v44, 0.0  ;;  %8569 = vmatprep.subr.bf16.mxu1 %v18122_v15  ;;  %v1198_v21 = vadd.f32 %v1197_v50, %v1196_v59  ;;  %v1206_v22 = vrot.slane %v1205_v38, 4  ;;  %v18124_v48 = vunpack.c.h.bf16 %v13912_v60 }
 0x110   :  { %8897 = vmatprep.subr.bf16.mxu0 %v18123_v11  ;;  %v1223_v42 = vadd.f32 %v1222_v25, %v1221_v30  ;;  %v1215_v33 = vrot.slane %v1214_v2, 4  ;;  %v18125_v3 = vunpack.c.l.bf16 %v13921_v52  ;;  %v14109_v10 = vadd.f32 %v1183_v17, %v1182_v35 }
 0x111   :  { %v1231_v37 = vsel %vm536_vm0, %v18124_v48, 0.0  ;;  %v1191_v36 = vadd.f32 %v1190_v28, %v1189_v55  ;;  %v1199_v9 = vrot.slane %v1198_v21, 2  ;;  %v18126_v41 = vcombine.low %v13786_v6, %v13797_v34 }
 0x112   :  { %v1239_v40 = vsel %vm536_vm0, %v18125_v3, 0.0  ;;  %v1224_v1 = vrot.slane %v1223_v42, 4  ;;  %v18127_v12 = vcombine.low %v13802_v51, %v13807_v0  ;;  %v1207_v60 = vadd.f32 %v1206_v22, %v1205_v38 }
 0x113   :  { %8570 = vmatpush1.bf16.msra.mxu1 %v18126_v41  ;;  %v1216_v32 = vadd.f32 %v1215_v33, %v1214_v2  ;;  %v1232_v49 = vadd.f32 %v1231_v37, %v1230_v27  ;;  %v18128_v16 = vunpack.c.h.bf16 %v13921_v52  ;;  %v1192_v57 = vrot.slane %v1191_v36, 1 }
 0x114   :  { %8898 = vmatpush1.bf16.msra.mxu0 %v18127_v12  ;;  %v1200_v43 = vadd.f32 %v1199_v9, %v1198_v21  ;;  %v1225_v29 = vadd.f32 %v1224_v1, %v1223_v42  ;;  %v1208_v13 = vrot.slane %v1207_v60, 2  ;;  %v18129_v34 = vunpack.c.l.bf16 %v13926_v5 }
 0x115   :  { %v1240_v56 = vsel %vm536_vm0, %v18128_v16, 0.0  ;;  %v1217_v46 = vrot.slane %v1216_v32, 2  ;;  %v1233_v7 = vrot.slane %v1232_v49, 4  ;;  %v1193_v51 = vadd.f32 %v1192_v57, %v1191_v36 }
 0x116   :  { %v1241_v20 = vadd.f32 %v1240_v56, %v1239_v40  ;;  %v1248_v6 = vsel %vm536_vm0, %v18129_v34, 0.0  ;;  %v1201_v0 = vrot.slane %v1200_v43, 1  ;;  %v1226_v4 = vrot.slane %v1225_v29, 2  ;;  %v14150_v34 = vld [vmem:[%s18084_s0 + $0x288] sm:$0xff]  }
 0x117   :  { %v1209_v53 = vadd.f32 %v1208_v13, %v1207_v60  ;;  %v1218_v62 = vadd.f32 %v1217_v46, %v1216_v32  ;;  %v1234_v52 = vadd.f32 %v1233_v7, %v1232_v49  ;;  %v18130_v24 = vunpack.c.h.bf16 %v13926_v5 }
 0x118   :  { %v1242_v63 = vrot.slane %v1241_v20, 4  ;;  %v1202_v19 = vadd.f32 %v1201_v0, %v1200_v43  ;;  %v1227_v58 = vadd.f32 %v1226_v4, %v1225_v29  ;;  %v1753_v50 = vpack.c.bf16 %v14026_v45, %v14026_v45  ;;  %v14145_v29 = vld [vmem:[%s18084_s0 + $0x280] sm:$0xff]  }
 0x119   :  { %v1249_v59 = vsel %vm536_vm0, %v18130_v24, 0.0  ;;  %v1210_v30 = vrot.slane %v1209_v53, 1  ;;  %v1219_v35 = vrot.slane %v1218_v62, 1  ;;  %v1235_v55 = vrot.slane %v1234_v52, 2  ;;  %v14160_v24 = vld [vmem:[%s18084_s0 + $0x290] sm:$0xff]  }
 0x11a   :  { %v1243_v47 = vadd.f32 %v1242_v63, %v1241_v20  ;;  %v1250_v39 = vadd.f32 %v1249_v59, %v1248_v6  ;;  %v1228_v26 = vrot.slane %v1227_v58, 1  ;;  %v1754_v2 = vpack.c.bf16 %v14028_v23, %v14028_v23 }
 0x11b   :  { %v1211_v44 = vadd.f32 %v1210_v30, %v1209_v53  ;;  %v1220_v5 = vadd.f32 %v1219_v35, %v1218_v62  ;;  %v1236_v25 = vadd.f32 %v1235_v55, %v1234_v52  ;;  %v1755_v27 = vpack.c.bf16 %v14036_v14, %v14036_v14 }
 0x11c   :  { %v1244_v54 = vrot.slane %v1243_v47, 2  ;;  %v1251_v38 = vrot.slane %v1250_v39, 4  ;;  %v1229_v15 = vadd.f32 %v1228_v26, %v1227_v58  ;;  %v1756_v28 = vpack.c.bf16 %v14038_v18, %v14038_v18  ;;  %v12252_v26 = vld [vmem:[%s18084_s0 + $0x2a0] sm:$0xff]  }
 0x11d   :  { %v1237_v21 = vrot.slane %v1236_v25, 1  ;;  %v1757_v45 = vpack.c.bf16 %v14046_v61, %v14046_v61  ;;  %v1758_v42 = vpack.c.bf16 %v14054_v31, %v14054_v31  ;;  %v1759_v23 = vpack.c.bf16 %v14083_v8, %v14083_v8 }
 0x11e   :  { %v1245_v11 = vadd.f32 %v1244_v54, %v1243_v47  ;;  %v1252_v17 = vadd.f32 %v1251_v38, %v1250_v39  ;;  %v1760_v14 = vpack.c.bf16 %v14109_v10, %v14109_v10  ;;  %v1761_v48 = vpack.c.bf16 %v1193_v51, %v1193_v51  ;;  %v14169_v39 = vld [vmem:[%s18084_s0 + $0x298] sm:$0xff]  }
 0x11f   :  { %v1238_v37 = vadd.f32 %v1237_v21, %v1236_v25  ;;  %v1762_v3 = vpack.c.bf16 %v1202_v19, %v1202_v19  ;;  %v1763_v40 = vpack.c.bf16 %v1211_v44, %v1211_v44  ;;  %v1764_v18 = vpack.c.bf16 %v1220_v5, %v1220_v5  ;;  %v14184_v5 = vld [vmem:[%s18084_s0 + $0x2a8] sm:$0xff]   ;;  %v14189_v25 = vld [vmem:[%s18084_s0 + $0x2b0] sm:$0xff]   ;;  %v14203_v21 = vld [vmem:[%s18084_s0 + $0x2c0] sm:$0xff]  }
 0x120   :  { %v1246_v22 = vrot.slane %v1245_v11, 1  ;;  %v1253_v33 = vrot.slane %v1252_v17, 2  ;;  %v1765_v1 = vpack.c.bf16 %v1229_v15, %v1229_v15  ;;  %v2011_v61 = vunpack.c.l.b16 %v1753_v50 }
 0x121   :  { %v1766_v41 = vpack.c.bf16 %v1238_v37, %v1238_v37  ;;  %v2012_v12 = vunpack.c.l.b16 %v1754_v2  ;;  %v2013_v31 = vunpack.c.l.b16 %v1755_v27  ;;  %v2014_v60 = vunpack.c.l.b16 %v1756_v28  ;;  %v14198_v28 = vld [vmem:[%s18084_s0 + $0x2b8] sm:$0xff]  }
 0x122   :  { %v1247_v36 = vadd.f32 %v1246_v22, %v1245_v11  ;;  %v1254_v9 = vadd.f32 %v1253_v33, %v1252_v17  ;;  %v2015_v49 = vunpack.c.l.b16 %v1757_v45  ;;  %v2016_v16 = vunpack.c.l.b16 %v1758_v42  ;;  %v14210_v33 = vld [vmem:[%s18084_s0 + $0x2c8] sm:$0xff]  }
 0x123   :  { %v2017_v56 = vunpack.c.l.b16 %v1759_v23  ;;  %v2018_v57 = vunpack.c.l.b16 %v1760_v14  ;;  %v2019_v10 = vunpack.c.l.b16 %v1761_v48  ;;  %v2020_v43 = vunpack.c.l.b16 %v1762_v3  ;;  %v14215_v14 = vld [vmem:[%s18084_s0 + $0x2d0] sm:$0xff]  }
 0x124   :  { %v1255_v32 = vrot.slane %v1254_v9, 1  ;;  %v1767_v8 = vpack.c.bf16 %v1247_v36, %v1247_v36  ;;  %v2021_v13 = vunpack.c.l.b16 %v1763_v40  ;;  %v2022_v46 = vunpack.c.l.b16 %v1764_v18  ;;  %v14223_v18 = vld [vmem:[%s18084_s0 + $0x2d8] sm:$0xff]   ;;  %v14228_v36 = vld [vmem:[%s18084_s0 + $0x2e0] sm:$0xff]  }
 0x125   :  { %v2023_v7 = vunpack.c.l.b16 %v1765_v1  ;;  %v2024_v6 = vunpack.c.l.b16 %v1766_v41  ;;  %v2138_v0 = vsel %vm2075_vm1, %v2012_v12, %v2011_v61  ;;  %v2145_v4 = vsel %vm2075_vm1, %v2020_v43, %v2019_v10  ;;  %v14237_v12 = vld [vmem:[%s18084_s0 + $0x2e8] sm:$0xff]  }
 0x126   :  { %v1256_v20 = vadd.f32 %v1255_v32, %v1254_v9  ;;  %v2025_v51 = vunpack.c.l.b16 %v1767_v8  ;;  %v2139_v53 = vsel %vm2077_vm2, %v2013_v31, %v2138_v0  ;;  %v2146_v62 = vsel %vm2077_vm2, %v2021_v13, %v2145_v4  ;;  %v14242_v31 = vld [vmem:[%s18084_s0 + $0x2f0] sm:$0xff]  }
 0x127   :  { %v11979_v52 = vunpack.c.l.bf16 %v14145_v29  ;;  %v2140_v59 = vsel %vm2079_vm3, %v2014_v60, %v2139_v53  ;;  %v2147_v19 = vsel %vm2079_vm3, %v2022_v46, %v2146_v62  ;;  %v11980_v58 = vunpack.c.h.bf16 %v14145_v29 }
 0x128   :  { %v1768_v63 = vpack.c.bf16 %v1256_v20, %v1256_v20  ;;  %v11983_v47 = vunpack.c.l.bf16 %v14150_v34  ;;  %v2141_v35 = vsel %vm2081_vm4, %v2015_v49, %v2140_v59  ;;  %v2148_v55 = vsel %vm2081_vm4, %v2023_v7, %v2147_v19 }
 0x129   :  { %v11984_v50 = vunpack.c.h.bf16 %v14150_v34  ;;  %v2142_v54 = vsel %vm2083_vm5, %v2016_v16, %v2141_v35  ;;  %v2149_v38 = vsel %vm2083_vm5, %v2024_v6, %v2148_v55  ;;  %v11987_v2 = vunpack.c.l.bf16 %v14160_v24  ;;  %v14252_v16 = vld [vmem:[%s18084_s0 + $0x2f8] sm:$0xff]  }
 0x12a   :  { %v2026_v30 = vunpack.c.l.b16 %v1768_v63  ;;  %v11988_v44 = vunpack.c.h.bf16 %v14160_v24  ;;  %v2143_v27 = vsel %vm2085_vm6, %v2017_v56, %v2142_v54  ;;  %v2150_v15 = vsel %vm2085_vm6, %v2025_v51, %v2149_v38 }
 0x12b   :  { %v11991_v11 = vunpack.c.l.bf16 %v14169_v39  ;;  %v11992_v17 = vunpack.c.h.bf16 %v14169_v39  ;;  %v2144_v45 = vsel %vm2087_vm7, %v2018_v57, %v2143_v27  ;;  %v11995_v23 = vunpack.c.l.bf16 %v12252_v26 }
 0x12c   :  { %v2151_v42 = vsel %vm2087_vm7, %v2026_v30, %v2150_v15  ;;  %v11996_v22 = vunpack.c.h.bf16 %v12252_v26  ;;  %v11999_v37 = vunpack.c.l.bf16 %v14184_v5  ;;  %v12000_v3 = vunpack.c.h.bf16 %v14184_v5 }
 0x12d   :  { %v2198_v48 = vpack.c.b16 %v2151_v42, %v2144_v45  ;;  %v12003_v40 = vunpack.c.l.bf16 %v14189_v25  ;;  %v12004_v9 = vunpack.c.h.bf16 %v14189_v25  ;;  %v12007_v1 = vunpack.c.l.bf16 %v14198_v28 }
 0x12e   :  { %v12008_v61 = vunpack.c.h.bf16 %v14198_v28  ;;  %v12011_v41 = vunpack.c.l.bf16 %v14203_v21  ;;  %v12012_v60 = vunpack.c.h.bf16 %v14203_v21  ;;  %v12015_v32 = vunpack.c.l.bf16 %v14210_v33 }
 0x12f   :  { %12403 = vmatprep.mubr.msk.bf16.mxu0 %vm536_vm0, %v2198_v48  ;;  %v12016_v8 = vunpack.c.h.bf16 %v14210_v33  ;;  %v12019_v49 = vunpack.c.l.bf16 %v14215_v14  ;;  %v12020_v56 = vunpack.c.h.bf16 %v14215_v14  ;;  %v12023_v57 = vunpack.c.l.bf16 %v14223_v18 }
 0x130   :  { %v12024_v10 = vunpack.c.h.bf16 %v14223_v18  ;;  %v12027_v43 = vunpack.c.l.bf16 %v14228_v36  ;;  %v12028_v29 = vunpack.c.h.bf16 %v14228_v36  ;;  %v12031_v20 = vunpack.c.l.bf16 %v14237_v12 }
 0x131   :  { %v12032_v13 = vunpack.c.h.bf16 %v14237_v12  ;;  %v12035_v46 = vunpack.c.l.bf16 %v14242_v31  ;;  %v12036_v7 = vunpack.c.h.bf16 %v14242_v31  ;;  %v12039_v34 = vunpack.c.l.bf16 %v14252_v16 }
 0x132   :  { %v12040_v6 = vunpack.c.h.bf16 %v14252_v16  ;;  %v1257_v51 = vsel %vm536_vm0, %v11979_v52, 0.0  ;;  %v1258_v0 = vsel %vm536_vm0, %v11980_v58, 0.0  ;;  %v1266_v4 = vsel %vm536_vm0, %v11983_v47, 0.0 }
 0x133   :  { %v1267_v63 = vsel %vm536_vm0, %v11984_v50, 0.0  ;;  %v1275_v53 = vsel %vm536_vm0, %v11987_v2, 0.0  ;;  %v1259_v62 = vadd.f32 %v1258_v0, %v1257_v51  ;;  %v1276_v59 = vsel %vm536_vm0, %v11988_v44, 0.0 }
 0x134   :  { %v1268_v24 = vadd.f32 %v1267_v63, %v1266_v4  ;;  %v1284_v19 = vsel %vm536_vm0, %v11991_v11, 0.0  ;;  %v1277_v39 = vadd.f32 %v1276_v59, %v1275_v53  ;;  %v1285_v30 = vsel %vm536_vm0, %v11992_v17, 0.0 }
 0x135   :  { %v1293_v35 = vsel %vm536_vm0, %v11995_v23, 0.0  ;;  %v1294_v52 = vsel %vm536_vm0, %v11996_v22, 0.0  ;;  %v1260_v58 = vrot.slane %v1259_v62, 4  ;;  %v1286_v47 = vadd.f32 %v1285_v30, %v1284_v19 }
 0x136   :  { %v1269_v55 = vrot.slane %v1268_v24, 4  ;;  %v1295_v26 = vadd.f32 %v1294_v52, %v1293_v35  ;;  %v1278_v50 = vrot.slane %v1277_v39, 4  ;;  %v1302_v54 = vsel %vm536_vm0, %v11999_v37, 0.0 }
 0x137   :  { %v1303_v38 = vsel %vm536_vm0, %v12000_v3, 0.0  ;;  %v1311_v2 = vsel %vm536_vm0, %v12003_v40, 0.0  ;;  %v1261_v44 = vadd.f32 %v1260_v58, %v1259_v62  ;;  %v1287_v25 = vrot.slane %v1286_v47, 4 }
 0x138   :  { %v1270_v5 = vadd.f32 %v1269_v55, %v1268_v24  ;;  %v1296_v27 = vrot.slane %v1295_v26, 4  ;;  %v1279_v15 = vadd.f32 %v1278_v50, %v1277_v39  ;;  %v1304_v11 = vadd.f32 %v1303_v38, %v1302_v54 }
 0x139   :  { %v1312_v17 = vsel %vm536_vm0, %v12004_v9, 0.0  ;;  %v1320_v28 = vsel %vm536_vm0, %v12007_v1, 0.0  ;;  %v1262_v45 = vrot.slane %v1261_v44, 2  ;;  %v1288_v23 = vadd.f32 %v1287_v25, %v1286_v47 }
 0x13a   :  { %v1271_v42 = vrot.slane %v1270_v5, 2  ;;  %v1297_v22 = vadd.f32 %v1296_v27, %v1295_v26  ;;  %v1280_v48 = vrot.slane %v1279_v15, 2  ;;  %v1305_v37 = vrot.slane %v1304_v11, 4 }
 0x13b   :  { %v1313_v51 = vadd.f32 %v1312_v17, %v1311_v2  ;;  %v1321_v3 = vsel %vm536_vm0, %v12008_v61, 0.0  ;;  %v1263_v40 = vadd.f32 %v1262_v45, %v1261_v44  ;;  %v1289_v4 = vrot.slane %v1288_v23, 2 }
 0x13c   :  { %v1272_v0 = vadd.f32 %v1271_v42, %v1270_v5  ;;  %v1298_v63 = vrot.slane %v1297_v22, 2  ;;  %v1281_v53 = vadd.f32 %v1280_v48, %v1279_v15  ;;  %v1306_v62 = vadd.f32 %v1305_v37, %v1304_v11 }
 0x13d   :  { %v1314_v24 = vrot.slane %v1313_v51, 4  ;;  %v1322_v59 = vadd.f32 %v1321_v3, %v1320_v28  ;;  %v1264_v9 = vrot.slane %v1263_v40, 1  ;;  %v1290_v1 = vadd.f32 %v1289_v4, %v1288_v23 }
 0x13e   :  { %v1273_v19 = vrot.slane %v1272_v0, 1  ;;  %v1299_v39 = vadd.f32 %v1298_v63, %v1297_v22  ;;  %v1282_v30 = vrot.slane %v1281_v53, 1  ;;  %v1307_v35 = vrot.slane %v1306_v62, 2 }
 0x13f   :  { %v1315_v52 = vadd.f32 %v1314_v24, %v1313_v51  ;;  %v1323_v58 = vrot.slane %v1322_v59, 4  ;;  %v14281_v55 = vadd.f32 %v1264_v9, %v1263_v40  ;;  %v1291_v61 = vrot.slane %v1290_v1, 1 }
 0x140   :  { %v14283_v47 = vadd.f32 %v1273_v19, %v1272_v0  ;;  %v1300_v26 = vrot.slane %v1299_v39, 1  ;;  %v14285_v50 = vadd.f32 %v1282_v30, %v1281_v53  ;;  %v1308_v54 = vadd.f32 %v1307_v35, %v1306_v62 }
 0x141   :  { %v1316_v38 = vrot.slane %v1315_v52, 2  ;;  %v1324_v2 = vadd.f32 %v1323_v58, %v1322_v59  ;;  %v14287_v44 = vadd.f32 %v1291_v61, %v1290_v1  ;;  %v1329_v25 = vsel %vm536_vm0, %v12011_v41, 0.0 }
 0x142   :  { %v14289_v5 = vadd.f32 %v1300_v26, %v1299_v39  ;;  %v1330_v27 = vsel %vm536_vm0, %v12012_v60, 0.0  ;;  %v1309_v15 = vrot.slane %v1308_v54, 1  ;;  %v1338_v45 = vsel %vm536_vm0, %v12015_v32, 0.0 }
 0x143   :  { %v1317_v11 = vadd.f32 %v1316_v38, %v1315_v52  ;;  %v1325_v17 = vrot.slane %v1324_v2, 2  ;;  %v1331_v28 = vadd.f32 %v1330_v27, %v1329_v25  ;;  %v1339_v42 = vsel %vm536_vm0, %v12016_v8, 0.0 }
 0x144   :  { %v1347_v41 = vsel %vm536_vm0, %v12019_v49, 0.0  ;;  %v1348_v21 = vsel %vm536_vm0, %v12020_v56, 0.0  ;;  %v14309_v60 = vadd.f32 %v1309_v15, %v1308_v54  ;;  %v1340_v37 = vadd.f32 %v1339_v42, %v1338_v45 }
 0x145   :  { %v1318_v23 = vrot.slane %v1317_v11, 1  ;;  %v1326_v22 = vadd.f32 %v1325_v17, %v1324_v2  ;;  %v1332_v48 = vrot.slane %v1331_v28, 4  ;;  %v1349_v51 = vadd.f32 %v1348_v21, %v1347_v41 }
 0x146   :  { %v1356_v33 = vsel %vm536_vm0, %v12023_v57, 0.0  ;;  %v1357_v32 = vsel %vm536_vm0, %v12024_v10, 0.0  ;;  %v1341_v3 = vrot.slane %v1340_v37, 4  ;;  %v1365_v0 = vsel %vm536_vm0, %v12027_v43, 0.0 }
 0x147   :  { %v14317_v8 = vadd.f32 %v1318_v23, %v1317_v11  ;;  %v1327_v14 = vrot.slane %v1326_v22, 1  ;;  %v1333_v49 = vadd.f32 %v1332_v48, %v1331_v28  ;;  %v1358_v56 = vadd.f32 %v1357_v32, %v1356_v33 }
 0x148   :  { %v1350_v40 = vrot.slane %v1349_v51, 4  ;;  %v1366_v4 = vsel %vm536_vm0, %v12028_v29, 0.0  ;;  %v1342_v53 = vadd.f32 %v1341_v3, %v1340_v37  ;;  %v1374_v24 = vsel %vm536_vm0, %v12031_v20, 0.0 }
 0x149   :  { %v14325_v57 = vadd.f32 %v1327_v14, %v1326_v22  ;;  %v1334_v18 = vrot.slane %v1333_v49, 2  ;;  %v1359_v63 = vrot.slane %v1358_v56, 4  ;;  %v1367_v10 = vadd.f32 %v1366_v4, %v1365_v0 }
 0x14a   :  { %v1351_v62 = vadd.f32 %v1350_v40, %v1349_v51  ;;  %v1375_v59 = vsel %vm536_vm0, %v12032_v13, 0.0  ;;  %v1343_v29 = vrot.slane %v1342_v53, 2  ;;  %v1383_v39 = vsel %vm536_vm0, %v12035_v46, 0.0  ;;  %v14342_v46 = vpop.f32.mrb[0].mxu0 }
 0x14b   :  { %v1335_v43 = vadd.f32 %v1334_v18, %v1333_v49  ;;  %v1360_v9 = vadd.f32 %v1359_v63, %v1358_v56  ;;  %v1368_v36 = vrot.slane %v1367_v10, 4  ;;  %v1376_v19 = vadd.f32 %v1375_v59, %v1374_v24 }
 0x14c   :  { %v1352_v1 = vrot.slane %v1351_v62, 2  ;;  %v1384_v30 = vsel %vm536_vm0, %v12036_v7, 0.0  ;;  %v1344_v58 = vadd.f32 %v1343_v29, %v1342_v53  ;;  %v1392_v26 = vsel %vm536_vm0, %v12039_v34, 0.0 }
 0x14d   :  { %v1336_v35 = vrot.slane %v1335_v43, 1  ;;  %v1361_v20 = vrot.slane %v1360_v9, 2  ;;  %v1369_v52 = vadd.f32 %v1368_v36, %v1367_v10  ;;  %v1377_v12 = vrot.slane %v1376_v19, 4 }
 0x14e   :  { %v1353_v13 = vadd.f32 %v1352_v1, %v1351_v62  ;;  %v1385_v61 = vadd.f32 %v1384_v30, %v1383_v39  ;;  %v1345_v31 = vrot.slane %v1344_v58, 1  ;;  %v1393_v15 = vsel %vm536_vm0, %v12040_v6, 0.0  ;;  %v2457_v30 = vld [vmem:[%s18085_s2 + $0x300] sm:$0xff] }
 0x14f   :  { %v1337_v54 = vadd.f32 %v1336_v35, %v1335_v43  ;;  %v1362_v38 = vadd.f32 %v1361_v20, %v1360_v9  ;;  %v1370_v2 = vrot.slane %v1369_v52, 2  ;;  %v1378_v25 = vadd.f32 %v1377_v12, %v1376_v19  ;;  %v14363_v43 = vpop.f32.mrb[1].mxu0  ;;  %v2461_v35 = vld [vmem:[%s18085_s2 + $0x320] sm:$0xff] }
 0x150   :  { %v1354_v27 = vrot.slane %v1353_v13, 1  ;;  %v1386_v7 = vrot.slane %v1385_v61, 4  ;;  %v1394_v45 = vadd.f32 %v1393_v15, %v1392_v26  ;;  %v1346_v42 = vadd.f32 %v1345_v31, %v1344_v58  ;;  %v14365_v19 = vpop.f32.mrb[2].mxu0  ;;  %v2462_v26 = vld [vmem:[%s18085_s2 + $0x328] sm:$0xff] }
 0x151   :  { %v1363_v11 = vrot.slane %v1362_v38, 1  ;;  %v1371_v17 = vadd.f32 %v1370_v2, %v1369_v52  ;;  %v1379_v28 = vrot.slane %v1378_v25, 2  ;;  %v1769_v21 = vpack.c.bf16 %v14281_v55, %v14281_v55  ;;  %v14373_v20 = vpop.f32.mrb[3].mxu0 }
 0x152   :  { %v1355_v41 = vadd.f32 %v1354_v27, %v1353_v13  ;;  %v1387_v34 = vadd.f32 %v1386_v7, %v1385_v61  ;;  %v1395_v37 = vrot.slane %v1394_v45, 4  ;;  %v1770_v16 = vpack.c.bf16 %v14283_v47, %v14283_v47  ;;  %v2458_v61 = vld [vmem:[%s18085_s2 + $0x308] sm:$0xff] }
 0x153   :  { %v1364_v23 = vadd.f32 %v1363_v11, %v1362_v38  ;;  %v1372_v22 = vrot.slane %v1371_v17, 1  ;;  %v1380_v48 = vadd.f32 %v1379_v28, %v1378_v25  ;;  %v1771_v6 = vpack.c.bf16 %v14285_v50, %v14285_v50  ;;  %v2465_v11 = vld [vmem:[%s18085_s2 + $0x340] sm:$0xff] }
 0x154   :  { %v1388_v51 = vrot.slane %v1387_v34, 2  ;;  %v1772_v33 = vpack.c.bf16 %v14287_v44, %v14287_v44  ;;  %v1396_v49 = vadd.f32 %v1395_v37, %v1394_v45  ;;  %v1773_v55 = vpack.c.bf16 %v14289_v5, %v14289_v5  ;;  %v2470_v37 = vld [vmem:[%s18085_s2 + $0x368] sm:$0xff] }
 0x155   :  { %v1373_v32 = vadd.f32 %v1372_v22, %v1371_v17  ;;  %v1381_v14 = vrot.slane %v1380_v48, 1  ;;  %v1774_v3 = vpack.c.bf16 %v14309_v60, %v14309_v60  ;;  %v1775_v40 = vpack.c.bf16 %v14317_v8, %v14317_v8  ;;  %v2469_v17 = vld [vmem:[%s18085_s2 + $0x360] sm:$0xff] }
 0x156   :  { %v1389_v56 = vadd.f32 %v1388_v51, %v1387_v34  ;;  %v1776_v47 = vpack.c.bf16 %v14325_v57, %v14325_v57  ;;  %v1397_v0 = vrot.slane %v1396_v49, 2  ;;  %v1777_v4 = vpack.c.bf16 %v1337_v54, %v1337_v54 }
 0x157   :  { %v1382_v50 = vadd.f32 %v1381_v14, %v1380_v48  ;;  %v1778_v44 = vpack.c.bf16 %v1346_v42, %v1346_v42  ;;  %v1779_v63 = vpack.c.bf16 %v1355_v41, %v1355_v41  ;;  %v1780_v10 = vpack.c.bf16 %v1364_v23, %v1364_v23  ;;  %v2466_v48 = vld [vmem:[%s18085_s2 + $0x348] sm:$0xff] }
 0x158   :  { %v1390_v18 = vrot.slane %v1389_v56, 1  ;;  %v1781_v53 = vpack.c.bf16 %v1373_v32, %v1373_v32  ;;  %v1398_v62 = vadd.f32 %v1397_v0, %v1396_v49  ;;  %v2027_v24 = vunpack.c.l.b16 %v1769_v21  ;;  %v12264_v49 = vld [vmem:[%s18084_s0 + $0x300] sm:$0xff]  }
 0x159   :  { %v1782_v5 = vpack.c.bf16 %v1382_v50, %v1382_v50  ;;  %v2028_v59 = vunpack.c.l.b16 %v1770_v16  ;;  %v2029_v9 = vunpack.c.l.b16 %v1771_v6  ;;  %v2030_v8 = vunpack.c.l.b16 %v1772_v33  ;;  %v12267_v50 = vld [vmem:[%s18084_s0 + $0x318] sm:$0xff]  }
 0x15a   :  { %v1391_v60 = vadd.f32 %v1390_v18, %v1389_v56  ;;  %v2031_v36 = vunpack.c.l.b16 %v1773_v55  ;;  %v1399_v57 = vrot.slane %v1398_v62, 1  ;;  %v2032_v29 = vunpack.c.l.b16 %v1774_v3  ;;  %v12265_v55 = vld [vmem:[%s18084_s0 + $0x308] sm:$0xff]  }
 0x15b   :  { %v2033_v1 = vunpack.c.l.b16 %v1775_v40  ;;  %v2034_v39 = vunpack.c.l.b16 %v1776_v47  ;;  %v2035_v12 = vunpack.c.l.b16 %v1777_v4  ;;  %v2036_v58 = vunpack.c.l.b16 %v1778_v44  ;;  %v12266_v47 = vld [vmem:[%s18084_s0 + $0x310] sm:$0xff]  }
 0x15c   :  { %v1783_v52 = vpack.c.bf16 %v1391_v60, %v1391_v60  ;;  %v2037_v13 = vunpack.c.l.b16 %v1779_v63  ;;  %v1400_v54 = vadd.f32 %v1399_v57, %v1398_v62  ;;  %v2038_v38 = vunpack.c.l.b16 %v1780_v10  ;;  %v12268_v63 = vld [vmem:[%s18084_s0 + $0x320] sm:$0xff]   ;;  %v12269_v10 = vld [vmem:[%s18084_s0 + $0x328] sm:$0xff]   ;;  %v14433_v60 = vld [vmem:[%s18084_s0 + $0x338] sm:$0xff]  }
 0x15d   :  { %v2039_v2 = vunpack.c.l.b16 %v1781_v53  ;;  %v2040_v25 = vunpack.c.l.b16 %v1782_v5  ;;  %v2152_v27 = vsel %vm2075_vm1, %v2028_v59, %v2027_v24  ;;  %v2159_v7 = vsel %vm2075_vm1, %v2036_v58, %v2035_v12  ;;  %v14428_v59 = vld [vmem:[%s18084_s0 + $0x330] sm:$0xff]   ;;  %v14454_v58 = vld [vmem:[%s18084_s0 + $0x358] sm:$0xff]  }
 0x15e   :  { %v2041_v31 = vunpack.c.l.b16 %v1783_v52  ;;  %v10665_v15 = vcombine.high %v2457_v30, %v2461_v35  ;;  %v1784_v28 = vpack.c.bf16 %v1400_v54, %v1400_v54  ;;  %v2153_v45 = vsel %vm2077_vm2, %v2029_v9, %v2152_v27  ;;  %v14449_v12 = vld [vmem:[%s18084_s0 + $0x350] sm:$0xff]  }
 0x15f   :  { %v2160_v42 = vsel %vm2077_vm2, %v2037_v13, %v2159_v7  ;;  %v10666_v41 = vcombine.low %v2458_v61, %v2462_v26  ;;  %v2154_v34 = vsel %vm2079_vm3, %v2030_v8, %v2153_v45  ;;  %v10667_v23 = vcombine.high %v2458_v61, %v2462_v26 }
 0x160   :  { %v2161_v21 = vsel %vm2079_vm3, %v2038_v38, %v2160_v42  ;;  %8571 = vmatprep.subr.bf16.mxu1 %v10665_v15  ;;  %v10664_v22 = vcombine.low %v2457_v30, %v2461_v35  ;;  %v2042_v51 = vunpack.c.l.b16 %v1784_v28  ;;  %v2155_v16 = vsel %vm2081_vm4, %v2031_v36, %v2154_v34  ;;  %v14462_v38 = vld [vmem:[%s18084_s0 + $0x360] sm:$0xff]   ;;  %v14476_v15 = vld [vmem:[%s18084_s0 + $0x370] sm:$0xff]  }
 0x161   :  { %v2162_v6 = vsel %vm2081_vm4, %v2039_v2, %v2161_v21  ;;  %v10673_v33 = vcombine.high %v2465_v11, %v2469_v17  ;;  %v2156_v32 = vsel %vm2083_vm5, %v2032_v29, %v2155_v16  ;;  %8899 = vmatprep.subr.bf16.mxu0 %v10667_v23  ;;  %v10675_v40 = vcombine.high %v2466_v48, %v2470_v37  ;;  %v14438_v29 = vld [vmem:[%s18084_s0 + $0x340] sm:$0xff]   ;;  %v14467_v2 = vld [vmem:[%s18084_s0 + $0x368] sm:$0xff]  }
 0x162   :  { %v2163_v14 = vsel %vm2083_vm5, %v2040_v25, %v2162_v6  ;;  %8572 = vmatpush1.bf16.msra.mxu1 %v10664_v22  ;;  %v2157_v56 = vsel %vm2085_vm6, %v2033_v1, %v2156_v32  ;;  %8900 = vmatpush1.bf16.msra.mxu0 %v10666_v41  ;;  %v10674_v44 = vcombine.low %v2466_v48, %v2470_v37  ;;  %v12043_v62 = vunpack.c.l.bf16 %v12264_v49  ;;  %v14443_v1 = vld [vmem:[%s18084_s0 + $0x348] sm:$0xff]  }
 0x163   :  { %v2164_v3 = vsel %vm2085_vm6, %v2041_v31, %v2163_v14  ;;  %8573 = vmatprep.subr.bf16.mxu1 %v10673_v33  ;;  %v2158_v0 = vsel %vm2087_vm7, %v2034_v39, %v2157_v56  ;;  %v10672_v18 = vcombine.low %v2465_v11, %v2469_v17  ;;  %8901 = vmatprep.subr.bf16.mxu0 %v10675_v40  ;;  %v12044_v5 = vunpack.c.h.bf16 %v12264_v49 }
 0x164   :  { %v2165_v4 = vsel %vm2087_vm7, %v2042_v51, %v2164_v3  ;;  %v12047_v24 = vunpack.c.l.bf16 %v12265_v55  ;;  %v12048_v9 = vunpack.c.h.bf16 %v12265_v55  ;;  %v12051_v8 = vunpack.c.l.bf16 %v12266_v47 }
 0x165   :  { %v2199_v53 = vpack.c.b16 %v2165_v4, %v2158_v0  ;;  %v12052_v36 = vunpack.c.h.bf16 %v12266_v47  ;;  %v12055_v57 = vunpack.c.l.bf16 %v12267_v50  ;;  %v12056_v39 = vunpack.c.h.bf16 %v12267_v50 }
 0x166   :  { %8574 = vmatpush1.bf16.msra.mxu1 %v10672_v18  ;;  %v12059_v30 = vunpack.c.l.bf16 %v12268_v63  ;;  %v12060_v35 = vunpack.c.h.bf16 %v12268_v63  ;;  %v12063_v52 = vunpack.c.l.bf16 %v12269_v10  ;;  %8902 = vmatpush1.bf16.msra.mxu0 %v10674_v44  ;;  %v12064_v13 = vunpack.c.h.bf16 %v12269_v10 }
 0x167   :  { %12404 = vmatmul.mubr.msk.bf16.gmra.mrb[8].mxu0 %vm536_vm0, %v2199_v53  ;;  %v12067_v61 = vunpack.c.l.bf16 %v14428_v59  ;;  %v12068_v26 = vunpack.c.h.bf16 %v14428_v59  ;;  %v12071_v54 = vunpack.c.l.bf16 %v14433_v60  ;;  %v12072_v25 = vunpack.c.h.bf16 %v14433_v60 }
 0x168   :  { %v12075_v31 = vunpack.c.l.bf16 %v14438_v29  ;;  %v12076_v27 = vunpack.c.h.bf16 %v14438_v29  ;;  %v12079_v7 = vunpack.c.l.bf16 %v14443_v1  ;;  %v12080_v11 = vunpack.c.h.bf16 %v14443_v1 }
 0x169   :  { %v12083_v17 = vunpack.c.l.bf16 %v14449_v12  ;;  %v12084_v28 = vunpack.c.h.bf16 %v14449_v12  ;;  %v12087_v45 = vunpack.c.l.bf16 %v14454_v58  ;;  %v12088_v42 = vunpack.c.h.bf16 %v14454_v58 }
 0x16a   :  { %v12091_v41 = vunpack.c.l.bf16 %v14462_v38  ;;  %v12092_v34 = vunpack.c.h.bf16 %v14462_v38  ;;  %v12095_v21 = vunpack.c.l.bf16 %v14467_v2  ;;  %v12096_v23 = vunpack.c.h.bf16 %v14467_v2 }
 0x16b   :  { %v12099_v22 = vunpack.c.l.bf16 %v14476_v15  ;;  %v1401_v48 = vsel %vm536_vm0, %v12043_v62, 0.0  ;;  %v1402_v37 = vsel %vm536_vm0, %v12044_v5, 0.0  ;;  %v1410_v16 = vsel %vm536_vm0, %v12047_v24, 0.0 }
 0x16c   :  { %v1403_v51 = vadd.f32 %v1402_v37, %v1401_v48  ;;  %v1411_v6 = vsel %vm536_vm0, %v12048_v9, 0.0  ;;  %v1419_v33 = vsel %vm536_vm0, %v12051_v8, 0.0  ;;  %v1420_v14 = vsel %vm536_vm0, %v12052_v36, 0.0 }
 0x16d   :  { %v1412_v32 = vadd.f32 %v1411_v6, %v1410_v16  ;;  %v1428_v49 = vsel %vm536_vm0, %v12055_v57, 0.0  ;;  %v1429_v55 = vsel %vm536_vm0, %v12056_v39, 0.0  ;;  %v1421_v3 = vadd.f32 %v1420_v14, %v1419_v33 }
 0x16e   :  { %v1404_v56 = vrot.slane %v1403_v51, 4  ;;  %v1430_v40 = vadd.f32 %v1429_v55, %v1428_v49  ;;  %v1437_v47 = vsel %vm536_vm0, %v12059_v30, 0.0  ;;  %v1438_v0 = vsel %vm536_vm0, %v12060_v35, 0.0 }
 0x16f   :  { %v1413_v50 = vrot.slane %v1412_v32, 4  ;;  %v1446_v4 = vsel %vm536_vm0, %v12063_v52, 0.0  ;;  %v1447_v44 = vsel %vm536_vm0, %v12064_v13, 0.0  ;;  %v1422_v63 = vrot.slane %v1421_v3, 4 }
 0x170   :  { %v1405_v18 = vadd.f32 %v1404_v56, %v1403_v51  ;;  %v1431_v10 = vrot.slane %v1430_v40, 4  ;;  %v1439_v53 = vadd.f32 %v1438_v0, %v1437_v47  ;;  %v1448_v5 = vadd.f32 %v1447_v44, %v1446_v4 }
 0x171   :  { %v1414_v62 = vadd.f32 %v1413_v50, %v1412_v32  ;;  %v1455_v24 = vsel %vm536_vm0, %v12067_v61, 0.0  ;;  %v1456_v59 = vsel %vm536_vm0, %v12068_v26, 0.0  ;;  %v1423_v9 = vadd.f32 %v1422_v63, %v1421_v3  ;;  %v14507_v26 = vld [vmem:[%s18084_s0 + $0x378] sm:$0xff]  }
 0x172   :  { %v1406_v60 = vrot.slane %v1405_v18, 2  ;;  %v1432_v8 = vadd.f32 %v1431_v10, %v1430_v40  ;;  %v1440_v36 = vrot.slane %v1439_v53, 4  ;;  %v1449_v39 = vrot.slane %v1448_v5, 4 }
 0x173   :  { %v1415_v57 = vrot.slane %v1414_v62, 2  ;;  %v1457_v30 = vadd.f32 %v1456_v59, %v1455_v24  ;;  %v1464_v35 = vsel %vm536_vm0, %v12071_v54, 0.0  ;;  %v1424_v13 = vrot.slane %v1423_v9, 2 }
 0x174   :  { %v1407_v52 = vadd.f32 %v1406_v60, %v1405_v18  ;;  %v1433_v48 = vrot.slane %v1432_v8, 2  ;;  %v1441_v37 = vadd.f32 %v1440_v36, %v1439_v53  ;;  %v1450_v16 = vadd.f32 %v1449_v39, %v1448_v5 }
 0x175   :  { %v1416_v51 = vadd.f32 %v1415_v57, %v1414_v62  ;;  %v1458_v6 = vrot.slane %v1457_v30, 4  ;;  %v1465_v61 = vsel %vm536_vm0, %v12072_v25, 0.0  ;;  %v1425_v32 = vadd.f32 %v1424_v13, %v1423_v9 }
 0x176   :  { %v1408_v33 = vrot.slane %v1407_v52, 1  ;;  %v1434_v14 = vadd.f32 %v1433_v48, %v1432_v8  ;;  %v1442_v49 = vrot.slane %v1441_v37, 2  ;;  %v1451_v54 = vrot.slane %v1450_v16, 2 }
 0x177   :  { %v1417_v55 = vrot.slane %v1416_v51, 1  ;;  %v1459_v56 = vadd.f32 %v1458_v6, %v1457_v30  ;;  %v1466_v3 = vadd.f32 %v1465_v61, %v1464_v35  ;;  %v12100_v40 = vunpack.c.h.bf16 %v14476_v15 }
 0x178   :  { %v1426_v47 = vrot.slane %v1425_v32, 1  ;;  %v1435_v50 = vrot.slane %v1434_v14, 1  ;;  %v1443_v0 = vadd.f32 %v1442_v49, %v1441_v37  ;;  %v12103_v25 = vunpack.c.l.bf16 %v14507_v26 }
 0x179   :  { %v1452_v4 = vadd.f32 %v1451_v54, %v1450_v16  ;;  %v1460_v44 = vrot.slane %v1459_v56, 2  ;;  %v1467_v18 = vrot.slane %v1466_v3, 4  ;;  %v12104_v63 = vunpack.c.h.bf16 %v14507_v26 }
 0x17a   :  { %v14512_v10 = vadd.f32 %v1408_v33, %v1407_v52  ;;  %v14514_v53 = vadd.f32 %v1417_v55, %v1416_v51  ;;  %v1473_v62 = vsel %vm536_vm0, %v12075_v31, 0.0  ;;  %v14519_v5 = vadd.f32 %v1426_v47, %v1425_v32 }
 0x17b   :  { %v1444_v24 = vrot.slane %v1443_v0, 1  ;;  %v1468_v59 = vadd.f32 %v1467_v18, %v1466_v3  ;;  %v1474_v60 = vsel %vm536_vm0, %v12076_v27, 0.0  ;;  %v14524_v9 = vadd.f32 %v1435_v50, %v1434_v14 }
 0x17c   :  { %v1475_v8 = vadd.f32 %v1474_v60, %v1473_v62  ;;  %v1482_v36 = vsel %vm536_vm0, %v12079_v7, 0.0  ;;  %v1483_v57 = vsel %vm536_vm0, %v12080_v11, 0.0  ;;  %v1453_v31 = vrot.slane %v1452_v4, 1 }
 0x17d   :  { %v1461_v39 = vadd.f32 %v1460_v44, %v1459_v56  ;;  %v1469_v30 = vrot.slane %v1468_v59, 2  ;;  %v1484_v35 = vadd.f32 %v1483_v57, %v1482_v36  ;;  %v1491_v29 = vsel %vm536_vm0, %v12083_v17, 0.0 }
 0x17e   :  { %v1476_v52 = vrot.slane %v1475_v8, 4  ;;  %v1492_v27 = vsel %vm536_vm0, %v12084_v28, 0.0  ;;  %v1500_v7 = vsel %vm536_vm0, %v12087_v45, 0.0  ;;  %v14541_v1 = vadd.f32 %v1444_v24, %v1443_v0 }
 0x17f   :  { %v1470_v11 = vadd.f32 %v1469_v30, %v1468_v59  ;;  %v1485_v13 = vrot.slane %v1484_v35, 4  ;;  %v1493_v48 = vadd.f32 %v1492_v27, %v1491_v29  ;;  %v1501_v51 = vsel %vm536_vm0, %v12088_v42, 0.0 }
 0x180   :  { %v1477_v37 = vadd.f32 %v1476_v52, %v1475_v8  ;;  %v1509_v12 = vsel %vm536_vm0, %v12091_v41, 0.0  ;;  %v1510_v17 = vsel %vm536_vm0, %v12092_v34, 0.0  ;;  %v1462_v28 = vrot.slane %v1461_v39, 1 }
 0x181   :  { %v1486_v45 = vadd.f32 %v1485_v13, %v1484_v35  ;;  %v1494_v16 = vrot.slane %v1493_v48, 4  ;;  %v1502_v6 = vadd.f32 %v1501_v51, %v1500_v7  ;;  %v1511_v33 = vadd.f32 %v1510_v17, %v1509_v12 }
 0x182   :  { %v1478_v61 = vrot.slane %v1477_v37, 2  ;;  %v1518_v58 = vsel %vm536_vm0, %v12095_v21, 0.0  ;;  %v1519_v42 = vsel %vm536_vm0, %v12096_v23, 0.0  ;;  %v1471_v32 = vrot.slane %v1470_v11, 1 }
 0x183   :  { %v1487_v41 = vrot.slane %v1486_v45, 2  ;;  %v1495_v14 = vadd.f32 %v1494_v16, %v1493_v48  ;;  %v1503_v38 = vrot.slane %v1502_v6, 4  ;;  %v1512_v34 = vrot.slane %v1511_v33, 4 }
 0x184   :  { %v1479_v49 = vadd.f32 %v1478_v61, %v1477_v37  ;;  %v1520_v55 = vadd.f32 %v1519_v42, %v1518_v58  ;;  %v1527_v54 = vsel %vm536_vm0, %v12099_v22, 0.0  ;;  %v1528_v21 = vsel %vm536_vm0, %v12100_v40, 0.0 }
 0x185   :  { %v1488_v56 = vadd.f32 %v1487_v41, %v1486_v45  ;;  %v1496_v3 = vrot.slane %v1495_v14, 2  ;;  %v1504_v47 = vadd.f32 %v1503_v38, %v1502_v6  ;;  %v1513_v2 = vadd.f32 %v1512_v34, %v1511_v33 }
 0x186   :  { %v1480_v50 = vrot.slane %v1479_v49, 1  ;;  %v1521_v0 = vrot.slane %v1520_v55, 4  ;;  %v1529_v23 = vadd.f32 %v1528_v21, %v1527_v54  ;;  %v1536_v24 = vsel %vm536_vm0, %v12103_v25, 0.0 }
 0x187   :  { %v1489_v44 = vrot.slane %v1488_v56, 1  ;;  %v1497_v18 = vadd.f32 %v1496_v3, %v1495_v14  ;;  %v1505_v62 = vrot.slane %v1504_v47, 2  ;;  %v1454_v59 = vadd.f32 %v1453_v31, %v1452_v4 }
 0x188   :  { %v1514_v60 = vrot.slane %v1513_v2, 2  ;;  %v1522_v8 = vadd.f32 %v1521_v0, %v1520_v55  ;;  %v1530_v15 = vrot.slane %v1529_v23, 4  ;;  %v1463_v36 = vadd.f32 %v1462_v28, %v1461_v39 }
 0x189   :  { %v1498_v22 = vrot.slane %v1497_v18, 1  ;;  %v1506_v57 = vadd.f32 %v1505_v62, %v1504_v47  ;;  %v1537_v40 = vsel %vm536_vm0, %v12104_v63, 0.0  ;;  %v1472_v27 = vadd.f32 %v1471_v32, %v1470_v11 }
 0x18a   :  { %v1515_v30 = vadd.f32 %v1514_v60, %v1513_v2  ;;  %v1523_v35 = vrot.slane %v1522_v8, 2  ;;  %v1531_v52 = vadd.f32 %v1530_v15, %v1529_v23  ;;  %v1538_v29 = vadd.f32 %v1537_v40, %v1536_v24 }
 0x18b   :  { %v1481_v7 = vadd.f32 %v1480_v50, %v1479_v49  ;;  %v1490_v13 = vadd.f32 %v1489_v44, %v1488_v56  ;;  %v1507_v48 = vrot.slane %v1506_v57, 1  ;;  %v1499_v51 = vadd.f32 %v1498_v22, %v1497_v18  ;;  %v14586_v22 = vld [vmem:[%s18084_s0 + $0x388] sm:$0xff]  }
 0x18c   :  { %v1516_v25 = vrot.slane %v1515_v30, 1  ;;  %v1524_v4 = vadd.f32 %v1523_v35, %v1522_v8  ;;  %v1532_v31 = vrot.slane %v1531_v52, 2  ;;  %v1539_v37 = vrot.slane %v1538_v29, 4 }
 0x18d   :  { %v1508_v39 = vadd.f32 %v1507_v48, %v1506_v57  ;;  %v1785_v12 = vpack.c.bf16 %v14512_v10, %v14512_v10  ;;  %v1786_v26 = vpack.c.bf16 %v14514_v53, %v14514_v53  ;;  %v1787_v11 = vpack.c.bf16 %v14519_v5, %v14519_v5  ;;  %v14602_v48 = vld [vmem:[%s18084_s0 + $0x398] sm:$0xff]  }
 0x18e   :  { %v1517_v63 = vadd.f32 %v1516_v25, %v1515_v30  ;;  %v1525_v17 = vrot.slane %v1524_v4, 1  ;;  %v1533_v28 = vadd.f32 %v1532_v31, %v1531_v52  ;;  %v1540_v45 = vadd.f32 %v1539_v37, %v1538_v29  ;;  %v14593_v52 = vld [vmem:[%s18084_s0 + $0x390] sm:$0xff]  }
 0x18f   :  { %v1788_v16 = vpack.c.bf16 %v14524_v9, %v14524_v9  ;;  %v1789_v6 = vpack.c.bf16 %v14541_v1, %v14541_v1  ;;  %v1790_v61 = vpack.c.bf16 %v1454_v59, %v1454_v59  ;;  %v1791_v42 = vpack.c.bf16 %v1463_v36, %v1463_v36  ;;  %v14579_v59 = vld [vmem:[%s18084_s0 + $0x380] sm:$0xff]  }
 0x190   :  { %v1526_v33 = vadd.f32 %v1525_v17, %v1524_v4  ;;  %v1534_v58 = vrot.slane %v1533_v28, 1  ;;  %v1541_v10 = vrot.slane %v1540_v45, 2  ;;  %v1793_v32 = vpack.c.bf16 %v1481_v7, %v1481_v7  ;;  %v14617_v17 = vld [vmem:[%s18084_s0 + $0x3a8] sm:$0xff]  }
 0x191   :  { %v1794_v53 = vpack.c.bf16 %v1490_v13, %v1490_v13  ;;  %v1795_v41 = vpack.c.bf16 %v1499_v51, %v1499_v51  ;;  %v1796_v14 = vpack.c.bf16 %v1508_v39, %v1508_v39  ;;  %v1792_v34 = vpack.c.bf16 %v1472_v27, %v1472_v27  ;;  %v12284_v51 = vld [vmem:[%s18084_s0 + $0x3a0] sm:$0xff]  }
 0x192   :  { %v1535_v38 = vadd.f32 %v1534_v58, %v1533_v28  ;;  %v1542_v49 = vadd.f32 %v1541_v10, %v1540_v45  ;;  %v1797_v55 = vpack.c.bf16 %v1517_v63, %v1517_v63  ;;  %v1798_v5 = vpack.c.bf16 %v1526_v33, %v1526_v33 }
 0x193   :  { %v2043_v54 = vunpack.c.l.b16 %v1785_v12  ;;  %v2044_v56 = vunpack.c.l.b16 %v1786_v26  ;;  %v2045_v9 = vunpack.c.l.b16 %v1787_v11  ;;  %v2046_v1 = vunpack.c.l.b16 %v1788_v16 }
 0x194   :  { %v1543_v3 = vrot.slane %v1542_v49, 1  ;;  %v1799_v47 = vpack.c.bf16 %v1535_v38, %v1535_v38  ;;  %v2047_v21 = vunpack.c.l.b16 %v1789_v6  ;;  %v2051_v50 = vunpack.c.l.b16 %v1793_v32  ;;  %v14626_v6 = vld [vmem:[%s18084_s0 + $0x3b0] sm:$0xff]   ;;  %v14639_v32 = vld [vmem:[%s18084_s0 + $0x3c0] sm:$0xff]  }
 0x195   :  { %v2052_v2 = vunpack.c.l.b16 %v1794_v53  ;;  %v2053_v0 = vunpack.c.l.b16 %v1795_v41  ;;  %v2054_v23 = vunpack.c.l.b16 %v1796_v14  ;;  %v2048_v18 = vunpack.c.l.b16 %v1790_v61  ;;  %v14631_v61 = vld [vmem:[%s18084_s0 + $0x3b8] sm:$0xff]   ;;  %v14644_v53 = vld [vmem:[%s18084_s0 + $0x3c8] sm:$0xff]  }
 0x196   :  { %v1544_v44 = vadd.f32 %v1543_v3, %v1542_v49  ;;  %v2049_v62 = vunpack.c.l.b16 %v1791_v42  ;;  %v2055_v24 = vunpack.c.l.b16 %v1797_v55  ;;  %v2050_v60 = vunpack.c.l.b16 %v1792_v34  ;;  %v14651_v34 = vld [vmem:[%s18084_s0 + $0x3d0] sm:$0xff]   ;;  %v14656_v55 = vld [vmem:[%s18084_s0 + $0x3d8] sm:$0xff]   ;;  %v14665_v3 = vld [vmem:[%s18084_s0 + $0x3e0] sm:$0xff]  }
 0x197   :  { %v2056_v8 = vunpack.c.l.b16 %v1798_v5  ;;  %v2166_v15 = vsel %vm2075_vm1, %v2044_v56, %v2043_v54  ;;  %v2173_v36 = vsel %vm2075_vm1, %v2052_v2, %v2051_v50  ;;  %v2057_v40 = vunpack.c.l.b16 %v1799_v47  ;;  %v14670_v47 = vld [vmem:[%s18084_s0 + $0x3e8] sm:$0xff]  }
 0x198   :  { %v1800_v57 = vpack.c.bf16 %v1544_v44, %v1544_v44  ;;  %v2167_v30 = vsel %vm2077_vm2, %v2045_v9, %v2166_v15  ;;  %v2174_v35 = vsel %vm2077_vm2, %v2053_v0, %v2173_v36  ;;  %v12107_v7 = vunpack.c.l.bf16 %v14579_v59  ;;  %v14680_v0 = vld [vmem:[%s18084_s0 + $0x3f0] sm:$0xff]  }
 0x199   :  { %v2168_v29 = vsel %vm2079_vm3, %v2046_v1, %v2167_v30  ;;  %v2175_v27 = vsel %vm2079_vm3, %v2054_v23, %v2174_v35  ;;  %v12108_v13 = vunpack.c.h.bf16 %v14579_v59  ;;  %v12111_v37 = vunpack.c.l.bf16 %v14586_v22  ;;  %v14685_v23 = vld [vmem:[%s18084_s0 + $0x3f8] sm:$0xff]  }
 0x19a   :  { %v2058_v25 = vunpack.c.l.b16 %v1800_v57  ;;  %v2169_v4 = vsel %vm2081_vm4, %v2047_v21, %v2168_v29  ;;  %v2176_v31 = vsel %vm2081_vm4, %v2055_v24, %v2175_v27  ;;  %v12112_v26 = vunpack.c.h.bf16 %v14586_v22 }
 0x19b   :  { %v2170_v39 = vsel %vm2083_vm5, %v2048_v18, %v2169_v4  ;;  %v2177_v12 = vsel %vm2083_vm5, %v2056_v8, %v2176_v31  ;;  %v12115_v63 = vunpack.c.l.bf16 %v14593_v52  ;;  %v12116_v11 = vunpack.c.h.bf16 %v14593_v52 }
 0x19c   :  { %v2171_v28 = vsel %vm2085_vm6, %v2049_v62, %v2170_v39  ;;  %v2178_v45 = vsel %vm2085_vm6, %v2057_v40, %v2177_v12  ;;  %v12119_v16 = vunpack.c.l.bf16 %v14602_v48  ;;  %v12120_v10 = vunpack.c.h.bf16 %v14602_v48 }
 0x19d   :  { %v2172_v33 = vsel %vm2087_vm7, %v2050_v60, %v2171_v28  ;;  %v2179_v58 = vsel %vm2087_vm7, %v2058_v25, %v2178_v45  ;;  %v12123_v42 = vunpack.c.l.bf16 %v12284_v51  ;;  %v12124_v14 = vunpack.c.h.bf16 %v12284_v51 }
 0x19e   :  { %v2200_v41 = vpack.c.b16 %v2179_v58, %v2172_v33  ;;  %v12127_v38 = vunpack.c.l.bf16 %v14617_v17  ;;  %v12128_v49 = vunpack.c.h.bf16 %v14617_v17  ;;  %v12131_v5 = vunpack.c.l.bf16 %v14626_v6 }
 0x19f   :  { %v12132_v54 = vunpack.c.h.bf16 %v14626_v6  ;;  %v12135_v56 = vunpack.c.l.bf16 %v14631_v61  ;;  %v12136_v9 = vunpack.c.h.bf16 %v14631_v61  ;;  %v12139_v1 = vunpack.c.l.bf16 %v14639_v32 }
 0x1a0   :  { %12407 = vmatprep.mubr.msk.bf16.mxu0 %vm536_vm0, %v2200_v41  ;;  %v12140_v21 = vunpack.c.h.bf16 %v14639_v32  ;;  %v12143_v50 = vunpack.c.l.bf16 %v14644_v53  ;;  %v12144_v2 = vunpack.c.h.bf16 %v14644_v53  ;;  %v12147_v44 = vunpack.c.l.bf16 %v14651_v34 }
 0x1a1   :  { %v12148_v18 = vunpack.c.h.bf16 %v14651_v34  ;;  %v12151_v62 = vunpack.c.l.bf16 %v14656_v55  ;;  %v12152_v24 = vunpack.c.h.bf16 %v14656_v55  ;;  %v12155_v59 = vunpack.c.l.bf16 %v14665_v3 }
 0x1a2   :  { %v12156_v60 = vunpack.c.h.bf16 %v14665_v3  ;;  %v12159_v8 = vunpack.c.l.bf16 %v14670_v47  ;;  %v12160_v15 = vunpack.c.h.bf16 %v14670_v47  ;;  %v12163_v36 = vunpack.c.l.bf16 %v14680_v0 }
 0x1a3   :  { %v12164_v22 = vunpack.c.h.bf16 %v14680_v0  ;;  %v12167_v57 = vunpack.c.l.bf16 %v14685_v23  ;;  %v1545_v40 = vsel %vm536_vm0, %v12107_v7, 0.0  ;;  %v1546_v30 = vsel %vm536_vm0, %v12108_v13, 0.0 }
 0x1a4   :  { %v1554_v35 = vsel %vm536_vm0, %v12111_v37, 0.0  ;;  %v1555_v52 = vsel %vm536_vm0, %v12112_v26, 0.0  ;;  %v1563_v29 = vsel %vm536_vm0, %v12115_v63, 0.0  ;;  %v1547_v27 = vadd.f32 %v1546_v30, %v1545_v40 }
 0x1a5   :  { %v1556_v48 = vadd.f32 %v1555_v52, %v1554_v35  ;;  %v1564_v25 = vsel %vm536_vm0, %v12116_v11, 0.0  ;;  %v1572_v4 = vsel %vm536_vm0, %v12119_v16, 0.0  ;;  %v1573_v51 = vsel %vm536_vm0, %v12120_v10, 0.0 }
 0x1a6   :  { %v1565_v31 = vadd.f32 %v1564_v25, %v1563_v29  ;;  %v1581_v39 = vsel %vm536_vm0, %v12123_v42, 0.0  ;;  %v1582_v7 = vsel %vm536_vm0, %v12124_v14, 0.0  ;;  %v1548_v13 = vrot.slane %v1547_v27, 4 }
 0x1a7   :  { %v1557_v12 = vrot.slane %v1556_v48, 4  ;;  %v1574_v37 = vadd.f32 %v1573_v51, %v1572_v4  ;;  %v1583_v17 = vadd.f32 %v1582_v7, %v1581_v39  ;;  %v1590_v63 = vsel %vm536_vm0, %v12127_v38, 0.0 }
 0x1a8   :  { %v1566_v26 = vrot.slane %v1565_v31, 4  ;;  %v1591_v28 = vsel %vm536_vm0, %v12128_v49, 0.0  ;;  %v1599_v45 = vsel %vm536_vm0, %v12131_v5, 0.0  ;;  %v1549_v11 = vadd.f32 %v1548_v13, %v1547_v27 }
 0x1a9   :  { %v1558_v16 = vadd.f32 %v1557_v12, %v1556_v48  ;;  %v1575_v6 = vrot.slane %v1574_v37, 4  ;;  %v1584_v61 = vrot.slane %v1583_v17, 4  ;;  %v1592_v58 = vadd.f32 %v1591_v28, %v1590_v63 }
 0x1aa   :  { %v1567_v33 = vadd.f32 %v1566_v26, %v1565_v31  ;;  %v1600_v10 = vsel %vm536_vm0, %v12132_v54, 0.0  ;;  %v1608_v42 = vsel %vm536_vm0, %v12135_v56, 0.0  ;;  %v1550_v41 = vrot.slane %v1549_v11, 2 }
 0x1ab   :  { %v1559_v14 = vrot.slane %v1558_v16, 2  ;;  %v1576_v40 = vadd.f32 %v1575_v6, %v1574_v37  ;;  %v1585_v30 = vadd.f32 %v1584_v61, %v1583_v17  ;;  %v1593_v38 = vrot.slane %v1592_v58, 4 }
 0x1ac   :  { %v1568_v35 = vrot.slane %v1567_v33, 2  ;;  %v1601_v52 = vadd.f32 %v1600_v10, %v1599_v45  ;;  %v1609_v49 = vsel %vm536_vm0, %v12136_v9, 0.0  ;;  %v1551_v5 = vadd.f32 %v1550_v41, %v1549_v11 }
 0x1ad   :  { %v1560_v29 = vadd.f32 %v1559_v14, %v1558_v16  ;;  %v1577_v27 = vrot.slane %v1576_v40, 2  ;;  %v1586_v48 = vrot.slane %v1585_v30, 2  ;;  %v1594_v4 = vadd.f32 %v1593_v38, %v1592_v58 }
 0x1ae   :  { %v1569_v25 = vadd.f32 %v1568_v35, %v1567_v33  ;;  %v1602_v31 = vrot.slane %v1601_v52, 4  ;;  %v1610_v51 = vadd.f32 %v1609_v49, %v1608_v42  ;;  %v1552_v54 = vrot.slane %v1551_v5, 1 }
 0x1af   :  { %v1561_v39 = vrot.slane %v1560_v29, 1  ;;  %v1578_v56 = vadd.f32 %v1577_v27, %v1576_v40  ;;  %v1587_v7 = vadd.f32 %v1586_v48, %v1585_v30  ;;  %v1595_v12 = vrot.slane %v1594_v4, 2 }
 0x1b0   :  { %v1570_v13 = vrot.slane %v1569_v25, 1  ;;  %v1603_v37 = vadd.f32 %v1602_v31, %v1601_v52  ;;  %v1611_v17 = vrot.slane %v1610_v51, 4  ;;  %v12168_v26 = vunpack.c.h.bf16 %v14685_v23 }
 0x1b1   :  { %v14715_v63 = vadd.f32 %v1552_v54, %v1551_v5  ;;  %v14717_v9 = vadd.f32 %v1561_v39, %v1560_v29  ;;  %v1579_v28 = vrot.slane %v1578_v56, 1  ;;  %v1588_v45 = vrot.slane %v1587_v7, 1 }
 0x1b2   :  { %v1596_v11 = vadd.f32 %v1595_v12, %v1594_v4  ;;  %v1604_v16 = vrot.slane %v1603_v37, 2  ;;  %v1612_v6 = vadd.f32 %v1611_v17, %v1610_v51  ;;  %v14719_v61 = vadd.f32 %v1570_v13, %v1569_v25 }
 0x1b3   :  { %v14721_v33 = vadd.f32 %v1579_v28, %v1578_v56  ;;  %v1617_v58 = vsel %vm536_vm0, %v12139_v1, 0.0  ;;  %v1618_v10 = vsel %vm536_vm0, %v12140_v21, 0.0  ;;  %v1626_v30 = vsel %vm536_vm0, %v12143_v50, 0.0 }
 0x1b4   :  { %v1597_v42 = vrot.slane %v1596_v11, 1  ;;  %v1605_v41 = vadd.f32 %v1604_v16, %v1603_v37  ;;  %v1613_v14 = vrot.slane %v1612_v6, 2  ;;  %v1619_v40 = vadd.f32 %v1618_v10, %v1617_v58 }
 0x1b5   :  { %v1627_v35 = vsel %vm536_vm0, %v12144_v2, 0.0  ;;  %v1635_v1 = vsel %vm536_vm0, %v12147_v44, 0.0  ;;  %v1636_v32 = vsel %vm536_vm0, %v12148_v18, 0.0  ;;  %v14741_v21 = vadd.f32 %v1588_v45, %v1587_v7 }
 0x1b6   :  { %v1606_v38 = vrot.slane %v1605_v41, 1  ;;  %v1614_v52 = vadd.f32 %v1613_v14, %v1612_v6  ;;  %v1620_v49 = vrot.slane %v1619_v40, 4  ;;  %v1628_v5 = vadd.f32 %v1627_v35, %v1626_v30 }
 0x1b7   :  { %v1637_v29 = vadd.f32 %v1636_v32, %v1635_v1  ;;  %v1644_v53 = vsel %vm536_vm0, %v12151_v62, 0.0  ;;  %v1645_v50 = vsel %vm536_vm0, %v12152_v24, 0.0  ;;  %v14749_v2 = vadd.f32 %v1597_v42, %v1596_v11 }
 0x1b8   :  { %v14751_v34 = vadd.f32 %v1606_v38, %v1605_v41  ;;  %v1621_v44 = vadd.f32 %v1620_v49, %v1619_v40  ;;  %v1646_v18 = vadd.f32 %v1645_v50, %v1644_v53  ;;  %v1629_v27 = vrot.slane %v1628_v5, 4 }
 0x1b9   :  { %v1638_v48 = vrot.slane %v1637_v29, 4  ;;  %v1653_v25 = vsel %vm536_vm0, %v12155_v59, 0.0  ;;  %v1654_v62 = vsel %vm536_vm0, %v12156_v60, 0.0  ;;  %v1615_v4 = vrot.slane %v1614_v52, 1 }
 0x1ba   :  { %v1622_v55 = vrot.slane %v1621_v44, 2  ;;  %v1647_v31 = vrot.slane %v1646_v18, 4  ;;  %v1655_v24 = vadd.f32 %v1654_v62, %v1653_v25  ;;  %v1630_v51 = vadd.f32 %v1629_v27, %v1628_v5 }
 0x1bb   :  { %v1639_v54 = vadd.f32 %v1638_v48, %v1637_v29  ;;  %v1662_v39 = vsel %vm536_vm0, %v12159_v8, 0.0  ;;  %v1663_v56 = vsel %vm536_vm0, %v12160_v15, 0.0  ;;  %v1671_v37 = vsel %vm536_vm0, %v12163_v36, 0.0 }
 0x1bc   :  { %v1623_v7 = vadd.f32 %v1622_v55, %v1621_v44  ;;  %v1648_v59 = vadd.f32 %v1647_v31, %v1646_v18  ;;  %v1656_v13 = vrot.slane %v1655_v24, 4  ;;  %v1664_v3 = vadd.f32 %v1663_v56, %v1662_v39 }
 0x1bd   :  { %v1631_v12 = vrot.slane %v1630_v51, 2  ;;  %v1640_v60 = vrot.slane %v1639_v54, 2  ;;  %v1672_v17 = vsel %vm536_vm0, %v12164_v22, 0.0  ;;  %v1680_v6 = vsel %vm536_vm0, %v12167_v57, 0.0 }
 0x1be   :  { %v1624_v28 = vrot.slane %v1623_v7, 1  ;;  %v1649_v8 = vrot.slane %v1648_v59, 2  ;;  %v1657_v45 = vadd.f32 %v1656_v13, %v1655_v24  ;;  %v1665_v47 = vrot.slane %v1664_v3, 4 }
 0x1bf   :  { %v1632_v11 = vadd.f32 %v1631_v12, %v1630_v51  ;;  %v1641_v15 = vadd.f32 %v1640_v60, %v1639_v54  ;;  %v1673_v16 = vadd.f32 %v1672_v17, %v1671_v37  ;;  %v14774_v58 = vadd.f32 %v1615_v4, %v1614_v52 }
 0x1c0   :  { %v1650_v10 = vadd.f32 %v1649_v8, %v1648_v59  ;;  %v1658_v42 = vrot.slane %v1657_v45, 2  ;;  %v1666_v36 = vadd.f32 %v1665_v47, %v1664_v3  ;;  %v1681_v22 = vsel %vm536_vm0, %v12168_v26, 0.0  ;;  %v2477_v8 = vld [vmem:[%s18085_s2 + $0x3a0] sm:$0xff] }
 0x1c1   :  { %v1633_v41 = vrot.slane %v1632_v11, 1  ;;  %v1642_v0 = vrot.slane %v1641_v15, 1  ;;  %v1674_v14 = vrot.slane %v1673_v16, 4  ;;  %v1682_v1 = vadd.f32 %v1681_v22, %v1680_v6  ;;  %v2478_v6 = vld [vmem:[%s18085_s2 + $0x3a8] sm:$0xff] }
 0x1c2   :  { %v1651_v40 = vrot.slane %v1650_v10, 1  ;;  %v1659_v30 = vadd.f32 %v1658_v42, %v1657_v45  ;;  %v1667_v35 = vrot.slane %v1666_v36, 2  ;;  %v1625_v32 = vadd.f32 %v1624_v28, %v1623_v7  ;;  %v2473_v28 = vld [vmem:[%s18085_s2 + $0x380] sm:$0xff] }
 0x1c3   :  { %v1634_v38 = vadd.f32 %v1633_v41, %v1632_v11  ;;  %v1643_v49 = vadd.f32 %v1642_v0, %v1641_v15  ;;  %v1675_v57 = vadd.f32 %v1674_v14, %v1673_v16  ;;  %v1683_v29 = vrot.slane %v1682_v1, 4  ;;  %v2474_v16 = vld [vmem:[%s18085_s2 + $0x388] sm:$0xff] }
 0x1c4   :  { %v1660_v52 = vrot.slane %v1659_v30, 1  ;;  %v1668_v5 = vadd.f32 %v1667_v35, %v1666_v36  ;;  %v1801_v53 = vpack.c.bf16 %v14715_v63, %v14715_v63  ;;  %v1652_v50 = vadd.f32 %v1651_v40, %v1650_v10 }
 0x1c5   :  { %v1676_v44 = vrot.slane %v1675_v57, 2  ;;  %v1802_v23 = vpack.c.bf16 %v14717_v9, %v14717_v9  ;;  %v1803_v26 = vpack.c.bf16 %v14719_v61, %v14719_v61  ;;  %v1684_v48 = vadd.f32 %v1683_v29, %v1682_v1 }
 0x1c6   :  { %v1661_v18 = vadd.f32 %v1660_v52, %v1659_v30  ;;  %v1669_v27 = vrot.slane %v1668_v5, 1  ;;  %v1804_v25 = vpack.c.bf16 %v14721_v33, %v14721_v33  ;;  %v1805_v4 = vpack.c.bf16 %v14741_v21, %v14741_v21  ;;  %v2481_v52 = vld [vmem:[%s18085_s2 + $0x3c0] sm:$0xff] }
 0x1c7   :  { %v1677_v62 = vadd.f32 %v1676_v44, %v1675_v57  ;;  %v1806_v63 = vpack.c.bf16 %v14749_v2, %v14749_v2  ;;  %v1807_v55 = vpack.c.bf16 %v14751_v34, %v14751_v34  ;;  %v1685_v31 = vrot.slane %v1684_v48, 2 }
 0x1c8   :  { %v1670_v9 = vadd.f32 %v1669_v27, %v1668_v5  ;;  %v1808_v61 = vpack.c.bf16 %v14774_v58, %v14774_v58  ;;  %v1809_v24 = vpack.c.bf16 %v1625_v32, %v1625_v32  ;;  %v1810_v54 = vpack.c.bf16 %v1634_v38, %v1634_v38  ;;  %v2485_v5 = vld [vmem:[%s18085_s2 + $0x3e0] sm:$0xff] }
 0x1c9   :  { %v1678_v51 = vrot.slane %v1677_v62, 1  ;;  %v1811_v39 = vpack.c.bf16 %v1643_v49, %v1643_v49  ;;  %v1812_v33 = vpack.c.bf16 %v1652_v50, %v1652_v50  ;;  %v1686_v56 = vadd.f32 %v1685_v31, %v1684_v48  ;;  %v2490_v31 = vld [vmem:[%s18085_s2 + $0x408] sm:$0xff] }
 0x1ca   :  { %v1813_v7 = vpack.c.bf16 %v1661_v18, %v1661_v18  ;;  %v1814_v59 = vpack.c.bf16 %v1670_v9, %v1670_v9  ;;  %v2059_v21 = vunpack.c.l.b16 %v1801_v53  ;;  %v2060_v3 = vunpack.c.l.b16 %v1802_v23  ;;  %v2482_v23 = vld [vmem:[%s18085_s2 + $0x3c8] sm:$0xff]  ;;  %v14827_v18 = vpop.f32.mrb[4].mxu0  ;;  %v2493_v9 = vld [vmem:[%s18085_s2 + $0x420] sm:$0xff] }
 0x1cb   :  { %v1679_v13 = vadd.f32 %v1678_v51, %v1677_v62  ;;  %v2061_v2 = vunpack.c.l.b16 %v1803_v26  ;;  %v2062_v12 = vunpack.c.l.b16 %v1804_v25  ;;  %v1687_v60 = vrot.slane %v1686_v56, 1  ;;  %v2486_v26 = vld [vmem:[%s18085_s2 + $0x3e8] sm:$0xff]  ;;  %v2489_v25 = vld [vmem:[%s18085_s2 + $0x400] sm:$0xff] }
 0x1cc   :  { %v2063_v34 = vunpack.c.l.b16 %v1805_v4  ;;  %v2064_v37 = vunpack.c.l.b16 %v1806_v63  ;;  %v2065_v17 = vunpack.c.l.b16 %v1807_v55  ;;  %v2067_v47 = vunpack.c.l.b16 %v1809_v24 }
 0x1cd   :  { %v1815_v45 = vpack.c.bf16 %v1679_v13, %v1679_v13  ;;  %v2068_v11 = vunpack.c.l.b16 %v1810_v54  ;;  %v2069_v15 = vunpack.c.l.b16 %v1811_v39  ;;  %v1688_v58 = vadd.f32 %v1687_v60, %v1686_v56  ;;  %v14849_v39 = vpop.f32.mrb[5].mxu0 }
 0x1ce   :  { %v2070_v10 = vunpack.c.l.b16 %v1812_v33  ;;  %v2071_v42 = vunpack.c.l.b16 %v1813_v7  ;;  %v2072_v36 = vunpack.c.l.b16 %v1814_v59  ;;  %v2180_v0 = vsel %vm2075_vm1, %v2060_v3, %v2059_v21  ;;  %v14853_v21 = vpop.f32.mrb[6].mxu0 }
 0x1cf   :  { %v2073_v41 = vunpack.c.l.b16 %v1815_v45  ;;  %v2187_v14 = vsel %vm2075_vm1, %v2068_v11, %v2067_v47  ;;  %v10681_v22 = vcombine.high %v2473_v28, %v2477_v8  ;;  %v1816_v40 = vpack.c.bf16 %v1688_v58, %v1688_v58  ;;  %v14862_v60 = vpop.f32.mrb[7].mxu0  ;;  %v2505_v45 = vld [vmem:[%s18085_s2 + $0x480] sm:$0xff]  ;;  %v2506_v58 = vld [vmem:[%s18085_s2 + $0x488] sm:$0xff] }
 0x1d0   :  { %v2181_v30 = vsel %vm2077_vm2, %v2061_v2, %v2180_v0  ;;  %v2188_v35 = vsel %vm2077_vm2, %v2069_v15, %v2187_v14  ;;  %v10682_v1 = vcombine.low %v2474_v16, %v2478_v6  ;;  %v2066_v32 = vunpack.c.l.b16 %v1808_v61  ;;  %v2494_v61 = vld [vmem:[%s18085_s2 + $0x428] sm:$0xff]  ;;  %v2509_v47 = vld [vmem:[%s18085_s2 + $0x4a0] sm:$0xff] }
 0x1d1   :  { %v2182_v38 = vsel %vm2079_vm3, %v2062_v12, %v2181_v30  ;;  %v2189_v49 = vsel %vm2079_vm3, %v2070_v10, %v2188_v35  ;;  %8575 = vmatprep.subr.bf16.mxu1 %v10681_v22  ;;  %v10683_v57 = vcombine.high %v2474_v16, %v2478_v6  ;;  %v2074_v29 = vunpack.c.l.b16 %v1816_v40  ;;  %v2497_v12 = vld [vmem:[%s18085_s2 + $0x440] sm:$0xff]  ;;  %v2510_v10 = vld [vmem:[%s18085_s2 + $0x4a8] sm:$0xff] }
 0x1d2   :  { %v2183_v53 = vsel %vm2081_vm4, %v2063_v34, %v2182_v38  ;;  %v2190_v50 = vsel %vm2081_vm4, %v2071_v42, %v2189_v49  ;;  %v10680_v44 = vcombine.low %v2473_v28, %v2477_v8  ;;  %v2330_v63 = vmax.f32 %v14373_v20, 0.0  ;;  %v2498_v28 = vld [vmem:[%s18085_s2 + $0x448] sm:$0xff]  ;;  %v2513_v42 = vld [vmem:[%s18085_s2 + $0x4c0] sm:$0xff] }
 0x1d3   :  { %v2184_v27 = vsel %vm2083_vm5, %v2064_v37, %v2183_v53  ;;  %v2191_v48 = vsel %vm2083_vm5, %v2072_v36, %v2190_v50  ;;  %8903 = vmatprep.subr.bf16.mxu0 %v10683_v57  ;;  %v10689_v55 = vcombine.high %v2481_v52, %v2485_v5  ;;  %v2329_v54 = vmax.f32 %v14363_v43, 0.0  ;;  %v2501_v43 = vld [vmem:[%s18085_s2 + $0x460] sm:$0xff]  ;;  %v2502_v8 = vld [vmem:[%s18085_s2 + $0x468] sm:$0xff] }
 0x1d4   :  { %v2185_v62 = vsel %vm2085_vm6, %v2065_v17, %v2184_v27  ;;  %v2192_v4 = vsel %vm2085_vm6, %v2073_v41, %v2191_v48  ;;  %8576 = vmatpush1.bf16.msra.mxu1 %v10680_v44  ;;  %8904 = vmatpush1.bf16.msra.mxu0 %v10682_v1  ;;  %v10690_v20 = vcombine.low %v2482_v23, %v2486_v26  ;;  %v2332_v13 = vmax.f32 %v14365_v19, 0.0  ;;  %v2517_v36 = vld [vmem:[%s18085_s2 + $0x4e0] sm:$0xff]  ;;  %v2514_v40 = vld [vmem:[%s18085_s2 + $0x4c8] sm:$0xff] }
 0x1d5   :  { %v2186_v24 = vsel %vm2087_vm7, %v2066_v32, %v2185_v62  ;;  %v2193_v51 = vsel %vm2087_vm7, %v2074_v29, %v2192_v4  ;;  %v14851_v56 = vpack.c.bf16 %v2330_v63, %v2330_v63  ;;  %8577 = vmatprep.subr.bf16.mxu1 %v10689_v55  ;;  %v10691_v7 = vcombine.high %v2482_v23, %v2486_v26  ;;  %v2518_v30 = vld [vmem:[%s18085_s2 + $0x4e8] sm:$0xff]  ;;  %v2521_v35 = vld [vmem:[%s18085_s2 + $0x500] sm:$0xff] }
 0x1d6   :  { %v2201_v33 = vpack.c.b16 %v2193_v51, %v2186_v24  ;;  %v10688_v59 = vcombine.low %v2481_v52, %v2485_v5  ;;  %v10697_v3 = vcombine.high %v2489_v25, %v2493_v9  ;;  %v10699_v2 = vcombine.high %v2490_v31, %v2494_v61  ;;  %v2525_v1 = vld [vmem:[%s18085_s2 + $0x520] sm:$0xff]  ;;  %v2522_v52 = vld [vmem:[%s18085_s2 + $0x508] sm:$0xff] }
 0x1d7   :  { %8905 = vmatprep.subr.bf16.mxu0 %v10691_v7  ;;  %v10696_v34 = vcombine.low %v2489_v25, %v2493_v9  ;;  %v14865_v37 = vpack.c.bf16 %v2329_v54, %v2329_v54  ;;  %8579 = vmatprep.mubr.bf16.mxu1 %v14851_v56  ;;  %v10705_v19 = vcombine.high %v2497_v12, %v2501_v43  ;;  %v2526_v5 = vld [vmem:[%s18085_s2 + $0x528] sm:$0xff]  ;;  %v2529_v29 = vld [vmem:[%s18085_s2 + $0x540] sm:$0xff] }
 0x1d8   :  { %12408 = vmatmul.mubr.msk.bf16.gmra.mrb[12].mxu0 %vm536_vm0, %v2201_v33  ;;  %8578 = vmatpush1.bf16.msra.mxu1 %v10688_v59  ;;  %v14868_v17 = vpack.c.bf16 %v2332_v13, %v2332_v13  ;;  %v10698_v11 = vcombine.low %v2490_v31, %v2494_v61  ;;  %v10704_v15 = vcombine.low %v2497_v12, %v2501_v43  ;;  %v2533_v53 = vld [vmem:[%s18085_s2 + $0x560] sm:$0xff]  ;;  %v2530_v27 = vld [vmem:[%s18085_s2 + $0x548] sm:$0xff] }
 0x1d9   :  { %8906 = vmatpush1.bf16.msra.mxu0 %v10690_v20  ;;  %8588 = vmatprep.subr.bf16.mxu1 %v10697_v3  ;;  %v10707_v16 = vcombine.high %v2498_v28, %v2502_v8  ;;  %v10713_v6 = vcombine.high %v2505_v45, %v2509_v47  ;;  %v10706_v41 = vcombine.low %v2498_v28, %v2502_v8  ;;  %v2534_v48 = vld [vmem:[%s18085_s2 + $0x568] sm:$0xff]  ;;  %v2537_v25 = vld [vmem:[%s18085_s2 + $0x580] sm:$0xff] }
 0x1da   :  { %8907 = vmatprep.mubr.bf16.mxu0 %v14851_v56  ;;  %8916 = vmatprep.subr.bf16.mxu0 %v10699_v2  ;;  %v10712_v0 = vcombine.low %v2505_v45, %v2509_v47  ;;  %v10715_v14 = vcombine.high %v2506_v58, %v2510_v10  ;;  %v10721_v22 = vcombine.high %v2513_v42, %v2517_v36  ;;  %v2541_v62 = vld [vmem:[%s18085_s2 + $0x5a0] sm:$0xff]  ;;  %v2538_v31 = vld [vmem:[%s18085_s2 + $0x588] sm:$0xff] }
 0x1db   :  { %8580 = vmatmul.mubr.bf16.vlgmr.msra.gmra.mrb[0].mxu1 %v14865_v37  ;;  %v10714_v32 = vcombine.low %v2506_v58, %v2510_v10  ;;  %v10720_v38 = vcombine.low %v2513_v42, %v2517_v36  ;;  %v10723_v49 = vcombine.high %v2514_v40, %v2518_v30  ;;  %v10729_v57 = vcombine.high %v2521_v35, %v2525_v1  ;;  %v2542_v61 = vld [vmem:[%s18085_s2 + $0x5a8] sm:$0xff]  ;;  %v2545_v24 = vld [vmem:[%s18085_s2 + $0x5c0] sm:$0xff] }
 0x1dc   :  { %8589 = vmatpush1.bf16.msra.mxu1 %v10696_v34  ;;  %8620 = vmatprep.mubr.bf16.mxu1 %v14868_v17  ;;  %v10722_v50 = vcombine.low %v2514_v40, %v2518_v30  ;;  %v10728_v44 = vcombine.low %v2521_v35, %v2525_v1  ;;  %v10731_v23 = vcombine.high %v2522_v52, %v2526_v5  ;;  %v2549_v51 = vld [vmem:[%s18085_s2 + $0x5e0] sm:$0xff]  ;;  %v2546_v59 = vld [vmem:[%s18085_s2 + $0x5c8] sm:$0xff] }
 0x1dd   :  { %8590 = vmatprep.subr.bf16.mxu1 %v10705_v19  ;;  %v10737_v26 = vcombine.high %v2529_v29, %v2533_v53  ;;  %v10730_v4 = vcombine.low %v2522_v52, %v2526_v5  ;;  %v10736_v63 = vcombine.low %v2529_v29, %v2533_v53  ;;  %v10739_v55 = vcombine.high %v2530_v27, %v2534_v48  ;;  %v2550_v13 = vld [vmem:[%s18085_s2 + $0x5e8] sm:$0xff]  ;;  %v2553_v3 = vld [vmem:[%s18085_s2 + $0x600] sm:$0xff] }
 0x1de   :  { %v10745_v9 = vcombine.high %v2537_v25, %v2541_v62  ;;  %v10738_v54 = vcombine.low %v2530_v27, %v2534_v48  ;;  %v10744_v20 = vcombine.low %v2537_v25, %v2541_v62  ;;  %v10747_v33 = vcombine.high %v2538_v31, %v2542_v61  ;;  %v2557_v2 = vld [vmem:[%s18085_s2 + $0x620] sm:$0xff]  ;;  %v2554_v28 = vld [vmem:[%s18085_s2 + $0x608] sm:$0xff] }
 0x1df   :  { %v10753_v7 = vcombine.high %v2545_v24, %v2549_v51  ;;  %v10746_v12 = vcombine.low %v2538_v31, %v2542_v61  ;;  %v10752_v43 = vcombine.low %v2545_v24, %v2549_v51  ;;  %v10755_v34 = vcombine.high %v2546_v59, %v2550_v13  ;;  %v2558_v8 = vld [vmem:[%s18085_s2 + $0x628] sm:$0xff]  ;;  %v2561_v45 = vld [vmem:[%s18085_s2 + $0x640] sm:$0xff] }
 0x1e0   :  { %8908 = vmatmul.mubr.bf16.vlgmr.msra.gmra.mrb[16].mxu0 %v14865_v37  ;;  %8591 = vmatpush1.bf16.msra.mxu1 %v10704_v15  ;;  %v10761_v19 = vcombine.high %v2553_v3, %v2557_v2  ;;  %v2565_v47 = vld [vmem:[%s18085_s2 + $0x660] sm:$0xff]  ;;  %v10760_v15 = vcombine.low %v2553_v3, %v2557_v2  ;;  %v2562_v58 = vld [vmem:[%s18085_s2 + $0x648] sm:$0xff] }
 0x1e1   :  { %8917 = vmatpush1.bf16.msra.mxu0 %v10698_v11  ;;  %8948 = vmatprep.mubr.bf16.mxu0 %v14868_v17  ;;  %v10754_v11 = vcombine.low %v2546_v59, %v2550_v13  ;;  %v2566_v10 = vld [vmem:[%s18085_s2 + $0x668] sm:$0xff]  ;;  %v2569_v42 = vld [vmem:[%s18085_s2 + $0x680] sm:$0xff] }
 0x1e2   :  { %8918 = vmatprep.subr.bf16.mxu0 %v10707_v16  ;;  %8592 = vmatprep.subr.bf16.mxu1 %v10713_v6  ;;  %v10763_v16 = vcombine.high %v2554_v28, %v2558_v8  ;;  %v10769_v6 = vcombine.high %v2561_v45, %v2565_v47  ;;  %v2573_v36 = vld [vmem:[%s18085_s2 + $0x6a0] sm:$0xff]  ;;  %v2570_v40 = vld [vmem:[%s18085_s2 + $0x688] sm:$0xff] }
 0x1e3   :  { %v2574_v30 = vld [vmem:[%s18085_s2 + $0x6a8] sm:$0xff]  ;;  %v2577_v35 = vld [vmem:[%s18085_s2 + $0x6c0] sm:$0xff] }
 0x1e4   :  { %8593 = vmatpush1.bf16.msra.mxu1 %v10712_v0  ;;  %v10768_v0 = vcombine.low %v2561_v45, %v2565_v47  ;;  %v2581_v1 = vld [vmem:[%s18085_s2 + $0x6e0] sm:$0xff]  ;;  %v2578_v52 = vld [vmem:[%s18085_s2 + $0x6c8] sm:$0xff] }
 0x1e5   :  { %8919 = vmatpush1.bf16.msra.mxu0 %v10706_v41  ;;  %8594 = vmatprep.subr.bf16.mxu1 %v10721_v22  ;;  %v10762_v41 = vcombine.low %v2554_v28, %v2558_v8  ;;  %v10777_v22 = vcombine.high %v2569_v42, %v2573_v36  ;;  %v2582_v5 = vld [vmem:[%s18085_s2 + $0x6e8] sm:$0xff]  ;;  %v2585_v29 = vld [vmem:[%s18085_s2 + $0x700] sm:$0xff] }
 0x1e6   :  { %8920 = vmatprep.subr.bf16.mxu0 %v10715_v14  ;;  %v10771_v14 = vcombine.high %v2562_v58, %v2566_v10  ;;  %v2589_v53 = vld [vmem:[%s18085_s2 + $0x720] sm:$0xff]  ;;  %v2586_v27 = vld [vmem:[%s18085_s2 + $0x708] sm:$0xff] }
 0x1e7   :  { %v2590_v48 = vld [vmem:[%s18085_s2 + $0x728] sm:$0xff]  ;;  %v2593_v25 = vld [vmem:[%s18085_s2 + $0x740] sm:$0xff] }
 0x1e8   :  { %8595 = vmatpush1.bf16.msra.mxu1 %v10720_v38  ;;  %v10776_v38 = vcombine.low %v2569_v42, %v2573_v36  ;;  %v2597_v62 = vld [vmem:[%s18085_s2 + $0x760] sm:$0xff]  ;;  %v2594_v31 = vld [vmem:[%s18085_s2 + $0x748] sm:$0xff]  ;;  %v2334_v36 = vmax.f32 %v14862_v60, 0.0 }
 0x1e9   :  { %8921 = vmatpush1.bf16.msra.mxu0 %v10714_v32  ;;  %8596 = vmatprep.subr.bf16.mxu1 %v10729_v57  ;;  %v10770_v32 = vcombine.low %v2562_v58, %v2566_v10  ;;  %v10785_v57 = vcombine.high %v2577_v35, %v2581_v1  ;;  %v2598_v61 = vld [vmem:[%s18085_s2 + $0x768] sm:$0xff]  ;;  %v2601_v24 = vld [vmem:[%s18085_s2 + $0x780] sm:$0xff] }
 0x1ea   :  { %8922 = vmatprep.subr.bf16.mxu0 %v10723_v49  ;;  %v10779_v49 = vcombine.high %v2570_v40, %v2574_v30  ;;  %v2605_v51 = vld [vmem:[%s18085_s2 + $0x7a0] sm:$0xff]  ;;  %v2602_v59 = vld [vmem:[%s18085_s2 + $0x788] sm:$0xff] }
 0x1eb   :  { %v2606_v13 = vld [vmem:[%s18085_s2 + $0x7a8] sm:$0xff]  ;;  %v2609_v3 = vld [vmem:[%s18085_s2 + $0x7c0] sm:$0xff] }
 0x1ec   :  { %8597 = vmatpush1.bf16.msra.mxu1 %v10728_v44  ;;  %v10784_v44 = vcombine.low %v2577_v35, %v2581_v1  ;;  %v2613_v2 = vld [vmem:[%s18085_s2 + $0x7e0] sm:$0xff]  ;;  %v2610_v28 = vld [vmem:[%s18085_s2 + $0x7c8] sm:$0xff]  ;;  %v15077_v1 = vpack.c.bf16 %v2334_v36, %v2334_v36 }
 0x1ed   :  { %8923 = vmatpush1.bf16.msra.mxu0 %v10722_v50  ;;  %8598 = vmatprep.subr.bf16.mxu1 %v10737_v26  ;;  %v10778_v50 = vcombine.low %v2570_v40, %v2574_v30  ;;  %v10793_v26 = vcombine.high %v2585_v29, %v2589_v53  ;;  %v2614_v8 = vld [vmem:[%s18085_s2 + $0x7e8] sm:$0xff]  ;;  %v2617_v45 = vld [vmem:[%s18085_s2 + $0x800] sm:$0xff] }
 0x1ee   :  { %8924 = vmatprep.subr.bf16.mxu0 %v10731_v23  ;;  %v10787_v23 = vcombine.high %v2578_v52, %v2582_v5  ;;  %v2621_v47 = vld [vmem:[%s18085_s2 + $0x820] sm:$0xff]  ;;  %v2618_v10 = vld [vmem:[%s18085_s2 + $0x808] sm:$0xff] }
 0x1ef   :  { %v10825_v58 = vcombine.high %v2617_v45, %v2621_v47  ;;  %v2622_v42 = vld [vmem:[%s18085_s2 + $0x828] sm:$0xff] }
 0x1f0   :  { %8599 = vmatpush1.bf16.msra.mxu1 %v10736_v63  ;;  %v10792_v63 = vcombine.low %v2585_v29, %v2589_v53  ;;  %v2626_v60 = vld [vmem:[%s18085_s2 + $0x848] sm:$0xff] }
 0x1f1   :  { %8925 = vmatpush1.bf16.msra.mxu0 %v10730_v4  ;;  %8600 = vmatprep.subr.bf16.mxu1 %v10745_v9  ;;  %v10786_v4 = vcombine.low %v2578_v52, %v2582_v5  ;;  %v10801_v9 = vcombine.high %v2593_v25, %v2597_v62  ;;  %v2630_v35 = vld [vmem:[%s18085_s2 + $0x868] sm:$0xff] }
 0x1f2   :  { %8926 = vmatprep.subr.bf16.mxu0 %v10739_v55  ;;  %v10795_v55 = vcombine.high %v2586_v27, %v2590_v48  ;;  %v10835_v52 = vcombine.high %v2626_v60, %v2630_v35  ;;  %v2634_v29 = vld [vmem:[%s18085_s2 + $0x888] sm:$0xff] }
 0x1f3   :  { %v2638_v53 = vld [vmem:[%s18085_s2 + $0x8a8] sm:$0xff] }
 0x1f4   :  { %8601 = vmatpush1.bf16.msra.mxu1 %v10744_v20  ;;  %v10800_v20 = vcombine.low %v2593_v25, %v2597_v62  ;;  %v2642_v25 = vld [vmem:[%s18085_s2 + $0x8c8] sm:$0xff] }
 0x1f5   :  { %8927 = vmatpush1.bf16.msra.mxu0 %v10738_v54  ;;  %8602 = vmatprep.subr.bf16.mxu1 %v10753_v7  ;;  %v10794_v54 = vcombine.low %v2586_v27, %v2590_v48  ;;  %v10809_v7 = vcombine.high %v2601_v24, %v2605_v51  ;;  %v10843_v27 = vcombine.high %v2634_v29, %v2638_v53  ;;  %v2646_v62 = vld [vmem:[%s18085_s2 + $0x8e8] sm:$0xff] }
 0x1f6   :  { %8928 = vmatprep.subr.bf16.mxu0 %v10747_v33  ;;  %v10803_v33 = vcombine.high %v2594_v31, %v2598_v61  ;;  %v2678_v36 = vld [vmem:[%s18085_s2 + $0x9e8] sm:$0xff] }
 0x1f8   :  { %8603 = vmatpush1.bf16.msra.mxu1 %v10752_v43  ;;  %v10808_v43 = vcombine.low %v2601_v24, %v2605_v51  ;;  %v2650_v24 = vld [vmem:[%s18085_s2 + $0x908] sm:$0xff] }
 0x1f9   :  { %8929 = vmatpush1.bf16.msra.mxu0 %v10746_v12  ;;  %8604 = vmatprep.subr.bf16.mxu1 %v10761_v19  ;;  %v10802_v12 = vcombine.low %v2594_v31, %v2598_v61  ;;  %v10817_v19 = vcombine.high %v2609_v3, %v2613_v2  ;;  %v10851_v31 = vcombine.high %v2642_v25, %v2646_v62  ;;  %v2654_v51 = vld [vmem:[%s18085_s2 + $0x928] sm:$0xff] }
 0x1fa   :  { %8930 = vmatprep.subr.bf16.mxu0 %v10755_v34  ;;  %v10811_v34 = vcombine.high %v2602_v59, %v2606_v13 }
 0x1fc   :  { %8605 = vmatpush1.bf16.msra.mxu1 %v10760_v15  ;;  %v10816_v15 = vcombine.low %v2609_v3, %v2613_v2  ;;  %v2658_v3 = vld [vmem:[%s18085_s2 + $0x948] sm:$0xff] }
 0x1fd   :  { %8931 = vmatpush1.bf16.msra.mxu0 %v10754_v11  ;;  %8606 = vmatprep.subr.bf16.mxu1 %v10769_v6  ;;  %v10810_v11 = vcombine.low %v2602_v59, %v2606_v13  ;;  %v2331_v6 = vmax.f32 %v14342_v46, 0.0  ;;  %v2629_v46 = vld [vmem:[%s18085_s2 + $0x860] sm:$0xff]  ;;  %v10859_v59 = vcombine.high %v2650_v24, %v2654_v51  ;;  %v2662_v2 = vld [vmem:[%s18085_s2 + $0x968] sm:$0xff] }
 0x1fe   :  { %8932 = vmatprep.subr.bf16.mxu0 %v10763_v16  ;;  %v10819_v16 = vcombine.high %v2610_v28, %v2614_v8 }
 0x1ff   :  { %v15069_v40 = vpack.c.bf16 %v2331_v6, %v2331_v6 }
 0x200   :  { %8607 = vmatpush1.bf16.msra.mxu1 %v10768_v0  ;;  %v10818_v0 = vcombine.low %v2610_v28, %v2614_v8  ;;  %v10867_v28 = vcombine.high %v2658_v3, %v2662_v2 }
 0x201   :  { %8933 = vmatpush1.bf16.msra.mxu0 %v10762_v41  ;;  %8608 = vmatprep.subr.bf16.mxu1 %v10777_v22  ;;  %v2625_v41 = vld [vmem:[%s18085_s2 + $0x840] sm:$0xff]  ;;  %v10827_v22 = vcombine.high %v2618_v10, %v2622_v42 }
 0x202   :  { %8934 = vmatprep.subr.bf16.mxu0 %v10771_v14  ;;  %v10824_v14 = vcombine.low %v2617_v45, %v2621_v47  ;;  %v10833_v30 = vcombine.high %v2625_v41, %v2629_v46  ;;  %v2666_v45 = vld [vmem:[%s18085_s2 + $0x988] sm:$0xff] }
 0x203   :  { %v2670_v47 = vld [vmem:[%s18085_s2 + $0x9a8] sm:$0xff] }
 0x204   :  { %8609 = vmatpush1.bf16.msra.mxu1 %v10776_v38  ;;  %v2637_v38 = vld [vmem:[%s18085_s2 + $0x8a0] sm:$0xff] }
 0x205   :  { %8935 = vmatpush1.bf16.msra.mxu0 %v10770_v32  ;;  %8610 = vmatprep.subr.bf16.mxu1 %v10785_v57  ;;  %v2633_v32 = vld [vmem:[%s18085_s2 + $0x880] sm:$0xff]  ;;  %v10832_v57 = vcombine.low %v2625_v41, %v2629_v46 }
 0x206   :  { %8936 = vmatprep.subr.bf16.mxu0 %v10779_v49  ;;  %v10826_v49 = vcombine.low %v2618_v10, %v2622_v42  ;;  %v10841_v5 = vcombine.high %v2633_v32, %v2637_v38  ;;  %v2674_v42 = vld [vmem:[%s18085_s2 + $0x9c8] sm:$0xff]  ;;  %v2681_v41 = vld [vmem:[%s18085_s2 + $0xa00] sm:$0xff] }
 0x207   :  { %v2685_v46 = vld [vmem:[%s18085_s2 + $0xa20] sm:$0xff] }
 0x208   :  { %8611 = vmatpush1.bf16.msra.mxu1 %v10784_v44  ;;  %v2645_v44 = vld [vmem:[%s18085_s2 + $0x8e0] sm:$0xff] }
 0x209   :  { %8937 = vmatpush1.bf16.msra.mxu0 %v10778_v50  ;;  %8612 = vmatprep.subr.bf16.mxu1 %v10793_v26  ;;  %v2641_v50 = vld [vmem:[%s18085_s2 + $0x8c0] sm:$0xff]  ;;  %v10840_v26 = vcombine.low %v2633_v32, %v2637_v38 }
 0x20a   :  { %8938 = vmatprep.subr.bf16.mxu0 %v10787_v23  ;;  %v10834_v23 = vcombine.low %v2626_v60, %v2630_v35  ;;  %v10849_v48 = vcombine.high %v2641_v50, %v2645_v44  ;;  %v2682_v60 = vld [vmem:[%s18085_s2 + $0xa08] sm:$0xff]  ;;  %v2689_v32 = vld [vmem:[%s18085_s2 + $0xa40] sm:$0xff] }
 0x20b   :  { %v2686_v35 = vld [vmem:[%s18085_s2 + $0xa28] sm:$0xff]  ;;  %v2693_v38 = vld [vmem:[%s18085_s2 + $0xa60] sm:$0xff] }
 0x20c   :  { %8613 = vmatpush1.bf16.msra.mxu1 %v10792_v63  ;;  %v2653_v63 = vld [vmem:[%s18085_s2 + $0x920] sm:$0xff] }
 0x20d   :  { %8939 = vmatpush1.bf16.msra.mxu0 %v10786_v4  ;;  %8614 = vmatprep.subr.bf16.mxu1 %v10801_v9  ;;  %v2649_v4 = vld [vmem:[%s18085_s2 + $0x900] sm:$0xff]  ;;  %v10848_v9 = vcombine.low %v2641_v50, %v2645_v44  ;;  %v2690_v50 = vld [vmem:[%s18085_s2 + $0xa48] sm:$0xff] }
 0x20e   :  { %8940 = vmatprep.subr.bf16.mxu0 %v10795_v55  ;;  %v10842_v55 = vcombine.low %v2634_v29, %v2638_v53  ;;  %v10857_v61 = vcombine.high %v2649_v4, %v2653_v63  ;;  %v10897_v53 = vcombine.high %v2689_v32, %v2693_v38  ;;  %v2694_v44 = vld [vmem:[%s18085_s2 + $0xa68] sm:$0xff] }
 0x210   :  { %8615 = vmatpush1.bf16.msra.mxu1 %v10800_v20  ;;  %v2661_v20 = vld [vmem:[%s18085_s2 + $0x960] sm:$0xff] }
 0x211   :  { %8941 = vmatpush1.bf16.msra.mxu0 %v10794_v54  ;;  %8616 = vmatprep.subr.bf16.mxu1 %v10809_v7  ;;  %v2657_v54 = vld [vmem:[%s18085_s2 + $0x940] sm:$0xff]  ;;  %v10856_v7 = vcombine.low %v2649_v4, %v2653_v63  ;;  %v10899_v4 = vcombine.high %v2690_v50, %v2694_v44 }
 0x212   :  { %8942 = vmatprep.subr.bf16.mxu0 %v10803_v33  ;;  %v10850_v33 = vcombine.low %v2642_v25, %v2646_v62  ;;  %v10865_v13 = vcombine.high %v2657_v54, %v2661_v20  ;;  %v10890_v25 = vcombine.low %v2682_v60, %v2686_v35  ;;  %v10896_v62 = vcombine.low %v2689_v32, %v2693_v38 }
 0x214   :  { %8617 = vmatpush1.bf16.msra.mxu1 %v10808_v43  ;;  %v2669_v43 = vld [vmem:[%s18085_s2 + $0x9a0] sm:$0xff] }
 0x215   :  { %8943 = vmatpush1.bf16.msra.mxu0 %v10802_v12  ;;  %8618 = vmatprep.subr.bf16.mxu1 %v10817_v19  ;;  %v2665_v12 = vld [vmem:[%s18085_s2 + $0x980] sm:$0xff]  ;;  %v10864_v19 = vcombine.low %v2657_v54, %v2661_v20 }
 0x216   :  { %8944 = vmatprep.subr.bf16.mxu0 %v10811_v34  ;;  %v10858_v34 = vcombine.low %v2650_v24, %v2654_v51  ;;  %v10873_v8 = vcombine.high %v2665_v12, %v2669_v43  ;;  %v10872_v6 = vcombine.low %v2665_v12, %v2669_v43  ;;  %v10898_v24 = vcombine.low %v2690_v50, %v2694_v44 }
 0x218   :  { %8619 = vmatpush1.bf16.msra.mxu1 %v10816_v15  ;;  %v2677_v15 = vld [vmem:[%s18085_s2 + $0x9e0] sm:$0xff] }
 0x219   :  { %8945 = vmatpush1.bf16.msra.mxu0 %v10810_v11  ;;  %8629 = vmatprep.subr.bf16.mxu1 %v10825_v58  ;;  %v2673_v11 = vld [vmem:[%s18085_s2 + $0x9c0] sm:$0xff]  ;;  %v10875_v58 = vcombine.high %v2666_v45, %v2670_v47 }
 0x21a   :  { %8946 = vmatprep.subr.bf16.mxu0 %v10819_v16  ;;  %v10866_v16 = vcombine.low %v2658_v3, %v2662_v2  ;;  %v10881_v10 = vcombine.high %v2673_v11, %v2677_v15 }
 0x21b   :  { %8621 = vmatmul.mubr.bf16.vlgmr.msra.gmra.mrb[0].mxu1 %v15069_v40 }
 0x21c   :  { %8630 = vmatpush1.bf16.msra.mxu1 %v10824_v14  ;;  %8661 = vmatprep.mubr.bf16.mxu1 %v15077_v1  ;;  %v10880_v14 = vcombine.low %v2673_v11, %v2677_v15 }
 0x21d   :  { %8947 = vmatpush1.bf16.msra.mxu0 %v10818_v0  ;;  %8631 = vmatprep.subr.bf16.mxu1 %v10833_v30  ;;  %v10874_v0 = vcombine.low %v2666_v45, %v2670_v47  ;;  %v10889_v30 = vcombine.high %v2681_v41, %v2685_v46 }
 0x21e   :  { %8957 = vmatprep.subr.bf16.mxu0 %v10827_v22  ;;  %v10883_v22 = vcombine.high %v2674_v42, %v2678_v36 }
 0x220   :  { %8949 = vmatmul.mubr.bf16.vlgmr.msra.gmra.mrb[16].mxu0 %v15069_v40  ;;  %8632 = vmatpush1.bf16.msra.mxu1 %v10832_v57 }
 0x221   :  { %8958 = vmatpush1.bf16.msra.mxu0 %v10826_v49  ;;  %8989 = vmatprep.mubr.bf16.mxu0 %v15077_v1  ;;  %v10882_v49 = vcombine.low %v2674_v42, %v2678_v36 }
 0x222   :  { %8959 = vmatprep.subr.bf16.mxu0 %v10835_v52  ;;  %8633 = vmatprep.subr.bf16.mxu1 %v10841_v5  ;;  %v10888_v52 = vcombine.low %v2681_v41, %v2685_v46  ;;  %v10891_v5 = vcombine.high %v2682_v60, %v2686_v35 }
 0x224   :  { %8634 = vmatpush1.bf16.msra.mxu1 %v10840_v26  ;;  %v2697_v26 = vld [vmem:[%s18085_s2 + $0xa80] sm:$0xff] }
 0x225   :  { %8960 = vmatpush1.bf16.msra.mxu0 %v10834_v23  ;;  %8635 = vmatprep.subr.bf16.mxu1 %v10849_v48 }
 0x226   :  { %8961 = vmatprep.subr.bf16.mxu0 %v10843_v27  ;;  %v2701_v27 = vld [vmem:[%s18085_s2 + $0xaa0] sm:$0xff] }
 0x227   :  { %v10905_v63 = vcombine.high %v2697_v26, %v2701_v27  ;;  %v10904_v51 = vcombine.low %v2697_v26, %v2701_v27  ;;  %v2333_v27 = vmax.f32 %v14849_v39, 0.0  ;;  %v2336_v39 = vmax.f32 %v14853_v21, 0.0  ;;  %v2761_v21 = vld [vmem:[%s18085_s2 + $0xc80] sm:$0xff] }
 0x228   :  { %8636 = vmatpush1.bf16.msra.mxu1 %v10848_v9  ;;  %v2702_v9 = vld [vmem:[%s18085_s2 + $0xaa8] sm:$0xff] }
 0x229   :  { %8962 = vmatpush1.bf16.msra.mxu0 %v10842_v55  ;;  %8637 = vmatprep.subr.bf16.mxu1 %v10857_v61  ;;  %v2698_v55 = vld [vmem:[%s18085_s2 + $0xa88] sm:$0xff]  ;;  %v2709_v61 = vld [vmem:[%s18085_s2 + $0xae0] sm:$0xff] }
 0x22a   :  { %8963 = vmatprep.subr.bf16.mxu0 %v10851_v31  ;;  %v2705_v31 = vld [vmem:[%s18085_s2 + $0xac0] sm:$0xff]  ;;  %v10907_v54 = vcombine.high %v2698_v55, %v2702_v9  ;;  %v10906_v3 = vcombine.low %v2698_v55, %v2702_v9 }
 0x22b   :  { %v10913_v20 = vcombine.high %v2705_v31, %v2709_v61  ;;  %v10912_v2 = vcombine.low %v2705_v31, %v2709_v61  ;;  %v2757_v55 = vld [vmem:[%s18085_s2 + $0xc60] sm:$0xff] }
 0x22c   :  { %8638 = vmatpush1.bf16.msra.mxu1 %v10856_v7  ;;  %v2710_v7 = vld [vmem:[%s18085_s2 + $0xae8] sm:$0xff] }
 0x22d   :  { %8964 = vmatpush1.bf16.msra.mxu0 %v10850_v33  ;;  %8639 = vmatprep.subr.bf16.mxu1 %v10865_v13  ;;  %v2706_v33 = vld [vmem:[%s18085_s2 + $0xac8] sm:$0xff]  ;;  %v2717_v13 = vld [vmem:[%s18085_s2 + $0xb20] sm:$0xff] }
 0x22e   :  { %8965 = vmatprep.subr.bf16.mxu0 %v10859_v59  ;;  %v2713_v59 = vld [vmem:[%s18085_s2 + $0xb00] sm:$0xff]  ;;  %v10915_v12 = vcombine.high %v2706_v33, %v2710_v7  ;;  %v10914_v45 = vcombine.low %v2706_v33, %v2710_v7  ;;  %v15293_v7 = vpack.c.bf16 %v2336_v39, %v2336_v39 }
 0x22f   :  { %v10921_v43 = vcombine.high %v2713_v59, %v2717_v13  ;;  %v10920_v47 = vcombine.low %v2713_v59, %v2717_v13  ;;  %v2765_v33 = vld [vmem:[%s18085_s2 + $0xca0] sm:$0xff] }
 0x230   :  { %8640 = vmatpush1.bf16.msra.mxu1 %v10864_v19  ;;  %v2718_v19 = vld [vmem:[%s18085_s2 + $0xb28] sm:$0xff] }
 0x231   :  { %8966 = vmatpush1.bf16.msra.mxu0 %v10858_v34  ;;  %8641 = vmatprep.subr.bf16.mxu1 %v10873_v8  ;;  %v2714_v34 = vld [vmem:[%s18085_s2 + $0xb08] sm:$0xff]  ;;  %v2725_v8 = vld [vmem:[%s18085_s2 + $0xb60] sm:$0xff] }
 0x232   :  { %8967 = vmatprep.subr.bf16.mxu0 %v10867_v28  ;;  %v2721_v28 = vld [vmem:[%s18085_s2 + $0xb40] sm:$0xff]  ;;  %v10923_v11 = vcombine.high %v2714_v34, %v2718_v19  ;;  %v10922_v42 = vcombine.low %v2714_v34, %v2718_v19 }
 0x233   :  { %v10929_v15 = vcombine.high %v2721_v28, %v2725_v8  ;;  %v10928_v36 = vcombine.low %v2721_v28, %v2725_v8  ;;  %v2769_v34 = vld [vmem:[%s18085_s2 + $0xcc0] sm:$0xff]  ;;  %v10968_v8 = vcombine.low %v2761_v21, %v2765_v33 }
 0x234   :  { %8642 = vmatpush1.bf16.msra.mxu1 %v10872_v6  ;;  %v2726_v6 = vld [vmem:[%s18085_s2 + $0xb68] sm:$0xff]  ;;  %v2773_v19 = vld [vmem:[%s18085_s2 + $0xce0] sm:$0xff] }
 0x235   :  { %8968 = vmatpush1.bf16.msra.mxu0 %v10866_v16  ;;  %8643 = vmatprep.subr.bf16.mxu1 %v10881_v10  ;;  %v2722_v16 = vld [vmem:[%s18085_s2 + $0xb48] sm:$0xff]  ;;  %v2733_v10 = vld [vmem:[%s18085_s2 + $0xba0] sm:$0xff] }
 0x236   :  { %8969 = vmatprep.subr.bf16.mxu0 %v10875_v58  ;;  %v2729_v58 = vld [vmem:[%s18085_s2 + $0xb80] sm:$0xff]  ;;  %v10931_v41 = vcombine.high %v2722_v16, %v2726_v6  ;;  %v10930_v60 = vcombine.low %v2722_v16, %v2726_v6 }
 0x237   :  { %v10937_v46 = vcombine.high %v2729_v58, %v2733_v10  ;;  %v10936_v35 = vcombine.low %v2729_v58, %v2733_v10  ;;  %v2777_v16 = vld [vmem:[%s18085_s2 + $0xd00] sm:$0xff]  ;;  %v10976_v10 = vcombine.low %v2769_v34, %v2773_v19 }
 0x238   :  { %8644 = vmatpush1.bf16.msra.mxu1 %v10880_v14  ;;  %v2734_v14 = vld [vmem:[%s18085_s2 + $0xba8] sm:$0xff]  ;;  %v2781_v6 = vld [vmem:[%s18085_s2 + $0xd20] sm:$0xff] }
 0x239   :  { %8970 = vmatpush1.bf16.msra.mxu0 %v10874_v0  ;;  %8645 = vmatprep.subr.bf16.mxu1 %v10889_v30  ;;  %v2730_v0 = vld [vmem:[%s18085_s2 + $0xb88] sm:$0xff]  ;;  %v2741_v30 = vld [vmem:[%s18085_s2 + $0xbe0] sm:$0xff] }
 0x23a   :  { %v15173_v57 = vpop.f32.mrb[8].mxu0  ;;  %8971 = vmatprep.subr.bf16.mxu0 %v10883_v22  ;;  %v2737_v22 = vld [vmem:[%s18085_s2 + $0xbc0] sm:$0xff]  ;;  %v10939_v32 = vcombine.high %v2730_v0, %v2734_v14  ;;  %v10938_v50 = vcombine.low %v2730_v0, %v2734_v14 }
 0x23b   :  { %v15175_v29 = vpop.f32.mrb[9].mxu0  ;;  %v10945_v38 = vcombine.high %v2737_v22, %v2741_v30  ;;  %v10944_v44 = vcombine.low %v2737_v22, %v2741_v30  ;;  %v2785_v0 = vld [vmem:[%s18085_s2 + $0xd40] sm:$0xff]  ;;  %v10984_v30 = vcombine.low %v2777_v16, %v2781_v6 }
 0x23c   :  { %v15183_v23 = vpop.f32.mrb[10].mxu0  ;;  %8646 = vmatpush1.bf16.msra.mxu1 %v10888_v52  ;;  %v2742_v52 = vld [vmem:[%s18085_s2 + $0xbe8] sm:$0xff]  ;;  %v2789_v14 = vld [vmem:[%s18085_s2 + $0xd60] sm:$0xff] }
 0x23d   :  { %v15191_v48 = vpop.f32.mrb[11].mxu0  ;;  %8972 = vmatpush1.bf16.msra.mxu0 %v10882_v49  ;;  %8647 = vmatprep.subr.bf16.mxu1 %v10897_v53  ;;  %v2738_v49 = vld [vmem:[%s18085_s2 + $0xbc8] sm:$0xff]  ;;  %v2749_v53 = vld [vmem:[%s18085_s2 + $0xc20] sm:$0xff] }
 0x23e   :  { %8973 = vmatprep.subr.bf16.mxu0 %v10891_v5  ;;  %v2745_v5 = vld [vmem:[%s18085_s2 + $0xc00] sm:$0xff]  ;;  %v10947_v26 = vcombine.high %v2738_v49, %v2742_v52  ;;  %v10946_v9 = vcombine.low %v2738_v49, %v2742_v52 }
 0x23f   :  { %v10952_v31 = vcombine.low %v2745_v5, %v2749_v53  ;;  %v2793_v49 = vld [vmem:[%s18085_s2 + $0xd80] sm:$0xff] }
 0x240   :  { %8648 = vmatpush1.bf16.msra.mxu1 %v10896_v62  ;;  %v2746_v62 = vld [vmem:[%s18085_s2 + $0xc08] sm:$0xff]  ;;  %v2797_v52 = vld [vmem:[%s18085_s2 + $0xda0] sm:$0xff] }
 0x241   :  { %8974 = vmatpush1.bf16.msra.mxu0 %v10890_v25  ;;  %8649 = vmatprep.subr.bf16.mxu1 %v10905_v63  ;;  %v10953_v25 = vcombine.high %v2745_v5, %v2749_v53  ;;  %v2753_v63 = vld [vmem:[%s18085_s2 + $0xc40] sm:$0xff]  ;;  %v10992_v53 = vcombine.low %v2785_v0, %v2789_v14 }
 0x242   :  { %8975 = vmatprep.subr.bf16.mxu0 %v10899_v4  ;;  %v2750_v4 = vld [vmem:[%s18085_s2 + $0xc28] sm:$0xff]  ;;  %v10960_v13 = vcombine.low %v2753_v63, %v2757_v55 }
 0x243   :  { %v10955_v61 = vcombine.high %v2746_v62, %v2750_v4  ;;  %v10954_v59 = vcombine.low %v2746_v62, %v2750_v4  ;;  %v2805_v62 = vld [vmem:[%s18085_s2 + $0xde0] sm:$0xff] }
 0x244   :  { %8650 = vmatpush1.bf16.msra.mxu1 %v10904_v51  ;;  %v10961_v51 = vcombine.high %v2753_v63, %v2757_v55  ;;  %v11000_v63 = vcombine.low %v2793_v49, %v2797_v52 }
 0x245   :  { %8976 = vmatpush1.bf16.msra.mxu0 %v10898_v24  ;;  %8651 = vmatprep.subr.bf16.mxu1 %v10913_v20  ;;  %v15279_v24 = vpack.c.bf16 %v2333_v27, %v2333_v27  ;;  %v2758_v20 = vld [vmem:[%s18085_s2 + $0xc68] sm:$0xff] }
 0x246   :  { %8977 = vmatprep.subr.bf16.mxu0 %v10907_v54  ;;  %v2754_v54 = vld [vmem:[%s18085_s2 + $0xc48] sm:$0xff] }
 0x247   :  { %v10962_v28 = vcombine.low %v2754_v54, %v2758_v20  ;;  %v2798_v27 = vld [vmem:[%s18085_s2 + $0xda8] sm:$0xff] }
 0x248   :  { %8652 = vmatpush1.bf16.msra.mxu1 %v10912_v2  ;;  %v10969_v2 = vcombine.high %v2761_v21, %v2765_v33 }
 0x249   :  { %8978 = vmatpush1.bf16.msra.mxu0 %v10906_v3  ;;  %8653 = vmatprep.subr.bf16.mxu1 %v10921_v43  ;;  %v10963_v3 = vcombine.high %v2754_v54, %v2758_v20  ;;  %v2766_v43 = vld [vmem:[%s18085_s2 + $0xca8] sm:$0xff] }
 0x24a   :  { %8979 = vmatprep.subr.bf16.mxu0 %v10915_v12  ;;  %v2762_v12 = vld [vmem:[%s18085_s2 + $0xc88] sm:$0xff] }
 0x24b   :  { %v10970_v58 = vcombine.low %v2762_v12, %v2766_v43 }
 0x24c   :  { %8654 = vmatpush1.bf16.msra.mxu1 %v10920_v47  ;;  %v10977_v47 = vcombine.high %v2769_v34, %v2773_v19 }
 0x24d   :  { %8980 = vmatpush1.bf16.msra.mxu0 %v10914_v45  ;;  %8655 = vmatprep.subr.bf16.mxu1 %v10929_v15  ;;  %v10971_v45 = vcombine.high %v2762_v12, %v2766_v43  ;;  %v2774_v15 = vld [vmem:[%s18085_s2 + $0xce8] sm:$0xff] }
 0x24e   :  { %8981 = vmatprep.subr.bf16.mxu0 %v10923_v11  ;;  %v2770_v11 = vld [vmem:[%s18085_s2 + $0xcc8] sm:$0xff] }
 0x24f   :  { %v10978_v22 = vcombine.low %v2770_v11, %v2774_v15 }
 0x250   :  { %8656 = vmatpush1.bf16.msra.mxu1 %v10928_v36  ;;  %v10985_v36 = vcombine.high %v2777_v16, %v2781_v6 }
 0x251   :  { %8982 = vmatpush1.bf16.msra.mxu0 %v10922_v42  ;;  %8657 = vmatprep.subr.bf16.mxu1 %v10937_v46  ;;  %v10979_v42 = vcombine.high %v2770_v11, %v2774_v15  ;;  %v2782_v46 = vld [vmem:[%s18085_s2 + $0xd28] sm:$0xff] }
 0x252   :  { %8983 = vmatprep.subr.bf16.mxu0 %v10931_v41  ;;  %v2778_v41 = vld [vmem:[%s18085_s2 + $0xd08] sm:$0xff] }
 0x253   :  { %v10986_v5 = vcombine.low %v2778_v41, %v2782_v46 }
 0x254   :  { %8658 = vmatpush1.bf16.msra.mxu1 %v10936_v35  ;;  %v10993_v35 = vcombine.high %v2785_v0, %v2789_v14 }
 0x255   :  { %8984 = vmatpush1.bf16.msra.mxu0 %v10930_v60  ;;  %8659 = vmatprep.subr.bf16.mxu1 %v10945_v38  ;;  %v10987_v60 = vcombine.high %v2778_v41, %v2782_v46  ;;  %v2790_v38 = vld [vmem:[%s18085_s2 + $0xd68] sm:$0xff] }
 0x256   :  { %8985 = vmatprep.subr.bf16.mxu0 %v10939_v32  ;;  %v2786_v32 = vld [vmem:[%s18085_s2 + $0xd48] sm:$0xff] }
 0x257   :  { %v10994_v4 = vcombine.low %v2786_v32, %v2790_v38 }
 0x258   :  { %8660 = vmatpush1.bf16.msra.mxu1 %v10944_v44  ;;  %v11001_v44 = vcombine.high %v2793_v49, %v2797_v52 }
 0x259   :  { %8986 = vmatpush1.bf16.msra.mxu0 %v10938_v50  ;;  %8670 = vmatprep.subr.bf16.mxu1 %v10953_v25  ;;  %v10995_v50 = vcombine.high %v2786_v32, %v2790_v38  ;;  %v2801_v25 = vld [vmem:[%s18085_s2 + $0xdc0] sm:$0xff] }
 0x25a   :  { %8987 = vmatprep.subr.bf16.mxu0 %v10947_v26  ;;  %v2794_v26 = vld [vmem:[%s18085_s2 + $0xd88] sm:$0xff]  ;;  %v11009_v39 = vcombine.high %v2801_v25, %v2805_v62  ;;  %v11008_v20 = vcombine.low %v2801_v25, %v2805_v62 }
 0x25b   :  { %8662 = vmatmul.mubr.bf16.vlgmr.msra.gmra.mrb[0].mxu1 %v15279_v24  ;;  %v11003_v55 = vcombine.high %v2794_v26, %v2798_v27  ;;  %v11002_v54 = vcombine.low %v2794_v26, %v2798_v27 }
 0x25c   :  { %8671 = vmatpush1.bf16.msra.mxu1 %v10952_v31  ;;  %8702 = vmatprep.mubr.bf16.mxu1 %v15293_v7  ;;  %v2806_v31 = vld [vmem:[%s18085_s2 + $0xde8] sm:$0xff] }
 0x25d   :  { %8988 = vmatpush1.bf16.msra.mxu0 %v10946_v9  ;;  %8672 = vmatprep.subr.bf16.mxu1 %v10961_v51  ;;  %v2802_v9 = vld [vmem:[%s18085_s2 + $0xdc8] sm:$0xff]  ;;  %v2813_v51 = vld [vmem:[%s18085_s2 + $0xe20] sm:$0xff] }
 0x25e   :  { %8998 = vmatprep.subr.bf16.mxu0 %v10955_v61  ;;  %v2809_v61 = vld [vmem:[%s18085_s2 + $0xe00] sm:$0xff]  ;;  %v11011_v21 = vcombine.high %v2802_v9, %v2806_v31  ;;  %v11010_v12 = vcombine.low %v2802_v9, %v2806_v31 }
 0x25f   :  { %v11017_v33 = vcombine.high %v2809_v61, %v2813_v51  ;;  %v11016_v43 = vcombine.low %v2809_v61, %v2813_v51 }
 0x260   :  { %8990 = vmatmul.mubr.bf16.vlgmr.msra.gmra.mrb[16].mxu0 %v15279_v24  ;;  %8673 = vmatpush1.bf16.msra.mxu1 %v10960_v13  ;;  %v2814_v13 = vld [vmem:[%s18085_s2 + $0xe28] sm:$0xff] }
 0x261   :  { %8999 = vmatpush1.bf16.msra.mxu0 %v10954_v59  ;;  %9030 = vmatprep.mubr.bf16.mxu0 %v15293_v7  ;;  %v2810_v59 = vld [vmem:[%s18085_s2 + $0xe08] sm:$0xff] }
 0x262   :  { %9000 = vmatprep.subr.bf16.mxu0 %v10963_v3  ;;  %8674 = vmatprep.subr.bf16.mxu1 %v10969_v2  ;;  %v2817_v3 = vld [vmem:[%s18085_s2 + $0xe40] sm:$0xff]  ;;  %v11019_v34 = vcombine.high %v2810_v59, %v2814_v13  ;;  %v11018_v11 = vcombine.low %v2810_v59, %v2814_v13 }
 0x263   :  { %v2821_v2 = vld [vmem:[%s18085_s2 + $0xe60] sm:$0xff] }
 0x264   :  { %8675 = vmatpush1.bf16.msra.mxu1 %v10968_v8  ;;  %v11025_v19 = vcombine.high %v2817_v3, %v2821_v2  ;;  %v2822_v8 = vld [vmem:[%s18085_s2 + $0xe68] sm:$0xff]  ;;  %v11024_v15 = vcombine.low %v2817_v3, %v2821_v2 }
 0x265   :  { %9001 = vmatpush1.bf16.msra.mxu0 %v10962_v28  ;;  %8676 = vmatprep.subr.bf16.mxu1 %v10977_v47  ;;  %v2818_v28 = vld [vmem:[%s18085_s2 + $0xe48] sm:$0xff]  ;;  %v2829_v47 = vld [vmem:[%s18085_s2 + $0xea0] sm:$0xff] }
 0x266   :  { %9002 = vmatprep.subr.bf16.mxu0 %v10971_v45  ;;  %v2825_v45 = vld [vmem:[%s18085_s2 + $0xe80] sm:$0xff]  ;;  %v11027_v16 = vcombine.high %v2818_v28, %v2822_v8  ;;  %v11026_v41 = vcombine.low %v2818_v28, %v2822_v8 }
 0x267   :  { %v11033_v6 = vcombine.high %v2825_v45, %v2829_v47  ;;  %v11032_v46 = vcombine.low %v2825_v45, %v2829_v47  ;;  %v2335_v47 = vmax.f32 %v14827_v18, 0.0  ;;  %v2885_v18 = vld [vmem:[%s18085_s2 + $0x1060] sm:$0xff] }
 0x268   :  { %8677 = vmatpush1.bf16.msra.mxu1 %v10976_v10  ;;  %v2830_v10 = vld [vmem:[%s18085_s2 + $0xea8] sm:$0xff] }
 0x269   :  { %9003 = vmatpush1.bf16.msra.mxu0 %v10970_v58  ;;  %8678 = vmatprep.subr.bf16.mxu1 %v10985_v36  ;;  %v2826_v58 = vld [vmem:[%s18085_s2 + $0xe88] sm:$0xff]  ;;  %v2837_v36 = vld [vmem:[%s18085_s2 + $0xee0] sm:$0xff] }
 0x26a   :  { %9004 = vmatprep.subr.bf16.mxu0 %v10979_v42  ;;  %v2833_v42 = vld [vmem:[%s18085_s2 + $0xec0] sm:$0xff]  ;;  %v11035_v0 = vcombine.high %v2826_v58, %v2830_v10  ;;  %v11034_v32 = vcombine.low %v2826_v58, %v2830_v10 }
 0x26b   :  { %v11041_v14 = vcombine.high %v2833_v42, %v2837_v36  ;;  %v11040_v38 = vcombine.low %v2833_v42, %v2837_v36  ;;  %v2881_v58 = vld [vmem:[%s18085_s2 + $0x1040] sm:$0xff] }
 0x26c   :  { %8679 = vmatpush1.bf16.msra.mxu1 %v10984_v30  ;;  %v2838_v30 = vld [vmem:[%s18085_s2 + $0xee8] sm:$0xff] }
 0x26d   :  { %9005 = vmatpush1.bf16.msra.mxu0 %v10978_v22  ;;  %8680 = vmatprep.subr.bf16.mxu1 %v10993_v35  ;;  %v2834_v22 = vld [vmem:[%s18085_s2 + $0xec8] sm:$0xff]  ;;  %v2845_v35 = vld [vmem:[%s18085_s2 + $0xf20] sm:$0xff] }
 0x26e   :  { %9006 = vmatprep.subr.bf16.mxu0 %v10987_v60  ;;  %v2841_v60 = vld [vmem:[%s18085_s2 + $0xf00] sm:$0xff]  ;;  %v11043_v49 = vcombine.high %v2834_v22, %v2838_v30  ;;  %v11042_v26 = vcombine.low %v2834_v22, %v2838_v30 }
 0x26f   :  { %v11049_v52 = vcombine.high %v2841_v60, %v2845_v35  ;;  %v11048_v27 = vcombine.low %v2841_v60, %v2845_v35  ;;  %v2889_v22 = vld [vmem:[%s18085_s2 + $0x1080] sm:$0xff]  ;;  %v11088_v35 = vcombine.low %v2881_v58, %v2885_v18 }
 0x270   :  { %8681 = vmatpush1.bf16.msra.mxu1 %v10992_v53  ;;  %v2846_v53 = vld [vmem:[%s18085_s2 + $0xf28] sm:$0xff]  ;;  %v2893_v30 = vld [vmem:[%s18085_s2 + $0x10a0] sm:$0xff] }
 0x271   :  { %9007 = vmatpush1.bf16.msra.mxu0 %v10986_v5  ;;  %8682 = vmatprep.subr.bf16.mxu1 %v11001_v44  ;;  %v2842_v5 = vld [vmem:[%s18085_s2 + $0xf08] sm:$0xff]  ;;  %v2853_v44 = vld [vmem:[%s18085_s2 + $0xf60] sm:$0xff] }
 0x272   :  { %9008 = vmatprep.subr.bf16.mxu0 %v10995_v50  ;;  %v2849_v50 = vld [vmem:[%s18085_s2 + $0xf40] sm:$0xff]  ;;  %v11051_v25 = vcombine.high %v2842_v5, %v2846_v53  ;;  %v11050_v9 = vcombine.low %v2842_v5, %v2846_v53 }
 0x273   :  { %v11057_v62 = vcombine.high %v2849_v50, %v2853_v44  ;;  %v11056_v31 = vcombine.low %v2849_v50, %v2853_v44  ;;  %v2897_v5 = vld [vmem:[%s18085_s2 + $0x10c0] sm:$0xff]  ;;  %v11096_v44 = vcombine.low %v2889_v22, %v2893_v30 }
 0x274   :  { %8683 = vmatpush1.bf16.msra.mxu1 %v11000_v63  ;;  %v2854_v63 = vld [vmem:[%s18085_s2 + $0xf68] sm:$0xff]  ;;  %v2901_v53 = vld [vmem:[%s18085_s2 + $0x10e0] sm:$0xff] }
 0x275   :  { %9009 = vmatpush1.bf16.msra.mxu0 %v10994_v4  ;;  %8684 = vmatprep.subr.bf16.mxu1 %v11009_v39  ;;  %v2850_v4 = vld [vmem:[%s18085_s2 + $0xf48] sm:$0xff]  ;;  %v2861_v39 = vld [vmem:[%s18085_s2 + $0xfa0] sm:$0xff] }
 0x276   :  { %9010 = vmatprep.subr.bf16.mxu0 %v11003_v55  ;;  %v2857_v55 = vld [vmem:[%s18085_s2 + $0xf80] sm:$0xff]  ;;  %v11059_v61 = vcombine.high %v2850_v4, %v2854_v63  ;;  %v11058_v59 = vcombine.low %v2850_v4, %v2854_v63 }
 0x277   :  { %v11065_v51 = vcombine.high %v2857_v55, %v2861_v39  ;;  %v11064_v13 = vcombine.low %v2857_v55, %v2861_v39  ;;  %v2905_v4 = vld [vmem:[%s18085_s2 + $0x1100] sm:$0xff]  ;;  %v11104_v39 = vcombine.low %v2897_v5, %v2901_v53 }
 0x278   :  { %8685 = vmatpush1.bf16.msra.mxu1 %v11008_v20  ;;  %v2862_v20 = vld [vmem:[%s18085_s2 + $0xfa8] sm:$0xff]  ;;  %v2909_v63 = vld [vmem:[%s18085_s2 + $0x1120] sm:$0xff] }
 0x279   :  { %9011 = vmatpush1.bf16.msra.mxu0 %v11002_v54  ;;  %8686 = vmatprep.subr.bf16.mxu1 %v11017_v33  ;;  %v2858_v54 = vld [vmem:[%s18085_s2 + $0xf88] sm:$0xff]  ;;  %v2869_v33 = vld [vmem:[%s18085_s2 + $0xfe0] sm:$0xff] }
 0x27a   :  { %9012 = vmatprep.subr.bf16.mxu0 %v11011_v21  ;;  %v2865_v21 = vld [vmem:[%s18085_s2 + $0xfc0] sm:$0xff]  ;;  %v11067_v3 = vcombine.high %v2858_v54, %v2862_v20  ;;  %v11066_v28 = vcombine.low %v2858_v54, %v2862_v20 }
 0x27b   :  { %v11073_v2 = vcombine.high %v2865_v21, %v2869_v33  ;;  %v11072_v8 = vcombine.low %v2865_v21, %v2869_v33  ;;  %v2913_v54 = vld [vmem:[%s18085_s2 + $0x1140] sm:$0xff]  ;;  %v11112_v33 = vcombine.low %v2905_v4, %v2909_v63 }
 0x27c   :  { %8687 = vmatpush1.bf16.msra.mxu1 %v11016_v43  ;;  %v2870_v43 = vld [vmem:[%s18085_s2 + $0xfe8] sm:$0xff]  ;;  %v2917_v20 = vld [vmem:[%s18085_s2 + $0x1160] sm:$0xff] }
 0x27d   :  { %9013 = vmatpush1.bf16.msra.mxu0 %v11010_v12  ;;  %8688 = vmatprep.subr.bf16.mxu1 %v11025_v19  ;;  %v2866_v12 = vld [vmem:[%s18085_s2 + $0xfc8] sm:$0xff]  ;;  %v2877_v19 = vld [vmem:[%s18085_s2 + $0x1020] sm:$0xff] }
 0x27e   :  { %9014 = vmatprep.subr.bf16.mxu0 %v11019_v34  ;;  %v2873_v34 = vld [vmem:[%s18085_s2 + $0x1000] sm:$0xff]  ;;  %v11075_v45 = vcombine.high %v2866_v12, %v2870_v43  ;;  %v11074_v10 = vcombine.low %v2866_v12, %v2870_v43  ;;  %v2918_v12 = vld [vmem:[%s18085_s2 + $0x1168] sm:$0xff] }
 0x27f   :  { %v11080_v42 = vcombine.low %v2873_v34, %v2877_v19 }
 0x280   :  { %8689 = vmatpush1.bf16.msra.mxu1 %v11024_v15  ;;  %v2874_v15 = vld [vmem:[%s18085_s2 + $0x1008] sm:$0xff] }
 0x281   :  { %9015 = vmatpush1.bf16.msra.mxu0 %v11018_v11  ;;  %8690 = vmatprep.subr.bf16.mxu1 %v11033_v6  ;;  %v11081_v11 = vcombine.high %v2873_v34, %v2877_v19  ;;  %v2338_v6 = vmax.f32 %v15191_v48, 0.0  ;;  %v2882_v48 = vld [vmem:[%s18085_s2 + $0x1048] sm:$0xff]  ;;  %v2921_v34 = vld [vmem:[%s18085_s2 + $0x1180] sm:$0xff] }
 0x282   :  { %9016 = vmatprep.subr.bf16.mxu0 %v11027_v16  ;;  %v2878_v16 = vld [vmem:[%s18085_s2 + $0x1028] sm:$0xff]  ;;  %v2925_v19 = vld [vmem:[%s18085_s2 + $0x11a0] sm:$0xff] }
 0x283   :  { %v11083_v36 = vcombine.high %v2874_v15, %v2878_v16  ;;  %v11082_v60 = vcombine.low %v2874_v15, %v2878_v16  ;;  %v11129_v15 = vcombine.high %v2921_v34, %v2925_v19  ;;  %v2922_v16 = vld [vmem:[%s18085_s2 + $0x1188] sm:$0xff] }
 0x284   :  { %8691 = vmatpush1.bf16.msra.mxu1 %v11032_v46  ;;  %v11089_v46 = vcombine.high %v2881_v58, %v2885_v18  ;;  %v2929_v58 = vld [vmem:[%s18085_s2 + $0x11c0] sm:$0xff] }
 0x285   :  { %9017 = vmatpush1.bf16.msra.mxu0 %v11026_v41  ;;  %8692 = vmatprep.subr.bf16.mxu1 %v11041_v14  ;;  %v15481_v41 = vpack.c.bf16 %v2335_v47, %v2335_v47  ;;  %v15489_v14 = vpack.c.bf16 %v2338_v6, %v2338_v6  ;;  %v11120_v47 = vcombine.low %v2913_v54, %v2917_v20  ;;  %v2926_v6 = vld [vmem:[%s18085_s2 + $0x11a8] sm:$0xff]  ;;  %v2933_v18 = vld [vmem:[%s18085_s2 + $0x11e0] sm:$0xff] }
 0x286   :  { %9018 = vmatprep.subr.bf16.mxu0 %v11035_v0  ;;  %v2886_v0 = vld [vmem:[%s18085_s2 + $0x1068] sm:$0xff] }
 0x287   :  { %v11090_v50 = vcombine.low %v2882_v48, %v2886_v0 }
 0x288   :  { %8693 = vmatpush1.bf16.msra.mxu1 %v11040_v38  ;;  %v11097_v38 = vcombine.high %v2889_v22, %v2893_v30  ;;  %v2937_v22 = vld [vmem:[%s18085_s2 + $0x1200] sm:$0xff] }
 0x289   :  { %9019 = vmatpush1.bf16.msra.mxu0 %v11034_v32  ;;  %8694 = vmatprep.subr.bf16.mxu1 %v11049_v52  ;;  %v11091_v32 = vcombine.high %v2882_v48, %v2886_v0  ;;  %v2894_v52 = vld [vmem:[%s18085_s2 + $0x10a8] sm:$0xff]  ;;  %v2941_v30 = vld [vmem:[%s18085_s2 + $0x1220] sm:$0xff] }
 0x28a   :  { %9020 = vmatprep.subr.bf16.mxu0 %v11043_v49  ;;  %v2890_v49 = vld [vmem:[%s18085_s2 + $0x1088] sm:$0xff] }
 0x28b   :  { %v11098_v55 = vcombine.low %v2890_v49, %v2894_v52  ;;  %v2930_v48 = vld [vmem:[%s18085_s2 + $0x11c8] sm:$0xff] }
 0x28c   :  { %8695 = vmatpush1.bf16.msra.mxu1 %v11048_v27  ;;  %v11105_v27 = vcombine.high %v2897_v5, %v2901_v53  ;;  %v2934_v0 = vld [vmem:[%s18085_s2 + $0x11e8] sm:$0xff]  ;;  %v2945_v5 = vld [vmem:[%s18085_s2 + $0x1240] sm:$0xff] }
 0x28d   :  { %9021 = vmatpush1.bf16.msra.mxu0 %v11042_v26  ;;  %8696 = vmatprep.subr.bf16.mxu1 %v11057_v62  ;;  %v11099_v26 = vcombine.high %v2890_v49, %v2894_v52  ;;  %v2902_v62 = vld [vmem:[%s18085_s2 + $0x10e8] sm:$0xff]  ;;  %v2949_v53 = vld [vmem:[%s18085_s2 + $0x1260] sm:$0xff] }
 0x28e   :  { %9022 = vmatprep.subr.bf16.mxu0 %v11051_v25  ;;  %v2898_v25 = vld [vmem:[%s18085_s2 + $0x10c8] sm:$0xff] }
 0x28f   :  { %v11106_v21 = vcombine.low %v2898_v25, %v2902_v62  ;;  %v2938_v49 = vld [vmem:[%s18085_s2 + $0x1208] sm:$0xff] }
 0x290   :  { %8697 = vmatpush1.bf16.msra.mxu1 %v11056_v31  ;;  %v11113_v31 = vcombine.high %v2905_v4, %v2909_v63  ;;  %v2942_v52 = vld [vmem:[%s18085_s2 + $0x1228] sm:$0xff]  ;;  %v2953_v4 = vld [vmem:[%s18085_s2 + $0x1280] sm:$0xff] }
 0x291   :  { %9023 = vmatpush1.bf16.msra.mxu0 %v11050_v9  ;;  %8698 = vmatprep.subr.bf16.mxu1 %v11065_v51  ;;  %v11107_v9 = vcombine.high %v2898_v25, %v2902_v62  ;;  %v2910_v51 = vld [vmem:[%s18085_s2 + $0x1128] sm:$0xff]  ;;  %v2957_v63 = vld [vmem:[%s18085_s2 + $0x12a0] sm:$0xff] }
 0x292   :  { %9024 = vmatprep.subr.bf16.mxu0 %v11059_v61  ;;  %v2906_v61 = vld [vmem:[%s18085_s2 + $0x1108] sm:$0xff] }
 0x293   :  { %v2946_v25 = vld [vmem:[%s18085_s2 + $0x1248] sm:$0xff] }
 0x294   :  { %8699 = vmatpush1.bf16.msra.mxu1 %v11064_v13  ;;  %v2950_v62 = vld [vmem:[%s18085_s2 + $0x1268] sm:$0xff] }
 0x295   :  { %9025 = vmatpush1.bf16.msra.mxu0 %v11058_v59  ;;  %8700 = vmatprep.subr.bf16.mxu1 %v11073_v2  ;;  %v11115_v59 = vcombine.high %v2906_v61, %v2910_v51  ;;  %v2914_v2 = vld [vmem:[%s18085_s2 + $0x1148] sm:$0xff] }
 0x296   :  { %9026 = vmatprep.subr.bf16.mxu0 %v11067_v3  ;;  %v11121_v3 = vcombine.high %v2913_v54, %v2917_v20  ;;  %v2961_v54 = vld [vmem:[%s18085_s2 + $0x12c0] sm:$0xff] }
 0x297   :  { %v2965_v20 = vld [vmem:[%s18085_s2 + $0x12e0] sm:$0xff] }
 0x298   :  { %8701 = vmatpush1.bf16.msra.mxu1 %v11072_v8  ;;  %v11114_v8 = vcombine.low %v2906_v61, %v2910_v51  ;;  %v2954_v61 = vld [vmem:[%s18085_s2 + $0x1288] sm:$0xff] }
 0x299   :  { %9027 = vmatpush1.bf16.msra.mxu0 %v11066_v28  ;;  %8711 = vmatprep.subr.bf16.mxu1 %v11081_v11  ;;  %v11123_v11 = vcombine.high %v2914_v2, %v2918_v12  ;;  %v2958_v51 = vld [vmem:[%s18085_s2 + $0x12a8] sm:$0xff] }
 0x29a   :  { %9028 = vmatprep.subr.bf16.mxu0 %v11075_v45 }
 0x29b   :  { %8703 = vmatmul.mubr.bf16.vlgmr.msra.gmra.mrb[0].mxu1 %v15481_v41 }
 0x29c   :  { %8712 = vmatpush1.bf16.msra.mxu1 %v11080_v42  ;;  %8743 = vmatprep.mubr.bf16.mxu1 %v15489_v14  ;;  %v11128_v42 = vcombine.low %v2921_v34, %v2925_v19  ;;  %v2969_v34 = vld [vmem:[%s18085_s2 + $0x1300] sm:$0xff] }
 0x29d   :  { %9029 = vmatpush1.bf16.msra.mxu0 %v11074_v10  ;;  %8713 = vmatprep.subr.bf16.mxu1 %v11089_v46  ;;  %v11122_v10 = vcombine.low %v2914_v2, %v2918_v12  ;;  %v11137_v46 = vcombine.high %v2929_v58, %v2933_v18  ;;  %v2962_v2 = vld [vmem:[%s18085_s2 + $0x12c8] sm:$0xff]  ;;  %v2973_v19 = vld [vmem:[%s18085_s2 + $0x1320] sm:$0xff] }
 0x29e   :  { %9039 = vmatprep.subr.bf16.mxu0 %v11083_v36  ;;  %v11131_v36 = vcombine.high %v2922_v16, %v2926_v6  ;;  %v2966_v12 = vld [vmem:[%s18085_s2 + $0x12e8] sm:$0xff] }
 0x2a0   :  { %9031 = vmatmul.mubr.bf16.vlgmr.msra.gmra.mrb[16].mxu0 %v15481_v41  ;;  %8714 = vmatpush1.bf16.msra.mxu1 %v11088_v35  ;;  %v11136_v35 = vcombine.low %v2929_v58, %v2933_v18  ;;  %v2977_v58 = vld [vmem:[%s18085_s2 + $0x1340] sm:$0xff] }
 0x2a1   :  { %9040 = vmatpush1.bf16.msra.mxu0 %v11082_v60  ;;  %9071 = vmatprep.mubr.bf16.mxu0 %v15489_v14  ;;  %v11130_v60 = vcombine.low %v2922_v16, %v2926_v6  ;;  %v2970_v16 = vld [vmem:[%s18085_s2 + $0x1308] sm:$0xff]  ;;  %v2981_v18 = vld [vmem:[%s18085_s2 + $0x1360] sm:$0xff] }
 0x2a2   :  { %9041 = vmatprep.subr.bf16.mxu0 %v11091_v32  ;;  %8715 = vmatprep.subr.bf16.mxu1 %v11097_v38  ;;  %v11139_v32 = vcombine.high %v2930_v48, %v2934_v0  ;;  %v11145_v38 = vcombine.high %v2937_v22, %v2941_v30  ;;  %v2974_v6 = vld [vmem:[%s18085_s2 + $0x1328] sm:$0xff] }
 0x2a4   :  { %8716 = vmatpush1.bf16.msra.mxu1 %v11096_v44  ;;  %v11144_v44 = vcombine.low %v2937_v22, %v2941_v30  ;;  %v2985_v22 = vld [vmem:[%s18085_s2 + $0x1380] sm:$0xff] }
 0x2a5   :  { %9042 = vmatpush1.bf16.msra.mxu0 %v11090_v50  ;;  %8717 = vmatprep.subr.bf16.mxu1 %v11105_v27  ;;  %v11138_v50 = vcombine.low %v2930_v48, %v2934_v0  ;;  %v11153_v27 = vcombine.high %v2945_v5, %v2949_v53  ;;  %v2978_v48 = vld [vmem:[%s18085_s2 + $0x1348] sm:$0xff]  ;;  %v2989_v30 = vld [vmem:[%s18085_s2 + $0x13a0] sm:$0xff] }
 0x2a6   :  { %9043 = vmatprep.subr.bf16.mxu0 %v11099_v26  ;;  %v11147_v26 = vcombine.high %v2938_v49, %v2942_v52  ;;  %v2982_v0 = vld [vmem:[%s18085_s2 + $0x1368] sm:$0xff] }
 0x2a8   :  { %8718 = vmatpush1.bf16.msra.mxu1 %v11104_v39  ;;  %v11152_v39 = vcombine.low %v2945_v5, %v2949_v53  ;;  %v2993_v5 = vld [vmem:[%s18085_s2 + $0x13c0] sm:$0xff] }
 0x2a9   :  { %9044 = vmatpush1.bf16.msra.mxu0 %v11098_v55  ;;  %8719 = vmatprep.subr.bf16.mxu1 %v11113_v31  ;;  %v11146_v55 = vcombine.low %v2938_v49, %v2942_v52  ;;  %v11161_v31 = vcombine.high %v2953_v4, %v2957_v63  ;;  %v2986_v49 = vld [vmem:[%s18085_s2 + $0x1388] sm:$0xff]  ;;  %v2997_v53 = vld [vmem:[%s18085_s2 + $0x13e0] sm:$0xff] }
 0x2aa   :  { %9045 = vmatprep.subr.bf16.mxu0 %v11107_v9  ;;  %v11155_v9 = vcombine.high %v2946_v25, %v2950_v62  ;;  %v2990_v52 = vld [vmem:[%s18085_s2 + $0x13a8] sm:$0xff] }
 0x2ab   :  { %v15537_v13 = vpop.f32.mrb[12].mxu0 }
 0x2ac   :  { %v15545_v43 = vpop.f32.mrb[13].mxu0  ;;  %8720 = vmatpush1.bf16.msra.mxu1 %v11112_v33  ;;  %v11160_v33 = vcombine.low %v2953_v4, %v2957_v63  ;;  %v3001_v4 = vld [vmem:[%s18085_s2 + $0x1400] sm:$0xff] }
 0x2ad   :  { %v15553_v28 = vpop.f32.mrb[14].mxu0  ;;  %9046 = vmatpush1.bf16.msra.mxu0 %v11106_v21  ;;  %8721 = vmatprep.subr.bf16.mxu1 %v11121_v3  ;;  %v11154_v21 = vcombine.low %v2946_v25, %v2950_v62  ;;  %v11169_v3 = vcombine.high %v2961_v54, %v2965_v20  ;;  %v2994_v25 = vld [vmem:[%s18085_s2 + $0x13c8] sm:$0xff]  ;;  %v3005_v63 = vld [vmem:[%s18085_s2 + $0x1420] sm:$0xff] }
 0x2ae   :  { %v15555_v45 = vpop.f32.mrb[15].mxu0  ;;  %9047 = vmatprep.subr.bf16.mxu0 %v11115_v59  ;;  %v11163_v59 = vcombine.high %v2954_v61, %v2958_v51  ;;  %v2998_v62 = vld [vmem:[%s18085_s2 + $0x13e8] sm:$0xff] }
 0x2b0   :  { %8722 = vmatpush1.bf16.msra.mxu1 %v11120_v47  ;;  %v11168_v47 = vcombine.low %v2961_v54, %v2965_v20  ;;  %v3006_v54 = vld [vmem:[%s18085_s2 + $0x1428] sm:$0xff]  ;;  %v3009_v20 = vld [vmem:[%s18085_s2 + $0x1440] sm:$0xff] }
 0x2b1   :  { %9048 = vmatpush1.bf16.msra.mxu0 %v11114_v8  ;;  %8723 = vmatprep.subr.bf16.mxu1 %v11129_v15  ;;  %v11162_v8 = vcombine.low %v2954_v61, %v2958_v51  ;;  %v11177_v15 = vcombine.high %v2969_v34, %v2973_v19  ;;  %v11209_v61 = vcombine.high %v3001_v4, %v3005_v63  ;;  %v3002_v51 = vld [vmem:[%s18085_s2 + $0x1408] sm:$0xff] }
 0x2b2   :  { %9049 = vmatprep.subr.bf16.mxu0 %v11123_v11  ;;  %v11171_v11 = vcombine.high %v2962_v2, %v2966_v12 }
 0x2b4   :  { %8724 = vmatpush1.bf16.msra.mxu1 %v11128_v42  ;;  %v11176_v42 = vcombine.low %v2969_v34, %v2973_v19  ;;  %v3010_v34 = vld [vmem:[%s18085_s2 + $0x1448] sm:$0xff] }
 0x2b5   :  { %9050 = vmatpush1.bf16.msra.mxu0 %v11122_v10  ;;  %8725 = vmatprep.subr.bf16.mxu1 %v11137_v46  ;;  %v11170_v10 = vcombine.low %v2962_v2, %v2966_v12  ;;  %v11185_v46 = vcombine.high %v2977_v58, %v2981_v18  ;;  %v3014_v19 = vld [vmem:[%s18085_s2 + $0x1468] sm:$0xff] }
 0x2b6   :  { %9051 = vmatprep.subr.bf16.mxu0 %v11131_v36  ;;  %v11179_v36 = vcombine.high %v2970_v16, %v2974_v6 }
 0x2b8   :  { %8726 = vmatpush1.bf16.msra.mxu1 %v11136_v35  ;;  %v11184_v35 = vcombine.low %v2977_v58, %v2981_v18  ;;  %v3018_v58 = vld [vmem:[%s18085_s2 + $0x1488] sm:$0xff] }
 0x2b9   :  { %9052 = vmatpush1.bf16.msra.mxu0 %v11130_v60  ;;  %8727 = vmatprep.subr.bf16.mxu1 %v11145_v38  ;;  %v11178_v60 = vcombine.low %v2970_v16, %v2974_v6  ;;  %v11193_v38 = vcombine.high %v2985_v22, %v2989_v30  ;;  %v11219_v16 = vcombine.high %v3010_v34, %v3014_v19  ;;  %v3022_v18 = vld [vmem:[%s18085_s2 + $0x14a8] sm:$0xff] }
 0x2ba   :  { %9053 = vmatprep.subr.bf16.mxu0 %v11139_v32  ;;  %v11187_v32 = vcombine.high %v2978_v48, %v2982_v0 }
 0x2bc   :  { %8728 = vmatpush1.bf16.msra.mxu1 %v11144_v44  ;;  %v11192_v44 = vcombine.low %v2985_v22, %v2989_v30  ;;  %v3026_v22 = vld [vmem:[%s18085_s2 + $0x14c8] sm:$0xff] }
 0x2bd   :  { %9054 = vmatpush1.bf16.msra.mxu0 %v11138_v50  ;;  %8729 = vmatprep.subr.bf16.mxu1 %v11153_v27  ;;  %v11186_v50 = vcombine.low %v2978_v48, %v2982_v0  ;;  %v11201_v27 = vcombine.high %v2993_v5, %v2997_v53  ;;  %v11227_v48 = vcombine.high %v3018_v58, %v3022_v18  ;;  %v3030_v30 = vld [vmem:[%s18085_s2 + $0x14e8] sm:$0xff] }
 0x2be   :  { %9055 = vmatprep.subr.bf16.mxu0 %v11147_v26  ;;  %v11195_v26 = vcombine.high %v2986_v49, %v2990_v52 }
 0x2c0   :  { %8730 = vmatpush1.bf16.msra.mxu1 %v11152_v39  ;;  %v11200_v39 = vcombine.low %v2993_v5, %v2997_v53  ;;  %v3034_v5 = vld [vmem:[%s18085_s2 + $0x1508] sm:$0xff] }
 0x2c1   :  { %9056 = vmatpush1.bf16.msra.mxu0 %v11146_v55  ;;  %8731 = vmatprep.subr.bf16.mxu1 %v11161_v31  ;;  %v11194_v55 = vcombine.low %v2986_v49, %v2990_v52  ;;  %v2337_v31 = vmax.f32 %v15175_v29, 0.0  ;;  %v2340_v29 = vmax.f32 %v15183_v23, 0.0  ;;  %v3017_v23 = vld [vmem:[%s18085_s2 + $0x1480] sm:$0xff]  ;;  %v11235_v49 = vcombine.high %v3026_v22, %v3030_v30  ;;  %v3038_v53 = vld [vmem:[%s18085_s2 + $0x1528] sm:$0xff] }
 0x2c2   :  { %9057 = vmatprep.subr.bf16.mxu0 %v11155_v9  ;;  %v11203_v9 = vcombine.high %v2994_v25, %v2998_v62 }
 0x2c3   :  { %v15691_v2 = vpack.c.bf16 %v2337_v31, %v2337_v31 }
 0x2c4   :  { %8732 = vmatpush1.bf16.msra.mxu1 %v11160_v33  ;;  %v11202_v33 = vcombine.low %v2994_v25, %v2998_v62  ;;  %v11243_v25 = vcombine.high %v3034_v5, %v3038_v53 }
 0x2c5   :  { %9058 = vmatpush1.bf16.msra.mxu0 %v11154_v21  ;;  %8733 = vmatprep.subr.bf16.mxu1 %v11169_v3  ;;  %v3013_v21 = vld [vmem:[%s18085_s2 + $0x1460] sm:$0xff]  ;;  %v11211_v3 = vcombine.high %v3002_v51, %v3006_v54 }
 0x2c6   :  { %9059 = vmatprep.subr.bf16.mxu0 %v11163_v59  ;;  %v11208_v59 = vcombine.low %v3001_v4, %v3005_v63  ;;  %v11217_v12 = vcombine.high %v3009_v20, %v3013_v21  ;;  %v3042_v4 = vld [vmem:[%s18085_s2 + $0x1548] sm:$0xff] }
 0x2c7   :  { %v3046_v63 = vld [vmem:[%s18085_s2 + $0x1568] sm:$0xff] }
 0x2c8   :  { %8734 = vmatpush1.bf16.msra.mxu1 %v11168_v47  ;;  %v15705_v47 = vpack.c.bf16 %v2340_v29, %v2340_v29  ;;  %v3061_v29 = vld [vmem:[%s18085_s2 + $0x15e0] sm:$0xff] }
 0x2c9   :  { %9060 = vmatpush1.bf16.msra.mxu0 %v11162_v8  ;;  %8735 = vmatprep.subr.bf16.mxu1 %v11177_v15  ;;  %v3021_v8 = vld [vmem:[%s18085_s2 + $0x14a0] sm:$0xff]  ;;  %v11216_v15 = vcombine.low %v3009_v20, %v3013_v21  ;;  %v3054_v20 = vld [vmem:[%s18085_s2 + $0x15a8] sm:$0xff] }
 0x2ca   :  { %9061 = vmatprep.subr.bf16.mxu0 %v11171_v11  ;;  %v11210_v11 = vcombine.low %v3002_v51, %v3006_v54  ;;  %v11225_v6 = vcombine.high %v3017_v23, %v3021_v8  ;;  %v3050_v54 = vld [vmem:[%s18085_s2 + $0x1588] sm:$0xff]  ;;  %v3057_v21 = vld [vmem:[%s18085_s2 + $0x15c0] sm:$0xff] }
 0x2cc   :  { %8736 = vmatpush1.bf16.msra.mxu1 %v11176_v42  ;;  %v3029_v42 = vld [vmem:[%s18085_s2 + $0x14e0] sm:$0xff] }
 0x2cd   :  { %9062 = vmatpush1.bf16.msra.mxu0 %v11170_v10  ;;  %8737 = vmatprep.subr.bf16.mxu1 %v11185_v46  ;;  %v3025_v10 = vld [vmem:[%s18085_s2 + $0x14c0] sm:$0xff]  ;;  %v11224_v46 = vcombine.low %v3017_v23, %v3021_v8 }
 0x2ce   :  { %9063 = vmatprep.subr.bf16.mxu0 %v11179_v36  ;;  %v11218_v36 = vcombine.low %v3010_v34, %v3014_v19  ;;  %v11233_v0 = vcombine.high %v3025_v10, %v3029_v42  ;;  %v3058_v34 = vld [vmem:[%s18085_s2 + $0x15c8] sm:$0xff]  ;;  %v3065_v23 = vld [vmem:[%s18085_s2 + $0x1600] sm:$0xff] }
 0x2cf   :  { %v3062_v19 = vld [vmem:[%s18085_s2 + $0x15e8] sm:$0xff]  ;;  %v3069_v8 = vld [vmem:[%s18085_s2 + $0x1620] sm:$0xff] }
 0x2d0   :  { %8738 = vmatpush1.bf16.msra.mxu1 %v11184_v35  ;;  %v3037_v35 = vld [vmem:[%s18085_s2 + $0x1520] sm:$0xff] }
 0x2d1   :  { %9064 = vmatpush1.bf16.msra.mxu0 %v11178_v60  ;;  %8739 = vmatprep.subr.bf16.mxu1 %v11193_v38  ;;  %v3033_v60 = vld [vmem:[%s18085_s2 + $0x1500] sm:$0xff]  ;;  %v11232_v38 = vcombine.low %v3025_v10, %v3029_v42 }
 0x2d2   :  { %9065 = vmatprep.subr.bf16.mxu0 %v11187_v32  ;;  %v11226_v32 = vcombine.low %v3018_v58, %v3022_v18  ;;  %v11241_v52 = vcombine.high %v3033_v60, %v3037_v35  ;;  %v3066_v58 = vld [vmem:[%s18085_s2 + $0x1608] sm:$0xff]  ;;  %v3073_v10 = vld [vmem:[%s18085_s2 + $0x1640] sm:$0xff] }
 0x2d3   :  { %v3070_v18 = vld [vmem:[%s18085_s2 + $0x1628] sm:$0xff]  ;;  %v3077_v42 = vld [vmem:[%s18085_s2 + $0x1660] sm:$0xff] }
 0x2d4   :  { %8740 = vmatpush1.bf16.msra.mxu1 %v11192_v44  ;;  %v3045_v44 = vld [vmem:[%s18085_s2 + $0x1560] sm:$0xff] }
 0x2d5   :  { %9066 = vmatpush1.bf16.msra.mxu0 %v11186_v50  ;;  %8741 = vmatprep.subr.bf16.mxu1 %v11201_v27  ;;  %v3041_v50 = vld [vmem:[%s18085_s2 + $0x1540] sm:$0xff]  ;;  %v11240_v27 = vcombine.low %v3033_v60, %v3037_v35 }
 0x2d6   :  { %9067 = vmatprep.subr.bf16.mxu0 %v11195_v26  ;;  %v11234_v26 = vcombine.low %v3026_v22, %v3030_v30  ;;  %v11249_v62 = vcombine.high %v3041_v50, %v3045_v44  ;;  %v11248_v31 = vcombine.low %v3041_v50, %v3045_v44  ;;  %v3074_v22 = vld [vmem:[%s18085_s2 + $0x1648] sm:$0xff]  ;;  %v3081_v60 = vld [vmem:[%s18085_s2 + $0x1680] sm:$0xff] }
 0x2d7   :  { %v3078_v30 = vld [vmem:[%s18085_s2 + $0x1668] sm:$0xff]  ;;  %v3085_v35 = vld [vmem:[%s18085_s2 + $0x16a0] sm:$0xff] }
 0x2d8   :  { %8742 = vmatpush1.bf16.msra.mxu1 %v11200_v39  ;;  %v3053_v39 = vld [vmem:[%s18085_s2 + $0x15a0] sm:$0xff] }
 0x2d9   :  { %9068 = vmatpush1.bf16.msra.mxu0 %v11194_v55  ;;  %8752 = vmatprep.subr.bf16.mxu1 %v11209_v61  ;;  %v3049_v55 = vld [vmem:[%s18085_s2 + $0x1580] sm:$0xff]  ;;  %v11251_v61 = vcombine.high %v3042_v4, %v3046_v63 }
 0x2da   :  { %9069 = vmatprep.subr.bf16.mxu0 %v11203_v9  ;;  %v11242_v9 = vcombine.low %v3034_v5, %v3038_v53  ;;  %v11257_v51 = vcombine.high %v3049_v55, %v3053_v39  ;;  %v3082_v5 = vld [vmem:[%s18085_s2 + $0x1688] sm:$0xff]  ;;  %v3089_v50 = vld [vmem:[%s18085_s2 + $0x16c0] sm:$0xff] }
 0x2db   :  { %8744 = vmatmul.mubr.bf16.vlgmr.msra.gmra.mrb[0].mxu1 %v15691_v2  ;;  %v3086_v53 = vld [vmem:[%s18085_s2 + $0x16a8] sm:$0xff]  ;;  %v3093_v44 = vld [vmem:[%s18085_s2 + $0x16e0] sm:$0xff] }
 0x2dc   :  { %8753 = vmatpush1.bf16.msra.mxu1 %v11208_v59  ;;  %8784 = vmatprep.mubr.bf16.mxu1 %v15705_v47  ;;  %v11256_v59 = vcombine.low %v3049_v55, %v3053_v39  ;;  %v3097_v55 = vld [vmem:[%s18085_s2 + $0x1700] sm:$0xff] }
 0x2dd   :  { %9070 = vmatpush1.bf16.msra.mxu0 %v11202_v33  ;;  %8754 = vmatprep.subr.bf16.mxu1 %v11217_v12  ;;  %v11250_v33 = vcombine.low %v3042_v4, %v3046_v63  ;;  %v11265_v12 = vcombine.high %v3057_v21, %v3061_v29  ;;  %v3090_v4 = vld [vmem:[%s18085_s2 + $0x16c8] sm:$0xff]  ;;  %v3101_v39 = vld [vmem:[%s18085_s2 + $0x1720] sm:$0xff] }
 0x2de   :  { %9080 = vmatprep.subr.bf16.mxu0 %v11211_v3  ;;  %v11259_v3 = vcombine.high %v3050_v54, %v3054_v20  ;;  %v3094_v63 = vld [vmem:[%s18085_s2 + $0x16e8] sm:$0xff] }
 0x2e0   :  { %9072 = vmatmul.mubr.bf16.vlgmr.msra.gmra.mrb[16].mxu0 %v15691_v2  ;;  %8755 = vmatpush1.bf16.msra.mxu1 %v11216_v15  ;;  %v11264_v15 = vcombine.low %v3057_v21, %v3061_v29  ;;  %v3105_v21 = vld [vmem:[%s18085_s2 + $0x1740] sm:$0xff] }
 0x2e1   :  { %9081 = vmatpush1.bf16.msra.mxu0 %v11210_v11  ;;  %9112 = vmatprep.mubr.bf16.mxu0 %v15705_v47  ;;  %v11258_v11 = vcombine.low %v3050_v54, %v3054_v20  ;;  %v3098_v54 = vld [vmem:[%s18085_s2 + $0x1708] sm:$0xff]  ;;  %v3109_v29 = vld [vmem:[%s18085_s2 + $0x1760] sm:$0xff] }
 0x2e2   :  { %9082 = vmatprep.subr.bf16.mxu0 %v11219_v16  ;;  %8756 = vmatprep.subr.bf16.mxu1 %v11225_v6  ;;  %v11267_v16 = vcombine.high %v3058_v34, %v3062_v19  ;;  %v11273_v6 = vcombine.high %v3065_v23, %v3069_v8  ;;  %v3102_v20 = vld [vmem:[%s18085_s2 + $0x1728] sm:$0xff] }
 0x2e4   :  { %8757 = vmatpush1.bf16.msra.mxu1 %v11224_v46  ;;  %v11272_v46 = vcombine.low %v3065_v23, %v3069_v8  ;;  %v3113_v23 = vld [vmem:[%s18085_s2 + $0x1780] sm:$0xff] }
 0x2e5   :  { %9083 = vmatpush1.bf16.msra.mxu0 %v11218_v36  ;;  %8758 = vmatprep.subr.bf16.mxu1 %v11233_v0  ;;  %v11266_v36 = vcombine.low %v3058_v34, %v3062_v19  ;;  %v11281_v0 = vcombine.high %v3073_v10, %v3077_v42  ;;  %v3106_v34 = vld [vmem:[%s18085_s2 + $0x1748] sm:$0xff]  ;;  %v3117_v8 = vld [vmem:[%s18085_s2 + $0x17a0] sm:$0xff] }
 0x2e6   :  { %9084 = vmatprep.subr.bf16.mxu0 %v11227_v48  ;;  %v11275_v48 = vcombine.high %v3066_v58, %v3070_v18  ;;  %v3110_v19 = vld [vmem:[%s18085_s2 + $0x1768] sm:$0xff] }
 0x2e8   :  { %8759 = vmatpush1.bf16.msra.mxu1 %v11232_v38  ;;  %v11280_v38 = vcombine.low %v3073_v10, %v3077_v42  ;;  %v3121_v10 = vld [vmem:[%s18085_s2 + $0x17c0] sm:$0xff] }
 0x2e9   :  { %9085 = vmatpush1.bf16.msra.mxu0 %v11226_v32  ;;  %8760 = vmatprep.subr.bf16.mxu1 %v11241_v52  ;;  %v11274_v32 = vcombine.low %v3066_v58, %v3070_v18  ;;  %v11289_v52 = vcombine.high %v3081_v60, %v3085_v35  ;;  %v3114_v58 = vld [vmem:[%s18085_s2 + $0x1788] sm:$0xff]  ;;  %v3125_v42 = vld [vmem:[%s18085_s2 + $0x17e0] sm:$0xff] }
 0x2ea   :  { %9086 = vmatprep.subr.bf16.mxu0 %v11235_v49  ;;  %v11283_v49 = vcombine.high %v3074_v22, %v3078_v30  ;;  %v3118_v18 = vld [vmem:[%s18085_s2 + $0x17a8] sm:$0xff] }
 0x2ec   :  { %8761 = vmatpush1.bf16.msra.mxu1 %v11240_v27  ;;  %v11288_v27 = vcombine.low %v3081_v60, %v3085_v35  ;;  %v3129_v60 = vld [vmem:[%s18085_s2 + $0x1800] sm:$0xff] }
 0x2ed   :  { %9087 = vmatpush1.bf16.msra.mxu0 %v11234_v26  ;;  %8762 = vmatprep.subr.bf16.mxu1 %v11249_v62  ;;  %v11282_v26 = vcombine.low %v3074_v22, %v3078_v30  ;;  %v11297_v62 = vcombine.high %v3089_v50, %v3093_v44  ;;  %v3122_v22 = vld [vmem:[%s18085_s2 + $0x17c8] sm:$0xff]  ;;  %v3133_v35 = vld [vmem:[%s18085_s2 + $0x1820] sm:$0xff] }
 0x2ee   :  { %9088 = vmatprep.subr.bf16.mxu0 %v11243_v25  ;;  %v11291_v25 = vcombine.high %v3082_v5, %v3086_v53  ;;  %v3126_v30 = vld [vmem:[%s18085_s2 + $0x17e8] sm:$0xff] }
 0x2f0   :  { %8763 = vmatpush1.bf16.msra.mxu1 %v11248_v31  ;;  %v11296_v31 = vcombine.low %v3089_v50, %v3093_v44  ;;  %v3134_v50 = vld [vmem:[%s18085_s2 + $0x1828] sm:$0xff]  ;;  %v3137_v44 = vld [vmem:[%s18085_s2 + $0x1840] sm:$0xff] }
 0x2f1   :  { %9089 = vmatpush1.bf16.msra.mxu0 %v11242_v9  ;;  %8764 = vmatprep.subr.bf16.mxu1 %v11257_v51  ;;  %v11290_v9 = vcombine.low %v3082_v5, %v3086_v53  ;;  %v11305_v51 = vcombine.high %v3097_v55, %v3101_v39  ;;  %v11337_v5 = vcombine.high %v3129_v60, %v3133_v35  ;;  %v3130_v53 = vld [vmem:[%s18085_s2 + $0x1808] sm:$0xff] }
 0x2f2   :  { %9090 = vmatprep.subr.bf16.mxu0 %v11251_v61  ;;  %v11299_v61 = vcombine.high %v3090_v4, %v3094_v63 }
 0x2f4   :  { %8765 = vmatpush1.bf16.msra.mxu1 %v11256_v59  ;;  %v11304_v59 = vcombine.low %v3097_v55, %v3101_v39  ;;  %v3138_v55 = vld [vmem:[%s18085_s2 + $0x1848] sm:$0xff] }
 0x2f5   :  { %9091 = vmatpush1.bf16.msra.mxu0 %v11250_v33  ;;  %8766 = vmatprep.subr.bf16.mxu1 %v11265_v12  ;;  %v11298_v33 = vcombine.low %v3090_v4, %v3094_v63  ;;  %v11313_v12 = vcombine.high %v3105_v21, %v3109_v29  ;;  %v3142_v39 = vld [vmem:[%s18085_s2 + $0x1868] sm:$0xff] }
 0x2f6   :  { %9092 = vmatprep.subr.bf16.mxu0 %v11259_v3  ;;  %v11307_v3 = vcombine.high %v3098_v54, %v3102_v20 }
 0x2f8   :  { %8767 = vmatpush1.bf16.msra.mxu1 %v11264_v15  ;;  %v11312_v15 = vcombine.low %v3105_v21, %v3109_v29  ;;  %v3146_v21 = vld [vmem:[%s18085_s2 + $0x1888] sm:$0xff] }
 0x2f9   :  { %9093 = vmatpush1.bf16.msra.mxu0 %v11258_v11  ;;  %8768 = vmatprep.subr.bf16.mxu1 %v11273_v6  ;;  %v11306_v11 = vcombine.low %v3098_v54, %v3102_v20  ;;  %v11321_v6 = vcombine.high %v3113_v23, %v3117_v8  ;;  %v11347_v54 = vcombine.high %v3138_v55, %v3142_v39  ;;  %v3150_v29 = vld [vmem:[%s18085_s2 + $0x18a8] sm:$0xff] }
 0x2fa   :  { %9094 = vmatprep.subr.bf16.mxu0 %v11267_v16  ;;  %v11315_v16 = vcombine.high %v3106_v34, %v3110_v19 }
 0x2fc   :  { %8769 = vmatpush1.bf16.msra.mxu1 %v11272_v46  ;;  %v11320_v46 = vcombine.low %v3113_v23, %v3117_v8  ;;  %v3154_v23 = vld [vmem:[%s18085_s2 + $0x18c8] sm:$0xff] }
 0x2fd   :  { %9095 = vmatpush1.bf16.msra.mxu0 %v11266_v36  ;;  %8770 = vmatprep.subr.bf16.mxu1 %v11281_v0  ;;  %v11314_v36 = vcombine.low %v3106_v34, %v3110_v19  ;;  %v11329_v0 = vcombine.high %v3121_v10, %v3125_v42  ;;  %v11355_v34 = vcombine.high %v3146_v21, %v3150_v29  ;;  %v3158_v8 = vld [vmem:[%s18085_s2 + $0x18e8] sm:$0xff] }
 0x2fe   :  { %9096 = vmatprep.subr.bf16.mxu0 %v11275_v48  ;;  %v11323_v48 = vcombine.high %v3114_v58, %v3118_v18 }
 0x300   :  { %8771 = vmatpush1.bf16.msra.mxu1 %v11280_v38  ;;  %v11328_v38 = vcombine.low %v3121_v10, %v3125_v42  ;;  %v3162_v10 = vld [vmem:[%s18085_s2 + $0x1908] sm:$0xff] }
 0x301   :  { %9097 = vmatpush1.bf16.msra.mxu0 %v11274_v32  ;;  %8772 = vmatprep.subr.bf16.mxu1 %v11289_v52  ;;  %v11322_v32 = vcombine.low %v3114_v58, %v3118_v18  ;;  %v2339_v52 = vmax.f32 %v15173_v57, 0.0  ;;  %v2342_v57 = vmax.f32 %v15555_v45, 0.0  ;;  %v3145_v45 = vld [vmem:[%s18085_s2 + $0x1880] sm:$0xff]  ;;  %v11363_v58 = vcombine.high %v3154_v23, %v3158_v8  ;;  %v3166_v42 = vld [vmem:[%s18085_s2 + $0x1928] sm:$0xff] }
 0x302   :  { %9098 = vmatprep.subr.bf16.mxu0 %v11283_v49  ;;  %v11331_v49 = vcombine.high %v3122_v22, %v3126_v30 }
 0x303   :  { %v15893_v4 = vpack.c.bf16 %v2339_v52, %v2339_v52 }
 0x304   :  { %8773 = vmatpush1.bf16.msra.mxu1 %v11288_v27  ;;  %v11330_v27 = vcombine.low %v3122_v22, %v3126_v30  ;;  %v11371_v22 = vcombine.high %v3162_v10, %v3166_v42 }
 0x305   :  { %9099 = vmatpush1.bf16.msra.mxu0 %v11282_v26  ;;  %8774 = vmatprep.subr.bf16.mxu1 %v11297_v62  ;;  %v3141_v26 = vld [vmem:[%s18085_s2 + $0x1860] sm:$0xff]  ;;  %v11339_v62 = vcombine.high %v3130_v53, %v3134_v50 }
 0x306   :  { %9100 = vmatprep.subr.bf16.mxu0 %v11291_v25  ;;  %v11336_v25 = vcombine.low %v3129_v60, %v3133_v35  ;;  %v11345_v63 = vcombine.high %v3137_v44, %v3141_v26  ;;  %v3170_v60 = vld [vmem:[%s18085_s2 + $0x1948] sm:$0xff] }
 0x307   :  { %v3174_v35 = vld [vmem:[%s18085_s2 + $0x1968] sm:$0xff] }
 0x308   :  { %8775 = vmatpush1.bf16.msra.mxu1 %v11296_v31  ;;  %v15907_v31 = vpack.c.bf16 %v2342_v57, %v2342_v57  ;;  %v3189_v57 = vld [vmem:[%s18085_s2 + $0x19e0] sm:$0xff] }
 0x309   :  { %9101 = vmatpush1.bf16.msra.mxu0 %v11290_v9  ;;  %8776 = vmatprep.subr.bf16.mxu1 %v11305_v51  ;;  %v3149_v9 = vld [vmem:[%s18085_s2 + $0x18a0] sm:$0xff]  ;;  %v11344_v51 = vcombine.low %v3137_v44, %v3141_v26  ;;  %v3182_v44 = vld [vmem:[%s18085_s2 + $0x19a8] sm:$0xff] }
 0x30a   :  { %9102 = vmatprep.subr.bf16.mxu0 %v11299_v61  ;;  %v11338_v61 = vcombine.low %v3130_v53, %v3134_v50  ;;  %v11353_v20 = vcombine.high %v3145_v45, %v3149_v9  ;;  %v3178_v50 = vld [vmem:[%s18085_s2 + $0x1988] sm:$0xff]  ;;  %v3185_v26 = vld [vmem:[%s18085_s2 + $0x19c0] sm:$0xff] }
 0x30c   :  { %8777 = vmatpush1.bf16.msra.mxu1 %v11304_v59  ;;  %v3157_v59 = vld [vmem:[%s18085_s2 + $0x18e0] sm:$0xff] }
 0x30d   :  { %9103 = vmatpush1.bf16.msra.mxu0 %v11298_v33  ;;  %8778 = vmatprep.subr.bf16.mxu1 %v11313_v12  ;;  %v3153_v33 = vld [vmem:[%s18085_s2 + $0x18c0] sm:$0xff]  ;;  %v11352_v12 = vcombine.low %v3145_v45, %v3149_v9 }
 0x30e   :  { %9104 = vmatprep.subr.bf16.mxu0 %v11307_v3  ;;  %v11346_v3 = vcombine.low %v3138_v55, %v3142_v39  ;;  %v11361_v19 = vcombine.high %v3153_v33, %v3157_v59  ;;  %v3186_v55 = vld [vmem:[%s18085_s2 + $0x19c8] sm:$0xff]  ;;  %v3193_v45 = vld [vmem:[%s18085_s2 + $0x1a00] sm:$0xff] }
 0x30f   :  { %v3190_v39 = vld [vmem:[%s18085_s2 + $0x19e8] sm:$0xff]  ;;  %v3197_v9 = vld [vmem:[%s18085_s2 + $0x1a20] sm:$0xff] }
 0x310   :  { %8779 = vmatpush1.bf16.msra.mxu1 %v11312_v15  ;;  %v3165_v15 = vld [vmem:[%s18085_s2 + $0x1920] sm:$0xff] }
 0x311   :  { %9105 = vmatpush1.bf16.msra.mxu0 %v11306_v11  ;;  %8780 = vmatprep.subr.bf16.mxu1 %v11321_v6  ;;  %v3161_v11 = vld [vmem:[%s18085_s2 + $0x1900] sm:$0xff]  ;;  %v11360_v6 = vcombine.low %v3153_v33, %v3157_v59 }
 0x312   :  { %9106 = vmatprep.subr.bf16.mxu0 %v11315_v16  ;;  %v11354_v16 = vcombine.low %v3146_v21, %v3150_v29  ;;  %v11369_v18 = vcombine.high %v3161_v11, %v3165_v15  ;;  %v3194_v21 = vld [vmem:[%s18085_s2 + $0x1a08] sm:$0xff]  ;;  %v3201_v33 = vld [vmem:[%s18085_s2 + $0x1a40] sm:$0xff] }
 0x313   :  { %v3198_v29 = vld [vmem:[%s18085_s2 + $0x1a28] sm:$0xff]  ;;  %v3205_v59 = vld [vmem:[%s18085_s2 + $0x1a60] sm:$0xff] }
 0x314   :  { %8781 = vmatpush1.bf16.msra.mxu1 %v11320_v46  ;;  %v3173_v46 = vld [vmem:[%s18085_s2 + $0x1960] sm:$0xff] }
 0x315   :  { %9107 = vmatpush1.bf16.msra.mxu0 %v11314_v36  ;;  %8782 = vmatprep.subr.bf16.mxu1 %v11329_v0  ;;  %v3169_v36 = vld [vmem:[%s18085_s2 + $0x1940] sm:$0xff]  ;;  %v11368_v0 = vcombine.low %v3161_v11, %v3165_v15 }
 0x316   :  { %9108 = vmatprep.subr.bf16.mxu0 %v11323_v48  ;;  %v11362_v48 = vcombine.low %v3154_v23, %v3158_v8  ;;  %v11377_v30 = vcombine.high %v3169_v36, %v3173_v46  ;;  %v11376_v52 = vcombine.low %v3169_v36, %v3173_v46  ;;  %v3202_v23 = vld [vmem:[%s18085_s2 + $0x1a48] sm:$0xff]  ;;  %v3209_v11 = vld [vmem:[%s18085_s2 + $0x1a80] sm:$0xff] }
 0x317   :  { %v3206_v8 = vld [vmem:[%s18085_s2 + $0x1a68] sm:$0xff]  ;;  %v3213_v15 = vld [vmem:[%s18085_s2 + $0x1aa0] sm:$0xff] }
 0x318   :  { %8783 = vmatpush1.bf16.msra.mxu1 %v11328_v38  ;;  %v3181_v38 = vld [vmem:[%s18085_s2 + $0x19a0] sm:$0xff] }
 0x319   :  { %9109 = vmatpush1.bf16.msra.mxu0 %v11322_v32  ;;  %8793 = vmatprep.subr.bf16.mxu1 %v11337_v5  ;;  %v3177_v32 = vld [vmem:[%s18085_s2 + $0x1980] sm:$0xff]  ;;  %v11379_v5 = vcombine.high %v3170_v60, %v3174_v35 }
 0x31a   :  { %9110 = vmatprep.subr.bf16.mxu0 %v11331_v49  ;;  %v11370_v49 = vcombine.low %v3162_v10, %v3166_v42  ;;  %v11385_v53 = vcombine.high %v3177_v32, %v3181_v38  ;;  %v3210_v10 = vld [vmem:[%s18085_s2 + $0x1a88] sm:$0xff]  ;;  %v3217_v36 = vld [vmem:[%s18085_s2 + $0x1ac0] sm:$0xff] }
 0x31b   :  { %8785 = vmatmul.mubr.bf16.vlgmr.msra.gmra.mrb[0].mxu1 %v15893_v4  ;;  %v3214_v42 = vld [vmem:[%s18085_s2 + $0x1aa8] sm:$0xff]  ;;  %v3221_v46 = vld [vmem:[%s18085_s2 + $0x1ae0] sm:$0xff] }
 0x31c   :  { %8794 = vmatpush1.bf16.msra.mxu1 %v11336_v25  ;;  %8825 = vmatprep.mubr.bf16.mxu1 %v15907_v31  ;;  %v11384_v25 = vcombine.low %v3177_v32, %v3181_v38  ;;  %v3225_v32 = vld [vmem:[%s18085_s2 + $0x1b00] sm:$0xff] }
 0x31d   :  { %9111 = vmatpush1.bf16.msra.mxu0 %v11330_v27  ;;  %8795 = vmatprep.subr.bf16.mxu1 %v11345_v63  ;;  %v11378_v27 = vcombine.low %v3170_v60, %v3174_v35  ;;  %v11393_v63 = vcombine.high %v3185_v26, %v3189_v57  ;;  %v3218_v60 = vld [vmem:[%s18085_s2 + $0x1ac8] sm:$0xff]  ;;  %v3229_v38 = vld [vmem:[%s18085_s2 + $0x1b20] sm:$0xff] }
 0x31e   :  { %9121 = vmatprep.subr.bf16.mxu0 %v11339_v62  ;;  %v11387_v62 = vcombine.high %v3178_v50, %v3182_v44  ;;  %v3222_v35 = vld [vmem:[%s18085_s2 + $0x1ae8] sm:$0xff] }
 0x320   :  { %9113 = vmatmul.mubr.bf16.vlgmr.msra.gmra.mrb[16].mxu0 %v15893_v4  ;;  %8796 = vmatpush1.bf16.msra.mxu1 %v11344_v51  ;;  %v11392_v51 = vcombine.low %v3185_v26, %v3189_v57  ;;  %v3233_v26 = vld [vmem:[%s18085_s2 + $0x1b40] sm:$0xff] }
 0x321   :  { %9122 = vmatpush1.bf16.msra.mxu0 %v11338_v61  ;;  %9153 = vmatprep.mubr.bf16.mxu0 %v15907_v31  ;;  %v11386_v61 = vcombine.low %v3178_v50, %v3182_v44  ;;  %v3226_v50 = vld [vmem:[%s18085_s2 + $0x1b08] sm:$0xff]  ;;  %v3237_v57 = vld [vmem:[%s18085_s2 + $0x1b60] sm:$0xff] }
 0x322   :  { %9123 = vmatprep.subr.bf16.mxu0 %v11347_v54  ;;  %8797 = vmatprep.subr.bf16.mxu1 %v11353_v20  ;;  %v11395_v54 = vcombine.high %v3186_v55, %v3190_v39  ;;  %v11401_v20 = vcombine.high %v3193_v45, %v3197_v9  ;;  %v3230_v44 = vld [vmem:[%s18085_s2 + $0x1b28] sm:$0xff] }
 0x324   :  { %8798 = vmatpush1.bf16.msra.mxu1 %v11352_v12  ;;  %v11400_v12 = vcombine.low %v3193_v45, %v3197_v9  ;;  %v3241_v45 = vld [vmem:[%s18085_s2 + $0x1b80] sm:$0xff] }
 0x325   :  { %9124 = vmatpush1.bf16.msra.mxu0 %v11346_v3  ;;  %8799 = vmatprep.subr.bf16.mxu1 %v11361_v19  ;;  %v11394_v3 = vcombine.low %v3186_v55, %v3190_v39  ;;  %v11409_v19 = vcombine.high %v3201_v33, %v3205_v59  ;;  %v3234_v55 = vld [vmem:[%s18085_s2 + $0x1b48] sm:$0xff]  ;;  %v3245_v9 = vld [vmem:[%s18085_s2 + $0x1ba0] sm:$0xff] }
 0x326   :  { %9125 = vmatprep.subr.bf16.mxu0 %v11355_v34  ;;  %v11403_v34 = vcombine.high %v3194_v21, %v3198_v29  ;;  %v3238_v39 = vld [vmem:[%s18085_s2 + $0x1b68] sm:$0xff] }
 0x328   :  { %8800 = vmatpush1.bf16.msra.mxu1 %v11360_v6  ;;  %v11408_v6 = vcombine.low %v3201_v33, %v3205_v59  ;;  %v3249_v33 = vld [vmem:[%s18085_s2 + $0x1bc0] sm:$0xff] }
 0x329   :  { %9126 = vmatpush1.bf16.msra.mxu0 %v11354_v16  ;;  %8801 = vmatprep.subr.bf16.mxu1 %v11369_v18  ;;  %v11402_v16 = vcombine.low %v3194_v21, %v3198_v29  ;;  %v11417_v18 = vcombine.high %v3209_v11, %v3213_v15  ;;  %v3242_v21 = vld [vmem:[%s18085_s2 + $0x1b88] sm:$0xff]  ;;  %v3253_v59 = vld [vmem:[%s18085_s2 + $0x1be0] sm:$0xff] }
 0x32a   :  { %9127 = vmatprep.subr.bf16.mxu0 %v11363_v58  ;;  %v11411_v58 = vcombine.high %v3202_v23, %v3206_v8  ;;  %v3246_v29 = vld [vmem:[%s18085_s2 + $0x1ba8] sm:$0xff] }
 0x32c   :  { %8802 = vmatpush1.bf16.msra.mxu1 %v11368_v0  ;;  %v11416_v0 = vcombine.low %v3209_v11, %v3213_v15  ;;  %v3257_v11 = vld [vmem:[%s18085_s2 + $0x1c00] sm:$0xff] }
 0x32d   :  { %9128 = vmatpush1.bf16.msra.mxu0 %v11362_v48  ;;  %8803 = vmatprep.subr.bf16.mxu1 %v11377_v30  ;;  %v11410_v48 = vcombine.low %v3202_v23, %v3206_v8  ;;  %v11425_v30 = vcombine.high %v3217_v36, %v3221_v46  ;;  %v3250_v23 = vld [vmem:[%s18085_s2 + $0x1bc8] sm:$0xff]  ;;  %v3261_v15 = vld [vmem:[%s18085_s2 + $0x1c20] sm:$0xff] }
 0x32e   :  { %9129 = vmatprep.subr.bf16.mxu0 %v11371_v22  ;;  %v11419_v22 = vcombine.high %v3210_v10, %v3214_v42  ;;  %v3254_v8 = vld [vmem:[%s18085_s2 + $0x1be8] sm:$0xff] }
 0x330   :  { %8804 = vmatpush1.bf16.msra.mxu1 %v11376_v52  ;;  %v11424_v52 = vcombine.low %v3217_v36, %v3221_v46  ;;  %v3262_v36 = vld [vmem:[%s18085_s2 + $0x1c28] sm:$0xff]  ;;  %v3265_v46 = vld [vmem:[%s18085_s2 + $0x1c40] sm:$0xff] }
 0x331   :  { %9130 = vmatpush1.bf16.msra.mxu0 %v11370_v49  ;;  %8805 = vmatprep.subr.bf16.mxu1 %v11385_v53  ;;  %v11418_v49 = vcombine.low %v3210_v10, %v3214_v42  ;;  %v11433_v53 = vcombine.high %v3225_v32, %v3229_v38  ;;  %v11465_v10 = vcombine.high %v3257_v11, %v3261_v15  ;;  %v3258_v42 = vld [vmem:[%s18085_s2 + $0x1c08] sm:$0xff] }
 0x332   :  { %9131 = vmatprep.subr.bf16.mxu0 %v11379_v5  ;;  %v11427_v5 = vcombine.high %v3218_v60, %v3222_v35 }
 0x334   :  { %8806 = vmatpush1.bf16.msra.mxu1 %v11384_v25  ;;  %v11432_v25 = vcombine.low %v3225_v32, %v3229_v38  ;;  %v3266_v32 = vld [vmem:[%s18085_s2 + $0x1c48] sm:$0xff] }
 0x335   :  { %9132 = vmatpush1.bf16.msra.mxu0 %v11378_v27  ;;  %8807 = vmatprep.subr.bf16.mxu1 %v11393_v63  ;;  %v11426_v27 = vcombine.low %v3218_v60, %v3222_v35  ;;  %v11441_v63 = vcombine.high %v3233_v26, %v3237_v57  ;;  %v3270_v38 = vld [vmem:[%s18085_s2 + $0x1c68] sm:$0xff] }
 0x336   :  { %9133 = vmatprep.subr.bf16.mxu0 %v11387_v62  ;;  %v11435_v62 = vcombine.high %v3226_v50, %v3230_v44 }
 0x338   :  { %8808 = vmatpush1.bf16.msra.mxu1 %v11392_v51  ;;  %v11440_v51 = vcombine.low %v3233_v26, %v3237_v57  ;;  %v3274_v26 = vld [vmem:[%s18085_s2 + $0x1c88] sm:$0xff] }
 0x339   :  { %9134 = vmatpush1.bf16.msra.mxu0 %v11386_v61  ;;  %8809 = vmatprep.subr.bf16.mxu1 %v11401_v20  ;;  %v11434_v61 = vcombine.low %v3226_v50, %v3230_v44  ;;  %v11449_v20 = vcombine.high %v3241_v45, %v3245_v9  ;;  %v11475_v50 = vcombine.high %v3266_v32, %v3270_v38  ;;  %v3278_v57 = vld [vmem:[%s18085_s2 + $0x1ca8] sm:$0xff] }
 0x33a   :  { %9135 = vmatprep.subr.bf16.mxu0 %v11395_v54  ;;  %v11443_v54 = vcombine.high %v3234_v55, %v3238_v39 }
 0x33c   :  { %8810 = vmatpush1.bf16.msra.mxu1 %v11400_v12  ;;  %v11448_v12 = vcombine.low %v3241_v45, %v3245_v9  ;;  %v3282_v45 = vld [vmem:[%s18085_s2 + $0x1cc8] sm:$0xff] }
 0x33d   :  { %9136 = vmatpush1.bf16.msra.mxu0 %v11394_v3  ;;  %8811 = vmatprep.subr.bf16.mxu1 %v11409_v19  ;;  %v11442_v3 = vcombine.low %v3234_v55, %v3238_v39  ;;  %v11457_v19 = vcombine.high %v3249_v33, %v3253_v59  ;;  %v11483_v55 = vcombine.high %v3274_v26, %v3278_v57  ;;  %v3286_v9 = vld [vmem:[%s18085_s2 + $0x1ce8] sm:$0xff] }
 0x33e   :  { %9137 = vmatprep.subr.bf16.mxu0 %v11403_v34  ;;  %v11451_v34 = vcombine.high %v3242_v21, %v3246_v29 }
 0x340   :  { %8812 = vmatpush1.bf16.msra.mxu1 %v11408_v6  ;;  %v11456_v6 = vcombine.low %v3249_v33, %v3253_v59  ;;  %v3290_v33 = vld [vmem:[%s18085_s2 + $0x1d08] sm:$0xff] }
 0x341   :  { %9138 = vmatpush1.bf16.msra.mxu0 %v11402_v16  ;;  %8813 = vmatprep.subr.bf16.mxu1 %v11417_v18  ;;  %v11450_v16 = vcombine.low %v3242_v21, %v3246_v29  ;;  %v2341_v18 = vmax.f32 %v15545_v43, 0.0  ;;  %v2344_v43 = vmax.f32 %v15553_v28, 0.0  ;;  %v3273_v28 = vld [vmem:[%s18085_s2 + $0x1c80] sm:$0xff]  ;;  %v11491_v21 = vcombine.high %v3282_v45, %v3286_v9  ;;  %v3294_v59 = vld [vmem:[%s18085_s2 + $0x1d28] sm:$0xff] }
 0x342   :  { %9139 = vmatprep.subr.bf16.mxu0 %v11411_v58  ;;  %v11459_v58 = vcombine.high %v3250_v23, %v3254_v8 }
 0x343   :  { %v16095_v60 = vpack.c.bf16 %v2341_v18, %v2341_v18 }
 0x344   :  { %8814 = vmatpush1.bf16.msra.mxu1 %v11416_v0  ;;  %v11458_v0 = vcombine.low %v3250_v23, %v3254_v8  ;;  %v11499_v23 = vcombine.high %v3290_v33, %v3294_v59 }
 0x345   :  { %9140 = vmatpush1.bf16.msra.mxu0 %v11410_v48  ;;  %8815 = vmatprep.subr.bf16.mxu1 %v11425_v30  ;;  %v3269_v48 = vld [vmem:[%s18085_s2 + $0x1c60] sm:$0xff]  ;;  %v11467_v30 = vcombine.high %v3258_v42, %v3262_v36 }
 0x346   :  { %9141 = vmatprep.subr.bf16.mxu0 %v11419_v22  ;;  %v11464_v22 = vcombine.low %v3257_v11, %v3261_v15  ;;  %v11473_v35 = vcombine.high %v3265_v46, %v3269_v48  ;;  %v3298_v11 = vld [vmem:[%s18085_s2 + $0x1d48] sm:$0xff] }
 0x347   :  { %v3302_v15 = vld [vmem:[%s18085_s2 + $0x1d68] sm:$0xff] }
 0x348   :  { %8816 = vmatpush1.bf16.msra.mxu1 %v11424_v52  ;;  %v16109_v52 = vpack.c.bf16 %v2344_v43, %v2344_v43  ;;  %v3317_v43 = vld [vmem:[%s18085_s2 + $0x1de0] sm:$0xff] }
 0x349   :  { %9142 = vmatpush1.bf16.msra.mxu0 %v11418_v49  ;;  %8817 = vmatprep.subr.bf16.mxu1 %v11433_v53  ;;  %v3277_v49 = vld [vmem:[%s18085_s2 + $0x1ca0] sm:$0xff]  ;;  %v11472_v53 = vcombine.low %v3265_v46, %v3269_v48  ;;  %v3310_v46 = vld [vmem:[%s18085_s2 + $0x1da8] sm:$0xff] }
 0x34a   :  { %9143 = vmatprep.subr.bf16.mxu0 %v11427_v5  ;;  %v11466_v5 = vcombine.low %v3258_v42, %v3262_v36  ;;  %v11481_v44 = vcombine.high %v3273_v28, %v3277_v49  ;;  %v3306_v36 = vld [vmem:[%s18085_s2 + $0x1d88] sm:$0xff]  ;;  %v3313_v48 = vld [vmem:[%s18085_s2 + $0x1dc0] sm:$0xff] }
 0x34c   :  { %8818 = vmatpush1.bf16.msra.mxu1 %v11432_v25  ;;  %v3285_v25 = vld [vmem:[%s18085_s2 + $0x1ce0] sm:$0xff] }
 0x34d   :  { %9144 = vmatpush1.bf16.msra.mxu0 %v11426_v27  ;;  %8819 = vmatprep.subr.bf16.mxu1 %v11441_v63  ;;  %v3281_v27 = vld [vmem:[%s18085_s2 + $0x1cc0] sm:$0xff]  ;;  %v11480_v63 = vcombine.low %v3273_v28, %v3277_v49 }
 0x34e   :  { %9145 = vmatprep.subr.bf16.mxu0 %v11435_v62  ;;  %v11474_v62 = vcombine.low %v3266_v32, %v3270_v38  ;;  %v11489_v39 = vcombine.high %v3281_v27, %v3285_v25  ;;  %v3314_v32 = vld [vmem:[%s18085_s2 + $0x1dc8] sm:$0xff]  ;;  %v3321_v28 = vld [vmem:[%s18085_s2 + $0x1e00] sm:$0xff] }
 0x34f   :  { %v3318_v38 = vld [vmem:[%s18085_s2 + $0x1de8] sm:$0xff]  ;;  %v3325_v49 = vld [vmem:[%s18085_s2 + $0x1e20] sm:$0xff] }
 0x350   :  { %8820 = vmatpush1.bf16.msra.mxu1 %v11440_v51  ;;  %v3293_v51 = vld [vmem:[%s18085_s2 + $0x1d20] sm:$0xff] }
 0x351   :  { %9146 = vmatpush1.bf16.msra.mxu0 %v11434_v61  ;;  %8821 = vmatprep.subr.bf16.mxu1 %v11449_v20  ;;  %v3289_v61 = vld [vmem:[%s18085_s2 + $0x1d00] sm:$0xff]  ;;  %v11488_v20 = vcombine.low %v3281_v27, %v3285_v25 }
 0x352   :  { %9147 = vmatprep.subr.bf16.mxu0 %v11443_v54  ;;  %v11482_v54 = vcombine.low %v3274_v26, %v3278_v57  ;;  %v11497_v29 = vcombine.high %v3289_v61, %v3293_v51  ;;  %v3322_v26 = vld [vmem:[%s18085_s2 + $0x1e08] sm:$0xff]  ;;  %v3329_v27 = vld [vmem:[%s18085_s2 + $0x1e40] sm:$0xff] }
 0x353   :  { %v3326_v57 = vld [vmem:[%s18085_s2 + $0x1e28] sm:$0xff]  ;;  %v3333_v25 = vld [vmem:[%s18085_s2 + $0x1e60] sm:$0xff] }
 0x354   :  { %8822 = vmatpush1.bf16.msra.mxu1 %v11448_v12  ;;  %v3301_v12 = vld [vmem:[%s18085_s2 + $0x1d60] sm:$0xff] }
 0x355   :  { %9148 = vmatpush1.bf16.msra.mxu0 %v11442_v3  ;;  %8823 = vmatprep.subr.bf16.mxu1 %v11457_v19  ;;  %v3297_v3 = vld [vmem:[%s18085_s2 + $0x1d40] sm:$0xff]  ;;  %v11496_v19 = vcombine.low %v3289_v61, %v3293_v51 }
 0x356   :  { %9149 = vmatprep.subr.bf16.mxu0 %v11451_v34  ;;  %v11490_v34 = vcombine.low %v3282_v45, %v3286_v9  ;;  %v11505_v8 = vcombine.high %v3297_v3, %v3301_v12  ;;  %v11504_v18 = vcombine.low %v3297_v3, %v3301_v12  ;;  %v3330_v45 = vld [vmem:[%s18085_s2 + $0x1e48] sm:$0xff]  ;;  %v3337_v61 = vld [vmem:[%s18085_s2 + $0x1e80] sm:$0xff] }
 0x357   :  { %v3334_v9 = vld [vmem:[%s18085_s2 + $0x1e68] sm:$0xff]  ;;  %v3341_v51 = vld [vmem:[%s18085_s2 + $0x1ea0] sm:$0xff] }
 0x358   :  { %8824 = vmatpush1.bf16.msra.mxu1 %v11456_v6  ;;  %v3309_v6 = vld [vmem:[%s18085_s2 + $0x1da0] sm:$0xff] }
 0x359   :  { %9150 = vmatpush1.bf16.msra.mxu0 %v11450_v16  ;;  %8834 = vmatprep.subr.bf16.mxu1 %v11465_v10  ;;  %v3305_v16 = vld [vmem:[%s18085_s2 + $0x1d80] sm:$0xff]  ;;  %v11507_v10 = vcombine.high %v3298_v11, %v3302_v15 }
 0x35a   :  { %9151 = vmatprep.subr.bf16.mxu0 %v11459_v58  ;;  %v11498_v58 = vcombine.low %v3290_v33, %v3294_v59  ;;  %v11513_v42 = vcombine.high %v3305_v16, %v3309_v6  ;;  %v3338_v33 = vld [vmem:[%s18085_s2 + $0x1e88] sm:$0xff]  ;;  %v3345_v3 = vld [vmem:[%s18085_s2 + $0x1ec0] sm:$0xff] }
 0x35b   :  { %8826 = vmatmul.mubr.bf16.vlgmr.msra.gmra.mrb[0].mxu1 %v16095_v60  ;;  %v3342_v59 = vld [vmem:[%s18085_s2 + $0x1ea8] sm:$0xff]  ;;  %v3349_v12 = vld [vmem:[%s18085_s2 + $0x1ee0] sm:$0xff] }
 0x35c   :  { %8835 = vmatpush1.bf16.msra.mxu1 %v11464_v22  ;;  %8866 = vmatprep.mubr.bf16.mxu1 %v16109_v52  ;;  %v11512_v22 = vcombine.low %v3305_v16, %v3309_v6  ;;  %v3353_v16 = vld [vmem:[%s18085_s2 + $0x1f00] sm:$0xff] }
 0x35d   :  { %9152 = vmatpush1.bf16.msra.mxu0 %v11458_v0  ;;  %8836 = vmatprep.subr.bf16.mxu1 %v11473_v35  ;;  %v11506_v0 = vcombine.low %v3298_v11, %v3302_v15  ;;  %v11521_v35 = vcombine.high %v3313_v48, %v3317_v43  ;;  %v3346_v11 = vld [vmem:[%s18085_s2 + $0x1ec8] sm:$0xff]  ;;  %v3357_v6 = vld [vmem:[%s18085_s2 + $0x1f20] sm:$0xff] }
 0x35e   :  { %9162 = vmatprep.subr.bf16.mxu0 %v11467_v30  ;;  %v11515_v30 = vcombine.high %v3306_v36, %v3310_v46  ;;  %v3350_v15 = vld [vmem:[%s18085_s2 + $0x1ee8] sm:$0xff] }
 0x360   :  { %9154 = vmatmul.mubr.bf16.vlgmr.msra.gmra.mrb[16].mxu0 %v16095_v60  ;;  %8837 = vmatpush1.bf16.msra.mxu1 %v11472_v53  ;;  %v11520_v53 = vcombine.low %v3313_v48, %v3317_v43  ;;  %v3361_v48 = vld [vmem:[%s18085_s2 + $0x1f40] sm:$0xff] }
 0x361   :  { %9163 = vmatpush1.bf16.msra.mxu0 %v11466_v5  ;;  %9194 = vmatprep.mubr.bf16.mxu0 %v16109_v52  ;;  %v11514_v5 = vcombine.low %v3306_v36, %v3310_v46  ;;  %v3354_v36 = vld [vmem:[%s18085_s2 + $0x1f08] sm:$0xff]  ;;  %v3365_v43 = vld [vmem:[%s18085_s2 + $0x1f60] sm:$0xff] }
 0x362   :  { %9164 = vmatprep.subr.bf16.mxu0 %v11475_v50  ;;  %8838 = vmatprep.subr.bf16.mxu1 %v11481_v44  ;;  %v11523_v50 = vcombine.high %v3314_v32, %v3318_v38  ;;  %v11529_v44 = vcombine.high %v3321_v28, %v3325_v49  ;;  %v3358_v46 = vld [vmem:[%s18085_s2 + $0x1f28] sm:$0xff] }
 0x364   :  { %8839 = vmatpush1.bf16.msra.mxu1 %v11480_v63  ;;  %v11528_v63 = vcombine.low %v3321_v28, %v3325_v49  ;;  %v3369_v28 = vld [vmem:[%s18085_s2 + $0x1f80] sm:$0xff] }
 0x365   :  { %9165 = vmatpush1.bf16.msra.mxu0 %v11474_v62  ;;  %8840 = vmatprep.subr.bf16.mxu1 %v11489_v39  ;;  %v11522_v62 = vcombine.low %v3314_v32, %v3318_v38  ;;  %v11537_v39 = vcombine.high %v3329_v27, %v3333_v25  ;;  %v3362_v32 = vld [vmem:[%s18085_s2 + $0x1f48] sm:$0xff]  ;;  %v3373_v49 = vld [vmem:[%s18085_s2 + $0x1fa0] sm:$0xff] }
 0x366   :  { %9166 = vmatprep.subr.bf16.mxu0 %v11483_v55  ;;  %v11531_v55 = vcombine.high %v3322_v26, %v3326_v57  ;;  %v3366_v38 = vld [vmem:[%s18085_s2 + $0x1f68] sm:$0xff] }
 0x368   :  { %8841 = vmatpush1.bf16.msra.mxu1 %v11488_v20  ;;  %v11536_v20 = vcombine.low %v3329_v27, %v3333_v25  ;;  %v3377_v27 = vld [vmem:[%s18085_s2 + $0x1fc0] sm:$0xff] }
 0x369   :  { %9167 = vmatpush1.bf16.msra.mxu0 %v11482_v54  ;;  %8842 = vmatprep.subr.bf16.mxu1 %v11497_v29  ;;  %v11530_v54 = vcombine.low %v3322_v26, %v3326_v57  ;;  %v11545_v29 = vcombine.high %v3337_v61, %v3341_v51  ;;  %v3370_v26 = vld [vmem:[%s18085_s2 + $0x1f88] sm:$0xff]  ;;  %v3381_v25 = vld [vmem:[%s18085_s2 + $0x1fe0] sm:$0xff] }
 0x36a   :  { %9168 = vmatprep.subr.bf16.mxu0 %v11491_v21  ;;  %v11539_v21 = vcombine.high %v3330_v45, %v3334_v9  ;;  %v3374_v57 = vld [vmem:[%s18085_s2 + $0x1fa8] sm:$0xff] }
 0x36c   :  { %8843 = vmatpush1.bf16.msra.mxu1 %v11496_v19  ;;  %v11544_v19 = vcombine.low %v3337_v61, %v3341_v51  ;;  %v2363_v61 = vld [vmem:[%s18085_s2 + $0x10] sm:$0xff] }
 0x36d   :  { %9169 = vmatpush1.bf16.msra.mxu0 %v11490_v34  ;;  %8844 = vmatprep.subr.bf16.mxu1 %v11505_v8  ;;  %v11538_v34 = vcombine.low %v3330_v45, %v3334_v9  ;;  %v11553_v8 = vcombine.high %v3345_v3, %v3349_v12  ;;  %v3378_v45 = vld [vmem:[%s18085_s2 + $0x1fc8] sm:$0xff]  ;;  %v2367_v51 = vld [vmem:[%s18085_s2 + $0x30] sm:$0xff] }
 0x36e   :  { %9170 = vmatprep.subr.bf16.mxu0 %v11499_v23  ;;  %v11547_v23 = vcombine.high %v3338_v33, %v3342_v59  ;;  %v3382_v9 = vld [vmem:[%s18085_s2 + $0x1fe8] sm:$0xff] }
 0x370   :  { %8845 = vmatpush1.bf16.msra.mxu1 %v11504_v18  ;;  %v11552_v18 = vcombine.low %v3345_v3, %v3349_v12  ;;  %v2368_v3 = vld [vmem:[%s18085_s2 + $0x38] sm:$0xff]  ;;  %v2371_v12 = vld [vmem:[%s18085_s2 + $0x50] sm:$0xff] }
 0x371   :  { %9171 = vmatpush1.bf16.msra.mxu0 %v11498_v58  ;;  %8846 = vmatprep.subr.bf16.mxu1 %v11513_v42  ;;  %v11546_v58 = vcombine.low %v3338_v33, %v3342_v59  ;;  %v11561_v42 = vcombine.high %v3353_v16, %v3357_v6  ;;  %v10573_v33 = vcombine.high %v2363_v61, %v2367_v51  ;;  %v2364_v59 = vld [vmem:[%s18085_s2 + $0x18] sm:$0xff] }
 0x372   :  { %9172 = vmatprep.subr.bf16.mxu0 %v11507_v10  ;;  %v11555_v10 = vcombine.high %v3346_v11, %v3350_v15 }
 0x374   :  { %8847 = vmatpush1.bf16.msra.mxu1 %v11512_v22  ;;  %v11560_v22 = vcombine.low %v3353_v16, %v3357_v6  ;;  %v2376_v16 = vld [vmem:[%s18085_s2 + $0x78] sm:$0xff]  ;;  %v2379_v6 = vld [vmem:[%s18085_s2 + $0x90] sm:$0xff] }
 0x375   :  { %9173 = vmatpush1.bf16.msra.mxu0 %v11506_v0  ;;  %8848 = vmatprep.subr.bf16.mxu1 %v11521_v35  ;;  %v11554_v0 = vcombine.low %v3346_v11, %v3350_v15  ;;  %v11569_v35 = vcombine.high %v3361_v48, %v3365_v43  ;;  %v2372_v15 = vld [vmem:[%s18085_s2 + $0x58] sm:$0xff] }
 0x376   :  { %9174 = vmatprep.subr.bf16.mxu0 %v11515_v30  ;;  %v11563_v30 = vcombine.high %v3354_v36, %v3358_v46 }
 0x378   :  { %8849 = vmatpush1.bf16.msra.mxu1 %v11520_v53  ;;  %v11568_v53 = vcombine.low %v3361_v48, %v3365_v43  ;;  %v2384_v48 = vld [vmem:[%s18085_s2 + $0xb8] sm:$0xff]  ;;  %v2387_v43 = vld [vmem:[%s18085_s2 + $0xd0] sm:$0xff] }
 0x379   :  { %9175 = vmatpush1.bf16.msra.mxu0 %v11514_v5  ;;  %8850 = vmatprep.subr.bf16.mxu1 %v11529_v44  ;;  %v11562_v5 = vcombine.low %v3354_v36, %v3358_v46  ;;  %v11577_v44 = vcombine.high %v3369_v28, %v3373_v49  ;;  %v2380_v46 = vld [vmem:[%s18085_s2 + $0x98] sm:$0xff] }
 0x37a   :  { %9176 = vmatprep.subr.bf16.mxu0 %v11523_v50  ;;  %v11571_v50 = vcombine.high %v3362_v32, %v3366_v38 }
 0x37c   :  { %8851 = vmatpush1.bf16.msra.mxu1 %v11528_v63  ;;  %v11576_v63 = vcombine.low %v3369_v28, %v3373_v49  ;;  %v2392_v28 = vld [vmem:[%s18085_s2 + $0xf8] sm:$0xff]  ;;  %v2395_v49 = vld [vmem:[%s18085_s2 + $0x110] sm:$0xff] }
 0x37d   :  { %9177 = vmatpush1.bf16.msra.mxu0 %v11522_v62  ;;  %8852 = vmatprep.subr.bf16.mxu1 %v11537_v39  ;;  %v11570_v62 = vcombine.low %v3362_v32, %v3366_v38  ;;  %v11585_v39 = vcombine.high %v3377_v27, %v3381_v25  ;;  %v2388_v38 = vld [vmem:[%s18085_s2 + $0xd8] sm:$0xff] }
 0x37e   :  { %9178 = vmatprep.subr.bf16.mxu0 %v11531_v55  ;;  %v11579_v55 = vcombine.high %v3370_v26, %v3374_v57 }
 0x380   :  { %8853 = vmatpush1.bf16.msra.mxu1 %v11536_v20  ;;  %v11584_v20 = vcombine.low %v3377_v27, %v3381_v25  ;;  %v2403_v27 = vld [vmem:[%s18085_s2 + $0x150] sm:$0xff] }
 0x381   :  { %9179 = vmatpush1.bf16.msra.mxu0 %v11530_v54  ;;  %8854 = vmatprep.subr.bf16.mxu1 %v11545_v29  ;;  %v11578_v54 = vcombine.low %v3370_v26, %v3374_v57  ;;  %v2343_v29 = vmax.f32 %v15537_v13, 0.0  ;;  %v11586_v13 = vcombine.low %v3378_v45, %v3382_v9  ;;  %v2396_v26 = vld [vmem:[%s18085_s2 + $0x118] sm:$0xff]  ;;  %v2407_v25 = vld [vmem:[%s18085_s2 + $0x170] sm:$0xff] }
 0x382   :  { %9180 = vmatprep.subr.bf16.mxu0 %v11539_v21  ;;  %v11587_v21 = vcombine.high %v3378_v45, %v3382_v9  ;;  %v2400_v57 = vld [vmem:[%s18085_s2 + $0x138] sm:$0xff] }
 0x383   :  { %v2404_v45 = vld [vmem:[%s18085_s2 + $0x158] sm:$0xff] }
 0x384   :  { %8855 = vmatpush1.bf16.msra.mxu1 %v11544_v19  ;;  %v10572_v19 = vcombine.low %v2363_v61, %v2367_v51  ;;  %v2408_v9 = vld [vmem:[%s18085_s2 + $0x178] sm:$0xff]  ;;  %v2411_v61 = vld [vmem:[%s18085_s2 + $0x190] sm:$0xff] }
 0x385   :  { %9181 = vmatpush1.bf16.msra.mxu0 %v11538_v34  ;;  %8856 = vmatprep.subr.bf16.mxu1 %v11553_v8  ;;  %v2375_v34 = vld [vmem:[%s18085_s2 + $0x70] sm:$0xff]  ;;  %v16296_v8 = vpack.c.bf16 %v2343_v29, %v2343_v29 }
 0x386   :  { %9182 = vmatprep.subr.bf16.mxu0 %v11547_v23  ;;  %v10575_v23 = vcombine.high %v2364_v59, %v2368_v3  ;;  %v10581_v11 = vcombine.high %v2371_v12, %v2375_v34  ;;  %v2415_v51 = vld [vmem:[%s18085_s2 + $0x1b0] sm:$0xff] }
 0x387   :  { %v10621_v29 = vcombine.high %v2411_v61, %v2415_v51 }
 0x388   :  { %8857 = vmatpush1.bf16.msra.mxu1 %v11552_v18  ;;  %v10574_v18 = vcombine.low %v2364_v59, %v2368_v3  ;;  %v2416_v59 = vld [vmem:[%s18085_s2 + $0x1b8] sm:$0xff]  ;;  %v2419_v3 = vld [vmem:[%s18085_s2 + $0x1d0] sm:$0xff] }
 0x389   :  { %9183 = vmatpush1.bf16.msra.mxu0 %v11546_v58  ;;  %8858 = vmatprep.subr.bf16.mxu1 %v11561_v42  ;;  %v2383_v58 = vld [vmem:[%s18085_s2 + $0xb0] sm:$0xff]  ;;  %v10583_v42 = vcombine.high %v2372_v15, %v2376_v16 }
 0x38a   :  { %9184 = vmatprep.subr.bf16.mxu0 %v11555_v10  ;;  %v10580_v10 = vcombine.low %v2371_v12, %v2375_v34  ;;  %v10589_v36 = vcombine.high %v2379_v6, %v2383_v58  ;;  %v2423_v12 = vld [vmem:[%s18085_s2 + $0x1f0] sm:$0xff]  ;;  %v10614_v34 = vcombine.low %v2404_v45, %v2408_v9 }
 0x38c   :  { %8859 = vmatpush1.bf16.msra.mxu1 %v11560_v22  ;;  %v10582_v22 = vcombine.low %v2372_v15, %v2376_v16  ;;  %v2424_v15 = vld [vmem:[%s18085_s2 + $0x1f8] sm:$0xff]  ;;  %v2427_v16 = vld [vmem:[%s18085_s2 + $0x210] sm:$0xff] }
 0x38d   :  { %9185 = vmatpush1.bf16.msra.mxu0 %v11554_v0  ;;  %8860 = vmatprep.subr.bf16.mxu1 %v11569_v35  ;;  %v2391_v0 = vld [vmem:[%s18085_s2 + $0xf0] sm:$0xff]  ;;  %v10591_v35 = vcombine.high %v2380_v46, %v2384_v48 }
 0x38e   :  { %9186 = vmatprep.subr.bf16.mxu0 %v11563_v30  ;;  %v10588_v30 = vcombine.low %v2379_v6, %v2383_v58  ;;  %v10597_v32 = vcombine.high %v2387_v43, %v2391_v0  ;;  %v2431_v6 = vld [vmem:[%s18085_s2 + $0x230] sm:$0xff] }
 0x390   :  { %8861 = vmatpush1.bf16.msra.mxu1 %v11568_v53  ;;  %v10596_v53 = vcombine.low %v2387_v43, %v2391_v0  ;;  %v2439_v43 = vld [vmem:[%s18085_s2 + $0x270] sm:$0xff] }
 0x391   :  { %9187 = vmatpush1.bf16.msra.mxu0 %v11562_v5  ;;  %8862 = vmatprep.subr.bf16.mxu1 %v11577_v44  ;;  %v10590_v5 = vcombine.low %v2380_v46, %v2384_v48  ;;  %v2432_v46 = vld [vmem:[%s18085_s2 + $0x238] sm:$0xff]  ;;  %v2435_v48 = vld [vmem:[%s18085_s2 + $0x250] sm:$0xff] }
 0x392   :  { %9188 = vmatprep.subr.bf16.mxu0 %v11571_v50  ;;  %v10599_v50 = vcombine.high %v2388_v38, %v2392_v28 }
 0x394   :  { %8863 = vmatpush1.bf16.msra.mxu1 %v11576_v63 }
 0x395   :  { %9189 = vmatpush1.bf16.msra.mxu0 %v11570_v62  ;;  %8864 = vmatprep.subr.bf16.mxu1 %v11585_v39  ;;  %v10598_v62 = vcombine.low %v2388_v38, %v2392_v28  ;;  %v10613_v39 = vcombine.high %v2403_v27, %v2407_v25  ;;  %v2440_v38 = vld [vmem:[%s18085_s2 + $0x278] sm:$0xff]  ;;  %v2443_v28 = vld [vmem:[%s18085_s2 + $0x290] sm:$0xff] }
 0x396   :  { %9190 = vmatprep.subr.bf16.mxu0 %v11579_v55  ;;  %v10607_v55 = vcombine.high %v2396_v26, %v2400_v57 }
 0x398   :  { %8865 = vmatpush1.bf16.msra.mxu1 %v11584_v20  ;;  %v10612_v20 = vcombine.low %v2403_v27, %v2407_v25  ;;  %v2455_v27 = vld [vmem:[%s18085_s2 + $0x2f0] sm:$0xff] }
 0x399   :  { %9191 = vmatpush1.bf16.msra.mxu0 %v11578_v54  ;;  %9203 = vmatprep.subr.bf16.mxu1 %v10573_v33  ;;  %v10606_v54 = vcombine.low %v2396_v26, %v2400_v57  ;;  %v2412_v33 = vld [vmem:[%s18085_s2 + $0x198] sm:$0xff]  ;;  %v2451_v57 = vld [vmem:[%s18085_s2 + $0x2d0] sm:$0xff] }
 0x39a   :  { %9192 = vmatprep.subr.bf16.mxu0 %v11587_v21  ;;  %v10615_v21 = vcombine.high %v2404_v45, %v2408_v9  ;;  %v10622_v58 = vcombine.low %v2412_v33, %v2416_v59  ;;  %v2448_v26 = vld [vmem:[%s18085_s2 + $0x2b8] sm:$0xff]  ;;  %v2459_v9 = vld [vmem:[%s18085_s2 + $0x310] sm:$0xff] }
 0x39b   :  { %8867 = vmatmul.mubr.bf16.vlgmr.msra.gmra.mrb[0].mxu1 %v16296_v8  ;;  %v2456_v45 = vld [vmem:[%s18085_s2 + $0x2f8] sm:$0xff] }
 0x39c   :  { %9204 = vmatpush1.bf16.msra.mxu1 %v10572_v19  ;;  %9235 = vmatprep.mubr.bf16.mxu1 %v14851_v56  ;;  %v10623_v19 = vcombine.high %v2412_v33, %v2416_v59  ;;  %v2464_v33 = vld [vmem:[%s18085_s2 + $0x338] sm:$0xff]  ;;  %v2467_v59 = vld [vmem:[%s18085_s2 + $0x350] sm:$0xff] }
 0x39d   :  { %9193 = vmatpush1.bf16.msra.mxu0 %v11586_v13  ;;  %9205 = vmatprep.subr.bf16.mxu1 %v10581_v11  ;;  %v10620_v13 = vcombine.low %v2411_v61, %v2415_v51  ;;  %v2420_v11 = vld [vmem:[%s18085_s2 + $0x1d8] sm:$0xff]  ;;  %v2463_v61 = vld [vmem:[%s18085_s2 + $0x330] sm:$0xff] }
 0x39e   :  { %9531 = vmatprep.subr.bf16.mxu0 %v10575_v23  ;;  %v10629_v23 = vcombine.high %v2419_v3, %v2423_v12  ;;  %v10630_v0 = vcombine.low %v2420_v11, %v2424_v15 }
 0x3a0   :  { %9195 = vmatmul.mubr.bf16.vlgmr.msra.gmra.mrb[16].mxu0 %v16296_v8  ;;  %9206 = vmatpush1.bf16.msra.mxu1 %v10580_v10  ;;  %v10631_v10 = vcombine.high %v2420_v11, %v2424_v15  ;;  %v2472_v11 = vld [vmem:[%s18085_s2 + $0x378] sm:$0xff]  ;;  %v2475_v15 = vld [vmem:[%s18085_s2 + $0x390] sm:$0xff] }
 0x3a1   :  { %9532 = vmatpush1.bf16.msra.mxu0 %v10574_v18  ;;  %9563 = vmatprep.mubr.bf16.mxu0 %v14851_v56  ;;  %v2399_v56 = vld [vmem:[%s18085_s2 + $0x130] sm:$0xff]  ;;  %v10628_v18 = vcombine.low %v2419_v3, %v2423_v12 }
 0x3a2   :  { %9533 = vmatprep.subr.bf16.mxu0 %v10583_v42  ;;  %9207 = vmatprep.subr.bf16.mxu1 %v10589_v36  ;;  %v10605_v44 = vcombine.high %v2395_v49, %v2399_v56  ;;  %v10604_v63 = vcombine.low %v2395_v49, %v2399_v56  ;;  %v10637_v42 = vcombine.high %v2427_v16, %v2431_v6  ;;  %v2428_v36 = vld [vmem:[%s18085_s2 + $0x218] sm:$0xff]  ;;  %v2447_v49 = vld [vmem:[%s18085_s2 + $0x2b0] sm:$0xff] }
 0x3a3   :  { %v10638_v56 = vcombine.low %v2428_v36, %v2432_v46  ;;  %v2471_v3 = vld [vmem:[%s18085_s2 + $0x370] sm:$0xff] }
 0x3a4   :  { %9208 = vmatpush1.bf16.msra.mxu1 %v10588_v30  ;;  %v10639_v30 = vcombine.high %v2428_v36, %v2432_v46  ;;  %v2480_v36 = vld [vmem:[%s18085_s2 + $0x3b8] sm:$0xff]  ;;  %v2483_v46 = vld [vmem:[%s18085_s2 + $0x3d0] sm:$0xff] }
 0x3a5   :  { %9534 = vmatpush1.bf16.msra.mxu0 %v10582_v22  ;;  %9209 = vmatprep.subr.bf16.mxu1 %v10597_v32  ;;  %v10636_v22 = vcombine.low %v2427_v16, %v2431_v6  ;;  %v2436_v32 = vld [vmem:[%s18085_s2 + $0x258] sm:$0xff]  ;;  %v2479_v16 = vld [vmem:[%s18085_s2 + $0x3b0] sm:$0xff] }
 0x3a6   :  { %9535 = vmatprep.subr.bf16.mxu0 %v10591_v35  ;;  %v10645_v35 = vcombine.high %v2435_v48, %v2439_v43  ;;  %v10646_v25 = vcombine.low %v2436_v32, %v2440_v38 }
 0x3a8   :  { %9210 = vmatpush1.bf16.msra.mxu1 %v10596_v53  ;;  %v10647_v53 = vcombine.high %v2436_v32, %v2440_v38  ;;  %v2488_v32 = vld [vmem:[%s18085_s2 + $0x3f8] sm:$0xff]  ;;  %v2491_v38 = vld [vmem:[%s18085_s2 + $0x410] sm:$0xff] }
 0x3a9   :  { %9536 = vmatpush1.bf16.msra.mxu0 %v10590_v5  ;;  %9211 = vmatprep.subr.bf16.mxu1 %v10605_v44  ;;  %v10644_v5 = vcombine.low %v2435_v48, %v2439_v43  ;;  %v2444_v44 = vld [vmem:[%s18085_s2 + $0x298] sm:$0xff]  ;;  %v2487_v48 = vld [vmem:[%s18085_s2 + $0x3f0] sm:$0xff] }
 0x3aa   :  { %9537 = vmatprep.subr.bf16.mxu0 %v10599_v50  ;;  %v10653_v50 = vcombine.high %v2443_v28, %v2447_v49  ;;  %v10654_v51 = vcombine.low %v2444_v44, %v2448_v26 }
 0x3ac   :  { %9212 = vmatpush1.bf16.msra.mxu1 %v10604_v63  ;;  %v10655_v63 = vcombine.high %v2444_v44, %v2448_v26  ;;  %v2496_v44 = vld [vmem:[%s18085_s2 + $0x438] sm:$0xff]  ;;  %v2499_v26 = vld [vmem:[%s18085_s2 + $0x450] sm:$0xff] }
 0x3ad   :  { %9538 = vmatpush1.bf16.msra.mxu0 %v10598_v62  ;;  %9213 = vmatprep.subr.bf16.mxu1 %v10613_v39  ;;  %v10652_v62 = vcombine.low %v2443_v28, %v2447_v49  ;;  %v2452_v39 = vld [vmem:[%s18085_s2 + $0x2d8] sm:$0xff]  ;;  %v2495_v28 = vld [vmem:[%s18085_s2 + $0x430] sm:$0xff] }
 0x3ae   :  { %9539 = vmatprep.subr.bf16.mxu0 %v10607_v55  ;;  %v10661_v55 = vcombine.high %v2451_v57, %v2455_v27  ;;  %v10662_v12 = vcombine.low %v2452_v39, %v2456_v45 }
 0x3b0   :  { %9214 = vmatpush1.bf16.msra.mxu1 %v10612_v20  ;;  %v10663_v20 = vcombine.high %v2452_v39, %v2456_v45  ;;  %v2504_v39 = vld [vmem:[%s18085_s2 + $0x478] sm:$0xff]  ;;  %v2507_v45 = vld [vmem:[%s18085_s2 + $0x490] sm:$0xff] }
 0x3b1   :  { %9540 = vmatpush1.bf16.msra.mxu0 %v10606_v54  ;;  %9215 = vmatprep.subr.bf16.mxu1 %v10621_v29  ;;  %v10660_v54 = vcombine.low %v2451_v57, %v2455_v27  ;;  %v2460_v29 = vld [vmem:[%s18085_s2 + $0x318] sm:$0xff]  ;;  %v2503_v57 = vld [vmem:[%s18085_s2 + $0x470] sm:$0xff] }
 0x3b2   :  { %9541 = vmatprep.subr.bf16.mxu0 %v10615_v21  ;;  %v10669_v21 = vcombine.high %v2459_v9, %v2463_v61  ;;  %v10670_v6 = vcombine.low %v2460_v29, %v2464_v33 }
 0x3b4   :  { %9216 = vmatpush1.bf16.msra.mxu1 %v10620_v13  ;;  %v10671_v13 = vcombine.high %v2460_v29, %v2464_v33  ;;  %v2512_v29 = vld [vmem:[%s18085_s2 + $0x4b8] sm:$0xff]  ;;  %v2515_v33 = vld [vmem:[%s18085_s2 + $0x4d0] sm:$0xff] }
 0x3b5   :  { %9542 = vmatpush1.bf16.msra.mxu0 %v10614_v34  ;;  %9217 = vmatprep.subr.bf16.mxu1 %v10629_v23  ;;  %v10668_v34 = vcombine.low %v2459_v9, %v2463_v61  ;;  %v2468_v23 = vld [vmem:[%s18085_s2 + $0x358] sm:$0xff]  ;;  %v2511_v9 = vld [vmem:[%s18085_s2 + $0x4b0] sm:$0xff] }
 0x3b6   :  { %9543 = vmatprep.subr.bf16.mxu0 %v10623_v19  ;;  %v10677_v19 = vcombine.high %v2467_v59, %v2471_v3  ;;  %v10678_v43 = vcombine.low %v2468_v23, %v2472_v11 }
 0x3b8   :  { %9218 = vmatpush1.bf16.msra.mxu1 %v10628_v18  ;;  %v10679_v18 = vcombine.high %v2468_v23, %v2472_v11  ;;  %v2523_v23 = vld [vmem:[%s18085_s2 + $0x510] sm:$0xff] }
 0x3b9   :  { %9544 = vmatpush1.bf16.msra.mxu0 %v10622_v58  ;;  %9219 = vmatprep.subr.bf16.mxu1 %v10637_v42  ;;  %v10676_v58 = vcombine.low %v2467_v59, %v2471_v3  ;;  %v2476_v42 = vld [vmem:[%s18085_s2 + $0x398] sm:$0xff]  ;;  %v2519_v59 = vld [vmem:[%s18085_s2 + $0x4f0] sm:$0xff] }
 0x3ba   :  { %9545 = vmatprep.subr.bf16.mxu0 %v10631_v10  ;;  %v10685_v10 = vcombine.high %v2475_v15, %v2479_v16  ;;  %v10686_v49 = vcombine.low %v2476_v42, %v2480_v36 }
 0x3bc   :  { %9220 = vmatpush1.bf16.msra.mxu1 %v10636_v22  ;;  %v10687_v22 = vcombine.high %v2476_v42, %v2480_v36  ;;  %v2535_v42 = vld [vmem:[%s18085_s2 + $0x570] sm:$0xff] }
 0x3bd   :  { %9546 = vmatpush1.bf16.msra.mxu0 %v10630_v0  ;;  %9221 = vmatprep.subr.bf16.mxu1 %v10645_v35  ;;  %v10684_v0 = vcombine.low %v2475_v15, %v2479_v16  ;;  %v2484_v35 = vld [vmem:[%s18085_s2 + $0x3d8] sm:$0xff]  ;;  %v10724_v15 = vcombine.low %v2515_v33, %v2519_v59 }
 0x3be   :  { %9547 = vmatprep.subr.bf16.mxu0 %v10639_v30  ;;  %v10693_v30 = vcombine.high %v2483_v46, %v2487_v48  ;;  %v10694_v27 = vcombine.low %v2484_v35, %v2488_v32 }
 0x3c0   :  { %9222 = vmatpush1.bf16.msra.mxu1 %v10644_v5  ;;  %v10695_v5 = vcombine.high %v2484_v35, %v2488_v32  ;;  %v2543_v35 = vld [vmem:[%s18085_s2 + $0x5b0] sm:$0xff] }
 0x3c1   :  { %9548 = vmatpush1.bf16.msra.mxu0 %v10638_v56  ;;  %9223 = vmatprep.subr.bf16.mxu1 %v10653_v50  ;;  %v10692_v56 = vcombine.low %v2483_v46, %v2487_v48  ;;  %v2492_v50 = vld [vmem:[%s18085_s2 + $0x418] sm:$0xff] }
 0x3c2   :  { %9549 = vmatprep.subr.bf16.mxu0 %v10647_v53  ;;  %v10701_v53 = vcombine.high %v2491_v38, %v2495_v28  ;;  %v10702_v61 = vcombine.low %v2492_v50, %v2496_v44 }
 0x3c4   :  { %9224 = vmatpush1.bf16.msra.mxu1 %v10652_v62  ;;  %v10703_v62 = vcombine.high %v2492_v50, %v2496_v44  ;;  %v2551_v50 = vld [vmem:[%s18085_s2 + $0x5f0] sm:$0xff] }
 0x3c5   :  { %9550 = vmatpush1.bf16.msra.mxu0 %v10646_v25  ;;  %9225 = vmatprep.subr.bf16.mxu1 %v10661_v55  ;;  %v10700_v25 = vcombine.low %v2491_v38, %v2495_v28  ;;  %v2500_v55 = vld [vmem:[%s18085_s2 + $0x458] sm:$0xff] }
 0x3c6   :  { %9551 = vmatprep.subr.bf16.mxu0 %v10655_v63  ;;  %v10709_v63 = vcombine.high %v2499_v26, %v2503_v57  ;;  %v10710_v3 = vcombine.low %v2500_v55, %v2504_v39 }
 0x3c8   :  { %9226 = vmatpush1.bf16.msra.mxu1 %v10660_v54  ;;  %v10711_v54 = vcombine.high %v2500_v55, %v2504_v39  ;;  %v2559_v55 = vld [vmem:[%s18085_s2 + $0x630] sm:$0xff] }
 0x3c9   :  { %9552 = vmatpush1.bf16.msra.mxu0 %v10654_v51  ;;  %9227 = vmatprep.subr.bf16.mxu1 %v10669_v21  ;;  %v10708_v51 = vcombine.low %v2499_v26, %v2503_v57  ;;  %v2508_v21 = vld [vmem:[%s18085_s2 + $0x498] sm:$0xff] }
 0x3ca   :  { %9553 = vmatprep.subr.bf16.mxu0 %v10663_v20  ;;  %v10717_v20 = vcombine.high %v2507_v45, %v2511_v9  ;;  %v10718_v11 = vcombine.low %v2508_v21, %v2512_v29 }
 0x3cc   :  { %9228 = vmatpush1.bf16.msra.mxu1 %v10668_v34  ;;  %v10719_v34 = vcombine.high %v2508_v21, %v2512_v29  ;;  %v2567_v21 = vld [vmem:[%s18085_s2 + $0x670] sm:$0xff] }
 0x3cd   :  { %9554 = vmatpush1.bf16.msra.mxu0 %v10662_v12  ;;  %9229 = vmatprep.subr.bf16.mxu1 %v10677_v19  ;;  %v10716_v12 = vcombine.low %v2507_v45, %v2511_v9  ;;  %v2520_v19 = vld [vmem:[%s18085_s2 + $0x4f8] sm:$0xff] }
 0x3ce   :  { %9555 = vmatprep.subr.bf16.mxu0 %v10671_v13  ;;  %v10725_v13 = vcombine.high %v2515_v33, %v2519_v59 }
 0x3d0   :  { %9230 = vmatpush1.bf16.msra.mxu1 %v10676_v58  ;;  %v2524_v58 = vld [vmem:[%s18085_s2 + $0x518] sm:$0xff] }
 0x3d1   :  { %9556 = vmatpush1.bf16.msra.mxu0 %v10670_v6  ;;  %9231 = vmatprep.subr.bf16.mxu1 %v10685_v10  ;;  %v2531_v10 = vld [vmem:[%s18085_s2 + $0x550] sm:$0xff] }
 0x3d2   :  { %9557 = vmatprep.subr.bf16.mxu0 %v10679_v18  ;;  %v2528_v18 = vld [vmem:[%s18085_s2 + $0x538] sm:$0xff]  ;;  %v10740_v38 = vcombine.low %v2531_v10, %v2535_v42 }
 0x3d3   :  { %v10735_v48 = vcombine.high %v2524_v58, %v2528_v18  ;;  %v10734_v32 = vcombine.low %v2524_v58, %v2528_v18  ;;  %v2583_v58 = vld [vmem:[%s18085_s2 + $0x6f0] sm:$0xff] }
 0x3d4   :  { %9232 = vmatpush1.bf16.msra.mxu1 %v10684_v0  ;;  %v2532_v0 = vld [vmem:[%s18085_s2 + $0x558] sm:$0xff] }
 0x3d5   :  { %9558 = vmatpush1.bf16.msra.mxu0 %v10678_v43  ;;  %9233 = vmatprep.subr.bf16.mxu1 %v10693_v30  ;;  %v10741_v43 = vcombine.high %v2531_v10, %v2535_v42  ;;  %v2539_v30 = vld [vmem:[%s18085_s2 + $0x590] sm:$0xff] }
 0x3d6   :  { %9559 = vmatprep.subr.bf16.mxu0 %v10687_v22  ;;  %v2536_v22 = vld [vmem:[%s18085_s2 + $0x578] sm:$0xff]  ;;  %v10748_v26 = vcombine.low %v2539_v30, %v2543_v35 }
 0x3d7   :  { %v10743_v28 = vcombine.high %v2532_v0, %v2536_v22  ;;  %v10742_v44 = vcombine.low %v2532_v0, %v2536_v22  ;;  %v2591_v0 = vld [vmem:[%s18085_s2 + $0x730] sm:$0xff] }
 0x3d8   :  { %9234 = vmatpush1.bf16.msra.mxu1 %v10692_v56  ;;  %v2540_v56 = vld [vmem:[%s18085_s2 + $0x598] sm:$0xff] }
 0x3d9   :  { %9560 = vmatpush1.bf16.msra.mxu0 %v10686_v49  ;;  %9244 = vmatprep.subr.bf16.mxu1 %v10701_v53  ;;  %v10749_v49 = vcombine.high %v2539_v30, %v2543_v35  ;;  %v2547_v53 = vld [vmem:[%s18085_s2 + $0x5d0] sm:$0xff] }
 0x3da   :  { %9561 = vmatprep.subr.bf16.mxu0 %v10695_v5  ;;  %v2544_v5 = vld [vmem:[%s18085_s2 + $0x5b8] sm:$0xff]  ;;  %v10756_v45 = vcombine.low %v2547_v53, %v2551_v50 }
 0x3db   :  { %9236 = vmatmul.mubr.bf16.vlgmr.msra.gmra.mrb[4].mxu1 %v14865_v37  ;;  %v10751_v57 = vcombine.high %v2540_v56, %v2544_v5  ;;  %v10750_v39 = vcombine.low %v2540_v56, %v2544_v5  ;;  %v2599_v56 = vld [vmem:[%s18085_s2 + $0x770] sm:$0xff] }
 0x3dc   :  { %9245 = vmatpush1.bf16.msra.mxu1 %v10700_v25  ;;  %9276 = vmatprep.mubr.bf16.mxu1 %v14868_v17  ;;  %v2548_v25 = vld [vmem:[%s18085_s2 + $0x5d8] sm:$0xff] }
 0x3dd   :  { %9562 = vmatpush1.bf16.msra.mxu0 %v10694_v27  ;;  %9246 = vmatprep.subr.bf16.mxu1 %v10709_v63  ;;  %v10757_v27 = vcombine.high %v2547_v53, %v2551_v50  ;;  %v2555_v63 = vld [vmem:[%s18085_s2 + $0x610] sm:$0xff] }
 0x3de   :  { %9572 = vmatprep.subr.bf16.mxu0 %v10703_v62  ;;  %v2552_v62 = vld [vmem:[%s18085_s2 + $0x5f8] sm:$0xff]  ;;  %v10764_v33 = vcombine.low %v2555_v63, %v2559_v55 }
 0x3df   :  { %v10759_v9 = vcombine.high %v2548_v25, %v2552_v62  ;;  %v10758_v29 = vcombine.low %v2548_v25, %v2552_v62  ;;  %v2607_v25 = vld [vmem:[%s18085_s2 + $0x7b0] sm:$0xff] }
 0x3e0   :  { %9564 = vmatmul.mubr.bf16.vlgmr.msra.gmra.mrb[20].mxu0 %v14865_v37  ;;  %9247 = vmatpush1.bf16.msra.mxu1 %v10708_v51  ;;  %v2516_v37 = vld [vmem:[%s18085_s2 + $0x4d8] sm:$0xff] }
 0x3e1   :  { %9573 = vmatpush1.bf16.msra.mxu0 %v10702_v61  ;;  %9604 = vmatprep.mubr.bf16.mxu0 %v14868_v17  ;;  %v2527_v17 = vld [vmem:[%s18085_s2 + $0x530] sm:$0xff]  ;;  %v10727_v16 = vcombine.high %v2516_v37, %v2520_v19  ;;  %v10726_v36 = vcombine.low %v2516_v37, %v2520_v19  ;;  %v10765_v61 = vcombine.high %v2555_v63, %v2559_v55  ;;  %v2556_v51 = vld [vmem:[%s18085_s2 + $0x618] sm:$0xff] }
 0x3e2   :  { %9574 = vmatprep.subr.bf16.mxu0 %v10711_v54  ;;  %9248 = vmatprep.subr.bf16.mxu1 %v10717_v20  ;;  %v10733_v6 = vcombine.high %v2523_v23, %v2527_v17  ;;  %v10732_v46 = vcombine.low %v2523_v23, %v2527_v17  ;;  %v2560_v54 = vld [vmem:[%s18085_s2 + $0x638] sm:$0xff]  ;;  %v2563_v20 = vld [vmem:[%s18085_s2 + $0x650] sm:$0xff] }
 0x3e3   :  { %v10767_v59 = vcombine.high %v2556_v51, %v2560_v54  ;;  %v2575_v37 = vld [vmem:[%s18085_s2 + $0x6b0] sm:$0xff]  ;;  %v10766_v19 = vcombine.low %v2556_v51, %v2560_v54  ;;  %v10772_v23 = vcombine.low %v2563_v20, %v2567_v21 }
 0x3e4   :  { %9249 = vmatpush1.bf16.msra.mxu1 %v10716_v12  ;;  %v2564_v12 = vld [vmem:[%s18085_s2 + $0x658] sm:$0xff]  ;;  %v2615_v51 = vld [vmem:[%s18085_s2 + $0x7f0] sm:$0xff] }
 0x3e5   :  { %9575 = vmatpush1.bf16.msra.mxu0 %v10710_v3  ;;  %9250 = vmatprep.subr.bf16.mxu1 %v10725_v13  ;;  %v10773_v3 = vcombine.high %v2563_v20, %v2567_v21  ;;  %v2571_v13 = vld [vmem:[%s18085_s2 + $0x690] sm:$0xff] }
 0x3e6   :  { %9576 = vmatprep.subr.bf16.mxu0 %v10719_v34  ;;  %v2568_v34 = vld [vmem:[%s18085_s2 + $0x678] sm:$0xff]  ;;  %v10780_v10 = vcombine.low %v2571_v13, %v2575_v37 }
 0x3e7   :  { %v10775_v17 = vcombine.high %v2564_v12, %v2568_v34  ;;  %v10774_v18 = vcombine.low %v2564_v12, %v2568_v34  ;;  %v2623_v12 = vld [vmem:[%s18085_s2 + $0x830] sm:$0xff] }
 0x3e8   :  { %9251 = vmatpush1.bf16.msra.mxu1 %v10724_v15  ;;  %v2572_v15 = vld [vmem:[%s18085_s2 + $0x698] sm:$0xff] }
 0x3e9   :  { %9577 = vmatpush1.bf16.msra.mxu0 %v10718_v11  ;;  %9252 = vmatprep.subr.bf16.mxu1 %v10733_v6  ;;  %v10781_v11 = vcombine.high %v2571_v13, %v2575_v37  ;;  %v2579_v6 = vld [vmem:[%s18085_s2 + $0x6d0] sm:$0xff] }
 0x3ea   :  { %9578 = vmatprep.subr.bf16.mxu0 %v10727_v16  ;;  %v2576_v16 = vld [vmem:[%s18085_s2 + $0x6b8] sm:$0xff]  ;;  %v10788_v30 = vcombine.low %v2579_v6, %v2583_v58 }
 0x3eb   :  { %v10783_v42 = vcombine.high %v2572_v15, %v2576_v16  ;;  %v10782_v22 = vcombine.low %v2572_v15, %v2576_v16  ;;  %v2631_v15 = vld [vmem:[%s18085_s2 + $0x870] sm:$0xff] }
 0x3ec   :  { %9253 = vmatpush1.bf16.msra.mxu1 %v10732_v46  ;;  %v2580_v46 = vld [vmem:[%s18085_s2 + $0x6d8] sm:$0xff] }
 0x3ed   :  { %9579 = vmatpush1.bf16.msra.mxu0 %v10726_v36  ;;  %9254 = vmatprep.subr.bf16.mxu1 %v10741_v43  ;;  %v10789_v36 = vcombine.high %v2579_v6, %v2583_v58  ;;  %v2587_v43 = vld [vmem:[%s18085_s2 + $0x710] sm:$0xff] }
 0x3ee   :  { %9580 = vmatprep.subr.bf16.mxu0 %v10735_v48  ;;  %v2584_v48 = vld [vmem:[%s18085_s2 + $0x6f8] sm:$0xff]  ;;  %v10796_v53 = vcombine.low %v2587_v43, %v2591_v0 }
 0x3ef   :  { %v10791_v35 = vcombine.high %v2580_v46, %v2584_v48  ;;  %v10790_v5 = vcombine.low %v2580_v46, %v2584_v48  ;;  %v2639_v46 = vld [vmem:[%s18085_s2 + $0x8b0] sm:$0xff] }
 0x3f0   :  { %9255 = vmatpush1.bf16.msra.mxu1 %v10740_v38  ;;  %v2588_v38 = vld [vmem:[%s18085_s2 + $0x718] sm:$0xff] }
 0x3f1   :  { %9581 = vmatpush1.bf16.msra.mxu0 %v10734_v32  ;;  %9256 = vmatprep.subr.bf16.mxu1 %v10749_v49  ;;  %v10797_v32 = vcombine.high %v2587_v43, %v2591_v0  ;;  %v2595_v49 = vld [vmem:[%s18085_s2 + $0x750] sm:$0xff] }
 0x3f2   :  { %9582 = vmatprep.subr.bf16.mxu0 %v10743_v28  ;;  %v2592_v28 = vld [vmem:[%s18085_s2 + $0x738] sm:$0xff]  ;;  %v10804_v63 = vcombine.low %v2595_v49, %v2599_v56 }
 0x3f3   :  { %v10799_v50 = vcombine.high %v2588_v38, %v2592_v28  ;;  %v10798_v62 = vcombine.low %v2588_v38, %v2592_v28  ;;  %v2647_v38 = vld [vmem:[%s18085_s2 + $0x8f0] sm:$0xff] }
 0x3f4   :  { %9257 = vmatpush1.bf16.msra.mxu1 %v10748_v26  ;;  %v2596_v26 = vld [vmem:[%s18085_s2 + $0x758] sm:$0xff] }
 0x3f5   :  { %9583 = vmatpush1.bf16.msra.mxu0 %v10742_v44  ;;  %9258 = vmatprep.subr.bf16.mxu1 %v10757_v27  ;;  %v10805_v44 = vcombine.high %v2595_v49, %v2599_v56  ;;  %v2603_v27 = vld [vmem:[%s18085_s2 + $0x790] sm:$0xff] }
 0x3f6   :  { %9584 = vmatprep.subr.bf16.mxu0 %v10751_v57  ;;  %v2600_v57 = vld [vmem:[%s18085_s2 + $0x778] sm:$0xff]  ;;  %v10812_v20 = vcombine.low %v2603_v27, %v2607_v25 }
 0x3f7   :  { %v10807_v55 = vcombine.high %v2596_v26, %v2600_v57  ;;  %v10806_v54 = vcombine.low %v2596_v26, %v2600_v57 }
 0x3f8   :  { %9259 = vmatpush1.bf16.msra.mxu1 %v10756_v45  ;;  %v2604_v45 = vld [vmem:[%s18085_s2 + $0x798] sm:$0xff] }
 0x3f9   :  { %9585 = vmatpush1.bf16.msra.mxu0 %v10750_v39  ;;  %9260 = vmatprep.subr.bf16.mxu1 %v10765_v61  ;;  %v10813_v39 = vcombine.high %v2603_v27, %v2607_v25  ;;  %v2611_v61 = vld [vmem:[%s18085_s2 + $0x7d0] sm:$0xff]  ;;  %v2652_v25 = vld [vmem:[%s18085_s2 + $0x918] sm:$0xff] }
 0x3fa   :  { %9586 = vmatprep.subr.bf16.mxu0 %v10759_v9  ;;  %v2608_v9 = vld [vmem:[%s18085_s2 + $0x7b8] sm:$0xff]  ;;  %v10820_v13 = vcombine.low %v2611_v61, %v2615_v51 }
 0x3fb   :  { %v10815_v21 = vcombine.high %v2604_v45, %v2608_v9  ;;  %v10814_v34 = vcombine.low %v2604_v45, %v2608_v9 }
 0x3fc   :  { %9261 = vmatpush1.bf16.msra.mxu1 %v10764_v33  ;;  %v2612_v33 = vld [vmem:[%s18085_s2 + $0x7d8] sm:$0xff] }
 0x3fd   :  { %9587 = vmatpush1.bf16.msra.mxu0 %v10758_v29  ;;  %9262 = vmatprep.subr.bf16.mxu1 %v10773_v3  ;;  %v10821_v29 = vcombine.high %v2611_v61, %v2615_v51  ;;  %v2619_v3 = vld [vmem:[%s18085_s2 + $0x810] sm:$0xff]  ;;  %v2660_v51 = vld [vmem:[%s18085_s2 + $0x958] sm:$0xff] }
 0x3fe   :  { %9588 = vmatprep.subr.bf16.mxu0 %v10767_v59  ;;  %v2616_v59 = vld [vmem:[%s18085_s2 + $0x7f8] sm:$0xff]  ;;  %v10828_v6 = vcombine.low %v2619_v3, %v2623_v12 }
 0x3ff   :  { %v10823_v37 = vcombine.high %v2612_v33, %v2616_v59  ;;  %v10822_v16 = vcombine.low %v2612_v33, %v2616_v59 }
 0x400   :  { %9263 = vmatpush1.bf16.msra.mxu1 %v10772_v23  ;;  %v2620_v23 = vld [vmem:[%s18085_s2 + $0x818] sm:$0xff] }
 0x401   :  { %9589 = vmatpush1.bf16.msra.mxu0 %v10766_v19  ;;  %9264 = vmatprep.subr.bf16.mxu1 %v10781_v11  ;;  %v10829_v19 = vcombine.high %v2619_v3, %v2623_v12  ;;  %v2627_v11 = vld [vmem:[%s18085_s2 + $0x850] sm:$0xff]  ;;  %v2668_v12 = vld [vmem:[%s18085_s2 + $0x998] sm:$0xff] }
 0x402   :  { %9590 = vmatprep.subr.bf16.mxu0 %v10775_v17  ;;  %v2624_v17 = vld [vmem:[%s18085_s2 + $0x838] sm:$0xff]  ;;  %v10836_v43 = vcombine.low %v2627_v11, %v2631_v15 }
 0x403   :  { %v10831_v58 = vcombine.high %v2620_v23, %v2624_v17  ;;  %v10830_v48 = vcombine.low %v2620_v23, %v2624_v17 }
 0x404   :  { %9265 = vmatpush1.bf16.msra.mxu1 %v10780_v10  ;;  %v2628_v10 = vld [vmem:[%s18085_s2 + $0x858] sm:$0xff] }
 0x405   :  { %9591 = vmatpush1.bf16.msra.mxu0 %v10774_v18  ;;  %9266 = vmatprep.subr.bf16.mxu1 %v10789_v36  ;;  %v10837_v18 = vcombine.high %v2627_v11, %v2631_v15  ;;  %v2635_v36 = vld [vmem:[%s18085_s2 + $0x890] sm:$0xff]  ;;  %v2676_v15 = vld [vmem:[%s18085_s2 + $0x9d8] sm:$0xff] }
 0x406   :  { %9592 = vmatprep.subr.bf16.mxu0 %v10783_v42  ;;  %v2632_v42 = vld [vmem:[%s18085_s2 + $0x878] sm:$0xff]  ;;  %v10844_v49 = vcombine.low %v2635_v36, %v2639_v46 }
 0x407   :  { %v10839_v0 = vcombine.high %v2628_v10, %v2632_v42  ;;  %v10838_v28 = vcombine.low %v2628_v10, %v2632_v42 }
 0x408   :  { %9267 = vmatpush1.bf16.msra.mxu1 %v10788_v30  ;;  %v2636_v30 = vld [vmem:[%s18085_s2 + $0x898] sm:$0xff] }
 0x409   :  { %9593 = vmatpush1.bf16.msra.mxu0 %v10782_v22  ;;  %9268 = vmatprep.subr.bf16.mxu1 %v10797_v32  ;;  %v10845_v22 = vcombine.high %v2635_v36, %v2639_v46  ;;  %v2643_v32 = vld [vmem:[%s18085_s2 + $0x8d0] sm:$0xff]  ;;  %v2684_v46 = vld [vmem:[%s18085_s2 + $0xa18] sm:$0xff] }
 0x40a   :  { %9594 = vmatprep.subr.bf16.mxu0 %v10791_v35  ;;  %v2640_v35 = vld [vmem:[%s18085_s2 + $0x8b8] sm:$0xff]  ;;  %v10852_v26 = vcombine.low %v2643_v32, %v2647_v38 }
 0x40b   :  { %v10847_v56 = vcombine.high %v2636_v30, %v2640_v35 }
 0x40c   :  { %9269 = vmatpush1.bf16.msra.mxu1 %v10796_v53  ;;  %v2648_v53 = vld [vmem:[%s18085_s2 + $0x8f8] sm:$0xff] }
 0x40d   :  { %9595 = vmatpush1.bf16.msra.mxu0 %v10790_v5  ;;  %9270 = vmatprep.subr.bf16.mxu1 %v10805_v44  ;;  %v10853_v5 = vcombine.high %v2643_v32, %v2647_v38  ;;  %v10846_v44 = vcombine.low %v2636_v30, %v2640_v35  ;;  %v2692_v38 = vld [vmem:[%s18085_s2 + $0xa58] sm:$0xff] }
 0x40e   :  { %9596 = vmatprep.subr.bf16.mxu0 %v10799_v50  ;;  %v2651_v50 = vld [vmem:[%s18085_s2 + $0x910] sm:$0xff] }
 0x410   :  { %9271 = vmatpush1.bf16.msra.mxu1 %v10804_v63  ;;  %v2659_v63 = vld [vmem:[%s18085_s2 + $0x950] sm:$0xff] }
 0x411   :  { %9597 = vmatpush1.bf16.msra.mxu0 %v10798_v62  ;;  %9272 = vmatprep.subr.bf16.mxu1 %v10813_v39  ;;  %v2656_v62 = vld [vmem:[%s18085_s2 + $0x938] sm:$0xff] }
 0x412   :  { %9598 = vmatprep.subr.bf16.mxu0 %v10807_v55  ;;  %v2663_v55 = vld [vmem:[%s18085_s2 + $0x970] sm:$0xff]  ;;  %v10863_v9 = vcombine.high %v2652_v25, %v2656_v62 }
 0x413   :  { %v10869_v61 = vcombine.high %v2659_v63, %v2663_v55  ;;  %v10868_v33 = vcombine.low %v2659_v63, %v2663_v55  ;;  %v2708_v55 = vld [vmem:[%s18085_s2 + $0xad8] sm:$0xff] }
 0x414   :  { %9273 = vmatpush1.bf16.msra.mxu1 %v10812_v20  ;;  %v2667_v20 = vld [vmem:[%s18085_s2 + $0x990] sm:$0xff] }
 0x415   :  { %9599 = vmatpush1.bf16.msra.mxu0 %v10806_v54  ;;  %9274 = vmatprep.subr.bf16.mxu1 %v10821_v29  ;;  %v2664_v54 = vld [vmem:[%s18085_s2 + $0x978] sm:$0xff]  ;;  %v10862_v29 = vcombine.low %v2652_v25, %v2656_v62 }
 0x416   :  { %9600 = vmatprep.subr.bf16.mxu0 %v10815_v21  ;;  %v2671_v21 = vld [vmem:[%s18085_s2 + $0x9b0] sm:$0xff]  ;;  %v10871_v59 = vcombine.high %v2660_v51, %v2664_v54 }
 0x417   :  { %v10877_v3 = vcombine.high %v2667_v20, %v2671_v21  ;;  %v10876_v23 = vcombine.low %v2667_v20, %v2671_v21  ;;  %v2716_v21 = vld [vmem:[%s18085_s2 + $0xb18] sm:$0xff] }
 0x418   :  { %9275 = vmatpush1.bf16.msra.mxu1 %v10820_v13  ;;  %v2675_v13 = vld [vmem:[%s18085_s2 + $0x9d0] sm:$0xff] }
 0x419   :  { %9601 = vmatpush1.bf16.msra.mxu0 %v10814_v34  ;;  %9285 = vmatprep.subr.bf16.mxu1 %v10829_v19  ;;  %v2672_v34 = vld [vmem:[%s18085_s2 + $0x9b8] sm:$0xff]  ;;  %v10870_v19 = vcombine.low %v2660_v51, %v2664_v54 }
 0x41a   :  { %9602 = vmatprep.subr.bf16.mxu0 %v10823_v37  ;;  %v2679_v37 = vld [vmem:[%s18085_s2 + $0x9f0] sm:$0xff]  ;;  %v10879_v17 = vcombine.high %v2668_v12, %v2672_v34 }
 0x41b   :  { %9277 = vmatmul.mubr.bf16.vlgmr.msra.gmra.mrb[4].mxu1 %v15069_v40  ;;  %v10885_v11 = vcombine.high %v2675_v13, %v2679_v37  ;;  %v10884_v10 = vcombine.low %v2675_v13, %v2679_v37  ;;  %v2724_v37 = vld [vmem:[%s18085_s2 + $0xb58] sm:$0xff] }
 0x41c   :  { %9286 = vmatpush1.bf16.msra.mxu1 %v10828_v6  ;;  %9317 = vmatprep.mubr.bf16.mxu1 %v15077_v1  ;;  %v2683_v6 = vld [vmem:[%s18085_s2 + $0xa10] sm:$0xff] }
 0x41d   :  { %9603 = vmatpush1.bf16.msra.mxu0 %v10822_v16  ;;  %9287 = vmatprep.subr.bf16.mxu1 %v10837_v18  ;;  %v2680_v16 = vld [vmem:[%s18085_s2 + $0x9f8] sm:$0xff]  ;;  %v10878_v18 = vcombine.low %v2668_v12, %v2672_v34 }
 0x41e   :  { %9613 = vmatprep.subr.bf16.mxu0 %v10831_v58  ;;  %v2687_v58 = vld [vmem:[%s18085_s2 + $0xa30] sm:$0xff]  ;;  %v10887_v42 = vcombine.high %v2676_v15, %v2680_v16 }
 0x41f   :  { %v10893_v36 = vcombine.high %v2683_v6, %v2687_v58  ;;  %v10892_v30 = vcombine.low %v2683_v6, %v2687_v58  ;;  %v2732_v58 = vld [vmem:[%s18085_s2 + $0xb98] sm:$0xff] }
 0x420   :  { %9605 = vmatmul.mubr.bf16.vlgmr.msra.gmra.mrb[20].mxu0 %v15069_v40  ;;  %9288 = vmatpush1.bf16.msra.mxu1 %v10836_v43  ;;  %v2644_v40 = vld [vmem:[%s18085_s2 + $0x8d8] sm:$0xff]  ;;  %v2691_v43 = vld [vmem:[%s18085_s2 + $0xa50] sm:$0xff] }
 0x421   :  { %9614 = vmatpush1.bf16.msra.mxu0 %v10830_v48  ;;  %9645 = vmatprep.mubr.bf16.mxu0 %v15077_v1  ;;  %v2655_v1 = vld [vmem:[%s18085_s2 + $0x930] sm:$0xff]  ;;  %v10855_v57 = vcombine.high %v2644_v40, %v2648_v53  ;;  %v10854_v39 = vcombine.low %v2644_v40, %v2648_v53  ;;  %v2688_v48 = vld [vmem:[%s18085_s2 + $0xa38] sm:$0xff] }
 0x422   :  { %9615 = vmatprep.subr.bf16.mxu0 %v10839_v0  ;;  %9289 = vmatprep.subr.bf16.mxu1 %v10845_v22  ;;  %v10861_v27 = vcombine.high %v2651_v50, %v2655_v1  ;;  %v10860_v45 = vcombine.low %v2651_v50, %v2655_v1  ;;  %v2695_v0 = vld [vmem:[%s18085_s2 + $0xa70] sm:$0xff]  ;;  %v10886_v22 = vcombine.low %v2676_v15, %v2680_v16  ;;  %v2700_v1 = vld [vmem:[%s18085_s2 + $0xa98] sm:$0xff] }
 0x423   :  { %v10895_v35 = vcombine.high %v2684_v46, %v2688_v48  ;;  %v10901_v32 = vcombine.high %v2691_v43, %v2695_v0  ;;  %v10900_v40 = vcombine.low %v2691_v43, %v2695_v0  ;;  %v2740_v0 = vld [vmem:[%s18085_s2 + $0xbd8] sm:$0xff] }
 0x424   :  { %9290 = vmatpush1.bf16.msra.mxu1 %v10844_v49  ;;  %v2699_v49 = vld [vmem:[%s18085_s2 + $0xa90] sm:$0xff] }
 0x425   :  { %9616 = vmatpush1.bf16.msra.mxu0 %v10838_v28  ;;  %9291 = vmatprep.subr.bf16.mxu1 %v10853_v5  ;;  %v2696_v28 = vld [vmem:[%s18085_s2 + $0xa78] sm:$0xff]  ;;  %v10894_v5 = vcombine.low %v2684_v46, %v2688_v48 }
 0x426   :  { %9617 = vmatprep.subr.bf16.mxu0 %v10847_v56  ;;  %v2703_v56 = vld [vmem:[%s18085_s2 + $0xab0] sm:$0xff]  ;;  %v10903_v53 = vcombine.high %v2692_v38, %v2696_v28 }
 0x427   :  { %v10909_v50 = vcombine.high %v2699_v49, %v2703_v56  ;;  %v10908_v25 = vcombine.low %v2699_v49, %v2703_v56  ;;  %v2748_v56 = vld [vmem:[%s18085_s2 + $0xc18] sm:$0xff] }
 0x428   :  { %9292 = vmatpush1.bf16.msra.mxu1 %v10852_v26  ;;  %v2707_v26 = vld [vmem:[%s18085_s2 + $0xad0] sm:$0xff] }
 0x429   :  { %9618 = vmatpush1.bf16.msra.mxu0 %v10846_v44  ;;  %9293 = vmatprep.subr.bf16.mxu1 %v10861_v27  ;;  %v2704_v44 = vld [vmem:[%s18085_s2 + $0xab8] sm:$0xff]  ;;  %v10902_v27 = vcombine.low %v2692_v38, %v2696_v28 }
 0x42a   :  { %9619 = vmatprep.subr.bf16.mxu0 %v10855_v57  ;;  %v2711_v57 = vld [vmem:[%s18085_s2 + $0xaf0] sm:$0xff]  ;;  %v10911_v62 = vcombine.high %v2700_v1, %v2704_v44 }
 0x42b   :  { %v10917_v63 = vcombine.high %v2707_v26, %v2711_v57  ;;  %v10916_v51 = vcombine.low %v2707_v26, %v2711_v57  ;;  %v2756_v57 = vld [vmem:[%s18085_s2 + $0xc58] sm:$0xff] }
 0x42c   :  { %9294 = vmatpush1.bf16.msra.mxu1 %v10860_v45  ;;  %v2715_v45 = vld [vmem:[%s18085_s2 + $0xb10] sm:$0xff] }
 0x42d   :  { %9620 = vmatpush1.bf16.msra.mxu0 %v10854_v39  ;;  %9295 = vmatprep.subr.bf16.mxu1 %v10869_v61  ;;  %v2712_v39 = vld [vmem:[%s18085_s2 + $0xaf8] sm:$0xff]  ;;  %v10910_v61 = vcombine.low %v2700_v1, %v2704_v44 }
 0x42e   :  { %9621 = vmatprep.subr.bf16.mxu0 %v10863_v9  ;;  %v2719_v9 = vld [vmem:[%s18085_s2 + $0xb30] sm:$0xff]  ;;  %v10919_v54 = vcombine.high %v2708_v55, %v2712_v39 }
 0x42f   :  { %v10925_v20 = vcombine.high %v2715_v45, %v2719_v9  ;;  %v10924_v12 = vcombine.low %v2715_v45, %v2719_v9  ;;  %v2764_v9 = vld [vmem:[%s18085_s2 + $0xc98] sm:$0xff] }
 0x430   :  { %9296 = vmatpush1.bf16.msra.mxu1 %v10868_v33  ;;  %v2723_v33 = vld [vmem:[%s18085_s2 + $0xb50] sm:$0xff] }
 0x431   :  { %9622 = vmatpush1.bf16.msra.mxu0 %v10862_v29  ;;  %9297 = vmatprep.subr.bf16.mxu1 %v10877_v3  ;;  %v2720_v29 = vld [vmem:[%s18085_s2 + $0xb38] sm:$0xff]  ;;  %v10918_v3 = vcombine.low %v2708_v55, %v2712_v39 }
 0x432   :  { %9623 = vmatprep.subr.bf16.mxu0 %v10871_v59  ;;  %v2727_v59 = vld [vmem:[%s18085_s2 + $0xb70] sm:$0xff]  ;;  %v10927_v34 = vcombine.high %v2716_v21, %v2720_v29 }
 0x433   :  { %v10933_v13 = vcombine.high %v2723_v33, %v2727_v59  ;;  %v10932_v15 = vcombine.low %v2723_v33, %v2727_v59  ;;  %v2776_v59 = vld [vmem:[%s18085_s2 + $0xcf8] sm:$0xff] }
 0x434   :  { %9298 = vmatpush1.bf16.msra.mxu1 %v10876_v23  ;;  %v2731_v23 = vld [vmem:[%s18085_s2 + $0xb90] sm:$0xff] }
 0x435   :  { %9624 = vmatpush1.bf16.msra.mxu0 %v10870_v19  ;;  %9299 = vmatprep.subr.bf16.mxu1 %v10885_v11  ;;  %v2728_v19 = vld [vmem:[%s18085_s2 + $0xb78] sm:$0xff]  ;;  %v10926_v11 = vcombine.low %v2716_v21, %v2720_v29 }
 0x436   :  { %9625 = vmatprep.subr.bf16.mxu0 %v10879_v17  ;;  %v2735_v17 = vld [vmem:[%s18085_s2 + $0xbb0] sm:$0xff]  ;;  %v10935_v16 = vcombine.high %v2724_v37, %v2728_v19 }
 0x437   :  { %v10941_v6 = vcombine.high %v2731_v23, %v2735_v17  ;;  %v10940_v46 = vcombine.low %v2731_v23, %v2735_v17  ;;  %v2784_v23 = vld [vmem:[%s18085_s2 + $0xd38] sm:$0xff]  ;;  %v2787_v17 = vld [vmem:[%s18085_s2 + $0xd50] sm:$0xff] }
 0x438   :  { %9300 = vmatpush1.bf16.msra.mxu1 %v10884_v10  ;;  %v2739_v10 = vld [vmem:[%s18085_s2 + $0xbd0] sm:$0xff] }
 0x439   :  { %9626 = vmatpush1.bf16.msra.mxu0 %v10878_v18  ;;  %9301 = vmatprep.subr.bf16.mxu1 %v10893_v36  ;;  %v2736_v18 = vld [vmem:[%s18085_s2 + $0xbb8] sm:$0xff]  ;;  %v10934_v36 = vcombine.low %v2724_v37, %v2728_v19 }
 0x43a   :  { %9627 = vmatprep.subr.bf16.mxu0 %v10887_v42  ;;  %v2743_v42 = vld [vmem:[%s18085_s2 + $0xbf0] sm:$0xff]  ;;  %v10943_v48 = vcombine.high %v2732_v58, %v2736_v18  ;;  %v2780_v19 = vld [vmem:[%s18085_s2 + $0xd18] sm:$0xff] }
 0x43b   :  { %v10949_v43 = vcombine.high %v2739_v10, %v2743_v42  ;;  %v10948_v38 = vcombine.low %v2739_v10, %v2743_v42  ;;  %v2792_v10 = vld [vmem:[%s18085_s2 + $0xd78] sm:$0xff]  ;;  %v2795_v42 = vld [vmem:[%s18085_s2 + $0xd90] sm:$0xff] }
 0x43c   :  { %9302 = vmatpush1.bf16.msra.mxu1 %v10892_v30  ;;  %v2747_v30 = vld [vmem:[%s18085_s2 + $0xc10] sm:$0xff] }
 0x43d   :  { %9628 = vmatpush1.bf16.msra.mxu0 %v10886_v22  ;;  %9303 = vmatprep.subr.bf16.mxu1 %v10901_v32  ;;  %v2744_v22 = vld [vmem:[%s18085_s2 + $0xbf8] sm:$0xff]  ;;  %v10942_v32 = vcombine.low %v2732_v58, %v2736_v18 }
 0x43e   :  { %9629 = vmatprep.subr.bf16.mxu0 %v10895_v35  ;;  %v2751_v35 = vld [vmem:[%s18085_s2 + $0xc30] sm:$0xff]  ;;  %v10951_v28 = vcombine.high %v2740_v0, %v2744_v22  ;;  %v2788_v18 = vld [vmem:[%s18085_s2 + $0xd58] sm:$0xff] }
 0x43f   :  { %v10957_v49 = vcombine.high %v2747_v30, %v2751_v35  ;;  %v10956_v1 = vcombine.low %v2747_v30, %v2751_v35  ;;  %v2800_v30 = vld [vmem:[%s18085_s2 + $0xdb8] sm:$0xff] }
 0x440   :  { %9304 = vmatpush1.bf16.msra.mxu1 %v10900_v40  ;;  %v2755_v40 = vld [vmem:[%s18085_s2 + $0xc50] sm:$0xff] }
 0x441   :  { %9630 = vmatpush1.bf16.msra.mxu0 %v10894_v5  ;;  %9305 = vmatprep.subr.bf16.mxu1 %v10909_v50  ;;  %v2752_v5 = vld [vmem:[%s18085_s2 + $0xc38] sm:$0xff]  ;;  %v10950_v50 = vcombine.low %v2740_v0, %v2744_v22 }
 0x442   :  { %9631 = vmatprep.subr.bf16.mxu0 %v10903_v53  ;;  %v2759_v53 = vld [vmem:[%s18085_s2 + $0xc70] sm:$0xff]  ;;  %v10959_v44 = vcombine.high %v2748_v56, %v2752_v5  ;;  %v2796_v22 = vld [vmem:[%s18085_s2 + $0xd98] sm:$0xff] }
 0x443   :  { %v10965_v26 = vcombine.high %v2755_v40, %v2759_v53  ;;  %v10964_v55 = vcombine.low %v2755_v40, %v2759_v53  ;;  %v11007_v40 = vcombine.high %v2796_v22, %v2800_v30 }
 0x444   :  { %9306 = vmatpush1.bf16.msra.mxu1 %v10908_v25  ;;  %v2763_v25 = vld [vmem:[%s18085_s2 + $0xc90] sm:$0xff] }
 0x445   :  { %9632 = vmatpush1.bf16.msra.mxu0 %v10902_v27  ;;  %9307 = vmatprep.subr.bf16.mxu1 %v10917_v63  ;;  %v2760_v27 = vld [vmem:[%s18085_s2 + $0xc78] sm:$0xff]  ;;  %v10958_v63 = vcombine.low %v2748_v56, %v2752_v5 }
 0x446   :  { %9633 = vmatprep.subr.bf16.mxu0 %v10911_v62  ;;  %v2767_v62 = vld [vmem:[%s18085_s2 + $0xcb0] sm:$0xff]  ;;  %v10967_v39 = vcombine.high %v2756_v57, %v2760_v27 }
 0x447   :  { %v10973_v45 = vcombine.high %v2763_v25, %v2767_v62  ;;  %v10972_v21 = vcombine.low %v2763_v25, %v2767_v62  ;;  %v2815_v25 = vld [vmem:[%s18085_s2 + $0xe30] sm:$0xff] }
 0x448   :  { %9308 = vmatpush1.bf16.msra.mxu1 %v10916_v51  ;;  %v2771_v51 = vld [vmem:[%s18085_s2 + $0xcd0] sm:$0xff] }
 0x449   :  { %9634 = vmatpush1.bf16.msra.mxu0 %v10910_v61  ;;  %9309 = vmatprep.subr.bf16.mxu1 %v10925_v20  ;;  %v2768_v61 = vld [vmem:[%s18085_s2 + $0xcb8] sm:$0xff]  ;;  %v10966_v20 = vcombine.low %v2756_v57, %v2760_v27  ;;  %v2811_v27 = vld [vmem:[%s18085_s2 + $0xe10] sm:$0xff] }
 0x44a   :  { %9635 = vmatprep.subr.bf16.mxu0 %v10919_v54  ;;  %v2775_v54 = vld [vmem:[%s18085_s2 + $0xcf0] sm:$0xff]  ;;  %v10975_v29 = vcombine.high %v2764_v9, %v2768_v61 }
 0x44b   :  { %v10981_v33 = vcombine.high %v2771_v51, %v2775_v54 }
 0x44c   :  { %9310 = vmatpush1.bf16.msra.mxu1 %v10924_v12  ;;  %v10974_v12 = vcombine.low %v2764_v9, %v2768_v61  ;;  %v11021_v9 = vcombine.high %v2811_v27, %v2815_v25  ;;  %v2812_v61 = vld [vmem:[%s18085_s2 + $0xe18] sm:$0xff] }
 0x44d   :  { %9636 = vmatpush1.bf16.msra.mxu0 %v10918_v3  ;;  %9311 = vmatprep.subr.bf16.mxu1 %v10933_v13  ;;  %v2779_v3 = vld [vmem:[%s18085_s2 + $0xd10] sm:$0xff] }
 0x44e   :  { %9637 = vmatprep.subr.bf16.mxu0 %v10927_v34  ;;  %v10980_v34 = vcombine.low %v2771_v51, %v2775_v54  ;;  %v2816_v51 = vld [vmem:[%s18085_s2 + $0xe38] sm:$0xff]  ;;  %v2819_v54 = vld [vmem:[%s18085_s2 + $0xe50] sm:$0xff] }
 0x450   :  { %9312 = vmatpush1.bf16.msra.mxu1 %v10932_v15 }
 0x451   :  { %9638 = vmatpush1.bf16.msra.mxu0 %v10926_v11  ;;  %9313 = vmatprep.subr.bf16.mxu1 %v10941_v6  ;;  %v2791_v11 = vld [vmem:[%s18085_s2 + $0xd70] sm:$0xff]  ;;  %v10991_v6 = vcombine.high %v2780_v19, %v2784_v23 }
 0x452   :  { %9639 = vmatprep.subr.bf16.mxu0 %v10935_v16  ;;  %v10997_v58 = vcombine.high %v2787_v17, %v2791_v11 }
 0x454   :  { %9314 = vmatpush1.bf16.msra.mxu1 %v10940_v46  ;;  %v10990_v46 = vcombine.low %v2780_v19, %v2784_v23  ;;  %v2828_v23 = vld [vmem:[%s18085_s2 + $0xe98] sm:$0xff] }
 0x455   :  { %9640 = vmatpush1.bf16.msra.mxu0 %v10934_v36  ;;  %9315 = vmatprep.subr.bf16.mxu1 %v10949_v43  ;;  %v2799_v36 = vld [vmem:[%s18085_s2 + $0xdb0] sm:$0xff]  ;;  %v10999_v43 = vcombine.high %v2788_v18, %v2792_v10 }
 0x456   :  { %9641 = vmatprep.subr.bf16.mxu0 %v10943_v48  ;;  %v10996_v48 = vcombine.low %v2787_v17, %v2791_v11  ;;  %v11005_v0 = vcombine.high %v2795_v42, %v2799_v36  ;;  %v11004_v5 = vcombine.low %v2795_v42, %v2799_v36  ;;  %v2832_v17 = vld [vmem:[%s18085_s2 + $0xeb8] sm:$0xff]  ;;  %v2835_v11 = vld [vmem:[%s18085_s2 + $0xed0] sm:$0xff] }
 0x457   :  { %v2840_v42 = vld [vmem:[%s18085_s2 + $0xef8] sm:$0xff]  ;;  %v2843_v36 = vld [vmem:[%s18085_s2 + $0xf10] sm:$0xff] }
 0x458   :  { %9316 = vmatpush1.bf16.msra.mxu1 %v10948_v38  ;;  %v2807_v38 = vld [vmem:[%s18085_s2 + $0xdf0] sm:$0xff] }
 0x459   :  { %9642 = vmatpush1.bf16.msra.mxu0 %v10942_v32  ;;  %9326 = vmatprep.subr.bf16.mxu1 %v10957_v49  ;;  %v2803_v32 = vld [vmem:[%s18085_s2 + $0xdd0] sm:$0xff]  ;;  %v10998_v49 = vcombine.low %v2788_v18, %v2792_v10  ;;  %v2836_v10 = vld [vmem:[%s18085_s2 + $0xed8] sm:$0xff] }
 0x45a   :  { %9643 = vmatprep.subr.bf16.mxu0 %v10951_v28 }
 0x45b   :  { %9318 = vmatmul.mubr.bf16.vlgmr.msra.gmra.mrb[4].mxu1 %v15279_v24 }
 0x45c   :  { %9327 = vmatpush1.bf16.msra.mxu1 %v10956_v1  ;;  %9358 = vmatprep.mubr.bf16.mxu1 %v15293_v7  ;;  %v11013_v1 = vcombine.high %v2803_v32, %v2807_v38 }
 0x45d   :  { %9644 = vmatpush1.bf16.msra.mxu0 %v10950_v50  ;;  %9328 = vmatprep.subr.bf16.mxu1 %v10965_v26  ;;  %v2808_v26 = vld [vmem:[%s18085_s2 + $0xdf8] sm:$0xff] }
 0x45e   :  { %9654 = vmatprep.subr.bf16.mxu0 %v10959_v44  ;;  %v2804_v44 = vld [vmem:[%s18085_s2 + $0xdd8] sm:$0xff] }
 0x460   :  { %9646 = vmatmul.mubr.bf16.vlgmr.msra.gmra.mrb[20].mxu0 %v15279_v24  ;;  %9329 = vmatpush1.bf16.msra.mxu1 %v10964_v55  ;;  %v2772_v24 = vld [vmem:[%s18085_s2 + $0xcd8] sm:$0xff] }
 0x461   :  { %9655 = vmatpush1.bf16.msra.mxu0 %v10958_v63  ;;  %9686 = vmatprep.mubr.bf16.mxu0 %v15293_v7  ;;  %v2783_v7 = vld [vmem:[%s18085_s2 + $0xd30] sm:$0xff]  ;;  %v10983_v13 = vcombine.high %v2772_v24, %v2776_v59  ;;  %v10982_v15 = vcombine.low %v2772_v24, %v2776_v59  ;;  %v11006_v63 = vcombine.low %v2796_v22, %v2800_v30  ;;  %v2820_v59 = vld [vmem:[%s18085_s2 + $0xe58] sm:$0xff] }
 0x462   :  { %9656 = vmatprep.subr.bf16.mxu0 %v10967_v39  ;;  %9330 = vmatprep.subr.bf16.mxu1 %v10973_v45  ;;  %v10989_v37 = vcombine.high %v2779_v3, %v2783_v7  ;;  %v10988_v16 = vcombine.low %v2779_v3, %v2783_v7  ;;  %v11012_v39 = vcombine.low %v2803_v32, %v2807_v38  ;;  %v2824_v3 = vld [vmem:[%s18085_s2 + $0xe78] sm:$0xff]  ;;  %v2827_v7 = vld [vmem:[%s18085_s2 + $0xe90] sm:$0xff] }
 0x463   :  { %v11015_v45 = vcombine.high %v2804_v44, %v2808_v26  ;;  %v2844_v30 = vld [vmem:[%s18085_s2 + $0xf18] sm:$0xff]  ;;  %v2851_v38 = vld [vmem:[%s18085_s2 + $0xf50] sm:$0xff] }
 0x464   :  { %9331 = vmatpush1.bf16.msra.mxu1 %v10972_v21  ;;  %v11014_v21 = vcombine.low %v2804_v44, %v2808_v26  ;;  %v2848_v32 = vld [vmem:[%s18085_s2 + $0xf38] sm:$0xff]  ;;  %v2859_v26 = vld [vmem:[%s18085_s2 + $0xf90] sm:$0xff] }
 0x465   :  { %9657 = vmatpush1.bf16.msra.mxu0 %v10966_v20  ;;  %9332 = vmatprep.subr.bf16.mxu1 %v10981_v33  ;;  %v2823_v20 = vld [vmem:[%s18085_s2 + $0xe70] sm:$0xff]  ;;  %v11023_v33 = vcombine.high %v2812_v61, %v2816_v51  ;;  %v2856_v44 = vld [vmem:[%s18085_s2 + $0xf78] sm:$0xff] }
 0x466   :  { %9658 = vmatprep.subr.bf16.mxu0 %v10975_v29  ;;  %v11020_v29 = vcombine.low %v2811_v27, %v2815_v25  ;;  %v11029_v24 = vcombine.high %v2819_v54, %v2823_v20  ;;  %v2863_v27 = vld [vmem:[%s18085_s2 + $0xfb0] sm:$0xff]  ;;  %v11054_v25 = vcombine.low %v2844_v30, %v2848_v32 }
 0x468   :  { %9333 = vmatpush1.bf16.msra.mxu1 %v10980_v34  ;;  %v11022_v34 = vcombine.low %v2812_v61, %v2816_v51  ;;  %v2871_v61 = vld [vmem:[%s18085_s2 + $0xff0] sm:$0xff] }
 0x469   :  { %9659 = vmatpush1.bf16.msra.mxu0 %v10974_v12  ;;  %9334 = vmatprep.subr.bf16.mxu1 %v10989_v37  ;;  %v2831_v12 = vld [vmem:[%s18085_s2 + $0xeb0] sm:$0xff]  ;;  %v11031_v37 = vcombine.high %v2820_v59, %v2824_v3 }
 0x46a   :  { %9660 = vmatprep.subr.bf16.mxu0 %v10983_v13  ;;  %v11028_v13 = vcombine.low %v2819_v54, %v2823_v20  ;;  %v11037_v19 = vcombine.high %v2827_v7, %v2831_v12  ;;  %v11068_v54 = vcombine.low %v2859_v26, %v2863_v27 }
 0x46c   :  { %9335 = vmatpush1.bf16.msra.mxu1 %v10988_v16  ;;  %v11030_v16 = vcombine.low %v2820_v59, %v2824_v3  ;;  %v2879_v59 = vld [vmem:[%s18085_s2 + $0x1030] sm:$0xff] }
 0x46d   :  { %9661 = vmatpush1.bf16.msra.mxu0 %v10982_v15  ;;  %9336 = vmatprep.subr.bf16.mxu1 %v10997_v58  ;;  %v2839_v15 = vld [vmem:[%s18085_s2 + $0xef0] sm:$0xff]  ;;  %v11039_v58 = vcombine.high %v2828_v23, %v2832_v17 }
 0x46e   :  { %9662 = vmatprep.subr.bf16.mxu0 %v10991_v6  ;;  %v16956_v35 = vpop.f32.mrb[0].mxu1  ;;  %v11036_v6 = vcombine.low %v2827_v7, %v2831_v12  ;;  %v11045_v18 = vcombine.high %v2835_v11, %v2839_v15 }
 0x46f   :  { %v16964_v28 = vpop.f32.mrb[1].mxu1 }
 0x470   :  { %v8872_v56 = vpop.f32.mrb[2].mxu1  ;;  %9337 = vmatpush1.bf16.msra.mxu1 %v10996_v48  ;;  %v11038_v48 = vcombine.low %v2828_v23, %v2832_v17  ;;  %v2887_v23 = vld [vmem:[%s18085_s2 + $0x1070] sm:$0xff] }
 0x471   :  { %9663 = vmatpush1.bf16.msra.mxu0 %v10990_v46  ;;  %v8873_v50 = vpop.f32.mrb[3].mxu1  ;;  %9338 = vmatprep.subr.bf16.mxu1 %v11005_v0  ;;  %v2847_v46 = vld [vmem:[%s18085_s2 + $0xf30] sm:$0xff]  ;;  %v11047_v0 = vcombine.high %v2836_v10, %v2840_v42  ;;  %v11046_v56 = vcombine.low %v2836_v10, %v2840_v42 }
 0x472   :  { %9664 = vmatprep.subr.bf16.mxu0 %v10999_v43  ;;  %v11044_v43 = vcombine.low %v2835_v11, %v2839_v15  ;;  %v11053_v22 = vcombine.high %v2843_v36, %v2847_v46  ;;  %v2895_v10 = vld [vmem:[%s18085_s2 + $0x10b0] sm:$0xff] }
 0x473   :  { %v16966_v53 = vpop.f32.mrb[16].mxu0 }
 0x474   :  { %v16974_v57 = vpop.f32.mrb[17].mxu0  ;;  %9339 = vmatpush1.bf16.msra.mxu1 %v11004_v5  ;;  %v11052_v5 = vcombine.low %v2843_v36, %v2847_v46 }
 0x475   :  { %v9200_v62 = vpop.f32.mrb[18].mxu0  ;;  %9665 = vmatpush1.bf16.msra.mxu0 %v10998_v49  ;;  %9340 = vmatprep.subr.bf16.mxu1 %v11013_v1  ;;  %v2855_v49 = vld [vmem:[%s18085_s2 + $0xf70] sm:$0xff]  ;;  %v2852_v1 = vld [vmem:[%s18085_s2 + $0xf58] sm:$0xff] }
 0x476   :  { %v9201_v55 = vpop.f32.mrb[19].mxu0  ;;  %9666 = vmatprep.subr.bf16.mxu0 %v11007_v40  ;;  %v11055_v40 = vcombine.high %v2844_v30, %v2848_v32  ;;  %v11061_v50 = vcombine.high %v2851_v38, %v2855_v49  ;;  %v11060_v62 = vcombine.low %v2851_v38, %v2855_v49  ;;  %v11062_v51 = vcombine.low %v2852_v1, %v2856_v44  ;;  %v2903_v30 = vld [vmem:[%s18085_s2 + $0x10f0] sm:$0xff] }
 0x477   :  { %v11069_v55 = vcombine.high %v2859_v26, %v2863_v27  ;;  %v2908_v27 = vld [vmem:[%s18085_s2 + $0x1118] sm:$0xff] }
 0x478   :  { %9341 = vmatpush1.bf16.msra.mxu1 %v11012_v39  ;;  %v2860_v39 = vld [vmem:[%s18085_s2 + $0xf98] sm:$0xff] }
 0x479   :  { %9667 = vmatpush1.bf16.msra.mxu0 %v11006_v63  ;;  %9342 = vmatprep.subr.bf16.mxu1 %v11021_v9  ;;  %v11063_v63 = vcombine.high %v2852_v1, %v2856_v44  ;;  %v2867_v9 = vld [vmem:[%s18085_s2 + $0xfd0] sm:$0xff] }
 0x47a   :  { %9668 = vmatprep.subr.bf16.mxu0 %v11015_v45  ;;  %v2864_v45 = vld [vmem:[%s18085_s2 + $0xfb8] sm:$0xff]  ;;  %v11076_v7 = vcombine.low %v2867_v9, %v2871_v61 }
 0x47b   :  { %v11071_v20 = vcombine.high %v2860_v39, %v2864_v45  ;;  %v11070_v3 = vcombine.low %v2860_v39, %v2864_v45 }
 0x47c   :  { %9343 = vmatpush1.bf16.msra.mxu1 %v11020_v29  ;;  %v2868_v29 = vld [vmem:[%s18085_s2 + $0xfd8] sm:$0xff] }
 0x47d   :  { %9669 = vmatpush1.bf16.msra.mxu0 %v11014_v21  ;;  %9344 = vmatprep.subr.bf16.mxu1 %v11029_v24  ;;  %v11077_v21 = vcombine.high %v2867_v9, %v2871_v61  ;;  %v2875_v24 = vld [vmem:[%s18085_s2 + $0x1010] sm:$0xff]  ;;  %v2916_v61 = vld [vmem:[%s18085_s2 + $0x1158] sm:$0xff] }
 0x47e   :  { %9670 = vmatprep.subr.bf16.mxu0 %v11023_v33  ;;  %v2872_v33 = vld [vmem:[%s18085_s2 + $0xff8] sm:$0xff]  ;;  %v11084_v11 = vcombine.low %v2875_v24, %v2879_v59 }
 0x47f   :  { %v11079_v12 = vcombine.high %v2868_v29, %v2872_v33  ;;  %v11078_v17 = vcombine.low %v2868_v29, %v2872_v33 }
 0x480   :  { %9345 = vmatpush1.bf16.msra.mxu1 %v11028_v13  ;;  %v2876_v13 = vld [vmem:[%s18085_s2 + $0x1018] sm:$0xff] }
 0x481   :  { %9671 = vmatpush1.bf16.msra.mxu0 %v11022_v34  ;;  %9346 = vmatprep.subr.bf16.mxu1 %v11037_v19  ;;  %v11085_v34 = vcombine.high %v2875_v24, %v2879_v59  ;;  %v2883_v19 = vld [vmem:[%s18085_s2 + $0x1050] sm:$0xff]  ;;  %v2924_v59 = vld [vmem:[%s18085_s2 + $0x1198] sm:$0xff] }
 0x482   :  { %9672 = vmatprep.subr.bf16.mxu0 %v11031_v37  ;;  %v2880_v37 = vld [vmem:[%s18085_s2 + $0x1038] sm:$0xff]  ;;  %v11092_v36 = vcombine.low %v2883_v19, %v2887_v23 }
 0x483   :  { %v11087_v15 = vcombine.high %v2876_v13, %v2880_v37  ;;  %v11086_v42 = vcombine.low %v2876_v13, %v2880_v37 }
 0x484   :  { %9347 = vmatpush1.bf16.msra.mxu1 %v11036_v6  ;;  %v2884_v6 = vld [vmem:[%s18085_s2 + $0x1058] sm:$0xff] }
 0x485   :  { %9673 = vmatpush1.bf16.msra.mxu0 %v11030_v16  ;;  %9348 = vmatprep.subr.bf16.mxu1 %v11045_v18  ;;  %v11093_v16 = vcombine.high %v2883_v19, %v2887_v23  ;;  %v2891_v18 = vld [vmem:[%s18085_s2 + $0x1090] sm:$0xff]  ;;  %v2932_v23 = vld [vmem:[%s18085_s2 + $0x11d8] sm:$0xff] }
 0x486   :  { %9674 = vmatprep.subr.bf16.mxu0 %v11039_v58  ;;  %v2888_v58 = vld [vmem:[%s18085_s2 + $0x1078] sm:$0xff]  ;;  %v11100_v38 = vcombine.low %v2891_v18, %v2895_v10 }
 0x487   :  { %v11095_v46 = vcombine.high %v2884_v6, %v2888_v58  ;;  %v11094_v32 = vcombine.low %v2884_v6, %v2888_v58 }
 0x488   :  { %9349 = vmatpush1.bf16.msra.mxu1 %v11044_v43  ;;  %v2892_v43 = vld [vmem:[%s18085_s2 + $0x1098] sm:$0xff] }
 0x489   :  { %9675 = vmatpush1.bf16.msra.mxu0 %v11038_v48  ;;  %9350 = vmatprep.subr.bf16.mxu1 %v11053_v22  ;;  %v11101_v48 = vcombine.high %v2891_v18, %v2895_v10  ;;  %v2899_v22 = vld [vmem:[%s18085_s2 + $0x10d0] sm:$0xff]  ;;  %v2940_v10 = vld [vmem:[%s18085_s2 + $0x1218] sm:$0xff] }
 0x48a   :  { %9676 = vmatprep.subr.bf16.mxu0 %v11047_v0  ;;  %v2896_v0 = vld [vmem:[%s18085_s2 + $0x10b8] sm:$0xff]  ;;  %v11108_v1 = vcombine.low %v2899_v22, %v2903_v30 }
 0x48b   :  { %v11103_v49 = vcombine.high %v2892_v43, %v2896_v0 }
 0x48c   :  { %9351 = vmatpush1.bf16.msra.mxu1 %v11052_v5  ;;  %v2904_v5 = vld [vmem:[%s18085_s2 + $0x10f8] sm:$0xff] }
 0x48d   :  { %9677 = vmatpush1.bf16.msra.mxu0 %v11046_v56  ;;  %9352 = vmatprep.subr.bf16.mxu1 %v11061_v50  ;;  %v11109_v56 = vcombine.high %v2899_v22, %v2903_v30  ;;  %v11102_v50 = vcombine.low %v2892_v43, %v2896_v0  ;;  %v2948_v30 = vld [vmem:[%s18085_s2 + $0x1258] sm:$0xff] }
 0x48e   :  { %9678 = vmatprep.subr.bf16.mxu0 %v11055_v40  ;;  %v2907_v40 = vld [vmem:[%s18085_s2 + $0x1110] sm:$0xff] }
 0x490   :  { %9353 = vmatpush1.bf16.msra.mxu1 %v11060_v62  ;;  %v2915_v62 = vld [vmem:[%s18085_s2 + $0x1150] sm:$0xff] }
 0x491   :  { %9679 = vmatpush1.bf16.msra.mxu0 %v11054_v25  ;;  %9354 = vmatprep.subr.bf16.mxu1 %v11069_v55  ;;  %v2912_v25 = vld [vmem:[%s18085_s2 + $0x1138] sm:$0xff] }
 0x492   :  { %9680 = vmatprep.subr.bf16.mxu0 %v11063_v63  ;;  %v2919_v63 = vld [vmem:[%s18085_s2 + $0x1170] sm:$0xff]  ;;  %v11119_v45 = vcombine.high %v2908_v27, %v2912_v25 }
 0x493   :  { %v11125_v9 = vcombine.high %v2915_v62, %v2919_v63  ;;  %v11124_v29 = vcombine.low %v2915_v62, %v2919_v63  ;;  %v2964_v63 = vld [vmem:[%s18085_s2 + $0x12d8] sm:$0xff] }
 0x494   :  { %9355 = vmatpush1.bf16.msra.mxu1 %v11068_v54  ;;  %v2923_v54 = vld [vmem:[%s18085_s2 + $0x1190] sm:$0xff] }
 0x495   :  { %9681 = vmatpush1.bf16.msra.mxu0 %v11062_v51  ;;  %9356 = vmatprep.subr.bf16.mxu1 %v11077_v21  ;;  %v2920_v51 = vld [vmem:[%s18085_s2 + $0x1178] sm:$0xff]  ;;  %v11118_v21 = vcombine.low %v2908_v27, %v2912_v25 }
 0x496   :  { %9682 = vmatprep.subr.bf16.mxu0 %v11071_v20  ;;  %v2927_v20 = vld [vmem:[%s18085_s2 + $0x11b0] sm:$0xff]  ;;  %v11127_v33 = vcombine.high %v2916_v61, %v2920_v51 }
 0x497   :  { %v11133_v24 = vcombine.high %v2923_v54, %v2927_v20  ;;  %v11132_v13 = vcombine.low %v2923_v54, %v2927_v20  ;;  %v2972_v20 = vld [vmem:[%s18085_s2 + $0x1318] sm:$0xff] }
 0x498   :  { %9357 = vmatpush1.bf16.msra.mxu1 %v11076_v7  ;;  %v2931_v7 = vld [vmem:[%s18085_s2 + $0x11d0] sm:$0xff] }
 0x499   :  { %9683 = vmatpush1.bf16.msra.mxu0 %v11070_v3  ;;  %9367 = vmatprep.subr.bf16.mxu1 %v11085_v34  ;;  %v2928_v3 = vld [vmem:[%s18085_s2 + $0x11b8] sm:$0xff]  ;;  %v11126_v34 = vcombine.low %v2916_v61, %v2920_v51 }
 0x49a   :  { %9684 = vmatprep.subr.bf16.mxu0 %v11079_v12  ;;  %v2935_v12 = vld [vmem:[%s18085_s2 + $0x11f0] sm:$0xff]  ;;  %v11135_v37 = vcombine.high %v2924_v59, %v2928_v3 }
 0x49b   :  { %9359 = vmatmul.mubr.bf16.vlgmr.msra.gmra.mrb[4].mxu1 %v15481_v41  ;;  %v11141_v19 = vcombine.high %v2931_v7, %v2935_v12  ;;  %v11140_v6 = vcombine.low %v2931_v7, %v2935_v12  ;;  %v2980_v12 = vld [vmem:[%s18085_s2 + $0x1358] sm:$0xff] }
 0x49c   :  { %9368 = vmatpush1.bf16.msra.mxu1 %v11084_v11  ;;  %9399 = vmatprep.mubr.bf16.mxu1 %v15489_v14  ;;  %v2939_v11 = vld [vmem:[%s18085_s2 + $0x1210] sm:$0xff] }
 0x49d   :  { %9685 = vmatpush1.bf16.msra.mxu0 %v11078_v17  ;;  %9369 = vmatprep.subr.bf16.mxu1 %v11093_v16  ;;  %v2936_v17 = vld [vmem:[%s18085_s2 + $0x11f8] sm:$0xff]  ;;  %v11134_v16 = vcombine.low %v2924_v59, %v2928_v3 }
 0x49e   :  { %9695 = vmatprep.subr.bf16.mxu0 %v11087_v15  ;;  %v2943_v15 = vld [vmem:[%s18085_s2 + $0x1230] sm:$0xff]  ;;  %v11143_v58 = vcombine.high %v2932_v23, %v2936_v17 }
 0x49f   :  { %v11149_v18 = vcombine.high %v2939_v11, %v2943_v15  ;;  %v11148_v43 = vcombine.low %v2939_v11, %v2943_v15  ;;  %v2988_v15 = vld [vmem:[%s18085_s2 + $0x1398] sm:$0xff] }
 0x4a0   :  { %9687 = vmatmul.mubr.bf16.vlgmr.msra.gmra.mrb[20].mxu0 %v15481_v41  ;;  %9370 = vmatpush1.bf16.msra.mxu1 %v11092_v36  ;;  %v2900_v41 = vld [vmem:[%s18085_s2 + $0x10d8] sm:$0xff]  ;;  %v2947_v36 = vld [vmem:[%s18085_s2 + $0x1250] sm:$0xff] }
 0x4a1   :  { %9696 = vmatpush1.bf16.msra.mxu0 %v11086_v42  ;;  %9727 = vmatprep.mubr.bf16.mxu0 %v15489_v14  ;;  %v2911_v14 = vld [vmem:[%s18085_s2 + $0x1130] sm:$0xff]  ;;  %v11111_v44 = vcombine.high %v2900_v41, %v2904_v5  ;;  %v11110_v55 = vcombine.low %v2900_v41, %v2904_v5  ;;  %v2944_v42 = vld [vmem:[%s18085_s2 + $0x1238] sm:$0xff] }
 0x4a2   :  { %9697 = vmatprep.subr.bf16.mxu0 %v11095_v46  ;;  %9371 = vmatprep.subr.bf16.mxu1 %v11101_v48  ;;  %v11117_v26 = vcombine.high %v2907_v40, %v2911_v14  ;;  %v11116_v39 = vcombine.low %v2907_v40, %v2911_v14  ;;  %v2951_v46 = vld [vmem:[%s18085_s2 + $0x1270] sm:$0xff]  ;;  %v11142_v48 = vcombine.low %v2932_v23, %v2936_v17  ;;  %v2956_v14 = vld [vmem:[%s18085_s2 + $0x1298] sm:$0xff] }
 0x4a3   :  { %v11151_v0 = vcombine.high %v2940_v10, %v2944_v42  ;;  %v11157_v22 = vcombine.high %v2947_v36, %v2951_v46  ;;  %v11156_v41 = vcombine.low %v2947_v36, %v2951_v46  ;;  %v2996_v46 = vld [vmem:[%s18085_s2 + $0x13d8] sm:$0xff] }
 0x4a4   :  { %9372 = vmatpush1.bf16.msra.mxu1 %v11100_v38  ;;  %v2955_v38 = vld [vmem:[%s18085_s2 + $0x1290] sm:$0xff] }
 0x4a5   :  { %9698 = vmatpush1.bf16.msra.mxu0 %v11094_v32  ;;  %9373 = vmatprep.subr.bf16.mxu1 %v11109_v56  ;;  %v2952_v32 = vld [vmem:[%s18085_s2 + $0x1278] sm:$0xff]  ;;  %v11150_v56 = vcombine.low %v2940_v10, %v2944_v42 }
 0x4a6   :  { %9699 = vmatprep.subr.bf16.mxu0 %v11103_v49  ;;  %v2959_v49 = vld [vmem:[%s18085_s2 + $0x12b0] sm:$0xff]  ;;  %v11159_v5 = vcombine.high %v2948_v30, %v2952_v32 }
 0x4a7   :  { %v11165_v40 = vcombine.high %v2955_v38, %v2959_v49  ;;  %v11164_v27 = vcombine.low %v2955_v38, %v2959_v49  ;;  %v3004_v49 = vld [vmem:[%s18085_s2 + $0x1418] sm:$0xff] }
 0x4a8   :  { %9374 = vmatpush1.bf16.msra.mxu1 %v11108_v1  ;;  %v2963_v1 = vld [vmem:[%s18085_s2 + $0x12d0] sm:$0xff] }
 0x4a9   :  { %9700 = vmatpush1.bf16.msra.mxu0 %v11102_v50  ;;  %9375 = vmatprep.subr.bf16.mxu1 %v11117_v26  ;;  %v2960_v50 = vld [vmem:[%s18085_s2 + $0x12b8] sm:$0xff]  ;;  %v11158_v26 = vcombine.low %v2948_v30, %v2952_v32 }
 0x4aa   :  { %9701 = vmatprep.subr.bf16.mxu0 %v11111_v44  ;;  %v2967_v44 = vld [vmem:[%s18085_s2 + $0x12f0] sm:$0xff]  ;;  %v11167_v25 = vcombine.high %v2956_v14, %v2960_v50 }
 0x4ab   :  { %v11173_v62 = vcombine.high %v2963_v1, %v2967_v44  ;;  %v11172_v61 = vcombine.low %v2963_v1, %v2967_v44  ;;  %v3012_v44 = vld [vmem:[%s18085_s2 + $0x1458] sm:$0xff] }
 0x4ac   :  { %9376 = vmatpush1.bf16.msra.mxu1 %v11116_v39  ;;  %v2971_v39 = vld [vmem:[%s18085_s2 + $0x1310] sm:$0xff] }
 0x4ad   :  { %9702 = vmatpush1.bf16.msra.mxu0 %v11110_v55  ;;  %9377 = vmatprep.subr.bf16.mxu1 %v11125_v9  ;;  %v2968_v55 = vld [vmem:[%s18085_s2 + $0x12f8] sm:$0xff]  ;;  %v11166_v9 = vcombine.low %v2956_v14, %v2960_v50 }
 0x4ae   :  { %9703 = vmatprep.subr.bf16.mxu0 %v11119_v45  ;;  %v2975_v45 = vld [vmem:[%s18085_s2 + $0x1330] sm:$0xff]  ;;  %v11175_v51 = vcombine.high %v2964_v63, %v2968_v55 }
 0x4af   :  { %v11181_v54 = vcombine.high %v2971_v39, %v2975_v45  ;;  %v11180_v59 = vcombine.low %v2971_v39, %v2975_v45  ;;  %v3020_v45 = vld [vmem:[%s18085_s2 + $0x1498] sm:$0xff] }
 0x4b0   :  { %9378 = vmatpush1.bf16.msra.mxu1 %v11124_v29  ;;  %v2979_v29 = vld [vmem:[%s18085_s2 + $0x1350] sm:$0xff] }
 0x4b1   :  { %9704 = vmatpush1.bf16.msra.mxu0 %v11118_v21  ;;  %9379 = vmatprep.subr.bf16.mxu1 %v11133_v24  ;;  %v2976_v21 = vld [vmem:[%s18085_s2 + $0x1338] sm:$0xff]  ;;  %v11174_v24 = vcombine.low %v2964_v63, %v2968_v55 }
 0x4b2   :  { %9705 = vmatprep.subr.bf16.mxu0 %v11127_v33  ;;  %v2983_v33 = vld [vmem:[%s18085_s2 + $0x1370] sm:$0xff]  ;;  %v11183_v3 = vcombine.high %v2972_v20, %v2976_v21 }
 0x4b3   :  { %v11189_v7 = vcombine.high %v2979_v29, %v2983_v33  ;;  %v11188_v23 = vcombine.low %v2979_v29, %v2983_v33  ;;  %v3032_v33 = vld [vmem:[%s18085_s2 + $0x14f8] sm:$0xff] }
 0x4b4   :  { %9380 = vmatpush1.bf16.msra.mxu1 %v11132_v13  ;;  %v2987_v13 = vld [vmem:[%s18085_s2 + $0x1390] sm:$0xff] }
 0x4b5   :  { %9706 = vmatpush1.bf16.msra.mxu0 %v11126_v34  ;;  %9381 = vmatprep.subr.bf16.mxu1 %v11141_v19  ;;  %v2984_v34 = vld [vmem:[%s18085_s2 + $0x1378] sm:$0xff]  ;;  %v11182_v19 = vcombine.low %v2972_v20, %v2976_v21 }
 0x4b6   :  { %9707 = vmatprep.subr.bf16.mxu0 %v11135_v37  ;;  %v2991_v37 = vld [vmem:[%s18085_s2 + $0x13b0] sm:$0xff]  ;;  %v11191_v17 = vcombine.high %v2980_v12, %v2984_v34 }
 0x4b7   :  { %v11197_v11 = vcombine.high %v2987_v13, %v2991_v37  ;;  %v11196_v10 = vcombine.low %v2987_v13, %v2991_v37  ;;  %v3040_v13 = vld [vmem:[%s18085_s2 + $0x1538] sm:$0xff]  ;;  %v3043_v37 = vld [vmem:[%s18085_s2 + $0x1550] sm:$0xff] }
 0x4b8   :  { %9382 = vmatpush1.bf16.msra.mxu1 %v11140_v6  ;;  %v2995_v6 = vld [vmem:[%s18085_s2 + $0x13d0] sm:$0xff] }
 0x4b9   :  { %9708 = vmatpush1.bf16.msra.mxu0 %v11134_v16  ;;  %9383 = vmatprep.subr.bf16.mxu1 %v11149_v18  ;;  %v2992_v16 = vld [vmem:[%s18085_s2 + $0x13b8] sm:$0xff]  ;;  %v11190_v18 = vcombine.low %v2980_v12, %v2984_v34 }
 0x4ba   :  { %9709 = vmatprep.subr.bf16.mxu0 %v11143_v58  ;;  %v2999_v58 = vld [vmem:[%s18085_s2 + $0x13f0] sm:$0xff]  ;;  %v11199_v42 = vcombine.high %v2988_v15, %v2992_v16  ;;  %v3036_v34 = vld [vmem:[%s18085_s2 + $0x1518] sm:$0xff] }
 0x4bb   :  { %v11205_v36 = vcombine.high %v2995_v6, %v2999_v58  ;;  %v11204_v30 = vcombine.low %v2995_v6, %v2999_v58  ;;  %v3048_v6 = vld [vmem:[%s18085_s2 + $0x1578] sm:$0xff]  ;;  %v3051_v58 = vld [vmem:[%s18085_s2 + $0x1590] sm:$0xff] }
 0x4bc   :  { %9384 = vmatpush1.bf16.msra.mxu1 %v11148_v43  ;;  %v3003_v43 = vld [vmem:[%s18085_s2 + $0x1410] sm:$0xff] }
 0x4bd   :  { %9710 = vmatpush1.bf16.msra.mxu0 %v11142_v48  ;;  %9385 = vmatprep.subr.bf16.mxu1 %v11157_v22  ;;  %v3000_v48 = vld [vmem:[%s18085_s2 + $0x13f8] sm:$0xff]  ;;  %v11198_v22 = vcombine.low %v2988_v15, %v2992_v16 }
 0x4be   :  { %9711 = vmatprep.subr.bf16.mxu0 %v11151_v0  ;;  %v3007_v0 = vld [vmem:[%s18085_s2 + $0x1430] sm:$0xff]  ;;  %v11207_v32 = vcombine.high %v2996_v46, %v3000_v48  ;;  %v3044_v16 = vld [vmem:[%s18085_s2 + $0x1558] sm:$0xff] }
 0x4bf   :  { %v11213_v38 = vcombine.high %v3003_v43, %v3007_v0  ;;  %v11212_v14 = vcombine.low %v3003_v43, %v3007_v0  ;;  %v3056_v43 = vld [vmem:[%s18085_s2 + $0x15b8] sm:$0xff]  ;;  %v3059_v0 = vld [vmem:[%s18085_s2 + $0x15d0] sm:$0xff] }
 0x4c0   :  { %9386 = vmatpush1.bf16.msra.mxu1 %v11156_v41  ;;  %v3011_v41 = vld [vmem:[%s18085_s2 + $0x1450] sm:$0xff] }
 0x4c1   :  { %9712 = vmatpush1.bf16.msra.mxu0 %v11150_v56  ;;  %9387 = vmatprep.subr.bf16.mxu1 %v11165_v40  ;;  %v3008_v56 = vld [vmem:[%s18085_s2 + $0x1438] sm:$0xff]  ;;  %v11206_v40 = vcombine.low %v2996_v46, %v3000_v48 }
 0x4c2   :  { %9713 = vmatprep.subr.bf16.mxu0 %v11159_v5  ;;  %v3015_v5 = vld [vmem:[%s18085_s2 + $0x1470] sm:$0xff]  ;;  %v11215_v50 = vcombine.high %v3004_v49, %v3008_v56  ;;  %v3052_v48 = vld [vmem:[%s18085_s2 + $0x1598] sm:$0xff] }
 0x4c3   :  { %v11221_v1 = vcombine.high %v3011_v41, %v3015_v5  ;;  %v11220_v63 = vcombine.low %v3011_v41, %v3015_v5  ;;  %v3064_v41 = vld [vmem:[%s18085_s2 + $0x15f8] sm:$0xff]  ;;  %v3067_v5 = vld [vmem:[%s18085_s2 + $0x1610] sm:$0xff] }
 0x4c4   :  { %9388 = vmatpush1.bf16.msra.mxu1 %v11164_v27  ;;  %v3019_v27 = vld [vmem:[%s18085_s2 + $0x1490] sm:$0xff] }
 0x4c5   :  { %9714 = vmatpush1.bf16.msra.mxu0 %v11158_v26  ;;  %9389 = vmatprep.subr.bf16.mxu1 %v11173_v62  ;;  %v3016_v26 = vld [vmem:[%s18085_s2 + $0x1478] sm:$0xff]  ;;  %v11214_v62 = vcombine.low %v3004_v49, %v3008_v56 }
 0x4c6   :  { %9715 = vmatprep.subr.bf16.mxu0 %v11167_v25  ;;  %v3023_v25 = vld [vmem:[%s18085_s2 + $0x14b0] sm:$0xff]  ;;  %v11223_v55 = vcombine.high %v3012_v44, %v3016_v26  ;;  %v3060_v56 = vld [vmem:[%s18085_s2 + $0x15d8] sm:$0xff] }
 0x4c7   :  { %v11229_v39 = vcombine.high %v3019_v27, %v3023_v25  ;;  %v11228_v20 = vcombine.low %v3019_v27, %v3023_v25  ;;  %v3072_v27 = vld [vmem:[%s18085_s2 + $0x1638] sm:$0xff]  ;;  %v3075_v25 = vld [vmem:[%s18085_s2 + $0x1650] sm:$0xff] }
 0x4c8   :  { %9390 = vmatpush1.bf16.msra.mxu1 %v11172_v61  ;;  %v3027_v61 = vld [vmem:[%s18085_s2 + $0x14d0] sm:$0xff] }
 0x4c9   :  { %9716 = vmatpush1.bf16.msra.mxu0 %v11166_v9  ;;  %9391 = vmatprep.subr.bf16.mxu1 %v11181_v54  ;;  %v3024_v9 = vld [vmem:[%s18085_s2 + $0x14b8] sm:$0xff]  ;;  %v11222_v54 = vcombine.low %v3012_v44, %v3016_v26 }
 0x4ca   :  { %9717 = vmatprep.subr.bf16.mxu0 %v11175_v51  ;;  %v3031_v51 = vld [vmem:[%s18085_s2 + $0x14f0] sm:$0xff]  ;;  %v11231_v21 = vcombine.high %v3020_v45, %v3024_v9  ;;  %v3068_v26 = vld [vmem:[%s18085_s2 + $0x1618] sm:$0xff] }
 0x4cb   :  { %v11237_v29 = vcombine.high %v3027_v61, %v3031_v51 }
 0x4cc   :  { %9392 = vmatpush1.bf16.msra.mxu1 %v11180_v59  ;;  %v11230_v59 = vcombine.low %v3020_v45, %v3024_v9  ;;  %v3076_v9 = vld [vmem:[%s18085_s2 + $0x1658] sm:$0xff] }
 0x4cd   :  { %9718 = vmatpush1.bf16.msra.mxu0 %v11174_v24  ;;  %9393 = vmatprep.subr.bf16.mxu1 %v11189_v7  ;;  %v3035_v24 = vld [vmem:[%s18085_s2 + $0x1510] sm:$0xff] }
 0x4ce   :  { %9719 = vmatprep.subr.bf16.mxu0 %v11183_v3  ;;  %v11236_v3 = vcombine.low %v3027_v61, %v3031_v51  ;;  %v3080_v61 = vld [vmem:[%s18085_s2 + $0x1678] sm:$0xff]  ;;  %v3083_v51 = vld [vmem:[%s18085_s2 + $0x1690] sm:$0xff] }
 0x4d0   :  { %9394 = vmatpush1.bf16.msra.mxu1 %v11188_v23 }
 0x4d1   :  { %9720 = vmatpush1.bf16.msra.mxu0 %v11182_v19  ;;  %9395 = vmatprep.subr.bf16.mxu1 %v11197_v11  ;;  %v3047_v19 = vld [vmem:[%s18085_s2 + $0x1570] sm:$0xff]  ;;  %v11247_v11 = vcombine.high %v3036_v34, %v3040_v13 }
 0x4d2   :  { %9721 = vmatprep.subr.bf16.mxu0 %v11191_v17  ;;  %v11253_v15 = vcombine.high %v3043_v37, %v3047_v19 }
 0x4d4   :  { %9396 = vmatpush1.bf16.msra.mxu1 %v11196_v10  ;;  %v11246_v10 = vcombine.low %v3036_v34, %v3040_v13  ;;  %v3092_v13 = vld [vmem:[%s18085_s2 + $0x16d8] sm:$0xff] }
 0x4d5   :  { %9722 = vmatpush1.bf16.msra.mxu0 %v11190_v18  ;;  %9397 = vmatprep.subr.bf16.mxu1 %v11205_v36  ;;  %v3055_v18 = vld [vmem:[%s18085_s2 + $0x15b0] sm:$0xff]  ;;  %v11255_v36 = vcombine.high %v3044_v16, %v3048_v6 }
 0x4d6   :  { %9723 = vmatprep.subr.bf16.mxu0 %v11199_v42  ;;  %v11252_v42 = vcombine.low %v3043_v37, %v3047_v19  ;;  %v11261_v46 = vcombine.high %v3051_v58, %v3055_v18  ;;  %v3096_v37 = vld [vmem:[%s18085_s2 + $0x16f8] sm:$0xff]  ;;  %v3099_v19 = vld [vmem:[%s18085_s2 + $0x1710] sm:$0xff] }
 0x4d8   :  { %9398 = vmatpush1.bf16.msra.mxu1 %v11204_v30  ;;  %v11254_v30 = vcombine.low %v3044_v16, %v3048_v6  ;;  %v3100_v6 = vld [vmem:[%s18085_s2 + $0x1718] sm:$0xff] }
 0x4d9   :  { %9724 = vmatpush1.bf16.msra.mxu0 %v11198_v22  ;;  %9408 = vmatprep.subr.bf16.mxu1 %v11213_v38  ;;  %v3063_v22 = vld [vmem:[%s18085_s2 + $0x15f0] sm:$0xff]  ;;  %v11263_v38 = vcombine.high %v3052_v48, %v3056_v43 }
 0x4da   :  { %9725 = vmatprep.subr.bf16.mxu0 %v11207_v32  ;;  %v11260_v32 = vcombine.low %v3051_v58, %v3055_v18  ;;  %v11269_v49 = vcombine.high %v3059_v0, %v3063_v22  ;;  %v3104_v58 = vld [vmem:[%s18085_s2 + $0x1738] sm:$0xff]  ;;  %v3107_v18 = vld [vmem:[%s18085_s2 + $0x1750] sm:$0xff] }
 0x4db   :  { %9400 = vmatmul.mubr.bf16.vlgmr.msra.gmra.mrb[4].mxu1 %v15691_v2 }
 0x4dc   :  { %9409 = vmatpush1.bf16.msra.mxu1 %v11212_v14  ;;  %9440 = vmatprep.mubr.bf16.mxu1 %v15705_v47  ;;  %v11262_v14 = vcombine.low %v3052_v48, %v3056_v43  ;;  %v3108_v43 = vld [vmem:[%s18085_s2 + $0x1758] sm:$0xff] }
 0x4dd   :  { %9726 = vmatpush1.bf16.msra.mxu0 %v11206_v40  ;;  %9410 = vmatprep.subr.bf16.mxu1 %v11221_v1  ;;  %v3071_v40 = vld [vmem:[%s18085_s2 + $0x1630] sm:$0xff]  ;;  %v11271_v1 = vcombine.high %v3060_v56, %v3064_v41 }
 0x4de   :  { %9736 = vmatprep.subr.bf16.mxu0 %v11215_v50  ;;  %v11268_v50 = vcombine.low %v3059_v0, %v3063_v22  ;;  %v11277_v44 = vcombine.high %v3067_v5, %v3071_v40  ;;  %v3112_v0 = vld [vmem:[%s18085_s2 + $0x1778] sm:$0xff]  ;;  %v3115_v22 = vld [vmem:[%s18085_s2 + $0x1790] sm:$0xff] }
 0x4e0   :  { %9728 = vmatmul.mubr.bf16.vlgmr.msra.gmra.mrb[20].mxu0 %v15691_v2  ;;  %9411 = vmatpush1.bf16.msra.mxu1 %v11220_v63  ;;  %v3028_v2 = vld [vmem:[%s18085_s2 + $0x14d8] sm:$0xff]  ;;  %v11270_v63 = vcombine.low %v3060_v56, %v3064_v41 }
 0x4e1   :  { %9737 = vmatpush1.bf16.msra.mxu0 %v11214_v62  ;;  %9768 = vmatprep.mubr.bf16.mxu0 %v15705_v47  ;;  %v3039_v47 = vld [vmem:[%s18085_s2 + $0x1530] sm:$0xff]  ;;  %v11239_v7 = vcombine.high %v3028_v2, %v3032_v33  ;;  %v11238_v23 = vcombine.low %v3028_v2, %v3032_v33  ;;  %v3084_v33 = vld [vmem:[%s18085_s2 + $0x1698] sm:$0xff] }
 0x4e2   :  { %9738 = vmatprep.subr.bf16.mxu0 %v11223_v55  ;;  %9412 = vmatprep.subr.bf16.mxu1 %v11229_v39  ;;  %v11245_v12 = vcombine.high %v3035_v24, %v3039_v47  ;;  %v11244_v17 = vcombine.low %v3035_v24, %v3039_v47  ;;  %v3079_v62 = vld [vmem:[%s18085_s2 + $0x1670] sm:$0xff]  ;;  %v11276_v55 = vcombine.low %v3067_v5, %v3071_v40  ;;  %v3088_v24 = vld [vmem:[%s18085_s2 + $0x16b8] sm:$0xff] }
 0x4e3   :  { %v11279_v39 = vcombine.high %v3068_v26, %v3072_v27  ;;  %v11285_v45 = vcombine.high %v3075_v25, %v3079_v62  ;;  %v3091_v47 = vld [vmem:[%s18085_s2 + $0x16d0] sm:$0xff]  ;;  %v3116_v41 = vld [vmem:[%s18085_s2 + $0x1798] sm:$0xff] }
 0x4e4   :  { %9413 = vmatpush1.bf16.msra.mxu1 %v11228_v20  ;;  %v11278_v20 = vcombine.low %v3068_v26, %v3072_v27  ;;  %v3120_v5 = vld [vmem:[%s18085_s2 + $0x17b8] sm:$0xff]  ;;  %v3123_v40 = vld [vmem:[%s18085_s2 + $0x17d0] sm:$0xff] }
 0x4e5   :  { %9739 = vmatpush1.bf16.msra.mxu0 %v11222_v54  ;;  %9414 = vmatprep.subr.bf16.mxu1 %v11237_v29  ;;  %v3087_v54 = vld [vmem:[%s18085_s2 + $0x16b0] sm:$0xff]  ;;  %v11287_v29 = vcombine.high %v3076_v9, %v3080_v61  ;;  %v3124_v27 = vld [vmem:[%s18085_s2 + $0x17d8] sm:$0xff] }
 0x4e6   :  { %9740 = vmatprep.subr.bf16.mxu0 %v11231_v21  ;;  %v11284_v21 = vcombine.low %v3075_v25, %v3079_v62  ;;  %v11293_v2 = vcombine.high %v3083_v51, %v3087_v54  ;;  %v3128_v25 = vld [vmem:[%s18085_s2 + $0x17f8] sm:$0xff]  ;;  %v3131_v62 = vld [vmem:[%s18085_s2 + $0x1810] sm:$0xff] }
 0x4e8   :  { %9415 = vmatpush1.bf16.msra.mxu1 %v11236_v3  ;;  %v11286_v3 = vcombine.low %v3076_v9, %v3080_v61  ;;  %v3132_v61 = vld [vmem:[%s18085_s2 + $0x1818] sm:$0xff] }
 0x4e9   :  { %9741 = vmatpush1.bf16.msra.mxu0 %v11230_v59  ;;  %9416 = vmatprep.subr.bf16.mxu1 %v11245_v12  ;;  %v3095_v59 = vld [vmem:[%s18085_s2 + $0x16f0] sm:$0xff]  ;;  %v11295_v12 = vcombine.high %v3084_v33, %v3088_v24 }
 0x4ea   :  { %9742 = vmatprep.subr.bf16.mxu0 %v11239_v7  ;;  %v11292_v7 = vcombine.low %v3083_v51, %v3087_v54  ;;  %v11301_v34 = vcombine.high %v3091_v47, %v3095_v59  ;;  %v3136_v51 = vld [vmem:[%s18085_s2 + $0x1838] sm:$0xff]  ;;  %v3139_v54 = vld [vmem:[%s18085_s2 + $0x1850] sm:$0xff] }
 0x4ec   :  { %9417 = vmatpush1.bf16.msra.mxu1 %v11244_v17  ;;  %v11294_v17 = vcombine.low %v3084_v33, %v3088_v24  ;;  %v3140_v24 = vld [vmem:[%s18085_s2 + $0x1858] sm:$0xff] }
 0x4ed   :  { %9743 = vmatpush1.bf16.msra.mxu0 %v11238_v23  ;;  %9418 = vmatprep.subr.bf16.mxu1 %v11253_v15  ;;  %v3103_v23 = vld [vmem:[%s18085_s2 + $0x1730] sm:$0xff]  ;;  %v11303_v15 = vcombine.high %v3092_v13, %v3096_v37 }
 0x4ee   :  { %9744 = vmatprep.subr.bf16.mxu0 %v11247_v11  ;;  %v11300_v11 = vcombine.low %v3091_v47, %v3095_v59  ;;  %v11309_v16 = vcombine.high %v3099_v19, %v3103_v23  ;;  %v3144_v47 = vld [vmem:[%s18085_s2 + $0x1878] sm:$0xff]  ;;  %v3147_v59 = vld [vmem:[%s18085_s2 + $0x1890] sm:$0xff] }
 0x4f0   :  { %9419 = vmatpush1.bf16.msra.mxu1 %v11252_v42  ;;  %v11302_v42 = vcombine.low %v3092_v13, %v3096_v37  ;;  %v11351_v13 = vcombine.high %v3140_v24, %v3144_v47  ;;  %v3152_v37 = vld [vmem:[%s18085_s2 + $0x18b8] sm:$0xff] }
 0x4f1   :  { %9745 = vmatpush1.bf16.msra.mxu0 %v11246_v10  ;;  %9420 = vmatprep.subr.bf16.mxu1 %v11261_v46  ;;  %v3111_v10 = vld [vmem:[%s18085_s2 + $0x1770] sm:$0xff]  ;;  %v11311_v46 = vcombine.high %v3100_v6, %v3104_v58 }
 0x4f2   :  { %9746 = vmatprep.subr.bf16.mxu0 %v11255_v36  ;;  %v11308_v36 = vcombine.low %v3099_v19, %v3103_v23  ;;  %v11317_v48 = vcombine.high %v3107_v18, %v3111_v10  ;;  %v3155_v23 = vld [vmem:[%s18085_s2 + $0x18d0] sm:$0xff] }
 0x4f4   :  { %9421 = vmatpush1.bf16.msra.mxu1 %v11260_v32  ;;  %v11310_v32 = vcombine.low %v3100_v6, %v3104_v58 }
 0x4f5   :  { %9747 = vmatpush1.bf16.msra.mxu0 %v11254_v30  ;;  %9422 = vmatprep.subr.bf16.mxu1 %v11269_v49  ;;  %v3119_v30 = vld [vmem:[%s18085_s2 + $0x17b0] sm:$0xff]  ;;  %v11319_v49 = vcombine.high %v3108_v43, %v3112_v0 }
 0x4f6   :  { %9748 = vmatprep.subr.bf16.mxu0 %v11263_v38  ;;  %v11316_v38 = vcombine.low %v3107_v18, %v3111_v10  ;;  %v11325_v56 = vcombine.high %v3115_v22, %v3119_v30  ;;  %v3163_v18 = vld [vmem:[%s18085_s2 + $0x1910] sm:$0xff] }
 0x4f8   :  { %9423 = vmatpush1.bf16.msra.mxu1 %v11268_v50  ;;  %v11318_v50 = vcombine.low %v3108_v43, %v3112_v0  ;;  %v3171_v0 = vld [vmem:[%s18085_s2 + $0x1950] sm:$0xff] }
 0x4f9   :  { %9749 = vmatpush1.bf16.msra.mxu0 %v11262_v14  ;;  %9424 = vmatprep.subr.bf16.mxu1 %v11277_v44  ;;  %v3127_v14 = vld [vmem:[%s18085_s2 + $0x17f0] sm:$0xff]  ;;  %v11327_v44 = vcombine.high %v3116_v41, %v3120_v5 }
 0x4fa   :  { %9750 = vmatprep.subr.bf16.mxu0 %v11271_v1  ;;  %v11324_v1 = vcombine.low %v3115_v22, %v3119_v30  ;;  %v11333_v26 = vcombine.high %v3123_v40, %v3127_v14  ;;  %v3175_v22 = vld [vmem:[%s18085_s2 + $0x1970] sm:$0xff] }
 0x4fc   :  { %9425 = vmatpush1.bf16.msra.mxu1 %v11276_v55  ;;  %v11326_v55 = vcombine.low %v3116_v41, %v3120_v5  ;;  %v11381_v41 = vcombine.high %v3171_v0, %v3175_v22  ;;  %v3179_v5 = vld [vmem:[%s18085_s2 + $0x1990] sm:$0xff] }
 0x4fd   :  { %9751 = vmatpush1.bf16.msra.mxu0 %v11270_v63  ;;  %9426 = vmatprep.subr.bf16.mxu1 %v11285_v45  ;;  %v3135_v63 = vld [vmem:[%s18085_s2 + $0x1830] sm:$0xff]  ;;  %v11335_v45 = vcombine.high %v3124_v27, %v3128_v25 }
 0x4fe   :  { %9752 = vmatprep.subr.bf16.mxu0 %v11279_v39  ;;  %v11332_v39 = vcombine.low %v3123_v40, %v3127_v14  ;;  %v11341_v9 = vcombine.high %v3131_v62, %v3135_v63  ;;  %v3183_v40 = vld [vmem:[%s18085_s2 + $0x19b0] sm:$0xff] }
 0x500   :  { %9427 = vmatpush1.bf16.msra.mxu1 %v11284_v21  ;;  %v11334_v21 = vcombine.low %v3124_v27, %v3128_v25  ;;  %v11389_v27 = vcombine.high %v3179_v5, %v3183_v40  ;;  %v3187_v25 = vld [vmem:[%s18085_s2 + $0x19d0] sm:$0xff] }
 0x501   :  { %9753 = vmatpush1.bf16.msra.mxu0 %v11278_v20  ;;  %9428 = vmatprep.subr.bf16.mxu1 %v11293_v2  ;;  %v3143_v20 = vld [vmem:[%s18085_s2 + $0x1870] sm:$0xff]  ;;  %v11343_v2 = vcombine.high %v3132_v61, %v3136_v51 }
 0x502   :  { %9754 = vmatprep.subr.bf16.mxu0 %v11287_v29  ;;  %v11340_v29 = vcombine.low %v3131_v62, %v3135_v63  ;;  %v11349_v33 = vcombine.high %v3139_v54, %v3143_v20  ;;  %v3191_v62 = vld [vmem:[%s18085_s2 + $0x19f0] sm:$0xff] }
 0x504   :  { %9429 = vmatpush1.bf16.msra.mxu1 %v11292_v7  ;;  %v11342_v7 = vcombine.low %v3132_v61, %v3136_v51  ;;  %v11397_v61 = vcombine.high %v3187_v25, %v3191_v62  ;;  %v3195_v51 = vld [vmem:[%s18085_s2 + $0x1a10] sm:$0xff] }
 0x505   :  { %9755 = vmatpush1.bf16.msra.mxu0 %v11286_v3  ;;  %9430 = vmatprep.subr.bf16.mxu1 %v11301_v34  ;;  %v3151_v3 = vld [vmem:[%s18085_s2 + $0x18b0] sm:$0xff]  ;;  %v11348_v34 = vcombine.low %v3139_v54, %v3143_v20 }
 0x506   :  { %9756 = vmatprep.subr.bf16.mxu0 %v11295_v12  ;;  %v3148_v12 = vld [vmem:[%s18085_s2 + $0x1898] sm:$0xff]  ;;  %v11357_v19 = vcombine.high %v3147_v59, %v3151_v3  ;;  %v3199_v54 = vld [vmem:[%s18085_s2 + $0x1a30] sm:$0xff] }
 0x507   :  { %v11359_v6 = vcombine.high %v3148_v12, %v3152_v37  ;;  %v11358_v10 = vcombine.low %v3148_v12, %v3152_v37  ;;  %v11404_v12 = vcombine.low %v3195_v51, %v3199_v54 }
 0x508   :  { %9431 = vmatpush1.bf16.msra.mxu1 %v11300_v11  ;;  %v11350_v11 = vcombine.low %v3140_v24, %v3144_v47  ;;  %v11405_v24 = vcombine.high %v3195_v51, %v3199_v54  ;;  %v3203_v47 = vld [vmem:[%s18085_s2 + $0x1a50] sm:$0xff] }
 0x509   :  { %9757 = vmatpush1.bf16.msra.mxu0 %v11294_v17  ;;  %9432 = vmatprep.subr.bf16.mxu1 %v11309_v16  ;;  %v3159_v17 = vld [vmem:[%s18085_s2 + $0x18f0] sm:$0xff]  ;;  %v11356_v16 = vcombine.low %v3147_v59, %v3151_v3 }
 0x50a   :  { %9758 = vmatprep.subr.bf16.mxu0 %v11303_v15  ;;  %v3156_v15 = vld [vmem:[%s18085_s2 + $0x18d8] sm:$0xff]  ;;  %v11365_v58 = vcombine.high %v3155_v23, %v3159_v17  ;;  %v3207_v59 = vld [vmem:[%s18085_s2 + $0x1a70] sm:$0xff] }
 0x50b   :  { %v11413_v37 = vcombine.high %v3203_v47, %v3207_v59  ;;  %v3255_v51 = vld [vmem:[%s18085_s2 + $0x1bf0] sm:$0xff] }
 0x50c   :  { %9433 = vmatpush1.bf16.msra.mxu1 %v11308_v36  ;;  %v11364_v36 = vcombine.low %v3155_v23, %v3159_v17  ;;  %v3215_v23 = vld [vmem:[%s18085_s2 + $0x1ab0] sm:$0xff] }
 0x50d   :  { %9759 = vmatpush1.bf16.msra.mxu0 %v11302_v42  ;;  %9434 = vmatprep.subr.bf16.mxu1 %v11317_v48  ;;  %v3164_v42 = vld [vmem:[%s18085_s2 + $0x1918] sm:$0xff] }
 0x50e   :  { %9760 = vmatprep.subr.bf16.mxu0 %v11311_v46  ;;  %v3168_v48 = vld [vmem:[%s18085_s2 + $0x1938] sm:$0xff] }
 0x50f   :  { %v11374_v14 = vcombine.low %v3164_v42, %v3168_v48 }
 0x510   :  { %9435 = vmatpush1.bf16.msra.mxu1 %v11316_v38 }
 0x511   :  { %9761 = vmatpush1.bf16.msra.mxu0 %v11310_v32  ;;  %9436 = vmatprep.subr.bf16.mxu1 %v11325_v56  ;;  %v3172_v32 = vld [vmem:[%s18085_s2 + $0x1958] sm:$0xff] }
 0x512   :  { %9762 = vmatprep.subr.bf16.mxu0 %v11319_v49  ;;  %v11375_v49 = vcombine.high %v3164_v42, %v3168_v48  ;;  %v3176_v56 = vld [vmem:[%s18085_s2 + $0x1978] sm:$0xff] }
 0x513   :  { %v11382_v63 = vcombine.low %v3172_v32, %v3176_v56 }
 0x514   :  { %9437 = vmatpush1.bf16.msra.mxu1 %v11324_v1  ;;  %v11380_v1 = vcombine.low %v3171_v0, %v3175_v22  ;;  %v3231_v0 = vld [vmem:[%s18085_s2 + $0x1b30] sm:$0xff] }
 0x515   :  { %9763 = vmatpush1.bf16.msra.mxu0 %v11318_v50  ;;  %9438 = vmatprep.subr.bf16.mxu1 %v11333_v26  ;;  %v3180_v50 = vld [vmem:[%s18085_s2 + $0x1998] sm:$0xff] }
 0x516   :  { %9764 = vmatprep.subr.bf16.mxu0 %v11327_v44  ;;  %v11383_v44 = vcombine.high %v3172_v32, %v3176_v56  ;;  %v3184_v26 = vld [vmem:[%s18085_s2 + $0x19b8] sm:$0xff] }
 0x517   :  { %v11390_v20 = vcombine.low %v3180_v50, %v3184_v26 }
 0x518   :  { %9439 = vmatpush1.bf16.msra.mxu1 %v11332_v39  ;;  %v11388_v39 = vcombine.low %v3179_v5, %v3183_v40  ;;  %v3239_v5 = vld [vmem:[%s18085_s2 + $0x1b70] sm:$0xff] }
 0x519   :  { %9765 = vmatpush1.bf16.msra.mxu0 %v11326_v55  ;;  %9449 = vmatprep.subr.bf16.mxu1 %v11341_v9  ;;  %v3188_v55 = vld [vmem:[%s18085_s2 + $0x19d8] sm:$0xff] }
 0x51a   :  { %9766 = vmatprep.subr.bf16.mxu0 %v11335_v45  ;;  %v11391_v45 = vcombine.high %v3180_v50, %v3184_v26  ;;  %v3192_v9 = vld [vmem:[%s18085_s2 + $0x19f8] sm:$0xff] }
 0x51b   :  { %9441 = vmatmul.mubr.bf16.vlgmr.msra.gmra.mrb[4].mxu1 %v15893_v4  ;;  %v11398_v3 = vcombine.low %v3188_v55, %v3192_v9 }
 0x51c   :  { %9450 = vmatpush1.bf16.msra.mxu1 %v11340_v29  ;;  %9481 = vmatprep.mubr.bf16.mxu1 %v15907_v31  ;;  %v11396_v29 = vcombine.low %v3187_v25, %v3191_v62  ;;  %v3247_v25 = vld [vmem:[%s18085_s2 + $0x1bb0] sm:$0xff] }
 0x51d   :  { %9767 = vmatpush1.bf16.msra.mxu0 %v11334_v21  ;;  %9451 = vmatprep.subr.bf16.mxu1 %v11349_v33  ;;  %v3196_v21 = vld [vmem:[%s18085_s2 + $0x1a18] sm:$0xff] }
 0x51e   :  { %9777 = vmatprep.subr.bf16.mxu0 %v11343_v2  ;;  %v11399_v2 = vcombine.high %v3188_v55, %v3192_v9  ;;  %v3200_v33 = vld [vmem:[%s18085_s2 + $0x1a38] sm:$0xff] }
 0x51f   :  { %v11406_v17 = vcombine.low %v3196_v21, %v3200_v33 }
 0x520   :  { %9769 = vmatmul.mubr.bf16.vlgmr.msra.gmra.mrb[20].mxu0 %v15893_v4  ;;  %9452 = vmatpush1.bf16.msra.mxu1 %v11348_v34  ;;  %v3160_v4 = vld [vmem:[%s18085_s2 + $0x18f8] sm:$0xff]  ;;  %v11407_v34 = vcombine.high %v3196_v21, %v3200_v33 }
 0x521   :  { %9778 = vmatpush1.bf16.msra.mxu0 %v11342_v7  ;;  %9809 = vmatprep.mubr.bf16.mxu0 %v15907_v31  ;;  %v3167_v31 = vld [vmem:[%s18085_s2 + $0x1930] sm:$0xff]  ;;  %v11367_v46 = vcombine.high %v3156_v15, %v3160_v4  ;;  %v11366_v30 = vcombine.low %v3156_v15, %v3160_v4  ;;  %v3204_v7 = vld [vmem:[%s18085_s2 + $0x1a58] sm:$0xff] }
 0x522   :  { %9779 = vmatprep.subr.bf16.mxu0 %v11351_v13  ;;  %9453 = vmatprep.subr.bf16.mxu1 %v11357_v19  ;;  %v11373_v43 = vcombine.high %v3163_v18, %v3167_v31  ;;  %v11372_v38 = vcombine.low %v3163_v18, %v3167_v31  ;;  %v3208_v13 = vld [vmem:[%s18085_s2 + $0x1a78] sm:$0xff]  ;;  %v3211_v19 = vld [vmem:[%s18085_s2 + $0x1a90] sm:$0xff] }
 0x523   :  { %v3216_v15 = vld [vmem:[%s18085_s2 + $0x1ab8] sm:$0xff]  ;;  %v11421_v4 = vcombine.high %v3211_v19, %v3215_v23  ;;  %v3223_v18 = vld [vmem:[%s18085_s2 + $0x1af0] sm:$0xff]  ;;  %v11414_v31 = vcombine.low %v3204_v7, %v3208_v13  ;;  %v11420_v42 = vcombine.low %v3211_v19, %v3215_v23 }
 0x524   :  { %9454 = vmatpush1.bf16.msra.mxu1 %v11356_v16  ;;  %v11412_v16 = vcombine.low %v3203_v47, %v3207_v59  ;;  %v3263_v47 = vld [vmem:[%s18085_s2 + $0x1c30] sm:$0xff] }
 0x525   :  { %9780 = vmatpush1.bf16.msra.mxu0 %v11350_v11  ;;  %9455 = vmatprep.subr.bf16.mxu1 %v11365_v58  ;;  %v3212_v11 = vld [vmem:[%s18085_s2 + $0x1a98] sm:$0xff]  ;;  %v3219_v58 = vld [vmem:[%s18085_s2 + $0x1ad0] sm:$0xff] }
 0x526   :  { %9781 = vmatprep.subr.bf16.mxu0 %v11359_v6  ;;  %v11415_v6 = vcombine.high %v3204_v7, %v3208_v13  ;;  %v11429_v48 = vcombine.high %v3219_v58, %v3223_v18  ;;  %v11422_v22 = vcombine.low %v3212_v11, %v3216_v15  ;;  %v11428_v32 = vcombine.low %v3219_v58, %v3223_v18  ;;  %v3264_v7 = vld [vmem:[%s18085_s2 + $0x1c38] sm:$0xff]  ;;  %v3267_v13 = vld [vmem:[%s18085_s2 + $0x1c50] sm:$0xff] }
 0x527   :  { %v3279_v58 = vld [vmem:[%s18085_s2 + $0x1cb0] sm:$0xff] }
 0x528   :  { %9456 = vmatpush1.bf16.msra.mxu1 %v11364_v36  ;;  %v11423_v36 = vcombine.high %v3212_v11, %v3216_v15 }
 0x529   :  { %9782 = vmatpush1.bf16.msra.mxu0 %v11358_v10  ;;  %9457 = vmatprep.subr.bf16.mxu1 %v11373_v43  ;;  %v3220_v10 = vld [vmem:[%s18085_s2 + $0x1ad8] sm:$0xff]  ;;  %v3227_v43 = vld [vmem:[%s18085_s2 + $0x1b10] sm:$0xff] }
 0x52a   :  { %9783 = vmatprep.subr.bf16.mxu0 %v11367_v46  ;;  %v3224_v46 = vld [vmem:[%s18085_s2 + $0x1af8] sm:$0xff]  ;;  %v11437_v56 = vcombine.high %v3227_v43, %v3231_v0  ;;  %v11436_v50 = vcombine.low %v3227_v43, %v3231_v0  ;;  %v3287_v43 = vld [vmem:[%s18085_s2 + $0x1cf0] sm:$0xff] }
 0x52b   :  { %v11430_v40 = vcombine.low %v3220_v10, %v3224_v46 }
 0x52c   :  { %9458 = vmatpush1.bf16.msra.mxu1 %v11372_v38  ;;  %v11431_v38 = vcombine.high %v3220_v10, %v3224_v46  ;;  %v3280_v46 = vld [vmem:[%s18085_s2 + $0x1cb8] sm:$0xff] }
 0x52d   :  { %9784 = vmatpush1.bf16.msra.mxu0 %v11366_v30  ;;  %9459 = vmatprep.subr.bf16.mxu1 %v11381_v41  ;;  %v3228_v30 = vld [vmem:[%s18085_s2 + $0x1b18] sm:$0xff]  ;;  %v3235_v41 = vld [vmem:[%s18085_s2 + $0x1b50] sm:$0xff] }
 0x52e   :  { %9785 = vmatprep.subr.bf16.mxu0 %v11375_v49  ;;  %v3232_v49 = vld [vmem:[%s18085_s2 + $0x1b38] sm:$0xff]  ;;  %v11445_v26 = vcombine.high %v3235_v41, %v3239_v5  ;;  %v11444_v55 = vcombine.low %v3235_v41, %v3239_v5 }
 0x52f   :  { %v11438_v62 = vcombine.low %v3228_v30, %v3232_v49 }
 0x530   :  { %9460 = vmatpush1.bf16.msra.mxu1 %v11380_v1  ;;  %v11439_v1 = vcombine.high %v3228_v30, %v3232_v49  ;;  %v3291_v49 = vld [vmem:[%s18085_s2 + $0x1d10] sm:$0xff] }
 0x531   :  { %9786 = vmatpush1.bf16.msra.mxu0 %v11374_v14  ;;  %9461 = vmatprep.subr.bf16.mxu1 %v11389_v27  ;;  %v3236_v14 = vld [vmem:[%s18085_s2 + $0x1b58] sm:$0xff]  ;;  %v3243_v27 = vld [vmem:[%s18085_s2 + $0x1b90] sm:$0xff] }
 0x532   :  { %9787 = vmatprep.subr.bf16.mxu0 %v11383_v44  ;;  %v3240_v44 = vld [vmem:[%s18085_s2 + $0x1b78] sm:$0xff]  ;;  %v11453_v9 = vcombine.high %v3243_v27, %v3247_v25  ;;  %v11452_v21 = vcombine.low %v3243_v27, %v3247_v25 }
 0x533   :  { %v11446_v54 = vcombine.low %v3236_v14, %v3240_v44 }
 0x534   :  { %9462 = vmatpush1.bf16.msra.mxu1 %v11388_v39  ;;  %v11447_v39 = vcombine.high %v3236_v14, %v3240_v44  ;;  %v3292_v14 = vld [vmem:[%s18085_s2 + $0x1d18] sm:$0xff]  ;;  %v3303_v44 = vld [vmem:[%s18085_s2 + $0x1d70] sm:$0xff] }
 0x535   :  { %9788 = vmatpush1.bf16.msra.mxu0 %v11382_v63  ;;  %9463 = vmatprep.subr.bf16.mxu1 %v11397_v61  ;;  %v3244_v63 = vld [vmem:[%s18085_s2 + $0x1b98] sm:$0xff]  ;;  %v3251_v61 = vld [vmem:[%s18085_s2 + $0x1bd0] sm:$0xff] }
 0x536   :  { %9789 = vmatprep.subr.bf16.mxu0 %v11391_v45  ;;  %v3248_v45 = vld [vmem:[%s18085_s2 + $0x1bb8] sm:$0xff]  ;;  %v11461_v33 = vcombine.high %v3251_v61, %v3255_v51 }
 0x537   :  { %v11454_v59 = vcombine.low %v3244_v63, %v3248_v45 }
 0x538   :  { %9464 = vmatpush1.bf16.msra.mxu1 %v11396_v29  ;;  %v11455_v29 = vcombine.high %v3244_v63, %v3248_v45  ;;  %v3300_v63 = vld [vmem:[%s18085_s2 + $0x1d58] sm:$0xff]  ;;  %v3311_v45 = vld [vmem:[%s18085_s2 + $0x1db0] sm:$0xff] }
 0x539   :  { %9790 = vmatpush1.bf16.msra.mxu0 %v11390_v20  ;;  %9465 = vmatprep.subr.bf16.mxu1 %v11405_v24  ;;  %v3252_v20 = vld [vmem:[%s18085_s2 + $0x1bd8] sm:$0xff]  ;;  %v3259_v24 = vld [vmem:[%s18085_s2 + $0x1c10] sm:$0xff] }
 0x53a   :  { %9791 = vmatprep.subr.bf16.mxu0 %v11399_v2  ;;  %v3256_v2 = vld [vmem:[%s18085_s2 + $0x1bf8] sm:$0xff]  ;;  %v11469_v19 = vcombine.high %v3259_v24, %v3263_v47 }
 0x53b   :  { %v11462_v23 = vcombine.low %v3252_v20, %v3256_v2 }
 0x53c   :  { %9466 = vmatpush1.bf16.msra.mxu1 %v11404_v12  ;;  %v11460_v12 = vcombine.low %v3251_v61, %v3255_v51 }
 0x53d   :  { %9792 = vmatpush1.bf16.msra.mxu0 %v11398_v3  ;;  %9467 = vmatprep.subr.bf16.mxu1 %v11413_v37  ;;  %v3260_v3 = vld [vmem:[%s18085_s2 + $0x1c18] sm:$0xff]  ;;  %v3271_v37 = vld [vmem:[%s18085_s2 + $0x1c70] sm:$0xff] }
 0x53e   :  { %9793 = vmatprep.subr.bf16.mxu0 %v11407_v34  ;;  %v11463_v34 = vcombine.high %v3252_v20, %v3256_v2  ;;  %v11471_v11 = vcombine.high %v3260_v3, %v3264_v7  ;;  %v11477_v15 = vcombine.high %v3267_v13, %v3271_v37  ;;  %v11470_v18 = vcombine.low %v3260_v3, %v3264_v7  ;;  %v3308_v20 = vld [vmem:[%s18085_s2 + $0x1d98] sm:$0xff]  ;;  %v3319_v2 = vld [vmem:[%s18085_s2 + $0x1df0] sm:$0xff] }
 0x53f   :  { %v3316_v3 = vld [vmem:[%s18085_s2 + $0x1dd8] sm:$0xff] }
 0x540   :  { %9468 = vmatpush1.bf16.msra.mxu1 %v11412_v16  ;;  %v3268_v16 = vld [vmem:[%s18085_s2 + $0x1c58] sm:$0xff] }
 0x541   :  { %9794 = vmatpush1.bf16.msra.mxu0 %v11406_v17  ;;  %9469 = vmatprep.subr.bf16.mxu1 %v11421_v4  ;;  %v11468_v17 = vcombine.low %v3259_v24, %v3263_v47  ;;  %v3275_v4 = vld [vmem:[%s18085_s2 + $0x1c90] sm:$0xff]  ;;  %v3320_v7 = vld [vmem:[%s18085_s2 + $0x1df8] sm:$0xff] }
 0x542   :  { %9795 = vmatprep.subr.bf16.mxu0 %v11415_v6  ;;  %v3272_v6 = vld [vmem:[%s18085_s2 + $0x1c78] sm:$0xff] }
 0x543   :  { %v11479_v10 = vcombine.high %v3268_v16, %v3272_v6  ;;  %v11478_v0 = vcombine.low %v3268_v16, %v3272_v6  ;;  %v3335_v16 = vld [vmem:[%s18085_s2 + $0x1e70] sm:$0xff]  ;;  %v11526_v6 = vcombine.low %v3316_v3, %v3320_v7 }
 0x544   :  { %9470 = vmatpush1.bf16.msra.mxu1 %v11420_v42  ;;  %v11485_v42 = vcombine.high %v3275_v4, %v3279_v58 }
 0x545   :  { %9796 = vmatpush1.bf16.msra.mxu0 %v11414_v31  ;;  %9471 = vmatprep.subr.bf16.mxu1 %v11429_v48  ;;  %v11476_v31 = vcombine.low %v3267_v13, %v3271_v37  ;;  %v3283_v48 = vld [vmem:[%s18085_s2 + $0x1cd0] sm:$0xff] }
 0x546   :  { %9797 = vmatprep.subr.bf16.mxu0 %v11423_v36  ;;  %v3276_v36 = vld [vmem:[%s18085_s2 + $0x1c98] sm:$0xff]  ;;  %v11492_v41 = vcombine.low %v3283_v48, %v3287_v43 }
 0x547   :  { %v11487_v30 = vcombine.high %v3276_v36, %v3280_v46 }
 0x548   :  { %9472 = vmatpush1.bf16.msra.mxu1 %v11428_v32  ;;  %v11493_v32 = vcombine.high %v3283_v48, %v3287_v43 }
 0x549   :  { %9798 = vmatpush1.bf16.msra.mxu0 %v11422_v22  ;;  %9473 = vmatprep.subr.bf16.mxu1 %v11437_v56  ;;  %v11484_v22 = vcombine.low %v3275_v4, %v3279_v58  ;;  %v11486_v56 = vcombine.low %v3276_v36, %v3280_v46  ;;  %v3343_v36 = vld [vmem:[%s18085_s2 + $0x1eb0] sm:$0xff] }
 0x54a   :  { %9799 = vmatprep.subr.bf16.mxu0 %v11431_v38  ;;  %v3288_v38 = vld [vmem:[%s18085_s2 + $0x1cf8] sm:$0xff] }
 0x54c   :  { %9474 = vmatpush1.bf16.msra.mxu1 %v11436_v50  ;;  %v3296_v50 = vld [vmem:[%s18085_s2 + $0x1d38] sm:$0xff] }
 0x54d   :  { %9800 = vmatpush1.bf16.msra.mxu0 %v11430_v40  ;;  %9475 = vmatprep.subr.bf16.mxu1 %v11445_v26  ;;  %v11503_v25 = vcombine.high %v3292_v14, %v3296_v50 }
 0x54e   :  { %9801 = vmatprep.subr.bf16.mxu0 %v11439_v1  ;;  %v3299_v1 = vld [vmem:[%s18085_s2 + $0x1d50] sm:$0xff] }
 0x54f   :  { %v11508_v61 = vcombine.low %v3299_v1, %v3303_v44 }
 0x550   :  { %9476 = vmatpush1.bf16.msra.mxu1 %v11444_v55  ;;  %v3304_v55 = vld [vmem:[%s18085_s2 + $0x1d78] sm:$0xff] }
 0x551   :  { %9802 = vmatpush1.bf16.msra.mxu0 %v11438_v62  ;;  %9477 = vmatprep.subr.bf16.mxu1 %v11453_v9  ;;  %v11509_v62 = vcombine.high %v3299_v1, %v3303_v44  ;;  %v11502_v9 = vcombine.low %v3292_v14, %v3296_v50  ;;  %v11511_v51 = vcombine.high %v3300_v63, %v3304_v55  ;;  %v3359_v14 = vld [vmem:[%s18085_s2 + $0x1f30] sm:$0xff]  ;;  %v3387_v50 = vlaneseq }
 0x552   :  { %9803 = vmatprep.subr.bf16.mxu0 %v11447_v39  ;;  %v3307_v39 = vld [vmem:[%s18085_s2 + $0x1d90] sm:$0xff] }
 0x553   :  { %v11516_v24 = vcombine.low %v3307_v39, %v3311_v45 }
 0x554   :  { %9478 = vmatpush1.bf16.msra.mxu1 %v11452_v21  ;;  %v3312_v21 = vld [vmem:[%s18085_s2 + $0x1db8] sm:$0xff] }
 0x555   :  { %9804 = vmatpush1.bf16.msra.mxu0 %v11446_v54  ;;  %9479 = vmatprep.subr.bf16.mxu1 %v11461_v33  ;;  %v11517_v54 = vcombine.high %v3307_v39, %v3311_v45  ;;  %v11510_v33 = vcombine.low %v3300_v63, %v3304_v55  ;;  %v11519_v47 = vcombine.high %v3308_v20, %v3312_v21  ;;  %v3363_v63 = vld [vmem:[%s18085_s2 + $0x1f50] sm:$0xff]  ;;  %v17826_v39 = vshrl.u32 %v3387_v50, 7  ;;  %v12548_v50 = vld [vmem:[%s18086_s4 + $0x60] sm:$0xff]  }
 0x556   :  { %9805 = vmatprep.subr.bf16.mxu0 %v11455_v29  ;;  %v3315_v29 = vld [vmem:[%s18085_s2 + $0x1dd0] sm:$0xff]  ;;  %v11518_v13 = vcombine.low %v3308_v20, %v3312_v21  ;;  %v3368_v20 = vld [vmem:[%s18085_s2 + $0x1f78] sm:$0xff] }
 0x557   :  { %v11524_v37 = vcombine.low %v3315_v29, %v3319_v2  ;;  %v3367_v55 = vld [vmem:[%s18085_s2 + $0x1f70] sm:$0xff] }
 0x558   :  { %9480 = vmatpush1.bf16.msra.mxu1 %v11460_v12  ;;  %v3323_v12 = vld [vmem:[%s18085_s2 + $0x1e10] sm:$0xff] }
 0x559   :  { %9806 = vmatpush1.bf16.msra.mxu0 %v11454_v59  ;;  %9490 = vmatprep.subr.bf16.mxu1 %v11469_v19  ;;  %v11525_v59 = vcombine.high %v3315_v29, %v3319_v2  ;;  %v11527_v19 = vcombine.high %v3316_v3, %v3320_v7  ;;  %v3371_v21 = vld [vmem:[%s18085_s2 + $0x1f90] sm:$0xff]  ;;  %v3393_v2 = vsub.s32 1, %v17826_v39  ;;  %v3401_v3 = vsub.s32 3, %v17826_v39 }
 0x55a   :  { %9807 = vmatprep.subr.bf16.mxu0 %v11463_v34  ;;  %v3327_v34 = vld [vmem:[%s18085_s2 + $0x1e30] sm:$0xff] }
 0x55b   :  { %9482 = vmatmul.mubr.bf16.vlgmr.msra.gmra.mrb[4].mxu1 %v16095_v60  ;;  %v11532_v4 = vcombine.low %v3323_v12, %v3327_v34  ;;  %v3375_v29 = vld [vmem:[%s18085_s2 + $0x1fb0] sm:$0xff] }
 0x55c   :  { %9491 = vmatpush1.bf16.msra.mxu1 %v11468_v17  ;;  %9522 = vmatprep.mubr.bf16.mxu1 %v16109_v52  ;;  %v3324_v17 = vld [vmem:[%s18085_s2 + $0x1e18] sm:$0xff]  ;;  %v11581_v7 = vcombine.high %v3371_v21, %v3375_v29 }
 0x55d   :  { %9808 = vmatpush1.bf16.msra.mxu0 %v11462_v23  ;;  %9492 = vmatprep.subr.bf16.mxu1 %v11477_v15  ;;  %v11533_v23 = vcombine.high %v3323_v12, %v3327_v34  ;;  %v3331_v15 = vld [vmem:[%s18085_s2 + $0x1e50] sm:$0xff]  ;;  %v3372_v12 = vld [vmem:[%s18085_s2 + $0x1f98] sm:$0xff] }
 0x55e   :  { %9818 = vmatprep.subr.bf16.mxu0 %v11471_v11  ;;  %v3328_v11 = vld [vmem:[%s18085_s2 + $0x1e38] sm:$0xff]  ;;  %v11540_v48 = vcombine.low %v3331_v15, %v3335_v16 }
 0x55f   :  { %v11535_v58 = vcombine.high %v3324_v17, %v3328_v11  ;;  %v11534_v46 = vcombine.low %v3324_v17, %v3328_v11  ;;  %v3376_v34 = vld [vmem:[%s18085_s2 + $0x1fb8] sm:$0xff]  ;;  %v11580_v17 = vcombine.low %v3371_v21, %v3375_v29  ;;  %v12558_v21 = vld [vmem:[%s18086_s4 + $0x30] sm:$0xff]  }
 0x560   :  { %9810 = vmatmul.mubr.bf16.vlgmr.msra.gmra.mrb[20].mxu0 %v16095_v60  ;;  %9493 = vmatpush1.bf16.msra.mxu1 %v11476_v31  ;;  %v3284_v60 = vld [vmem:[%s18085_s2 + $0x1cd8] sm:$0xff]  ;;  %v11583_v11 = vcombine.high %v3372_v12, %v3376_v34 }
 0x561   :  { %9819 = vmatpush1.bf16.msra.mxu0 %v11470_v18  ;;  %9850 = vmatprep.mubr.bf16.mxu0 %v16109_v52  ;;  %v3295_v52 = vld [vmem:[%s18085_s2 + $0x1d30] sm:$0xff]  ;;  %v11495_v5 = vcombine.high %v3284_v60, %v3288_v38  ;;  %v11494_v26 = vcombine.low %v3284_v60, %v3288_v38  ;;  %v11541_v18 = vcombine.high %v3331_v15, %v3335_v16  ;;  %v3332_v31 = vld [vmem:[%s18085_s2 + $0x1e58] sm:$0xff] }
 0x562   :  { %9820 = vmatprep.subr.bf16.mxu0 %v11479_v10  ;;  %9494 = vmatprep.subr.bf16.mxu1 %v11485_v42  ;;  %v11501_v40 = vcombine.high %v3291_v49, %v3295_v52  ;;  %v11500_v27 = vcombine.low %v3291_v49, %v3295_v52  ;;  %v3336_v10 = vld [vmem:[%s18085_s2 + $0x1e78] sm:$0xff]  ;;  %v3339_v42 = vld [vmem:[%s18085_s2 + $0x1e90] sm:$0xff] }
 0x563   :  { %v11543_v43 = vcombine.high %v3332_v31, %v3336_v10  ;;  %v3351_v60 = vld [vmem:[%s18085_s2 + $0x1ef0] sm:$0xff]  ;;  %v11542_v38 = vcombine.low %v3332_v31, %v3336_v10  ;;  %v11548_v49 = vcombine.low %v3339_v42, %v3343_v36 }
 0x564   :  { %9495 = vmatpush1.bf16.msra.mxu1 %v11484_v22  ;;  %v3340_v22 = vld [vmem:[%s18085_s2 + $0x1e98] sm:$0xff] }
 0x565   :  { %9821 = vmatpush1.bf16.msra.mxu0 %v11478_v0  ;;  %9496 = vmatprep.subr.bf16.mxu1 %v11493_v32  ;;  %v11549_v0 = vcombine.high %v3339_v42, %v3343_v36  ;;  %v3347_v32 = vld [vmem:[%s18085_s2 + $0x1ed0] sm:$0xff]  ;;  %v12532_v36 = vld [vmem:[%s18086_s4 + $0x40] sm:$0xff]  }
 0x566   :  { %9822 = vmatprep.subr.bf16.mxu0 %v11487_v30  ;;  %v3344_v30 = vld [vmem:[%s18085_s2 + $0x1eb8] sm:$0xff]  ;;  %v11556_v44 = vcombine.low %v3347_v32, %v3351_v60 }
 0x567   :  { %v11551_v52 = vcombine.high %v3340_v22, %v3344_v30  ;;  %v11550_v1 = vcombine.low %v3340_v22, %v3344_v30  ;;  %v12535_v30 = vld [vmem:[%s18086_s4 + $0x80] sm:$0xff]  }
 0x568   :  { %9497 = vmatpush1.bf16.msra.mxu1 %v11492_v41  ;;  %v3348_v41 = vld [vmem:[%s18085_s2 + $0x1ed8] sm:$0xff] }
 0x569   :  { %9823 = vmatpush1.bf16.msra.mxu0 %v11486_v56  ;;  %9498 = vmatprep.subr.bf16.mxu1 %v11501_v40  ;;  %v11557_v56 = vcombine.high %v3347_v32, %v3351_v60  ;;  %v3355_v40 = vld [vmem:[%s18085_s2 + $0x1f10] sm:$0xff]  ;;  %v12537_v32 = vld [vmem:[%s18086_s4 + $0xc8] sm:$0xff]  }
 0x56a   :  { %9824 = vmatprep.subr.bf16.mxu0 %v11495_v5  ;;  %v3352_v5 = vld [vmem:[%s18085_s2 + $0x1ef8] sm:$0xff]  ;;  %v12538_v60 = vld [vmem:[%s18086_s4 + $0x8] sm:$0xff]  }
 0x56b   :  { %v11558_v45 = vcombine.low %v3348_v41, %v3352_v5 }
 0x56c   :  { %9499 = vmatpush1.bf16.msra.mxu1 %v11500_v27  ;;  %v11565_v27 = vcombine.high %v3355_v40, %v3359_v14 }
 0x56d   :  { %9825 = vmatpush1.bf16.msra.mxu0 %v11494_v26  ;;  %9500 = vmatprep.subr.bf16.mxu1 %v11509_v62  ;;  %v11559_v26 = vcombine.high %v3348_v41, %v3352_v5  ;;  %v3360_v62 = vld [vmem:[%s18085_s2 + $0x1f38] sm:$0xff]  ;;  %v12542_v41 = vld [vmem:[%s18086_s4 + $0x10] sm:$0xff]  }
 0x56e   :  { %9826 = vmatprep.subr.bf16.mxu0 %v11503_v25  ;;  %v3356_v25 = vld [vmem:[%s18085_s2 + $0x1f18] sm:$0xff]  ;;  %v12543_v5 = vld [vmem:[%s18086_s4 + $0x90] sm:$0xff]  }
 0x570   :  { %9501 = vmatpush1.bf16.msra.mxu1 %v11508_v61  ;;  %v11567_v61 = vcombine.high %v3356_v25, %v3360_v62 }
 0x571   :  { %9827 = vmatpush1.bf16.msra.mxu0 %v11502_v9  ;;  %9502 = vmatprep.subr.bf16.mxu1 %v11517_v54  ;;  %v11564_v9 = vcombine.low %v3355_v40, %v3359_v14  ;;  %v3364_v54 = vld [vmem:[%s18085_s2 + $0x1f58] sm:$0xff] }
 0x572   :  { %9828 = vmatprep.subr.bf16.mxu0 %v11511_v51  ;;  %v11573_v51 = vcombine.high %v3363_v63, %v3367_v55  ;;  %v12545_v40 = vld [vmem:[%s18086_s4 + $0xd8] sm:$0xff]  }
 0x573   :  { %v12546_v14 = vld [vmem:[%s18086_s4 + $0x18] sm:$0xff]  }
 0x574   :  { %9503 = vmatpush1.bf16.msra.mxu1 %v11516_v24  ;;  %v17844_v24 = vld [vmem:[%s18087_s3] sm:$0xff] }
 0x575   :  { %9829 = vmatpush1.bf16.msra.mxu0 %v11510_v33  ;;  %9504 = vmatprep.subr.bf16.mxu1 %v11525_v59  ;;  %v11566_v33 = vcombine.low %v3356_v25, %v3360_v62  ;;  %v11575_v59 = vcombine.high %v3364_v54, %v3368_v20  ;;  %v3402_v15 = vrot.slane %v17844_v24, %v3401_v3  ;;  %v12552_v25 = vld [vmem:[%s18086_s4 + $0x68] sm:$0xff]   ;;  %v12551_v62 = vld [vmem:[%s18086_s4 + $0xa0] sm:$0xff]  }
 0x576   :  { %9830 = vmatprep.subr.bf16.mxu0 %v11519_v47  ;;  %v11572_v47 = vcombine.low %v3363_v63, %v3367_v55  ;;  %v3397_v63 = vsub.s32 2, %v17826_v39  ;;  %v12553_v55 = vld [vmem:[%s18086_s4 + $0xe8] sm:$0xff]  }
 0x577   :  { %v12414_v42 = vadd.f32 %v16974_v57, %v3402_v15  ;;  %v12536_v57 = vld [vmem:[%s18086_s4 + $0x48] sm:$0xff]  }
 0x578   :  { %9505 = vmatpush1.bf16.msra.mxu1 %v11524_v37  ;;  %v3383_v37 = vld [vmem:[%s18085_s2 + $0x1ff0] sm:$0xff]  ;;  %v12570_v15 = vld [vmem:[%s18086_s4 + $0x108] sm:$0xff]  }
 0x579   :  { %9831 = vmatpush1.bf16.msra.mxu0 %v11518_v13  ;;  %9506 = vmatprep.subr.bf16.mxu1 %v11533_v23  ;;  %v3379_v13 = vld [vmem:[%s18085_s2 + $0x1fd0] sm:$0xff]  ;;  %v11574_v23 = vcombine.low %v3364_v54, %v3368_v20  ;;  %v3398_v54 = vrot.slane %v17844_v24, %v3397_v63 }
 0x57a   :  { %9832 = vmatprep.subr.bf16.mxu0 %v11527_v19  ;;  %v3394_v19 = vrot.slane %v17844_v24, %v3393_v2  ;;  %v11589_v16 = vcombine.high %v3379_v13, %v3383_v37  ;;  %v11588_v31 = vcombine.low %v3379_v13, %v3383_v37  ;;  %v12557_v20 = vld [vmem:[%s18086_s4 + $0xf0] sm:$0xff]   ;;  %v12560_v2 = vld [vmem:[%s18086_s4 + $0x78] sm:$0xff]   ;;  %v12566_v13 = vld [vmem:[%s18086_s4 + $0x100] sm:$0xff]  }
 0x57c   :  { %9507 = vmatpush1.bf16.msra.mxu1 %v11532_v4  ;;  %v3384_v4 = vld [vmem:[%s18085_s2 + $0x1ff8] sm:$0xff] }
 0x57d   :  { %9833 = vmatpush1.bf16.msra.mxu0 %v11526_v6  ;;  %9508 = vmatprep.subr.bf16.mxu1 %v11541_v18  ;;  %v3380_v6 = vld [vmem:[%s18085_s2 + $0x1fd8] sm:$0xff]  ;;  %v11582_v18 = vcombine.low %v3372_v12, %v3376_v34  ;;  %v12565_v34 = vld [vmem:[%s18086_s4 + $0x1c0] sm:$0xff]  }
 0x57e   :  { %9834 = vmatprep.subr.bf16.mxu0 %v11535_v58  ;;  %v12412_v58 = vadd.f32 %v16964_v28, %v3394_v19  ;;  %v11591_v10 = vcombine.high %v3380_v6, %v3384_v4  ;;  %v12533_v28 = vld [vmem:[%s18086_s4 + $0xc0] sm:$0xff]   ;;  %v12568_v19 = vld [vmem:[%s18086_s4 + $0x148] sm:$0xff]  }
 0x580   :  { %9509 = vmatpush1.bf16.msra.mxu1 %v11540_v48  ;;  %v11590_v48 = vcombine.low %v3380_v6, %v3384_v4  ;;  %v12571_v6 = vld [vmem:[%s18086_s4 + $0x188] sm:$0xff]   ;;  %v12573_v4 = vld [vmem:[%s18086_s4 + $0x1d0] sm:$0xff]  }
 0x581   :  { %9835 = vmatpush1.bf16.msra.mxu0 %v11534_v46  ;;  %9510 = vmatprep.subr.bf16.mxu1 %v11549_v0  ;;  %v9860_v46 = vmax.f32 %v12412_v58, 0.0  ;;  %v9862_v0 = vmax.f32 %v12414_v42, 0.0  ;;  %v12574_v58 = vld [vmem:[%s18086_s4 + $0x110] sm:$0xff]   ;;  %v12578_v42 = vld [vmem:[%s18086_s4 + $0x118] sm:$0xff]  }
 0x582   :  { %9836 = vmatprep.subr.bf16.mxu0 %v11543_v43  ;;  %v12534_v43 = vld [vmem:[%s18086_s4] sm:$0xff]  }
 0x583   :  { %v9868_v22 = vpack.c.bf16 %v9860_v46, %v9860_v46  ;;  %v12579_v46 = vld [vmem:[%s18086_s4 + $0x198] sm:$0xff]  }
 0x584   :  { %9511 = vmatpush1.bf16.msra.mxu1 %v11548_v49  ;;  %v12540_v49 = vld [vmem:[%s18086_s4 + $0x50] sm:$0xff]  }
 0x585   :  { %9837 = vmatpush1.bf16.msra.mxu0 %v11542_v38  ;;  %9512 = vmatprep.subr.bf16.mxu1 %v11557_v56  ;;  %v9870_v38 = vpack.c.bf16 %v9862_v0, %v9862_v0  ;;  %v12541_v56 = vld [vmem:[%s18086_s4 + $0xd0] sm:$0xff]   ;;  %v12583_v0 = vld [vmem:[%s18086_s4 + $0x1a0] sm:$0xff]  }
 0x586   :  { %9838 = vmatprep.subr.bf16.mxu0 %v11551_v52  ;;  %v12539_v52 = vld [vmem:[%s18086_s4 + $0x88] sm:$0xff]  }
 0x588   :  { %9513 = vmatpush1.bf16.msra.mxu1 %v11556_v44  ;;  %v12549_v44 = vld [vmem:[%s18086_s4 + $0xe0] sm:$0xff]  }
 0x589   :  { %9839 = vmatpush1.bf16.msra.mxu0 %v11550_v1  ;;  %9514 = vmatprep.subr.bf16.mxu1 %v11565_v27  ;;  %v12547_v1 = vld [vmem:[%s18086_s4 + $0x98] sm:$0xff]   ;;  %v3389_v27 = vsub.s32 0, %v17826_v39 }
 0x58a   :  { %9840 = vmatprep.subr.bf16.mxu0 %v11559_v26  ;;  %v12550_v26 = vld [vmem:[%s18086_s4 + $0x20] sm:$0xff]  }
 0x58c   :  { %9515 = vmatpush1.bf16.msra.mxu1 %v11564_v9  ;;  %v3390_v9 = vrot.slane %v17844_v24, %v3389_v27 }
 0x58d   :  { %9841 = vmatpush1.bf16.msra.mxu0 %v11558_v45  ;;  %9516 = vmatprep.subr.bf16.mxu1 %v11573_v51  ;;  %v12554_v45 = vld [vmem:[%s18086_s4 + $0x28] sm:$0xff]  }
 0x58e   :  { %9842 = vmatprep.subr.bf16.mxu0 %v11567_v61  ;;  %v12556_v61 = vld [vmem:[%s18086_s4 + $0x70] sm:$0xff]   ;;  %v12555_v51 = vld [vmem:[%s18086_s4 + $0xa8] sm:$0xff]   ;;  %v12411_v29 = vadd.f32 %v16956_v35, %v3390_v9  ;;  %v12562_v35 = vld [vmem:[%s18086_s4 + $0x38] sm:$0xff]  }
 0x590   :  { %9517 = vmatpush1.bf16.msra.mxu1 %v11572_v47  ;;  %v12413_v47 = vadd.f32 %v16966_v53, %v3398_v54  ;;  %v9859_v3 = vmax.f32 %v12411_v29, 0.0  ;;  %v12563_v53 = vld [vmem:[%s18086_s4 + $0xb8] sm:$0xff]  }
 0x591   :  { %9843 = vmatpush1.bf16.msra.mxu0 %v11566_v33  ;;  %9518 = vmatprep.subr.bf16.mxu1 %v11581_v7  ;;  %v12559_v33 = vld [vmem:[%s18086_s4 + $0xb0] sm:$0xff]   ;;  %v12564_v7 = vld [vmem:[%s18086_s4 + $0x140] sm:$0xff]  }
 0x592   :  { %9844 = vmatprep.subr.bf16.mxu0 %v11575_v59  ;;  %v12561_v59 = vld [vmem:[%s18086_s4 + $0xf8] sm:$0xff]   ;;  %v9861_v12 = vmax.f32 %v12413_v47, 0.0  ;;  %v9867_v37 = vpack.c.bf16 %v9859_v3, %v9859_v3 }
 0x594   :  { %9519 = vmatpush1.bf16.msra.mxu1 %v11580_v17  ;;  %v9869_v17 = vpack.c.bf16 %v9861_v12, %v9861_v12 }
 0x595   :  { %9845 = vmatpush1.bf16.msra.mxu0 %v11574_v23  ;;  %9520 = vmatprep.subr.bf16.mxu1 %v11589_v16  ;;  %v12567_v23 = vld [vmem:[%s18086_s4 + $0x180] sm:$0xff]   ;;  %v12572_v16 = vld [vmem:[%s18086_s4 + $0x150] sm:$0xff]  }
 0x596   :  { %9846 = vmatprep.subr.bf16.mxu0 %v11583_v11  ;;  %v12569_v11 = vld [vmem:[%s18086_s4 + $0x1c8] sm:$0xff]  }
 0x598   :  { %9521 = vmatpush1.bf16.msra.mxu1 %v11588_v31  ;;  %v12575_v31 = vld [vmem:[%s18086_s4 + $0x190] sm:$0xff]  }
 0x599   :  { %9847 = vmatpush1.bf16.msra.mxu0 %v11582_v18  ;;  %12305 = vmatprep.subr.bf16.mxu1 %v12532_v36  ;;  %v12576_v18 = vld [vmem:[%s18086_s4 + $0x158] sm:$0xff]   ;;  %v12580_v36 = vld [vmem:[%s18086_s4 + $0x160] sm:$0xff]  }
 0x59a   :  { %9848 = vmatprep.subr.bf16.mxu0 %v11591_v10  ;;  %v12577_v10 = vld [vmem:[%s18086_s4 + $0x1d8] sm:$0xff]  }
 0x59b   :  { %9523 = vmatmul.mubr.bf16.vlgmr.msra.gmra.mrb[4].mxu1 %v16296_v8 }
 0x59c   :  { %12306 = vmatpush3.bf16.msra.mxu1 %v12534_v43  ;;  %10426 = vmatprep.mubr.bf16.mxu1 %v9868_v22  ;;  %v12584_v43 = vld [vmem:[%s18086_s4 + $0x168] sm:$0xff]  }
 0x59d   :  { %9849 = vmatpush1.bf16.msra.mxu0 %v11590_v48  ;;  %12307 = vmatprep.subr.bf16.mxu1 %v12536_v57  ;;  %v12581_v48 = vld [vmem:[%s18086_s4 + $0x1e0] sm:$0xff]   ;;  %v12585_v57 = vld [vmem:[%s18086_s4 + $0x1e8] sm:$0xff]  }
 0x59e   :  { %12327 = vmatprep.subr.bf16.mxu0 %v12533_v28  ;;  %v12582_v28 = vld [vmem:[%s18086_s4 + $0x120] sm:$0xff]   ;;  %v12586_v22 = vld [vmem:[%s18086_s4 + $0x128] sm:$0xff]  }
 0x5a0   :  { %9851 = vmatmul.mubr.bf16.vlgmr.msra.gmra.mrb[20].mxu0 %v16296_v8  ;;  %12308 = vmatpush3.bf16.msra.mxu1 %v12538_v60  ;;  %v12544_v8 = vld [vmem:[%s18086_s4 + $0x58] sm:$0xff]   ;;  %v12589_v60 = vld [vmem:[%s18086_s4 + $0x1f0] sm:$0xff]  }
 0x5a1   :  { %12328 = vmatpush3.bf16.msra.mxu0 %v12535_v30  ;;  %10466 = vmatprep.mubr.bf16.mxu0 %v9870_v38  ;;  %v12587_v30 = vld [vmem:[%s18086_s4 + $0x1a8] sm:$0xff]   ;;  %v12590_v38 = vld [vmem:[%s18086_s4 + $0x130] sm:$0xff]  }
 0x5a2   :  { %12329 = vmatprep.subr.bf16.mxu0 %v12537_v32  ;;  %12309 = vmatprep.subr.bf16.mxu1 %v12540_v49  ;;  %v12588_v32 = vld [vmem:[%s18086_s4 + $0x170] sm:$0xff]  }
 0x5a3   :  { %v12591_v49 = vld [vmem:[%s18086_s4 + $0x1b0] sm:$0xff]  }
 0x5a4   :  { %12310 = vmatpush3.bf16.msra.mxu1 %v12542_v41  ;;  %v12594_v41 = vld [vmem:[%s18086_s4 + $0x138] sm:$0xff]  }
 0x5a5   :  { %12330 = vmatpush3.bf16.msra.mxu0 %v12539_v52  ;;  %12311 = vmatprep.subr.bf16.mxu1 %v12544_v8  ;;  %v12592_v52 = vld [vmem:[%s18086_s4 + $0x178] sm:$0xff]  }
 0x5a6   :  { %12331 = vmatprep.subr.bf16.mxu0 %v12541_v56  ;;  %v12593_v56 = vld [vmem:[%s18086_s4 + $0x1f8] sm:$0xff]  }
 0x5a7   :  { %v12595_v8 = vld [vmem:[%s18086_s4 + $0x1b8] sm:$0xff]  }
 0x5a8   :  { %12312 = vmatpush3.bf16.msra.mxu1 %v12546_v14  ;;  %v3413_v14 = vsub.s32 6, %v17826_v39 }
 0x5a9   :  { %12332 = vmatpush3.bf16.msra.mxu0 %v12543_v5  ;;  %12313 = vmatprep.subr.bf16.mxu1 %v12548_v50  ;;  %v3405_v5 = vsub.s32 4, %v17826_v39 }
 0x5aa   :  { %12333 = vmatprep.subr.bf16.mxu0 %v12545_v40  ;;  %v3409_v40 = vsub.s32 5, %v17826_v39  ;;  %v3414_v27 = vrot.slane %v17844_v24, %v3413_v14 }
 0x5ab   :  { %v3406_v50 = vrot.slane %v17844_v24, %v3405_v5 }
 0x5ac   :  { %12314 = vmatpush3.bf16.msra.mxu1 %v12550_v26 }
 0x5ad   :  { %12334 = vmatpush3.bf16.msra.mxu0 %v12547_v1  ;;  %12315 = vmatprep.subr.bf16.mxu1 %v12552_v25  ;;  %v3417_v1 = vsub.s32 7, %v17826_v39 }
 0x5ae   :  { %12335 = vmatprep.subr.bf16.mxu0 %v12549_v44  ;;  %v3410_v44 = vrot.slane %v17844_v24, %v3409_v40 }
 0x5af   :  { %v3418_v63 = vrot.slane %v17844_v24, %v3417_v1 }
 0x5b0   :  { %12316 = vmatpush3.bf16.msra.mxu1 %v12554_v45 }
 0x5b1   :  { %12336 = vmatpush3.bf16.msra.mxu0 %v12551_v62  ;;  %12317 = vmatprep.subr.bf16.mxu1 %v12556_v61 }
 0x5b2   :  { %12337 = vmatprep.subr.bf16.mxu0 %v12553_v55 }
 0x5b4   :  { %12318 = vmatpush3.bf16.msra.mxu1 %v12558_v21 }
 0x5b5   :  { %12338 = vmatpush3.bf16.msra.mxu0 %v12555_v51  ;;  %12319 = vmatprep.subr.bf16.mxu1 %v12560_v2 }
 0x5b6   :  { %12339 = vmatprep.subr.bf16.mxu0 %v12557_v20 }
 0x5b8   :  { %12320 = vmatpush3.bf16.msra.mxu1 %v12562_v35 }
 0x5b9   :  { %12340 = vmatpush3.bf16.msra.mxu0 %v12559_v33  ;;  %12349 = vmatprep.subr.bf16.mxu1 %v12564_v7 }
 0x5ba   :  { %12341 = vmatprep.subr.bf16.mxu0 %v12561_v59 }
 0x5bb   :  { %10427 = vmatmul.mubr.bf16.vlgmr.msra.gmra.mrb[8].mxu1 %v9867_v37 }
 0x5bc   :  { %12350 = vmatpush3.bf16.msra.mxu1 %v12566_v13 }
 0x5bd   :  { %12342 = vmatpush3.bf16.msra.mxu0 %v12563_v53  ;;  %12351 = vmatprep.subr.bf16.mxu1 %v12568_v19  ;;  %v11592_v53 = vld [vmem:[%s18088_s5] ss:$0 sm:$0xff] }
 0x5be   :  { %12371 = vmatprep.subr.bf16.mxu0 %v12565_v34 }
 0x5c0   :  { %10467 = vmatmul.mubr.bf16.vlgmr.msra.gmra.mrb[24].mxu0 %v9869_v17  ;;  %12352 = vmatpush3.bf16.msra.mxu1 %v12570_v15 }
 0x5c1   :  { %12372 = vmatpush3.bf16.msra.mxu0 %v12567_v23  ;;  %12353 = vmatprep.subr.bf16.mxu1 %v12572_v16 }
 0x5c2   :  { %12373 = vmatprep.subr.bf16.mxu0 %v12569_v11 }
 0x5c4   :  { %12354 = vmatpush3.bf16.msra.mxu1 %v12574_v58 }
 0x5c5   :  { %12374 = vmatpush3.bf16.msra.mxu0 %v12571_v6  ;;  %12355 = vmatprep.subr.bf16.mxu1 %v12576_v18 }
 0x5c6   :  { %12375 = vmatprep.subr.bf16.mxu0 %v12573_v4 }
 0x5c8   :  { %12356 = vmatpush3.bf16.msra.mxu1 %v12578_v42 }
 0x5c9   :  { %12376 = vmatpush3.bf16.msra.mxu0 %v12575_v31  ;;  %12357 = vmatprep.subr.bf16.mxu1 %v12580_v36 }
 0x5ca   :  { %12377 = vmatprep.subr.bf16.mxu0 %v12577_v10 }
 0x5cc   :  { %12358 = vmatpush3.bf16.msra.mxu1 %v12582_v28 }
 0x5cd   :  { %12378 = vmatpush3.bf16.msra.mxu0 %v12579_v46  ;;  %12359 = vmatprep.subr.bf16.mxu1 %v12584_v43 }
 0x5ce   :  { %12379 = vmatprep.subr.bf16.mxu0 %v12581_v48 }
 0x5d0   :  { %12360 = vmatpush3.bf16.msra.mxu1 %v12586_v22 }
 0x5d1   :  { %12380 = vmatpush3.bf16.msra.mxu0 %v12583_v0  ;;  %12361 = vmatprep.subr.bf16.mxu1 %v12588_v32 }
 0x5d2   :  { %12381 = vmatprep.subr.bf16.mxu0 %v12585_v57 }
 0x5d4   :  { %12362 = vmatpush3.bf16.msra.mxu1 %v12590_v38 }
 0x5d5   :  { %12382 = vmatpush3.bf16.msra.mxu0 %v12587_v30  ;;  %12363 = vmatprep.subr.bf16.mxu1 %v12592_v52 }
 0x5d6   :  { %12383 = vmatprep.subr.bf16.mxu0 %v12589_v60 }
 0x5d8   :  { %12364 = vmatpush3.bf16.msra.mxu1 %v12594_v41 }
 0x5d9   :  { %12384 = vmatpush3.bf16.msra.mxu0 %v12591_v49 }
 0x5da   :  { %12385 = vmatprep.subr.bf16.mxu0 %v12593_v56 }
 0x5dd   :  { %12386 = vmatpush3.bf16.msra.mxu0 %v12595_v8 }
 0x66e   :  { %v9524_v26 = vpop.f32.mrb[4].mxu1 }
 0x66f   :  { %v12415_v25 = vadd.f32 %v9524_v26, %v3406_v50  ;;  %v9526_v62 = vpop.f32.mrb[5].mxu1 }
 0x670   :  { %v12416_v55 = vadd.f32 %v9526_v62, %v3410_v44  ;;  %v9528_v45 = vpop.f32.mrb[6].mxu1 }
 0x671   :  { %v9863_v9 = vmax.f32 %v12415_v25, 0.0  ;;  %v9529_v51 = vpop.f32.mrb[7].mxu1 }
 0x672   :  { %v9864_v20 = vmax.f32 %v12416_v55, 0.0 }
 0x673   :  { %v9852_v61 = vpop.f32.mrb[20].mxu0  ;;  %v9871_v59 = vpack.c.bf16 %v9863_v9, %v9863_v9 }
 0x674   :  { %v12417_v54 = vadd.f32 %v9852_v61, %v3414_v27  ;;  %v9854_v21 = vpop.f32.mrb[21].mxu0  ;;  %v9872_v33 = vpack.c.bf16 %v9864_v20, %v9864_v20 }
 0x675   :  { %v12418_v29 = vadd.f32 %v9854_v21, %v3418_v63  ;;  %v9856_v2 = vpop.f32.mrb[22].mxu0 }
 0x676   :  { %v9865_v39 = vmax.f32 %v12417_v54, 0.0  ;;  %v9857_v47 = vpop.f32.mrb[23].mxu0  ;;  %10506 = vmatprep.mubr.bf16.mxu1 %v9872_v33 }
 0x677   :  { %v9866_v35 = vmax.f32 %v12418_v29, 0.0  ;;  %10507 = vmatmul.mubr.bf16.vlgmr.msra.gmra.mrb[12].mxu1 %v9871_v59 }
 0x678   :  { %v9873_v7 = vpack.c.bf16 %v9865_v39, %v9865_v39 }
 0x679   :  { %v9874_v3 = vpack.c.bf16 %v9866_v35, %v9866_v35 }
 0x67b   :  { %10546 = vmatprep.mubr.bf16.mxu0 %v9874_v3 }
 0x67c   :  { %10547 = vmatmul.mubr.bf16.vlgmr.msra.gmra.mrb[28].mxu0 %v9873_v7 }
 0x68e   :  { %v12321_v24 = vpop.f32.mrb[8].mxu1 }
 0x68f   :  { %v12322_v12 = vpop.f32.mrb[9].mxu1 }
 0x690   :  { %v12323_v34 = vadd.f32 %v12322_v12, %v12321_v24  ;;  %v12324_v13 = vpop.f32.mrb[10].mxu1 }
 0x691   :  { %v12325_v19 = vpop.f32.mrb[11].mxu1 }
 0x692   :  { %v10429_v23 = vadd.f32 %v12323_v34, %v11592_v53 }
 0x693   :  { %v12343_v37 = vpop.f32.mrb[24].mxu0 }
 0x694   :  { %v12344_v17 = vpop.f32.mrb[25].mxu0 }
 0x695   :  { %v12345_v11 = vadd.f32 %v12344_v17, %v12343_v37  ;;  %v12346_v15 = vpop.f32.mrb[26].mxu0 }
 0x696   :  { %v12347_v16 = vpop.f32.mrb[27].mxu0 }
 0x697   :  { %v10469_v6 = vadd.f32 %v12345_v11, %v10429_v23 }
 0x74a   :  { %v12365_v4 = vpop.f32.mrb[12].mxu1 }
 0x74b   :  { %v12366_v58 = vpop.f32.mrb[13].mxu1 }
 0x74c   :  { %v12367_v18 = vadd.f32 %v12366_v58, %v12365_v4  ;;  %v12368_v31 = vpop.f32.mrb[14].mxu1 }
 0x74d   :  { %v12369_v42 = vpop.f32.mrb[15].mxu1 }
 0x74e   :  { %v10509_v36 = vadd.f32 %v12367_v18, %v10469_v6 }
 0x74f   :  { %v12387_v10 = vpop.f32.mrb[28].mxu0 }
 0x750   :  { %v12388_v46 = vpop.f32.mrb[29].mxu0 }
 0x751   :  { %v12389_v48 = vadd.f32 %v12388_v46, %v12387_v10  ;;  %v12390_v28 = vpop.f32.mrb[30].mxu0 }
 0x752   :  { %v12391_v43 = vpop.f32.mrb[31].mxu0 }
 0x753   :  { %v10549_v0 = vadd.f32 %v12389_v48, %v10509_v36 }
 0x755   :  { %10554 = vst [vmem:[%s18089_s6] sm:$0xff] %v10549_v0 }

</bundles_post_ra>
